<compile_context>
chip_gen: v6e
topology: v6e:2x2x1
jax: 0.10.0
libtpu: 0.0.40
codegen_flags: <defaults>
</compile_context>

<pallas_src>
import functools

import jax
import jax.numpy as jnp
import numpy as np
from jax import lax
from jax.experimental import pallas as pl
from jax.experimental.pallas import tpu as pltpu


def _round_up(x, m):
    return ((x + m - 1) // m) * m


# ---------------------------------------------------------------------------
# Wrapper-side weight preprocessing (tiny, pure layout / band construction)
# ---------------------------------------------------------------------------
def _conv_band(w, in_block, out_block, n_out, phase):
    """Banded matrix for a 5x5 conv along the row (W) axis, fused with the
    stride-2 pool phase.

    Returns band[kh, c_out*out_block + i, c_in*in_block + (2*i + phase + kw)]
            = w[c_out, c_in, kh, kw]
    so that   out_row(c_out, i) = conv output at out_w = 2*i + phase.
    """
    c_out, c_in, n_kh, n_kw = w.shape
    co, ci, i, k = np.meshgrid(np.arange(c_out), np.arange(c_in),
                               np.arange(n_out), np.arange(n_kw),
                               indexing="ij")
    rows = co * out_block + i
    cols = ci * in_block + 2 * i + phase + k
    vals = jnp.transpose(w, (2, 0, 1, 3))[:, co, ci, k]       # [kh, ...]
    band = jnp.zeros((n_kh, c_out * out_block, c_in * in_block), w.dtype)
    return band.at[:, rows, cols].set(vals)


# ---------------------------------------------------------------------------
# The single fused kernel: conv1+pool -> conv2+pool -> MLP head -> log_softmax
# ---------------------------------------------------------------------------
def _cnn_kernel(x_ref, b1a_ref, b1b_ref, c1b_ref, b2a_ref, b2b_ref, c2b_ref,
                f1w_ref, f1b_ref, f2w_ref, f2b_ref, f3w_ref, f3b_ref, out_ref):
    f32 = jnp.float32
    x = x_ref[...]                       # [96, N]  rows = c*32+w, cols = b*32+h
    n = x.shape[1]

    def shift(v, k):
        # out[:, j] = v[:, j + k]  (tail filled with zeros; tail is never used)
        if k == 0:
            return v
        pad = jnp.zeros((v.shape[0], k), v.dtype)
        return jnp.concatenate([v[:, k:], pad], axis=1)

    # ---- conv1 + bias + ReLU + 2x2 max-pool -------------------------------
    q1a = jnp.zeros((96, n), f32)        # rows = c1*16 + x1  (out_w = 2*x1)
    q1b = jnp.zeros((96, n), f32)        # rows = c1*16 + x1  (out_w = 2*x1+1)
    for kh in range(5):                  # H-direction conv taps via lane shifts
        xs = shift(x, kh)
        q1a = q1a + jnp.dot(b1a_ref[kh], xs, preferred_element_type=f32)
        q1b = q1b + jnp.dot(b1b_ref[kh], xs, preferred_element_type=f32)
    p1 = jnp.maximum(jnp.maximum(q1a, q1b) + c1b_ref[...], 0.0)  # pool over W
    p1 = jnp.maximum(p1, shift(p1, 1))                           # pool over H
    # p1[c1*16 + x1, b*32 + 2*y1] = h1[b, c1, y1, x1]

    # ---- conv2 + bias + ReLU + 2x2 max-pool -------------------------------
    q2a = jnp.zeros((128, n), f32)       # rows = c2*8 + x3  (out_w = 2*x3)
    q2b = jnp.zeros((128, n), f32)       # rows = c2*8 + x3  (out_w = 2*x3+1)
    for kh in range(5):
        ps = shift(p1, 2 * kh)           # pooled H lives at even lane offsets
        q2a = q2a + jnp.dot(b2a_ref[kh], ps, preferred_element_type=f32)
        q2b = q2b + jnp.dot(b2b_ref[kh], ps, preferred_element_type=f32)
    p2 = jnp.maximum(jnp.maximum(q2a, q2b) + c2b_ref[...], 0.0)  # pool over W
    p2 = jnp.maximum(p2, shift(p2, 2))                           # pool over H
    # p2[c2*8 + x3, b*32 + 4*y3] = h2[b, c2, y3, x3]

    # ---- fc1 -> ReLU -> fc2 -> ReLU -> fc3 -> log_softmax -----------------
    h = jnp.zeros((n, 128), f32)
    for y3 in range(5):                  # flattened-feature H index
        ps = shift(p2, 4 * y3)           # [128, N]
        h = h + lax.dot_general(
            ps, f1w_ref[y3],
            dimension_numbers=(((0,), (0,)), ((), ())),
            preferred_element_type=f32)  # -> [N, 128]
    h = jnp.maximum(h + f1b_ref[...], 0.0)
    h = jnp.maximum(jnp.dot(h, f2w_ref[...], preferred_element_type=f32)
                    + f2b_ref[...], 0.0)
    logits = jnp.dot(h, f3w_ref[...], preferred_element_type=f32) + f3b_ref[...]
    m = jnp.max(logits, axis=-1, keepdims=True)
    s = logits - m
    lse = jnp.log(jnp.sum(jnp.exp(s), axis=-1, keepdims=True))
    out_ref[...] = (s - lse).astype(out_ref.dtype)
    # valid rows are b*32 + 0; the wrapper slices them out.


# ---------------------------------------------------------------------------
# Full forward pass
# ---------------------------------------------------------------------------
@functools.partial(jax.jit, static_argnames=("tb_max",))
def cnn_cifar_forward(x, params, *, tb_max=64):
    """x: [B, 3, 32, 32] float32 -> log-probabilities [B, num_classes] float32."""
    (cw1, cb1), (cw2, cb2), (fw1, fb1), (fw2, fb2), (fw3, fb3) = params
    f32 = jnp.float32
    x = x.astype(f32)
    b = x.shape[0]
    nc = fw3.shape[0]
    nc_pad = _round_up(max(nc, 1), 128)

    # Batch tile: multiple of 4 (so the lane dim tb*32 is a multiple of 128),
    # capped so there are >= 2 grid steps whenever the batch allows (v7x).
    tb = max(4, min(tb_max, _round_up(-(-b // 2), 4)))
    b_pad = _round_up(b, tb)
    n_total = b_pad * 32
    lanes = tb * 32

    # Input as a 2-D matrix: row = c*32 + w, col = b*32 + h (lane-dense batch*H).
    xt = jnp.transpose(x, (1, 3, 0, 2))                     # [C, W, B, H]
    xt = jnp.pad(xt, ((0, 0), (0, 0), (0, b_pad - b), (0, 0)))
    x2d = xt.reshape(3 * 32, n_total)

    # Banded conv weights (two pool phases per conv) + expanded biases.
    band1a = _conv_band(cw1.astype(f32), 32, 16, 14, 0)      # [5, 96, 96]
    band1b = _conv_band(cw1.astype(f32), 32, 16, 14, 1)
    band2a = _conv_band(cw2.astype(f32), 16, 8, 5, 0)        # [5, 128, 96]
    band2b = _conv_band(cw2.astype(f32), 16, 8, 5, 1)
    c1col = jnp.repeat(cb1.astype(f32), 16).reshape(96, 1)
    c2col = jnp.repeat(cb2.astype(f32), 8).reshape(128, 1)

    # FC head, padded to lane-dense 128-wide blocks.
    f1w = jnp.zeros((5, 16, 8, 128), f32)
    f1w = f1w.at[:, :, :5, :120].set(
        jnp.transpose(fw1.astype(f32).reshape(120, 16, 5, 5), (2, 1, 3, 0)))
    f1w = f1w.reshape(5, 128, 128)                           # [y3, row, j]
    f1b = jnp.zeros((1, 128), f32).at[0, :120].set(fb1.astype(f32))
    f2w = jnp.zeros((128, 128), f32).at[:120, :100].set(fw2.astype(f32).T)
    f2b = jnp.zeros((1, 128), f32).at[0, :100].set(fb2.astype(f32))
    f3w = jnp.zeros((128, nc_pad), f32).at[:100, :nc].set(fw3.astype(f32).T)
    f3b = jnp.full((1, nc_pad), -1e30, f32).at[0, :nc].set(fb3.astype(f32))

    grid = (b_pad // tb,)

    def full_spec(shape):
        nd = len(shape)
        return pl.BlockSpec(shape, lambda i, nd=nd: (0,) * nd)

    flops_per_col = 2 * (2 * 5 * 96 * 96 + 2 * 5 * 128 * 96
                         + 5 * 128 * 128 + 128 * 128 + 128 * nc_pad)
    weight_bytes = 4 * (band1a.size * 2 + band2a.size * 2 + f1w.size
                        + f2w.size + f3w.size + 96 + 128 + 3 * 128 + nc_pad)

    out = pl.pallas_call(
        _cnn_kernel,
        out_shape=jax.ShapeDtypeStruct((n_total, nc_pad), f32),
        grid_spec=pltpu.PrefetchScalarGridSpec(
            num_scalar_prefetch=0,
            grid=grid,
            in_specs=[
                pl.BlockSpec((96, lanes), lambda i: (0, i)),   # input batch tile
                full_spec(band1a.shape), full_spec(band1b.shape),
                full_spec(c1col.shape),
                full_spec(band2a.shape), full_spec(band2b.shape),
                full_spec(c2col.shape),
                full_spec(f1w.shape), full_spec(f1b.shape),
                full_spec(f2w.shape), full_spec(f2b.shape),
                full_spec(f3w.shape), full_spec(f3b.shape),
            ],
            out_specs=pl.BlockSpec((lanes, nc_pad), lambda i: (i, 0)),
        ),
        compiler_params=pltpu.CompilerParams(
            dimension_semantics=("parallel",),
            vmem_limit_bytes=48 * 1024 * 1024,
        ),
        cost_estimate=pl.CostEstimate(
            flops=flops_per_col * n_total,
            transcendentals=n_total * nc_pad,
            bytes_accessed=4 * (96 * n_total + n_total * nc_pad) + weight_bytes,
        ),
    )(x2d, band1a, band1b, c1col, band2a, band2b, c2col,
      f1w, f1b, f2w, f2b, f3w, f3b)

    # Valid results live at lane offset 0 of each image's 32-lane block.
    return out.reshape(b_pad, 32, nc_pad)[:b, 0, :nc]


# ---------------------------------------------------------------------------
# Parameter init (PyTorch layouts + default nn.Conv2d / nn.Linear init) & reference
# ---------------------------------------------------------------------------
def init_cnn_cifar_params(key, num_classes):
    def uniform(k, shape, fan_in):
        bound = 1.0 / (fan_in ** 0.5)
        return jax.random.uniform(k, shape, jnp.float32, -bound, bound)

    keys = jax.random.split(key, 10)
    cw1 = uniform(keys[0], (6, 3, 5, 5), 3 * 25)
    cb1 = uniform(keys[1], (6,), 3 * 25)
    cw2 = uniform(keys[2], (16, 6, 5, 5), 6 * 25)
    cb2 = uniform(keys[3], (16,), 6 * 25)
    fw1 = uniform(keys[4], (120, 400), 400)
    fb1 = uniform(keys[5], (120,), 400)
    fw2 = uniform(keys[6], (100, 120), 120)
    fb2 = uniform(keys[7], (100,), 120)
    fw3 = uniform(keys[8], (num_classes, 100), 100)
    fb3 = uniform(keys[9], (num_classes,), 100)
    return ((cw1, cb1), (cw2, cb2), (fw1, fb1), (fw2, fb2), (fw3, fb3))


def cnn_cifar_reference(x, params):
    """Pure-JAX reference (lax.conv + reduce_window) for correctness checking."""
    (cw1, cb1), (cw2, cb2), (fw1, fb1), (fw2, fb2), (fw3, fb3) = params
    dn = ("NCHW", "OIHW", "NCHW")
    hp = lax.Precision.HIGHEST

    y = lax.conv_general_dilated(x, cw1, (1, 1), "VALID", dimension_numbers=dn,
                                 precision=hp)
    y = jnp.maximum(y + cb1[None, :, None, None], 0.0)
    y = lax.reduce_window(y, -jnp.inf, lax.max, (1, 1, 2, 2), (1, 1, 2, 2), "VALID")
    y = lax.conv_general_dilated(y, cw2, (1, 1), "VALID", dimension_numbers=dn,
                                 precision=hp)
    y = jnp.maximum(y + cb2[None, :, None, None], 0.0)
    y = lax.reduce_window(y, -jnp.inf, lax.max, (1, 1, 2, 2), (1, 1, 2, 2), "VALID")
    y = y.reshape(y.shape[0], -1)
    y = jnp.maximum(jnp.dot(y, fw1.T, precision=hp) + fb1, 0.0)
    y = jnp.maximum(jnp.dot(y, fw2.T, precision=hp) + fb2, 0.0)
    logits = jnp.dot(y, fw3.T, precision=hp) + fb3
    return jax.nn.log_softmax(logits, axis=-1)


if __name__ == "__main__":
    num_classes = 10
    batch = 8

    key = jax.random.PRNGKey(0)
    key, kx = jax.random.split(key)
    x = jax.random.normal(kx, (batch, 3, 32, 32), jnp.float32)
    params = init_cnn_cifar_params(key, num_classes)

    out = cnn_cifar_forward(x, params)
    out = jax.block_until_ready(out)
    assert out.shape == (batch, num_classes)

    ref = cnn_cifar_reference(x, params)
    max_diff = jnp.max(jnp.abs(out - ref))
    assert jnp.allclose(out, ref, atol=2e-3, rtol=2e-3), (
        f"mismatch vs reference, max abs diff={max_diff}")

    print("KERNEL_OK")
</pallas_src>

<mosaic_0001>
module attributes {stable_mosaic.version = 11 : i64} {
  func.func @_cnn_kernel(%arg0: i32, %arg1: memref<96x128xf32, #tpu.memory_space<vmem>>, %arg2: memref<5x96x96xf32, #tpu.memory_space<vmem>>, %arg3: memref<5x96x96xf32, #tpu.memory_space<vmem>>, %arg4: memref<96x1xf32, #tpu.memory_space<vmem>>, %arg5: memref<5x128x96xf32, #tpu.memory_space<vmem>>, %arg6: memref<5x128x96xf32, #tpu.memory_space<vmem>>, %arg7: memref<128x1xf32, #tpu.memory_space<vmem>>, %arg8: memref<5x128x128xf32, #tpu.memory_space<vmem>>, %arg9: memref<1x128xf32, #tpu.memory_space<vmem>>, %arg10: memref<128x128xf32, #tpu.memory_space<vmem>>, %arg11: memref<1x128xf32, #tpu.memory_space<vmem>>, %arg12: memref<128x128xf32, #tpu.memory_space<vmem>>, %arg13: memref<1x128xf32, #tpu.memory_space<vmem>>, %arg14: memref<128x128xf32, #tpu.memory_space<vmem>>) attributes {dimension_semantics = [#tpu.dimension_semantics<parallel>], iteration_bounds = array<i64: 2>, scalar_prefetch = 0 : i64, scratch_operands = 0 : i64, tpu.core_type = #tpu.core_type<tc>, window_params = [{transform_indices = @transform_0, window_bounds = array<i64: 96, 128>}, {pipeline_mode = #tpu.pipeline_mode<synchronous>, transform_indices = @transform_1, window_bounds = array<i64: 5, 96, 96>}, {pipeline_mode = #tpu.pipeline_mode<synchronous>, transform_indices = @transform_2, window_bounds = array<i64: 5, 96, 96>}, {pipeline_mode = #tpu.pipeline_mode<synchronous>, transform_indices = @transform_3, window_bounds = array<i64: 96, 1>}, {pipeline_mode = #tpu.pipeline_mode<synchronous>, transform_indices = @transform_4, window_bounds = array<i64: 5, 128, 96>}, {pipeline_mode = #tpu.pipeline_mode<synchronous>, transform_indices = @transform_5, window_bounds = array<i64: 5, 128, 96>}, {pipeline_mode = #tpu.pipeline_mode<synchronous>, transform_indices = @transform_6, window_bounds = array<i64: 128, 1>}, {pipeline_mode = #tpu.pipeline_mode<synchronous>, transform_indices = @transform_7, window_bounds = array<i64: 5, 128, 128>}, {pipeline_mode = #tpu.pipeline_mode<synchronous>, transform_indices = @transform_8, window_bounds = array<i64: 1, 128>}, {pipeline_mode = #tpu.pipeline_mode<synchronous>, transform_indices = @transform_9, window_bounds = array<i64: 128, 128>}, {pipeline_mode = #tpu.pipeline_mode<synchronous>, transform_indices = @transform_10, window_bounds = array<i64: 1, 128>}, {pipeline_mode = #tpu.pipeline_mode<synchronous>, transform_indices = @transform_11, window_bounds = array<i64: 128, 128>}, {pipeline_mode = #tpu.pipeline_mode<synchronous>, transform_indices = @transform_12, window_bounds = array<i64: 1, 128>}, {transform_indices = @transform_13, window_bounds = array<i64: 128, 128>}]} {
    %c0 = arith.constant 0 : index
    %c0_0 = arith.constant 0 : index
    %0 = vector.load %arg1[%c0, %c0_0] : memref<96x128xf32, #tpu.memory_space<vmem>>, vector<96x128xf32>
    %cst = arith.constant 0.000000e+00 : f32
    %1 = vector.broadcast %cst : f32 to vector<96x128xf32>
    %cst_1 = arith.constant 0.000000e+00 : f32
    %2 = vector.broadcast %cst_1 : f32 to vector<96x128xf32>
    %c0_2 = arith.constant 0 : index
    %c0_3 = arith.constant 0 : index
    %c0_4 = arith.constant 0 : index
    %3 = vector.load %arg2[%c0_2, %c0_3, %c0_4] : memref<5x96x96xf32, #tpu.memory_space<vmem>>, vector<1x96x96xf32>
    %4 = vector.shape_cast %3 : vector<1x96x96xf32> to vector<96x96xf32>
    %cst_5 = arith.constant dense<0.000000e+00> : vector<96x128xf32>
    %5 = tpu.matmul %4, %0, %cst_5 {dimension_numbers = #tpu.dot_dimension_numbers<[1], [0], [0], [1], [0, 0, 1, 1], [], []>} : vector<96x96xf32>, vector<96x128xf32>, vector<96x128xf32> -> vector<96x128xf32>
    %6 = arith.addf %1, %5 : vector<96x128xf32>
    %c0_6 = arith.constant 0 : index
    %c0_7 = arith.constant 0 : index
    %c0_8 = arith.constant 0 : index
    %7 = vector.load %arg3[%c0_6, %c0_7, %c0_8] : memref<5x96x96xf32, #tpu.memory_space<vmem>>, vector<1x96x96xf32>
    %8 = vector.shape_cast %7 : vector<1x96x96xf32> to vector<96x96xf32>
    %cst_9 = arith.constant dense<0.000000e+00> : vector<96x128xf32>
    %9 = tpu.matmul %8, %0, %cst_9 {dimension_numbers = #tpu.dot_dimension_numbers<[1], [0], [0], [1], [0, 0, 1, 1], [], []>} : vector<96x96xf32>, vector<96x128xf32>, vector<96x128xf32> -> vector<96x128xf32>
    %10 = arith.addf %2, %9 : vector<96x128xf32>
    %cst_10 = arith.constant 0.000000e+00 : f32
    %11 = vector.broadcast %cst_10 : f32 to vector<96x1xf32>
    %12 = vector.extract_strided_slice %0 {offsets = [0, 1], sizes = [96, 127], strides = [1, 1]} : vector<96x128xf32> to vector<96x127xf32>
    %13 = tpu.concatenate %12, %11 in 1 : vector<96x127xf32>, vector<96x1xf32> -> vector<96x128xf32>
    %c1 = arith.constant 1 : index
    %c0_11 = arith.constant 0 : index
    %c0_12 = arith.constant 0 : index
    %14 = vector.load %arg2[%c1, %c0_11, %c0_12] : memref<5x96x96xf32, #tpu.memory_space<vmem>>, vector<1x96x96xf32>
    %15 = vector.shape_cast %14 : vector<1x96x96xf32> to vector<96x96xf32>
    %cst_13 = arith.constant dense<0.000000e+00> : vector<96x128xf32>
    %16 = tpu.matmul %15, %13, %cst_13 {dimension_numbers = #tpu.dot_dimension_numbers<[1], [0], [0], [1], [0, 0, 1, 1], [], []>} : vector<96x96xf32>, vector<96x128xf32>, vector<96x128xf32> -> vector<96x128xf32>
    %17 = arith.addf %6, %16 : vector<96x128xf32>
    %c1_14 = arith.constant 1 : index
    %c0_15 = arith.constant 0 : index
    %c0_16 = arith.constant 0 : index
    %18 = vector.load %arg3[%c1_14, %c0_15, %c0_16] : memref<5x96x96xf32, #tpu.memory_space<vmem>>, vector<1x96x96xf32>
    %19 = vector.shape_cast %18 : vector<1x96x96xf32> to vector<96x96xf32>
    %cst_17 = arith.constant dense<0.000000e+00> : vector<96x128xf32>
    %20 = tpu.matmul %19, %13, %cst_17 {dimension_numbers = #tpu.dot_dimension_numbers<[1], [0], [0], [1], [0, 0, 1, 1], [], []>} : vector<96x96xf32>, vector<96x128xf32>, vector<96x128xf32> -> vector<96x128xf32>
    %21 = arith.addf %10, %20 : vector<96x128xf32>
    %cst_18 = arith.constant 0.000000e+00 : f32
    %22 = vector.broadcast %cst_18 : f32 to vector<96x2xf32>
    %23 = vector.extract_strided_slice %0 {offsets = [0, 2], sizes = [96, 126], strides = [1, 1]} : vector<96x128xf32> to vector<96x126xf32>
    %24 = tpu.concatenate %23, %22 in 1 : vector<96x126xf32>, vector<96x2xf32> -> vector<96x128xf32>
    %c2 = arith.constant 2 : index
    %c0_19 = arith.constant 0 : index
    %c0_20 = arith.constant 0 : index
    %25 = vector.load %arg2[%c2, %c0_19, %c0_20] : memref<5x96x96xf32, #tpu.memory_space<vmem>>, vector<1x96x96xf32>
    %26 = vector.shape_cast %25 : vector<1x96x96xf32> to vector<96x96xf32>
    %cst_21 = arith.constant dense<0.000000e+00> : vector<96x128xf32>
    %27 = tpu.matmul %26, %24, %cst_21 {dimension_numbers = #tpu.dot_dimension_numbers<[1], [0], [0], [1], [0, 0, 1, 1], [], []>} : vector<96x96xf32>, vector<96x128xf32>, vector<96x128xf32> -> vector<96x128xf32>
    %28 = arith.addf %17, %27 : vector<96x128xf32>
    %c2_22 = arith.constant 2 : index
    %c0_23 = arith.constant 0 : index
    %c0_24 = arith.constant 0 : index
    %29 = vector.load %arg3[%c2_22, %c0_23, %c0_24] : memref<5x96x96xf32, #tpu.memory_space<vmem>>, vector<1x96x96xf32>
    %30 = vector.shape_cast %29 : vector<1x96x96xf32> to vector<96x96xf32>
    %cst_25 = arith.constant dense<0.000000e+00> : vector<96x128xf32>
    %31 = tpu.matmul %30, %24, %cst_25 {dimension_numbers = #tpu.dot_dimension_numbers<[1], [0], [0], [1], [0, 0, 1, 1], [], []>} : vector<96x96xf32>, vector<96x128xf32>, vector<96x128xf32> -> vector<96x128xf32>
    %32 = arith.addf %21, %31 : vector<96x128xf32>
    %cst_26 = arith.constant 0.000000e+00 : f32
    %33 = vector.broadcast %cst_26 : f32 to vector<96x3xf32>
    %34 = vector.extract_strided_slice %0 {offsets = [0, 3], sizes = [96, 125], strides = [1, 1]} : vector<96x128xf32> to vector<96x125xf32>
    %35 = tpu.concatenate %34, %33 in 1 : vector<96x125xf32>, vector<96x3xf32> -> vector<96x128xf32>
    %c3 = arith.constant 3 : index
    %c0_27 = arith.constant 0 : index
    %c0_28 = arith.constant 0 : index
    %36 = vector.load %arg2[%c3, %c0_27, %c0_28] : memref<5x96x96xf32, #tpu.memory_space<vmem>>, vector<1x96x96xf32>
    %37 = vector.shape_cast %36 : vector<1x96x96xf32> to vector<96x96xf32>
    %cst_29 = arith.constant dense<0.000000e+00> : vector<96x128xf32>
    %38 = tpu.matmul %37, %35, %cst_29 {dimension_numbers = #tpu.dot_dimension_numbers<[1], [0], [0], [1], [0, 0, 1, 1], [], []>} : vector<96x96xf32>, vector<96x128xf32>, vector<96x128xf32> -> vector<96x128xf32>
    %39 = arith.addf %28, %38 : vector<96x128xf32>
    %c3_30 = arith.constant 3 : index
    %c0_31 = arith.constant 0 : index
    %c0_32 = arith.constant 0 : index
    %40 = vector.load %arg3[%c3_30, %c0_31, %c0_32] : memref<5x96x96xf32, #tpu.memory_space<vmem>>, vector<1x96x96xf32>
    %41 = vector.shape_cast %40 : vector<1x96x96xf32> to vector<96x96xf32>
    %cst_33 = arith.constant dense<0.000000e+00> : vector<96x128xf32>
    %42 = tpu.matmul %41, %35, %cst_33 {dimension_numbers = #tpu.dot_dimension_numbers<[1], [0], [0], [1], [0, 0, 1, 1], [], []>} : vector<96x96xf32>, vector<96x128xf32>, vector<96x128xf32> -> vector<96x128xf32>
    %43 = arith.addf %32, %42 : vector<96x128xf32>
    %cst_34 = arith.constant 0.000000e+00 : f32
    %44 = vector.broadcast %cst_34 : f32 to vector<96x4xf32>
    %45 = vector.extract_strided_slice %0 {offsets = [0, 4], sizes = [96, 124], strides = [1, 1]} : vector<96x128xf32> to vector<96x124xf32>
    %46 = tpu.concatenate %45, %44 in 1 : vector<96x124xf32>, vector<96x4xf32> -> vector<96x128xf32>
    %c4 = arith.constant 4 : index
    %c0_35 = arith.constant 0 : index
    %c0_36 = arith.constant 0 : index
    %47 = vector.load %arg2[%c4, %c0_35, %c0_36] : memref<5x96x96xf32, #tpu.memory_space<vmem>>, vector<1x96x96xf32>
    %48 = vector.shape_cast %47 : vector<1x96x96xf32> to vector<96x96xf32>
    %cst_37 = arith.constant dense<0.000000e+00> : vector<96x128xf32>
    %49 = tpu.matmul %48, %46, %cst_37 {dimension_numbers = #tpu.dot_dimension_numbers<[1], [0], [0], [1], [0, 0, 1, 1], [], []>} : vector<96x96xf32>, vector<96x128xf32>, vector<96x128xf32> -> vector<96x128xf32>
    %50 = arith.addf %39, %49 : vector<96x128xf32>
    %c4_38 = arith.constant 4 : index
    %c0_39 = arith.constant 0 : index
    %c0_40 = arith.constant 0 : index
    %51 = vector.load %arg3[%c4_38, %c0_39, %c0_40] : memref<5x96x96xf32, #tpu.memory_space<vmem>>, vector<1x96x96xf32>
    %52 = vector.shape_cast %51 : vector<1x96x96xf32> to vector<96x96xf32>
    %cst_41 = arith.constant dense<0.000000e+00> : vector<96x128xf32>
    %53 = tpu.matmul %52, %46, %cst_41 {dimension_numbers = #tpu.dot_dimension_numbers<[1], [0], [0], [1], [0, 0, 1, 1], [], []>} : vector<96x96xf32>, vector<96x128xf32>, vector<96x128xf32> -> vector<96x128xf32>
    %54 = arith.addf %43, %53 : vector<96x128xf32>
    %55 = arith.maximumf %50, %54 : vector<96x128xf32>
    %c0_42 = arith.constant 0 : index
    %c0_43 = arith.constant 0 : index
    %56 = vector.load %arg4[%c0_42, %c0_43] : memref<96x1xf32, #tpu.memory_space<vmem>>, vector<96x1xf32>
    %57 = vector.broadcast %56 : vector<96x1xf32> to vector<96x128xf32>
    %58 = arith.addf %55, %57 : vector<96x128xf32>
    %cst_44 = arith.constant 0.000000e+00 : f32
    %59 = vector.broadcast %cst_44 : f32 to vector<96x128xf32>
    %60 = arith.maximumf %58, %59 : vector<96x128xf32>
    %cst_45 = arith.constant 0.000000e+00 : f32
    %61 = vector.broadcast %cst_45 : f32 to vector<96x1xf32>
    %62 = vector.extract_strided_slice %60 {offsets = [0, 1], sizes = [96, 127], strides = [1, 1]} : vector<96x128xf32> to vector<96x127xf32>
    %63 = tpu.concatenate %62, %61 in 1 : vector<96x127xf32>, vector<96x1xf32> -> vector<96x128xf32>
    %64 = arith.maximumf %60, %63 : vector<96x128xf32>
    %cst_46 = arith.constant 0.000000e+00 : f32
    %65 = vector.broadcast %cst_46 : f32 to vector<128x128xf32>
    %cst_47 = arith.constant 0.000000e+00 : f32
    %66 = vector.broadcast %cst_47 : f32 to vector<128x128xf32>
    %c0_48 = arith.constant 0 : index
    %c0_49 = arith.constant 0 : index
    %c0_50 = arith.constant 0 : index
    %67 = vector.load %arg5[%c0_48, %c0_49, %c0_50] : memref<5x128x96xf32, #tpu.memory_space<vmem>>, vector<1x128x96xf32>
    %68 = vector.shape_cast %67 : vector<1x128x96xf32> to vector<128x96xf32>
    %cst_51 = arith.constant dense<0.000000e+00> : vector<128x128xf32>
    %69 = tpu.matmul %68, %64, %cst_51 {dimension_numbers = #tpu.dot_dimension_numbers<[1], [0], [0], [1], [0, 0, 1, 1], [], []>} : vector<128x96xf32>, vector<96x128xf32>, vector<128x128xf32> -> vector<128x128xf32>
    %70 = arith.addf %65, %69 : vector<128x128xf32>
    %c0_52 = arith.constant 0 : index
    %c0_53 = arith.constant 0 : index
    %c0_54 = arith.constant 0 : index
    %71 = vector.load %arg6[%c0_52, %c0_53, %c0_54] : memref<5x128x96xf32, #tpu.memory_space<vmem>>, vector<1x128x96xf32>
    %72 = vector.shape_cast %71 : vector<1x128x96xf32> to vector<128x96xf32>
    %cst_55 = arith.constant dense<0.000000e+00> : vector<128x128xf32>
    %73 = tpu.matmul %72, %64, %cst_55 {dimension_numbers = #tpu.dot_dimension_numbers<[1], [0], [0], [1], [0, 0, 1, 1], [], []>} : vector<128x96xf32>, vector<96x128xf32>, vector<128x128xf32> -> vector<128x128xf32>
    %74 = arith.addf %66, %73 : vector<128x128xf32>
    %cst_56 = arith.constant 0.000000e+00 : f32
    %75 = vector.broadcast %cst_56 : f32 to vector<96x2xf32>
    %76 = vector.extract_strided_slice %64 {offsets = [0, 2], sizes = [96, 126], strides = [1, 1]} : vector<96x128xf32> to vector<96x126xf32>
    %77 = tpu.concatenate %76, %75 in 1 : vector<96x126xf32>, vector<96x2xf32> -> vector<96x128xf32>
    %c1_57 = arith.constant 1 : index
    %c0_58 = arith.constant 0 : index
    %c0_59 = arith.constant 0 : index
    %78 = vector.load %arg5[%c1_57, %c0_58, %c0_59] : memref<5x128x96xf32, #tpu.memory_space<vmem>>, vector<1x128x96xf32>
    %79 = vector.shape_cast %78 : vector<1x128x96xf32> to vector<128x96xf32>
    %cst_60 = arith.constant dense<0.000000e+00> : vector<128x128xf32>
    %80 = tpu.matmul %79, %77, %cst_60 {dimension_numbers = #tpu.dot_dimension_numbers<[1], [0], [0], [1], [0, 0, 1, 1], [], []>} : vector<128x96xf32>, vector<96x128xf32>, vector<128x128xf32> -> vector<128x128xf32>
    %81 = arith.addf %70, %80 : vector<128x128xf32>
    %c1_61 = arith.constant 1 : index
    %c0_62 = arith.constant 0 : index
    %c0_63 = arith.constant 0 : index
    %82 = vector.load %arg6[%c1_61, %c0_62, %c0_63] : memref<5x128x96xf32, #tpu.memory_space<vmem>>, vector<1x128x96xf32>
    %83 = vector.shape_cast %82 : vector<1x128x96xf32> to vector<128x96xf32>
    %cst_64 = arith.constant dense<0.000000e+00> : vector<128x128xf32>
    %84 = tpu.matmul %83, %77, %cst_64 {dimension_numbers = #tpu.dot_dimension_numbers<[1], [0], [0], [1], [0, 0, 1, 1], [], []>} : vector<128x96xf32>, vector<96x128xf32>, vector<128x128xf32> -> vector<128x128xf32>
    %85 = arith.addf %74, %84 : vector<128x128xf32>
    %cst_65 = arith.constant 0.000000e+00 : f32
    %86 = vector.broadcast %cst_65 : f32 to vector<96x4xf32>
    %87 = vector.extract_strided_slice %64 {offsets = [0, 4], sizes = [96, 124], strides = [1, 1]} : vector<96x128xf32> to vector<96x124xf32>
    %88 = tpu.concatenate %87, %86 in 1 : vector<96x124xf32>, vector<96x4xf32> -> vector<96x128xf32>
    %c2_66 = arith.constant 2 : index
    %c0_67 = arith.constant 0 : index
    %c0_68 = arith.constant 0 : index
    %89 = vector.load %arg5[%c2_66, %c0_67, %c0_68] : memref<5x128x96xf32, #tpu.memory_space<vmem>>, vector<1x128x96xf32>
    %90 = vector.shape_cast %89 : vector<1x128x96xf32> to vector<128x96xf32>
    %cst_69 = arith.constant dense<0.000000e+00> : vector<128x128xf32>
    %91 = tpu.matmul %90, %88, %cst_69 {dimension_numbers = #tpu.dot_dimension_numbers<[1], [0], [0], [1], [0, 0, 1, 1], [], []>} : vector<128x96xf32>, vector<96x128xf32>, vector<128x128xf32> -> vector<128x128xf32>
    %92 = arith.addf %81, %91 : vector<128x128xf32>
    %c2_70 = arith.constant 2 : index
    %c0_71 = arith.constant 0 : index
    %c0_72 = arith.constant 0 : index
    %93 = vector.load %arg6[%c2_70, %c0_71, %c0_72] : memref<5x128x96xf32, #tpu.memory_space<vmem>>, vector<1x128x96xf32>
    %94 = vector.shape_cast %93 : vector<1x128x96xf32> to vector<128x96xf32>
    %cst_73 = arith.constant dense<0.000000e+00> : vector<128x128xf32>
    %95 = tpu.matmul %94, %88, %cst_73 {dimension_numbers = #tpu.dot_dimension_numbers<[1], [0], [0], [1], [0, 0, 1, 1], [], []>} : vector<128x96xf32>, vector<96x128xf32>, vector<128x128xf32> -> vector<128x128xf32>
    %96 = arith.addf %85, %95 : vector<128x128xf32>
    %cst_74 = arith.constant 0.000000e+00 : f32
    %97 = vector.broadcast %cst_74 : f32 to vector<96x6xf32>
    %98 = vector.extract_strided_slice %64 {offsets = [0, 6], sizes = [96, 122], strides = [1, 1]} : vector<96x128xf32> to vector<96x122xf32>
    %99 = tpu.concatenate %98, %97 in 1 : vector<96x122xf32>, vector<96x6xf32> -> vector<96x128xf32>
    %c3_75 = arith.constant 3 : index
    %c0_76 = arith.constant 0 : index
    %c0_77 = arith.constant 0 : index
    %100 = vector.load %arg5[%c3_75, %c0_76, %c0_77] : memref<5x128x96xf32, #tpu.memory_space<vmem>>, vector<1x128x96xf32>
    %101 = vector.shape_cast %100 : vector<1x128x96xf32> to vector<128x96xf32>
    %cst_78 = arith.constant dense<0.000000e+00> : vector<128x128xf32>
    %102 = tpu.matmul %101, %99, %cst_78 {dimension_numbers = #tpu.dot_dimension_numbers<[1], [0], [0], [1], [0, 0, 1, 1], [], []>} : vector<128x96xf32>, vector<96x128xf32>, vector<128x128xf32> -> vector<128x128xf32>
    %103 = arith.addf %92, %102 : vector<128x128xf32>
    %c3_79 = arith.constant 3 : index
    %c0_80 = arith.constant 0 : index
    %c0_81 = arith.constant 0 : index
    %104 = vector.load %arg6[%c3_79, %c0_80, %c0_81] : memref<5x128x96xf32, #tpu.memory_space<vmem>>, vector<1x128x96xf32>
    %105 = vector.shape_cast %104 : vector<1x128x96xf32> to vector<128x96xf32>
    %cst_82 = arith.constant dense<0.000000e+00> : vector<128x128xf32>
    %106 = tpu.matmul %105, %99, %cst_82 {dimension_numbers = #tpu.dot_dimension_numbers<[1], [0], [0], [1], [0, 0, 1, 1], [], []>} : vector<128x96xf32>, vector<96x128xf32>, vector<128x128xf32> -> vector<128x128xf32>
    %107 = arith.addf %96, %106 : vector<128x128xf32>
    %cst_83 = arith.constant 0.000000e+00 : f32
    %108 = vector.broadcast %cst_83 : f32 to vector<96x8xf32>
    %109 = vector.extract_strided_slice %64 {offsets = [0, 8], sizes = [96, 120], strides = [1, 1]} : vector<96x128xf32> to vector<96x120xf32>
    %110 = tpu.concatenate %109, %108 in 1 : vector<96x120xf32>, vector<96x8xf32> -> vector<96x128xf32>
    %c4_84 = arith.constant 4 : index
    %c0_85 = arith.constant 0 : index
    %c0_86 = arith.constant 0 : index
    %111 = vector.load %arg5[%c4_84, %c0_85, %c0_86] : memref<5x128x96xf32, #tpu.memory_space<vmem>>, vector<1x128x96xf32>
    %112 = vector.shape_cast %111 : vector<1x128x96xf32> to vector<128x96xf32>
    %cst_87 = arith.constant dense<0.000000e+00> : vector<128x128xf32>
    %113 = tpu.matmul %112, %110, %cst_87 {dimension_numbers = #tpu.dot_dimension_numbers<[1], [0], [0], [1], [0, 0, 1, 1], [], []>} : vector<128x96xf32>, vector<96x128xf32>, vector<128x128xf32> -> vector<128x128xf32>
    %114 = arith.addf %103, %113 : vector<128x128xf32>
    %c4_88 = arith.constant 4 : index
    %c0_89 = arith.constant 0 : index
    %c0_90 = arith.constant 0 : index
    %115 = vector.load %arg6[%c4_88, %c0_89, %c0_90] : memref<5x128x96xf32, #tpu.memory_space<vmem>>, vector<1x128x96xf32>
    %116 = vector.shape_cast %115 : vector<1x128x96xf32> to vector<128x96xf32>
    %cst_91 = arith.constant dense<0.000000e+00> : vector<128x128xf32>
    %117 = tpu.matmul %116, %110, %cst_91 {dimension_numbers = #tpu.dot_dimension_numbers<[1], [0], [0], [1], [0, 0, 1, 1], [], []>} : vector<128x96xf32>, vector<96x128xf32>, vector<128x128xf32> -> vector<128x128xf32>
    %118 = arith.addf %107, %117 : vector<128x128xf32>
    %119 = arith.maximumf %114, %118 : vector<128x128xf32>
    %c0_92 = arith.constant 0 : index
    %c0_93 = arith.constant 0 : index
    %120 = vector.load %arg7[%c0_92, %c0_93] : memref<128x1xf32, #tpu.memory_space<vmem>>, vector<128x1xf32>
    %121 = vector.broadcast %120 : vector<128x1xf32> to vector<128x128xf32>
    %122 = arith.addf %119, %121 : vector<128x128xf32>
    %cst_94 = arith.constant 0.000000e+00 : f32
    %123 = vector.broadcast %cst_94 : f32 to vector<128x128xf32>
    %124 = arith.maximumf %122, %123 : vector<128x128xf32>
    %cst_95 = arith.constant 0.000000e+00 : f32
    %125 = vector.broadcast %cst_95 : f32 to vector<128x2xf32>
    %126 = vector.extract_strided_slice %124 {offsets = [0, 2], sizes = [128, 126], strides = [1, 1]} : vector<128x128xf32> to vector<128x126xf32>
    %127 = tpu.concatenate %126, %125 in 1 : vector<128x126xf32>, vector<128x2xf32> -> vector<128x128xf32>
    %128 = arith.maximumf %124, %127 : vector<128x128xf32>
    %cst_96 = arith.constant 0.000000e+00 : f32
    %129 = vector.broadcast %cst_96 : f32 to vector<128x128xf32>
    %c0_97 = arith.constant 0 : index
    %c0_98 = arith.constant 0 : index
    %c0_99 = arith.constant 0 : index
    %130 = vector.load %arg8[%c0_97, %c0_98, %c0_99] : memref<5x128x128xf32, #tpu.memory_space<vmem>>, vector<1x128x128xf32>
    %131 = vector.shape_cast %130 : vector<1x128x128xf32> to vector<128x128xf32>
    %cst_100 = arith.constant dense<0.000000e+00> : vector<128x128xf32>
    %132 = tpu.matmul %128, %131, %cst_100 {dimension_numbers = #tpu.dot_dimension_numbers<[0], [0], [1], [1], [0, 1, 1, 1], [], []>} : vector<128x128xf32>, vector<128x128xf32>, vector<128x128xf32> -> vector<128x128xf32>
    %133 = arith.addf %129, %132 : vector<128x128xf32>
    %cst_101 = arith.constant 0.000000e+00 : f32
    %134 = vector.broadcast %cst_101 : f32 to vector<128x4xf32>
    %135 = vector.extract_strided_slice %128 {offsets = [0, 4], sizes = [128, 124], strides = [1, 1]} : vector<128x128xf32> to vector<128x124xf32>
    %136 = tpu.concatenate %135, %134 in 1 : vector<128x124xf32>, vector<128x4xf32> -> vector<128x128xf32>
    %c1_102 = arith.constant 1 : index
    %c0_103 = arith.constant 0 : index
    %c0_104 = arith.constant 0 : index
    %137 = vector.load %arg8[%c1_102, %c0_103, %c0_104] : memref<5x128x128xf32, #tpu.memory_space<vmem>>, vector<1x128x128xf32>
    %138 = vector.shape_cast %137 : vector<1x128x128xf32> to vector<128x128xf32>
    %cst_105 = arith.constant dense<0.000000e+00> : vector<128x128xf32>
    %139 = tpu.matmul %136, %138, %cst_105 {dimension_numbers = #tpu.dot_dimension_numbers<[0], [0], [1], [1], [0, 1, 1, 1], [], []>} : vector<128x128xf32>, vector<128x128xf32>, vector<128x128xf32> -> vector<128x128xf32>
    %140 = arith.addf %133, %139 : vector<128x128xf32>
    %cst_106 = arith.constant 0.000000e+00 : f32
    %141 = vector.broadcast %cst_106 : f32 to vector<128x8xf32>
    %142 = vector.extract_strided_slice %128 {offsets = [0, 8], sizes = [128, 120], strides = [1, 1]} : vector<128x128xf32> to vector<128x120xf32>
    %143 = tpu.concatenate %142, %141 in 1 : vector<128x120xf32>, vector<128x8xf32> -> vector<128x128xf32>
    %c2_107 = arith.constant 2 : index
    %c0_108 = arith.constant 0 : index
    %c0_109 = arith.constant 0 : index
    %144 = vector.load %arg8[%c2_107, %c0_108, %c0_109] : memref<5x128x128xf32, #tpu.memory_space<vmem>>, vector<1x128x128xf32>
    %145 = vector.shape_cast %144 : vector<1x128x128xf32> to vector<128x128xf32>
    %cst_110 = arith.constant dense<0.000000e+00> : vector<128x128xf32>
    %146 = tpu.matmul %143, %145, %cst_110 {dimension_numbers = #tpu.dot_dimension_numbers<[0], [0], [1], [1], [0, 1, 1, 1], [], []>} : vector<128x128xf32>, vector<128x128xf32>, vector<128x128xf32> -> vector<128x128xf32>
    %147 = arith.addf %140, %146 : vector<128x128xf32>
    %cst_111 = arith.constant 0.000000e+00 : f32
    %148 = vector.broadcast %cst_111 : f32 to vector<128x12xf32>
    %149 = vector.extract_strided_slice %128 {offsets = [0, 12], sizes = [128, 116], strides = [1, 1]} : vector<128x128xf32> to vector<128x116xf32>
    %150 = tpu.concatenate %149, %148 in 1 : vector<128x116xf32>, vector<128x12xf32> -> vector<128x128xf32>
    %c3_112 = arith.constant 3 : index
    %c0_113 = arith.constant 0 : index
    %c0_114 = arith.constant 0 : index
    %151 = vector.load %arg8[%c3_112, %c0_113, %c0_114] : memref<5x128x128xf32, #tpu.memory_space<vmem>>, vector<1x128x128xf32>
    %152 = vector.shape_cast %151 : vector<1x128x128xf32> to vector<128x128xf32>
    %cst_115 = arith.constant dense<0.000000e+00> : vector<128x128xf32>
    %153 = tpu.matmul %150, %152, %cst_115 {dimension_numbers = #tpu.dot_dimension_numbers<[0], [0], [1], [1], [0, 1, 1, 1], [], []>} : vector<128x128xf32>, vector<128x128xf32>, vector<128x128xf32> -> vector<128x128xf32>
    %154 = arith.addf %147, %153 : vector<128x128xf32>
    %cst_116 = arith.constant 0.000000e+00 : f32
    %155 = vector.broadcast %cst_116 : f32 to vector<128x16xf32>
    %156 = vector.extract_strided_slice %128 {offsets = [0, 16], sizes = [128, 112], strides = [1, 1]} : vector<128x128xf32> to vector<128x112xf32>
    %157 = tpu.concatenate %156, %155 in 1 : vector<128x112xf32>, vector<128x16xf32> -> vector<128x128xf32>
    %c4_117 = arith.constant 4 : index
    %c0_118 = arith.constant 0 : index
    %c0_119 = arith.constant 0 : index
    %158 = vector.load %arg8[%c4_117, %c0_118, %c0_119] : memref<5x128x128xf32, #tpu.memory_space<vmem>>, vector<1x128x128xf32>
    %159 = vector.shape_cast %158 : vector<1x128x128xf32> to vector<128x128xf32>
    %cst_120 = arith.constant dense<0.000000e+00> : vector<128x128xf32>
    %160 = tpu.matmul %157, %159, %cst_120 {dimension_numbers = #tpu.dot_dimension_numbers<[0], [0], [1], [1], [0, 1, 1, 1], [], []>} : vector<128x128xf32>, vector<128x128xf32>, vector<128x128xf32> -> vector<128x128xf32>
    %161 = arith.addf %154, %160 : vector<128x128xf32>
    %c0_121 = arith.constant 0 : index
    %c0_122 = arith.constant 0 : index
    %162 = vector.load %arg9[%c0_121, %c0_122] : memref<1x128xf32, #tpu.memory_space<vmem>>, vector<1x128xf32>
    %163 = vector.broadcast %162 : vector<1x128xf32> to vector<128x128xf32>
    %164 = arith.addf %161, %163 : vector<128x128xf32>
    %cst_123 = arith.constant 0.000000e+00 : f32
    %165 = vector.broadcast %cst_123 : f32 to vector<128x128xf32>
    %166 = arith.maximumf %164, %165 : vector<128x128xf32>
    %c0_124 = arith.constant 0 : index
    %c0_125 = arith.constant 0 : index
    %167 = vector.load %arg10[%c0_124, %c0_125] : memref<128x128xf32, #tpu.memory_space<vmem>>, vector<128x128xf32>
    %cst_126 = arith.constant dense<0.000000e+00> : vector<128x128xf32>
    %168 = tpu.matmul %166, %167, %cst_126 {dimension_numbers = #tpu.dot_dimension_numbers<[1], [0], [0], [1], [0, 0, 1, 1], [], []>} : vector<128x128xf32>, vector<128x128xf32>, vector<128x128xf32> -> vector<128x128xf32>
    %c0_127 = arith.constant 0 : index
    %c0_128 = arith.constant 0 : index
    %169 = vector.load %arg11[%c0_127, %c0_128] : memref<1x128xf32, #tpu.memory_space<vmem>>, vector<1x128xf32>
    %170 = vector.broadcast %169 : vector<1x128xf32> to vector<128x128xf32>
    %171 = arith.addf %168, %170 : vector<128x128xf32>
    %cst_129 = arith.constant 0.000000e+00 : f32
    %172 = vector.broadcast %cst_129 : f32 to vector<128x128xf32>
    %173 = arith.maximumf %171, %172 : vector<128x128xf32>
    %c0_130 = arith.constant 0 : index
    %c0_131 = arith.constant 0 : index
    %174 = vector.load %arg12[%c0_130, %c0_131] : memref<128x128xf32, #tpu.memory_space<vmem>>, vector<128x128xf32>
    %cst_132 = arith.constant dense<0.000000e+00> : vector<128x128xf32>
    %175 = tpu.matmul %173, %174, %cst_132 {dimension_numbers = #tpu.dot_dimension_numbers<[1], [0], [0], [1], [0, 0, 1, 1], [], []>} : vector<128x128xf32>, vector<128x128xf32>, vector<128x128xf32> -> vector<128x128xf32>
    %c0_133 = arith.constant 0 : index
    %c0_134 = arith.constant 0 : index
    %176 = vector.load %arg13[%c0_133, %c0_134] : memref<1x128xf32, #tpu.memory_space<vmem>>, vector<1x128xf32>
    %177 = vector.broadcast %176 : vector<1x128xf32> to vector<128x128xf32>
    %178 = arith.addf %175, %177 : vector<128x128xf32>
    %cst_135 = arith.constant dense<0xFF800000> : vector<128xf32>
    %179 = vector.multi_reduction <maximumf>, %178, %cst_135 [1] : vector<128x128xf32> to vector<128xf32>
    %180 = vector.shape_cast %179 : vector<128xf32> to vector<128x1xf32>
    %181 = vector.broadcast %180 : vector<128x1xf32> to vector<128x128xf32>
    %182 = arith.subf %178, %181 : vector<128x128xf32>
    %183 = math.exp %182 : vector<128x128xf32>
    %cst_136 = arith.constant dense<0.000000e+00> : vector<128xf32>
    %184 = vector.multi_reduction <add>, %183, %cst_136 [1] : vector<128x128xf32> to vector<128xf32>
    %185 = vector.shape_cast %184 : vector<128xf32> to vector<128x1xf32>
    %186 = math.log %185 : vector<128x1xf32>
    %187 = vector.broadcast %186 : vector<128x1xf32> to vector<128x128xf32>
    %188 = arith.subf %182, %187 : vector<128x128xf32>
    %c0_137 = arith.constant 0 : index
    %c0_138 = arith.constant 0 : index
    %189 = vector.load %arg14[%c0_137, %c0_138] : memref<128x128xf32, #tpu.memory_space<vmem>>, vector<128x128xf32>
    tpu.vector_store %arg14[%c0_137, %c0_138], %188 {strides = array<i32>} : memref<128x128xf32, #tpu.memory_space<vmem>>, vector<128x128xf32>,
    return
  }
  func.func @transform_0(%arg0: i32) -> (i32, i32) {
    %c0_i32 = arith.constant 0 : i32
    %c0_i32_0 = arith.constant 0 : i32
    return %c0_i32, %arg0 : i32, i32
  }
  func.func @transform_1(%arg0: i32) -> (i32, i32, i32) {
    %c0_i32 = arith.constant 0 : i32
    %c0_i32_0 = arith.constant 0 : i32
    %c0_i32_1 = arith.constant 0 : i32
    %c0_i32_2 = arith.constant 0 : i32
    return %c0_i32, %c0_i32_0, %c0_i32_1 : i32, i32, i32
  }
  func.func @transform_2(%arg0: i32) -> (i32, i32, i32) {
    %c0_i32 = arith.constant 0 : i32
    %c0_i32_0 = arith.constant 0 : i32
    %c0_i32_1 = arith.constant 0 : i32
    %c0_i32_2 = arith.constant 0 : i32
    return %c0_i32, %c0_i32_0, %c0_i32_1 : i32, i32, i32
  }
  func.func @transform_3(%arg0: i32) -> (i32, i32) {
    %c0_i32 = arith.constant 0 : i32
    %c0_i32_0 = arith.constant 0 : i32
    %c0_i32_1 = arith.constant 0 : i32
    return %c0_i32, %c0_i32_0 : i32, i32
  }
  func.func @transform_4(%arg0: i32) -> (i32, i32, i32) {
    %c0_i32 = arith.constant 0 : i32
    %c0_i32_0 = arith.constant 0 : i32
    %c0_i32_1 = arith.constant 0 : i32
    %c0_i32_2 = arith.constant 0 : i32
    return %c0_i32, %c0_i32_0, %c0_i32_1 : i32, i32, i32
  }
  func.func @transform_5(%arg0: i32) -> (i32, i32, i32) {
    %c0_i32 = arith.constant 0 : i32
    %c0_i32_0 = arith.constant 0 : i32
    %c0_i32_1 = arith.constant 0 : i32
    %c0_i32_2 = arith.constant 0 : i32
    return %c0_i32, %c0_i32_0, %c0_i32_1 : i32, i32, i32
  }
  func.func @transform_6(%arg0: i32) -> (i32, i32) {
    %c0_i32 = arith.constant 0 : i32
    %c0_i32_0 = arith.constant 0 : i32
    %c0_i32_1 = arith.constant 0 : i32
    return %c0_i32, %c0_i32_0 : i32, i32
  }
  func.func @transform_7(%arg0: i32) -> (i32, i32, i32) {
    %c0_i32 = arith.constant 0 : i32
    %c0_i32_0 = arith.constant 0 : i32
    %c0_i32_1 = arith.constant 0 : i32
    %c0_i32_2 = arith.constant 0 : i32
    return %c0_i32, %c0_i32_0, %c0_i32_1 : i32, i32, i32
  }
  func.func @transform_8(%arg0: i32) -> (i32, i32) {
    %c0_i32 = arith.constant 0 : i32
    %c0_i32_0 = arith.constant 0 : i32
    %c0_i32_1 = arith.constant 0 : i32
    return %c0_i32, %c0_i32_0 : i32, i32
  }
  func.func @transform_9(%arg0: i32) -> (i32, i32) {
    %c0_i32 = arith.constant 0 : i32
    %c0_i32_0 = arith.constant 0 : i32
    %c0_i32_1 = arith.constant 0 : i32
    return %c0_i32, %c0_i32_0 : i32, i32
  }
  func.func @transform_10(%arg0: i32) -> (i32, i32) {
    %c0_i32 = arith.constant 0 : i32
    %c0_i32_0 = arith.constant 0 : i32
    %c0_i32_1 = arith.constant 0 : i32
    return %c0_i32, %c0_i32_0 : i32, i32
  }
  func.func @transform_11(%arg0: i32) -> (i32, i32) {
    %c0_i32 = arith.constant 0 : i32
    %c0_i32_0 = arith.constant 0 : i32
    %c0_i32_1 = arith.constant 0 : i32
    return %c0_i32, %c0_i32_0 : i32, i32
  }
  func.func @transform_12(%arg0: i32) -> (i32, i32) {
    %c0_i32 = arith.constant 0 : i32
    %c0_i32_0 = arith.constant 0 : i32
    %c0_i32_1 = arith.constant 0 : i32
    return %c0_i32, %c0_i32_0 : i32, i32
  }
  func.func @transform_13(%arg0: i32) -> (i32, i32) {
    %c0_i32 = arith.constant 0 : i32
    %c0_i32_0 = arith.constant 0 : i32
    return %arg0, %c0_i32 : i32, i32
  }
}

</mosaic_0001>

<bundles_post_ra>
// kernel: cnn_cifar_forward.1
= control target key start
LH: loop header
LB: loop body
LE: loop exit
PB: predicated region body
PF: predicated region fallthrough
CT: control target
= control target key end

     0   :  { %s10761_s25 = smov 0   ;;  %s10763_s26 = smov 0   ;;  %s15183_s0 = inlined_call_operand.vmem [shape: f32[96,256], index: 0, kind: input, shape index: {}]   ;;  %s15184_s1 = inlined_call_operand.vmem [shape: f32[5,96,96], index: 1, kind: input, shape index: {}]   ;;  %s15185_s2 = inlined_call_operand.vmem [shape: f32[5,96,96], index: 2, kind: input, shape index: {}]   ;;  %s15186_s3 = inlined_call_operand.vmem [shape: f32[96,1], index: 3, kind: input, shape index: {}]   ;;  %s15187_s4 = inlined_call_operand.vmem [shape: f32[5,128,96], index: 4, kind: input, shape index: {}]   ;;  %s15188_s5 = inlined_call_operand.vmem [shape: f32[5,128,96], index: 5, kind: input, shape index: {}]   ;;  %s15189_s6 = inlined_call_operand.vmem [shape: f32[128,1], index: 6, kind: input, shape index: {}]   ;;  %s15190_s7 = inlined_call_operand.vmem [shape: f32[5,128,128], index: 7, kind: input, shape index: {}]   ;;  %s15191_s8 = inlined_call_operand.vmem [shape: f32[1,128], index: 8, kind: input, shape index: {}]   ;;  %s15192_s9 = inlined_call_operand.vmem [shape: f32[128,128], index: 9, kind: input, shape index: {}]   ;;  %s15193_s10 = inlined_call_operand.vmem [shape: f32[1,128], index: 10, kind: input, shape index: {}]   ;;  %s15194_s11 = inlined_call_operand.vmem [shape: f32[128,128], index: 11, kind: input, shape index: {}]   ;;  %s15195_s12 = inlined_call_operand.vmem [shape: f32[1,128], index: 12, kind: input, shape index: {}]   ;;  %s15196_s13 = inlined_call_operand.vmem [shape: f32[256,128], index: 13, kind: output, shape index: {}]  }
   0x1   :  { %s10765_s27 = smov 0  }
   0x2 LB: > { %s10778_s29 = sadd.s32 1, %s10680_s27   ;;  %s30_s14 = sadd.s32 1, %s10676_s26  ;;  %s10680_s27 = sphi %s10765_s27, %s15472_s27   ;;  %s10676_s26 = sphi %s10763_s26, %s15471_s26   ;;  %s10672_s25 = sphi %s10761_s25, %s15470_s25  }
   0x3   : > { %s27_s30 = ssub.s32 %s10680_s27, %s10778_s29  ;;  %p37_p1 = scmp.ne.s32.totalorder %s10676_s26, %s10672_s25 }
   0x4   : > { %p28_p0 = scmp.eq.s32.totalorder %s27_s30, 0  ;;  %p38_p2 = scmp.eq.s32.totalorder %s10680_s27, 0 }
   0x5   : > { %p7295_p4 = scmp.ge.s32.totalorder %s10680_s27, 2 }
   0x6   : > { %s10787_s15 = scalar_select %p28_p0, %s10676_s26, %s30_s14  }
   0x7   : > { %p39_p3 = por %p38_p2, %p37_p1  ;;  %377 = sbr.rel (%p7295_p4) target bundleno = 22 (0x16), region = 64 }
   0xc   : > { %380 = sbr.rel (!%p39_p3) target bundleno = 22 (0x16), region = 68  ;;  %s382_s16 = sand.u32 (%p39_p3), 1, %s10676_s26  }
   0xd   : > { %s7296_s17 = sshll.u32 (%p39_p3), %s10680_s27, 3  ;;  %s10133_s18 = smul.u32 (%p39_p3), 96, %s382_s16 }
   0xe   : > { %s386_s21 = scalar_lea.vmem (%p39_p3), %s15183_s0, %s7296_s17 }
   0xf   : > { %v437_v0 = vld [vmem:[%s386_s21] sm:$0xff] (%p39_p3)  ;;  %v439_v1 = vld [vmem:[%s386_s21 + $0x10] sm:$0xff] (%p39_p3)  ;;  %s384_s22 = scalar_lea.vmem (%p39_p3), [#allocation2], %s10133_s18 }
  0x10   : > { %v441_v2 = vld [vmem:[%s386_s21 + $0x20] sm:$0xff] (%p39_p3)  ;;  %v443_v3 = vld [vmem:[%s386_s21 + $0x30] sm:$0xff] (%p39_p3)  ;;  %438 = vst [vmem:[%s384_s22] sm:$0xff] (%p39_p3), %v437_v0  ;;  %440 = vst [vmem:[%s384_s22 + $0x8] sm:$0xff] (%p39_p3), %v439_v1 }
  0x11   : > { %v445_v4 = vld [vmem:[%s386_s21 + $0x40] sm:$0xff]  ;;  %v447_v5 = vld [vmem:[%s386_s21 + $0x50] sm:$0xff]  ;;  %442 = vst [vmem:[%s384_s22 + $0x10] sm:$0xff] %v441_v2  ;;  %444 = vst [vmem:[%s384_s22 + $0x18] sm:$0xff] %v443_v3 }
  0x12   : > { %446 = vst [vmem:[%s384_s22 + $0x20] sm:$0xff] %v445_v4  ;;  %448 = vst [vmem:[%s384_s22 + $0x28] sm:$0xff] %v447_v5  ;;  %v449_v6 = vld [vmem:[%s386_s21 + $0x60] sm:$0xff]  ;;  %v451_v7 = vld [vmem:[%s386_s21 + $0x70] sm:$0xff] }
  0x13   : > { %v453_v8 = vld [vmem:[%s386_s21 + $0x80] sm:$0xff]  ;;  %450 = vst [vmem:[%s384_s22 + $0x30] sm:$0xff] %v449_v6  ;;  %452 = vst [vmem:[%s384_s22 + $0x38] sm:$0xff] %v451_v7  ;;  %v455_v9 = vld [vmem:[%s386_s21 + $0x90] sm:$0xff] }
  0x14   : > { %454 = vst [vmem:[%s384_s22 + $0x40] sm:$0xff] %v453_v8  ;;  %v457_v10 = vld [vmem:[%s386_s21 + $0xa0] sm:$0xff]  ;;  %v459_v11 = vld [vmem:[%s386_s21 + $0xb0] sm:$0xff]  ;;  %456 = vst [vmem:[%s384_s22 + $0x48] sm:$0xff] %v455_v9 }
  0x15   : > { %458 = vst [vmem:[%s384_s22 + $0x50] sm:$0xff] %v457_v10  ;;  %460 = vst [vmem:[%s384_s22 + $0x58] sm:$0xff] %v459_v11 }
  0x16 PF: > { %p7297_p5 = scmp.ge.s32.totalorder %s10680_s27, 1  ;;  %p465_p6 = scmp.lt.s32.totalorder %s10680_s27, 3 }
  0x18   : > { %p466_p7 = pnand %p7297_p5, %p465_p6 }
  0x1a   : > { %469 = sbr.rel (%p466_p7) target bundleno = 2570 (0xa0a), region = 106 }
  0x1f   : > { %s472_s23 = sand.u32 1, %s10672_s25   ;;  %v533_v12 = vld [vmem:[%s15184_s1] sm:$0xff]  ;;  %vm631_vm0 = vcmask 785408   ;;  %s10682_s25 = smov 127   ;;  %v534_v26 = vld [vmem:[%s15184_s1 + $0x8] sm:$0xff]  ;;  %v535_v27 = vld [vmem:[%s15184_s1 + $0x10] sm:$0xff] }
  0x20   : > { %s10134_s14 = smul.u32 96, %s472_s23  ;;  %8875 = vmatprep.mubr.msk.f32.mxu1 %vm631_vm0, %v533_v12  ;;  %v7300_v21 = vld [vmem:[%s15184_s1 + $0x60] sm:$0xff]  ;;  %s10683_s19 = smov 126   ;;  %v536_v28 = vld [vmem:[%s15184_s1 + $0x18] sm:$0xff]  ;;  %v538_v30 = vld [vmem:[%s15184_s1 + $0x28] sm:$0xff]  ;;  %vm605_vm1 = vcmask 1039360  }
  0x21   : > { %8833 = vmatprep.mubr.msk.f32.mxu0 %vm631_vm0, %v7300_v21  ;;  %v537_v29 = vld [vmem:[%s15184_s1 + $0x20] sm:$0xff]  ;;  %v539_v31 = vld [vmem:[%s15184_s1 + $0x30] sm:$0xff]  ;;  %v540_v32 = vld [vmem:[%s15184_s1 + $0x38] sm:$0xff]  ;;  %s10685_s18 = smov 124   ;;  %vm1325_vm2 = vcmask 1031168   ;;  %vm1746_vm3 = vcmask 1022976  }
  0x22   : > { %s10802_s16 = scalar_lea.vmem [#allocation2], %s10134_s14  ;;  %v541_v33 = vld [vmem:[%s15184_s1 + $0x40] sm:$0xff]  ;;  %s10684_s14 = smov 125   ;;  %v542_v34 = vld [vmem:[%s15184_s1 + $0x48] sm:$0xff]  ;;  %v543_v35 = vld [vmem:[%s15184_s1 + $0x50] sm:$0xff]  ;;  %vm2167_vm4 = vcmask 1014784  }
  0x23   : > { %v10805_v13 = vld [vmem:[%s10802_s16 + $0x58] sm:$0xff]  ;;  %v10808_v14 = vld [vmem:[%s10802_s16 + $0x48] sm:$0xff]  ;;  %v10815_v15 = vld [vmem:[%s10802_s16 + $0x50] sm:$0xff]  ;;  %vm4166_vm5 = vcmask 998400   ;;  %vm4667_vm6 = vcmask 982016   ;;  %s10690_s24 = smov 116  }
  0x24   : > { %591 = vrot.lane.b32.xlu0 %v10805_v13, %s10682_s25  ;;  %587 = vrot.lane.b32.xlu1 %v10808_v14, %s10682_s25  ;;  %v10818_v16 = vld [vmem:[%s10802_s16 + $0x40] sm:$0xff]  ;;  %v10828_v17 = vld [vmem:[%s10802_s16 + $0x38] sm:$0xff]  ;;  %vm6161_vm7 = vcmask 949248   ;;  %vm6436_vm8 = vcmask 916480   ;;  %s15469_s22 = sadd.s32 4294967295, %s10680_s27  }
  0x25   : > { %8851 = vmatprep.subr.mxu1 %v10805_v13  ;;  %v10831_v18 = vld [vmem:[%s10802_s16 + $0x30] sm:$0xff]  ;;  %v10841_v19 = vld [vmem:[%s10802_s16 + $0x28] sm:$0xff]  ;;  %v10844_v20 = vld [vmem:[%s10802_s16 + $0x20] sm:$0xff]  ;;  %s7298_s23 = sshll.u32 %s15469_s22, 4 }
  0x26   : > { %8852 = vmatpush3.msra.mxu1 %v10805_v13  ;;  %v10857_v22 = vld [vmem:[%s10802_s16 + $0x18] sm:$0xff]  ;;  %v10860_v23 = vld [vmem:[%s10802_s16 + $0x10] sm:$0xff]  ;;  %v10871_v24 = vld [vmem:[%s10802_s16 + $0x8] sm:$0xff]  ;;  %p516_p8 = scmp.lt.s32.totalorder %s7298_s23, 31 }
  0x27   : > { %8853 = vmatprep.subr.mxu1 %v10815_v15  ;;  %v10874_v25 = vld [vmem:[%s10802_s16] sm:$0xff]  ;;  %v544_v36 = vld [vmem:[%s15184_s1 + $0x58] sm:$0xff]  ;;  %v546_v38 = vld [vmem:[%s15185_s2 + $0x8] sm:$0xff]  ;;  %s10688_s16 = smov 120  }
  0x28   : > { %589 = vrot.lane.b32.xlu0 %v10815_v15, %s10682_s25  ;;  %585 = vrot.lane.b32.xlu1 %v10818_v16, %s10682_s25  ;;  %v545_v37 = vld [vmem:[%s15185_s2] sm:$0xff]  ;;  %v547_v39 = vld [vmem:[%s15185_s2 + $0x10] sm:$0xff]  ;;  %s15474_s23 = smov (!%p516_p8, %s7298_s23), 31 }
  0x29   : > { %8854 = vmatpush3.msra.mxu1 %v10815_v15  ;;  %v548_v40 = vld [vmem:[%s15185_s2 + $0x18] sm:$0xff]  ;;  %v549_v41 = vld [vmem:[%s15185_s2 + $0x20] sm:$0xff]  ;;  %v550_v42 = vld [vmem:[%s15185_s2 + $0x28] sm:$0xff] }
  0x2a   : > { %8855 = vmatprep.subr.mxu1 %v10808_v14  ;;  %v551_v43 = vld [vmem:[%s15185_s2 + $0x30] sm:$0xff]  ;;  %v552_v44 = vld [vmem:[%s15185_s2 + $0x38] sm:$0xff]  ;;  %v553_v45 = vld [vmem:[%s15185_s2 + $0x40] sm:$0xff] }
  0x2b   : > { %8856 = vmatpush3.msra.mxu1 %v10808_v14  ;;  %v554_v46 = vld [vmem:[%s15185_s2 + $0x48] sm:$0xff]  ;;  %v555_v47 = vld [vmem:[%s15185_s2 + $0x50] sm:$0xff]  ;;  %v556_v48 = vld [vmem:[%s15185_s2 + $0x58] sm:$0xff] }
  0x2c   : > { %583 = vrot.lane.b32.xlu0 %v10828_v17, %s10682_s25  ;;  %581 = vrot.lane.b32.xlu1 %v10831_v18, %s10682_s25  ;;  %v7432_v49 = vld [vmem:[%s15185_s2 + $0xc0] sm:$0xff]  ;;  %v7301_v0 = vld [vmem:[%s15184_s1 + $0x68] sm:$0xff] }
  0x2d   : > { %8857 = vmatprep.subr.mxu1 %v10818_v16  ;;  %v7302_v1 = vld [vmem:[%s15184_s1 + $0x70] sm:$0xff]  ;;  %v7303_v4 = vld [vmem:[%s15184_s1 + $0x78] sm:$0xff]  ;;  %v7304_v6 = vld [vmem:[%s15184_s1 + $0x80] sm:$0xff] }
  0x2e   : > { %8858 = vmatpush3.msra.mxu1 %v10818_v16  ;;  %v7305_v8 = vld [vmem:[%s15184_s1 + $0x88] sm:$0xff]  ;;  %v7306_v10 = vld [vmem:[%s15184_s1 + $0x90] sm:$0xff]  ;;  %v7307_v12 = vld [vmem:[%s15184_s1 + $0x98] sm:$0xff] }
  0x2f   : > { %8859 = vmatprep.subr.mxu1 %v10828_v17 }
  0x30   : > { %579 = vrot.lane.b32.xlu0 %v10841_v19, %s10682_s25  ;;  %577 = vrot.lane.b32.xlu1 %v10844_v20, %s10682_s25 }
  0x31   : > { %8860 = vmatpush3.msra.mxu1 %v10828_v17 }
  0x32   : > { %8861 = vmatprep.subr.mxu1 %v10831_v18 }
  0x33   : > { %8862 = vmatpush3.msra.mxu1 %v10831_v18 }
  0x34   : > { %575 = vrot.lane.b32.xlu0 %v10857_v22, %s10682_s25  ;;  %573 = vrot.lane.b32.xlu1 %v10860_v23, %s10682_s25 }
  0x35   : > { %8863 = vmatprep.subr.mxu1 %v10841_v19 }
  0x36   : > { %8864 = vmatpush3.msra.mxu1 %v10841_v19 }
  0x37   : > { %8865 = vmatprep.subr.mxu1 %v10844_v20 }
  0x38   : > { %571 = vrot.lane.b32.xlu0 %v10871_v24, %s10682_s25  ;;  %569 = vrot.lane.b32.xlu1 %v10874_v25, %s10682_s25 }
  0x39   : > { %8866 = vmatpush3.msra.mxu1 %v10844_v20 }
  0x3a   : > { %8867 = vmatprep.subr.mxu1 %v10857_v22 }
  0x3b   : > { %8868 = vmatpush3.msra.mxu1 %v10857_v22 }
  0x3c   : > { %1311 = vrot.lane.b32.xlu0 %v10805_v13, %s10683_s19  ;;  %1309 = vrot.lane.b32.xlu1 %v10815_v15, %s10683_s19 }
  0x3d   : > { %8869 = vmatprep.subr.mxu1 %v10860_v23 }
  0x3e   : > { %8870 = vmatpush3.msra.mxu1 %v10860_v23 }
  0x3f   : > { %8871 = vmatprep.subr.mxu1 %v10871_v24 }
  0x40   : > { %1307 = vrot.lane.b32.xlu0 %v10808_v14, %s10683_s19  ;;  %1305 = vrot.lane.b32.xlu1 %v10818_v16, %s10683_s19 }
  0x41   : > { %8872 = vmatpush3.msra.mxu1 %v10871_v24 }
  0x42   : > { %8873 = vmatprep.subr.mxu1 %v10874_v25 }
  0x43   : > { %8874 = vmatpush3.msra.mxu1 %v10874_v25 }
  0x44   : > { %1303 = vrot.lane.b32.xlu0 %v10828_v17, %s10683_s19  ;;  %1301 = vrot.lane.b32.xlu1 %v10831_v18, %s10683_s19 }
  0x45   : > { %8876 = vmatmul.mubr.msk.f32.vlgmr.msra.gmra.mxu1 %vm631_vm0, %v534_v26  ;;  %8935 = vmatprep.subr.mxu1 %v10805_v13  ;;  %v7434_v26 = vld [vmem:[%s15185_s2 + $0xd0] sm:$0xff] }
  0x46   : > { %8936 = vmatpush3.msra.mxu1 %v10805_v13  ;;  %8878 = vmatprep.mubr.msk.f32.mxu1 %vm631_vm0, %v535_v27 }
  0x47   : > { %8937 = vmatprep.subr.mxu1 %v10815_v15 }
  0x48   : > { %1299 = vrot.lane.b32.xlu0 %v10841_v19, %s10683_s19  ;;  %1297 = vrot.lane.b32.xlu1 %v10844_v20, %s10683_s19 }
  0x49   : > { %8938 = vmatpush3.msra.mxu1 %v10815_v15 }
  0x4a   : > { %8879 = vmatmul.mubr.msk.f32.gmra.mxu1 %vm631_vm0, %v536_v28  ;;  %8939 = vmatprep.subr.mxu1 %v10808_v14  ;;  %v7435_v28 = vld [vmem:[%s15185_s2 + $0xd8] sm:$0xff] }
  0x4b   : > { %8940 = vmatpush3.msra.mxu1 %v10808_v14  ;;  %8881 = vmatprep.mubr.msk.f32.mxu1 %vm631_vm0, %v537_v29  ;;  %v7350_v29 = vld [vmem:[%s15185_s2 + $0x70] sm:$0xff] }
  0x4c   : > { %1295 = vrot.lane.b32.xlu0 %v10857_v22, %s10683_s19  ;;  %1293 = vrot.lane.b32.xlu1 %v10860_v23, %s10683_s19 }
  0x4d   : > { %8941 = vmatprep.subr.mxu1 %v10818_v16 }
  0x4e   : > { %8942 = vmatpush3.msra.mxu1 %v10818_v16 }
  0x4f   : > { %8882 = vmatmul.mubr.msk.f32.gmra.mxu1 %vm631_vm0, %v538_v30  ;;  %8943 = vmatprep.subr.mxu1 %v10828_v17  ;;  %v7351_v30 = vld [vmem:[%s15185_s2 + $0x78] sm:$0xff] }
  0x50   : > { %1291 = vrot.lane.b32.xlu0 %v10871_v24, %s10683_s19  ;;  %1289 = vrot.lane.b32.xlu1 %v10874_v25, %s10683_s19 }
  0x51   : > { %8944 = vmatpush3.msra.mxu1 %v10828_v17  ;;  %8884 = vmatprep.mubr.msk.f32.mxu1 %vm631_vm0, %v539_v31 }
  0x52   : > { %8945 = vmatprep.subr.mxu1 %v10831_v18 }
  0x53   : > { %8946 = vmatpush3.msra.mxu1 %v10831_v18 }
  0x54   : > { %1732 = vrot.lane.b32.xlu0 %v10805_v13, %s10684_s14  ;;  %1730 = vrot.lane.b32.xlu1 %v10815_v15, %s10684_s14 }
  0x55   : > { %8885 = vmatmul.mubr.msk.f32.gmra.mxu1 %vm631_vm0, %v540_v32  ;;  %8947 = vmatprep.subr.mxu1 %v10841_v19  ;;  %v7436_v32 = vld [vmem:[%s15185_s2 + $0xe0] sm:$0xff] }
  0x56   : > { %8948 = vmatpush3.msra.mxu1 %v10841_v19  ;;  %8887 = vmatprep.mubr.msk.f32.mxu1 %vm631_vm0, %v541_v33 }
  0x57   : > { %8949 = vmatprep.subr.mxu1 %v10844_v20 }
  0x58   : > { %1728 = vrot.lane.b32.xlu0 %v10808_v14, %s10684_s14  ;;  %1726 = vrot.lane.b32.xlu1 %v10818_v16, %s10684_s14 }
  0x59   : > { %8950 = vmatpush3.msra.mxu1 %v10844_v20 }
  0x5a   : > { %8888 = vmatmul.mubr.msk.f32.gmra.mxu1 %vm631_vm0, %v542_v34  ;;  %8951 = vmatprep.subr.mxu1 %v10857_v22  ;;  %v7437_v34 = vld [vmem:[%s15185_s2 + $0xe8] sm:$0xff] }
  0x5b   : > { %8952 = vmatpush3.msra.mxu1 %v10857_v22  ;;  %8890 = vmatprep.mubr.msk.f32.mxu1 %vm631_vm0, %v543_v35  ;;  %v7352_v35 = vld [vmem:[%s15185_s2 + $0x80] sm:$0xff] }
  0x5c   : > { %1724 = vrot.lane.b32.xlu0 %v10828_v17, %s10684_s14  ;;  %1722 = vrot.lane.b32.xlu1 %v10831_v18, %s10684_s14 }
  0x5d   : > { %8953 = vmatprep.subr.mxu1 %v10860_v23 }
  0x5e   : > { %8954 = vmatpush3.msra.mxu1 %v10860_v23 }
  0x5f   : > { %8891 = vmatmul.mubr.msk.f32.gmra.mxu1 %vm631_vm0, %v544_v36  ;;  %8955 = vmatprep.subr.mxu1 %v10871_v24  ;;  %v7353_v36 = vld [vmem:[%s15185_s2 + $0x88] sm:$0xff] }
  0x60   : > { %1720 = vrot.lane.b32.xlu0 %v10841_v19, %s10684_s14  ;;  %1718 = vrot.lane.b32.xlu1 %v10844_v20, %s10684_s14 }
  0x61   : > { %8956 = vmatpush3.msra.mxu1 %v10871_v24  ;;  %8959 = vmatprep.mubr.msk.f32.mxu1 %vm631_vm0, %v545_v37 }
  0x62   : > { %8957 = vmatprep.subr.mxu1 %v10874_v25 }
  0x63   : > { %8958 = vmatpush3.msra.mxu1 %v10874_v25 }
  0x64   : > { %1716 = vrot.lane.b32.xlu0 %v10857_v22, %s10684_s14  ;;  %1714 = vrot.lane.b32.xlu1 %v10860_v23, %s10684_s14 }
  0x65   : > { %8960 = vmatmul.mubr.msk.f32.vlgmr.msra.gmra.mxu1 %vm631_vm0, %v546_v38  ;;  %v7438_v38 = vld [vmem:[%s15185_s2 + $0xf0] sm:$0xff] }
  0x66   : > { %8962 = vmatprep.mubr.msk.f32.mxu1 %vm631_vm0, %v547_v39 }
  0x68   : > { %1712 = vrot.lane.b32.xlu0 %v10871_v24, %s10684_s14  ;;  %1710 = vrot.lane.b32.xlu1 %v10874_v25, %s10684_s14 }
  0x69   : > { %8963 = vmatmul.mubr.msk.f32.gmra.mxu1 %vm631_vm0, %v548_v40  ;;  %v7439_v40 = vld [vmem:[%s15185_s2 + $0xf8] sm:$0xff] }
  0x6a   : > { %8965 = vmatprep.mubr.msk.f32.mxu1 %vm631_vm0, %v549_v41  ;;  %v7354_v41 = vld [vmem:[%s15185_s2 + $0x90] sm:$0xff] }
  0x6c   : > { %2153 = vrot.lane.b32.xlu0 %v10805_v13, %s10685_s18  ;;  %2151 = vrot.lane.b32.xlu1 %v10815_v15, %s10685_s18 }
  0x6d   : > { %8966 = vmatmul.mubr.msk.f32.gmra.mxu1 %vm631_vm0, %v550_v42  ;;  %v7355_v42 = vld [vmem:[%s15185_s2 + $0x98] sm:$0xff] }
  0x6e   : > { %8968 = vmatprep.mubr.msk.f32.mxu1 %vm631_vm0, %v551_v43 }
  0x70   : > { %2149 = vrot.lane.b32.xlu0 %v10808_v14, %s10685_s18  ;;  %2147 = vrot.lane.b32.xlu1 %v10818_v16, %s10685_s18  ;;  %v7308_v14 = vld [vmem:[%s15184_s1 + $0xa0] sm:$0xff]  ;;  %v7309_v16 = vld [vmem:[%s15184_s1 + $0xa8] sm:$0xff] }
  0x71   : > { %8969 = vmatmul.mubr.msk.f32.gmra.mxu1 %vm631_vm0, %v552_v44  ;;  %v7440_v44 = vld [vmem:[%s15185_s2 + $0x100] sm:$0xff] }
  0x72   : > { %8971 = vmatprep.mubr.msk.f32.mxu1 %vm631_vm0, %v553_v45 }
  0x74   : > { %2145 = vrot.lane.b32.xlu0 %v10828_v17, %s10685_s18  ;;  %2143 = vrot.lane.b32.xlu1 %v10831_v18, %s10685_s18  ;;  %v7310_v18 = vld [vmem:[%s15184_s1 + $0xb0] sm:$0xff] }
  0x75   : > { %8972 = vmatmul.mubr.msk.f32.gmra.mxu1 %vm631_vm0, %v554_v46  ;;  %v7441_v46 = vld [vmem:[%s15185_s2 + $0x108] sm:$0xff] }
  0x76   : > { %8974 = vmatprep.mubr.msk.f32.mxu1 %vm631_vm0, %v555_v47  ;;  %v7356_v47 = vld [vmem:[%s15185_s2 + $0xa0] sm:$0xff] }
  0x78   : > { %2141 = vrot.lane.b32.xlu0 %v10841_v19, %s10685_s18  ;;  %2139 = vrot.lane.b32.xlu1 %v10844_v20, %s10685_s18  ;;  %v7311_v20 = vld [vmem:[%s15184_s1 + $0xb8] sm:$0xff] }
  0x79   : > { %8975 = vmatmul.mubr.msk.f32.gmra.mxu1 %vm631_vm0, %v556_v48  ;;  %v7357_v48 = vld [vmem:[%s15185_s2 + $0xa8] sm:$0xff] }
  0x7a   : > { %9043 = vmatprep.mubr.msk.f32.mxu1 %vm631_vm0, %v7432_v49 }
  0x7c   : > { %2137 = vrot.lane.b32.xlu0 %v10857_v22, %s10685_s18  ;;  %2135 = vrot.lane.b32.xlu1 %v10860_v23, %s10685_s18  ;;  %v7433_v22 = vld [vmem:[%s15185_s2 + $0xc8] sm:$0xff]  ;;  %v7348_v23 = vld [vmem:[%s15185_s2 + $0x60] sm:$0xff] }
  0x80   : > { %2133 = vrot.lane.b32.xlu0 %v10871_v24, %s10685_s18  ;;  %2131 = vrot.lane.b32.xlu1 %v10874_v25, %s10685_s18  ;;  %v7349_v24 = vld [vmem:[%s15185_s2 + $0x68] sm:$0xff] }
  0x96   : > { %v592_v50 = vpop.permute.xlu0 %591  ;;  %v588_v51 = vpop.permute.xlu1 %587 }
  0x97   : > { %8809 = vmatprep.subr.msk.mxu0 %vm605_vm1, %v592_v50 }
  0x98   : > { %8810 = vmatpush3.msk.msra.mxu0 %vm605_vm1, %v592_v50 }
  0x9a   : > { %v590_v52 = vpop.permute.xlu0 %589  ;;  %v11086_v53 = vpop.permute.xlu1 %585 }
  0x9b   : > { %8811 = vmatprep.subr.msk.mxu0 %vm605_vm1, %v590_v52 }
  0x9c   : > { %8812 = vmatpush3.msk.msra.mxu0 %vm605_vm1, %v590_v52 }
  0x9d   : > { %8813 = vmatprep.subr.msk.mxu0 %vm605_vm1, %v588_v51 }
  0x9e   : > { %8814 = vmatpush3.msk.msra.mxu0 %vm605_vm1, %v588_v51  ;;  %v11092_v54 = vpop.permute.xlu0 %583  ;;  %v11094_v55 = vpop.permute.xlu1 %581 }
  0x9f   : > { %8815 = vmatprep.subr.msk.mxu0 %vm605_vm1, %v11086_v53 }
  0xa0   : > { %8816 = vmatpush3.msk.msra.mxu0 %vm605_vm1, %v11086_v53 }
  0xa1   : > { %8817 = vmatprep.subr.msk.mxu0 %vm605_vm1, %v11092_v54 }
  0xa2   : > { %8818 = vmatpush3.msk.msra.mxu0 %vm605_vm1, %v11092_v54  ;;  %v11104_v56 = vpop.permute.xlu0 %579  ;;  %v11106_v57 = vpop.permute.xlu1 %577 }
  0xa3   : > { %8819 = vmatprep.subr.msk.mxu0 %vm605_vm1, %v11094_v55 }
  0xa4   : > { %8820 = vmatpush3.msk.msra.mxu0 %vm605_vm1, %v11094_v55 }
  0xa5   : > { %8821 = vmatprep.subr.msk.mxu0 %vm605_vm1, %v11104_v56 }
  0xa6   : > { %8822 = vmatpush3.msk.msra.mxu0 %vm605_vm1, %v11104_v56  ;;  %v11116_v58 = vpop.permute.xlu0 %575  ;;  %v11118_v59 = vpop.permute.xlu1 %573 }
  0xa7   : > { %8823 = vmatprep.subr.msk.mxu0 %vm605_vm1, %v11106_v57 }
  0xa8   : > { %8824 = vmatpush3.msk.msra.mxu0 %vm605_vm1, %v11106_v57 }
  0xa9   : > { %8825 = vmatprep.subr.msk.mxu0 %vm605_vm1, %v11116_v58 }
  0xaa   : > { %8826 = vmatpush3.msk.msra.mxu0 %vm605_vm1, %v11116_v58  ;;  %v11128_v60 = vpop.permute.xlu0 %571  ;;  %v11130_v61 = vpop.permute.xlu1 %569 }
  0xab   : > { %8827 = vmatprep.subr.msk.mxu0 %vm605_vm1, %v11118_v59 }
  0xac   : > { %8828 = vmatpush3.msk.msra.mxu0 %vm605_vm1, %v11118_v59 }
  0xad   : > { %8829 = vmatprep.subr.msk.mxu0 %vm605_vm1, %v11128_v60 }
  0xae   : > { %8830 = vmatpush3.msk.msra.mxu0 %vm605_vm1, %v11128_v60  ;;  %v11140_v62 = vpop.permute.xlu0 %1311  ;;  %v11142_v63 = vpop.permute.xlu1 %1309 }
  0xaf   : > { %8831 = vmatprep.subr.msk.mxu0 %vm605_vm1, %v11130_v61  ;;  %9019 = vmatprep.subr.msk.mxu1 %vm1325_vm2, %v11140_v62 }
  0xb0   : > { %8832 = vmatpush3.msk.msra.mxu0 %vm605_vm1, %v11130_v61  ;;  %9020 = vmatpush3.msk.msra.mxu1 %vm1325_vm2, %v11140_v62 }
  0xb1   : > { %8834 = vmatmul.mubr.msk.f32.vlgmr.msra.gmra.mxu0 %vm631_vm0, %v7301_v0  ;;  %8893 = vmatprep.subr.msk.mxu0 %vm605_vm1, %v592_v50  ;;  %v7507_v0 = vld [vmem:[%s15185_s2 + $0x138] sm:$0xff] }
  0xb2   : > { %9021 = vmatprep.subr.msk.mxu1 %vm1325_vm2, %v11142_v63  ;;  %v11162_v2 = vpop.permute.xlu0 %1307  ;;  %8894 = vmatpush3.msk.msra.mxu0 %vm605_vm1, %v592_v50  ;;  %v11165_v3 = vpop.permute.xlu1 %1305  ;;  %v7442_v50 = vld [vmem:[%s15185_s2 + $0x110] sm:$0xff] }
  0xb3   : > { %9022 = vmatpush3.msk.msra.mxu1 %vm1325_vm2, %v11142_v63  ;;  %8895 = vmatprep.subr.msk.mxu0 %vm605_vm1, %v590_v52 }
  0xb4   : > { %9023 = vmatprep.subr.msk.mxu1 %vm1325_vm2, %v11162_v2  ;;  %8836 = vmatprep.mubr.msk.f32.mxu0 %vm631_vm0, %v7302_v1  ;;  %v7398_v1 = vld [vmem:[%s15184_s1 + $0xd0] sm:$0xff] }
  0xb5   : > { %8896 = vmatpush3.msk.msra.mxu0 %vm605_vm1, %v590_v52  ;;  %9024 = vmatpush3.msk.msra.mxu1 %vm1325_vm2, %v11162_v2  ;;  %v7443_v52 = vld [vmem:[%s15185_s2 + $0x118] sm:$0xff] }
  0xb6   : > { %8837 = vmatmul.mubr.msk.f32.gmra.mxu0 %vm631_vm0, %v7303_v4  ;;  %8897 = vmatprep.subr.msk.mxu0 %vm605_vm1, %v588_v51  ;;  %v11181_v5 = vpop.permute.xlu0 %1303  ;;  %v11186_v7 = vpop.permute.xlu1 %1301  ;;  %v7508_v4 = vld [vmem:[%s15185_s2 + $0x140] sm:$0xff] }
  0xb7   : > { %9025 = vmatprep.subr.msk.mxu1 %vm1325_vm2, %v11165_v3  ;;  %8898 = vmatpush3.msk.msra.mxu0 %vm605_vm1, %v588_v51 }
  0xb8   : > { %9026 = vmatpush3.msk.msra.mxu1 %vm1325_vm2, %v11165_v3  ;;  %8899 = vmatprep.subr.msk.mxu0 %vm605_vm1, %v11086_v53 }
  0xb9   : > { %9027 = vmatprep.subr.msk.mxu1 %vm1325_vm2, %v11181_v5  ;;  %8839 = vmatprep.mubr.msk.f32.mxu0 %vm631_vm0, %v7304_v6  ;;  %v7509_v6 = vld [vmem:[%s15185_s2 + $0x148] sm:$0xff] }
  0xba   : > { %8900 = vmatpush3.msk.msra.mxu0 %vm605_vm1, %v11086_v53  ;;  %9028 = vmatpush3.msk.msra.mxu1 %vm1325_vm2, %v11181_v5  ;;  %v11205_v9 = vpop.permute.xlu0 %1299  ;;  %v11213_v11 = vpop.permute.xlu1 %1297  ;;  %v7358_v53 = vld [vmem:[%s15185_s2 + $0xb0] sm:$0xff] }
  0xbb   : > { %8840 = vmatmul.mubr.msk.f32.gmra.mxu0 %vm631_vm0, %v7305_v8  ;;  %8901 = vmatprep.subr.msk.mxu0 %vm605_vm1, %v11092_v54  ;;  %v7401_v8 = vld [vmem:[%s15184_s1 + $0xe8] sm:$0xff] }
  0xbc   : > { %9029 = vmatprep.subr.msk.mxu1 %vm1325_vm2, %v11186_v7  ;;  %8902 = vmatpush3.msk.msra.mxu0 %vm605_vm1, %v11092_v54  ;;  %v7359_v54 = vld [vmem:[%s15185_s2 + $0xb8] sm:$0xff] }
  0xbd   : > { %9030 = vmatpush3.msk.msra.mxu1 %vm1325_vm2, %v11186_v7  ;;  %8903 = vmatprep.subr.msk.mxu0 %vm605_vm1, %v11094_v55 }
  0xbe   : > { %9031 = vmatprep.subr.msk.mxu1 %vm1325_vm2, %v11205_v9  ;;  %8842 = vmatprep.mubr.msk.f32.mxu0 %vm631_vm0, %v7306_v10  ;;  %v11229_v13 = vpop.permute.xlu0 %1295  ;;  %v11245_v15 = vpop.permute.xlu1 %1293  ;;  %v7510_v10 = vld [vmem:[%s15185_s2 + $0x150] sm:$0xff] }
  0xbf   : > { %8904 = vmatpush3.msk.msra.mxu0 %vm605_vm1, %v11094_v55  ;;  %9032 = vmatpush3.msk.msra.mxu1 %vm1325_vm2, %v11205_v9 }
  0xc0   : > { %8843 = vmatmul.mubr.msk.f32.gmra.mxu0 %vm631_vm0, %v7307_v12  ;;  %8905 = vmatprep.subr.msk.mxu0 %vm605_vm1, %v11104_v56  ;;  %v7511_v12 = vld [vmem:[%s15185_s2 + $0x158] sm:$0xff] }
  0xc1   : > { %9033 = vmatprep.subr.msk.mxu1 %vm1325_vm2, %v11213_v11  ;;  %8906 = vmatpush3.msk.msra.mxu0 %vm605_vm1, %v11104_v56  ;;  %v7504_v56 = vld [vmem:[%s15185_s2 + $0x120] sm:$0xff] }
  0xc2   : > { %9034 = vmatpush3.msk.msra.mxu1 %vm1325_vm2, %v11213_v11  ;;  %8907 = vmatprep.subr.msk.mxu0 %vm605_vm1, %v11106_v57  ;;  %v11261_v17 = vpop.permute.xlu0 %1291  ;;  %v11277_v19 = vpop.permute.xlu1 %1289 }
  0xc3   : > { %9035 = vmatprep.subr.msk.mxu1 %vm1325_vm2, %v11229_v13  ;;  %8845 = vmatprep.mubr.msk.f32.mxu0 %vm631_vm0, %v7308_v14  ;;  %v7403_v14 = vld [vmem:[%s15184_s1 + $0xf8] sm:$0xff] }
  0xc4   : > { %8908 = vmatpush3.msk.msra.mxu0 %vm605_vm1, %v11106_v57  ;;  %9036 = vmatpush3.msk.msra.mxu1 %vm1325_vm2, %v11229_v13 }
  0xc5   : > { %8846 = vmatmul.mubr.msk.f32.gmra.mxu0 %vm631_vm0, %v7309_v16  ;;  %8909 = vmatprep.subr.msk.mxu0 %vm605_vm1, %v11116_v58  ;;  %v7512_v16 = vld [vmem:[%s15185_s2 + $0x160] sm:$0xff] }
  0xc6   : > { %9037 = vmatprep.subr.msk.mxu1 %vm1325_vm2, %v11245_v15  ;;  %8910 = vmatpush3.msk.msra.mxu0 %vm605_vm1, %v11116_v58  ;;  %v11292_v21 = vpop.permute.xlu0 %1732  ;;  %v11314_v25 = vpop.permute.xlu1 %1730  ;;  %v7505_v58 = vld [vmem:[%s15185_s2 + $0x128] sm:$0xff] }
  0xc7   : > { %9038 = vmatpush3.msk.msra.mxu1 %vm1325_vm2, %v11245_v15  ;;  %8911 = vmatprep.subr.msk.mxu0 %vm605_vm1, %v11118_v59 }
  0xc8   : > { %9039 = vmatprep.subr.msk.mxu1 %vm1325_vm2, %v11261_v17  ;;  %8848 = vmatprep.mubr.msk.f32.mxu0 %vm631_vm0, %v7310_v18  ;;  %v7513_v18 = vld [vmem:[%s15185_s2 + $0x168] sm:$0xff] }
  0xc9   : > { %8912 = vmatpush3.msk.msra.mxu0 %vm605_vm1, %v11118_v59  ;;  %9040 = vmatpush3.msk.msra.mxu1 %vm1325_vm2, %v11261_v17  ;;  %v7396_v59 = vld [vmem:[%s15184_s1 + $0xc0] sm:$0xff] }
  0xca   : > { %8849 = vmatmul.mubr.msk.f32.gmra.mxu0 %vm631_vm0, %v7311_v20  ;;  %8913 = vmatprep.subr.msk.mxu0 %vm605_vm1, %v11128_v60  ;;  %v11329_v27 = vpop.permute.xlu0 %1728  ;;  %v11350_v31 = vpop.permute.xlu1 %1726  ;;  %v7405_v20 = vld [vmem:[%s15184_s1 + $0x108] sm:$0xff] }
  0xcb   : > { %9041 = vmatprep.subr.msk.mxu1 %vm1325_vm2, %v11277_v19  ;;  %8914 = vmatpush3.msk.msra.mxu0 %vm605_vm1, %v11128_v60  ;;  %v7397_v60 = vld [vmem:[%s15184_s1 + $0xc8] sm:$0xff] }
  0xcc   : > { %9042 = vmatpush3.msk.msra.mxu1 %vm1325_vm2, %v11277_v19  ;;  %8915 = vmatprep.subr.msk.mxu0 %vm605_vm1, %v11130_v61 }
  0xcd   : > { %9044 = vmatmul.mubr.msk.f32.vlgmr.msra.gmra.mxu1 %vm631_vm0, %v7433_v22  ;;  %9103 = vmatprep.subr.msk.mxu1 %vm1746_vm3, %v11292_v21  ;;  %v7514_v22 = vld [vmem:[%s15185_s2 + $0x170] sm:$0xff] }
  0xce   : > { %8916 = vmatpush3.msk.msra.mxu0 %vm605_vm1, %v11130_v61  ;;  %8917 = vmatprep.mubr.msk.f32.mxu0 %vm631_vm0, %v7348_v23  ;;  %v11365_v33 = vpop.permute.xlu0 %1724  ;;  %v11386_v37 = vpop.permute.xlu1 %1722 }
  0xcf   : > { %9104 = vmatpush3.msk.msra.mxu1 %vm1746_vm3, %v11292_v21  ;;  %8918 = vmatmul.mubr.msk.f32.vlgmr.msra.gmra.mxu0 %vm631_vm0, %v7349_v24  ;;  %v7515_v24 = vld [vmem:[%s15185_s2 + $0x178] sm:$0xff] }
  0xd0   : > { %8977 = vmatprep.subr.msk.mxu0 %vm1325_vm2, %v11140_v62  ;;  %9105 = vmatprep.subr.msk.mxu1 %vm1746_vm3, %v11314_v25 }
  0xd1   : > { %8978 = vmatpush3.msk.msra.mxu0 %vm1325_vm2, %v11140_v62  ;;  %9046 = vmatprep.mubr.msk.f32.mxu1 %vm631_vm0, %v7434_v26  ;;  %v7506_v62 = vld [vmem:[%s15185_s2 + $0x130] sm:$0xff]  ;;  %v7407_v26 = vld [vmem:[%s15184_s1 + $0x118] sm:$0xff] }
  0xd2   : > { %9106 = vmatpush3.msk.msra.mxu1 %vm1746_vm3, %v11314_v25  ;;  %8979 = vmatprep.subr.msk.mxu0 %vm1325_vm2, %v11142_v63  ;;  %v11401_v39 = vpop.permute.xlu0 %1720  ;;  %v11422_v43 = vpop.permute.xlu1 %1718 }
  0xd3   : > { %9047 = vmatmul.mubr.msk.f32.gmra.mxu1 %vm631_vm0, %v7435_v28  ;;  %9107 = vmatprep.subr.msk.mxu1 %vm1746_vm3, %v11329_v27  ;;  %v7576_v28 = vld [vmem:[%s15185_s2 + $0x180] sm:$0xff] }
  0xd4   : > { %8920 = vmatprep.mubr.msk.f32.mxu0 %vm631_vm0, %v7350_v29  ;;  %8980 = vmatpush3.msk.msra.mxu0 %vm1325_vm2, %v11142_v63  ;;  %v7577_v29 = vld [vmem:[%s15185_s2 + $0x188] sm:$0xff] }
  0xd5   : > { %9108 = vmatpush3.msk.msra.mxu1 %vm1746_vm3, %v11329_v27  ;;  %8921 = vmatmul.mubr.msk.f32.gmra.mxu0 %vm631_vm0, %v7351_v30  ;;  %v7468_v30 = vld [vmem:[%s15184_s1 + $0x120] sm:$0xff] }
  0xd6   : > { %8981 = vmatprep.subr.msk.mxu0 %vm1325_vm2, %v11162_v2  ;;  %9109 = vmatprep.subr.msk.mxu1 %vm1746_vm3, %v11350_v31  ;;  %v11437_v45 = vpop.permute.xlu0 %1716  ;;  %v11458_v49 = vpop.permute.xlu1 %1714 }
  0xd7   : > { %8982 = vmatpush3.msk.msra.mxu0 %vm1325_vm2, %v11162_v2  ;;  %9049 = vmatprep.mubr.msk.f32.mxu1 %vm631_vm0, %v7436_v32  ;;  %v7399_v2 = vld [vmem:[%s15184_s1 + $0xd8] sm:$0xff]  ;;  %v7578_v32 = vld [vmem:[%s15185_s2 + $0x190] sm:$0xff] }
  0xd8   : > { %9110 = vmatpush3.msk.msra.mxu1 %vm1746_vm3, %v11350_v31  ;;  %8983 = vmatprep.subr.msk.mxu0 %vm1325_vm2, %v11165_v3 }
  0xd9   : > { %9050 = vmatmul.mubr.msk.f32.gmra.mxu1 %vm631_vm0, %v7437_v34  ;;  %9111 = vmatprep.subr.msk.mxu1 %vm1746_vm3, %v11365_v33  ;;  %v7579_v34 = vld [vmem:[%s15185_s2 + $0x198] sm:$0xff] }
  0xda   : > { %8923 = vmatprep.mubr.msk.f32.mxu0 %vm631_vm0, %v7352_v35  ;;  %8984 = vmatpush3.msk.msra.mxu0 %vm1325_vm2, %v11165_v3  ;;  %v11473_v51 = vpop.permute.xlu0 %1712  ;;  %v11494_v55 = vpop.permute.xlu1 %1710  ;;  %v7580_v35 = vld [vmem:[%s15185_s2 + $0x1a0] sm:$0xff] }
  0xdb   : > { %9112 = vmatpush3.msk.msra.mxu1 %vm1746_vm3, %v11365_v33  ;;  %8924 = vmatmul.mubr.msk.f32.gmra.mxu0 %vm631_vm0, %v7353_v36  ;;  %v7471_v36 = vld [vmem:[%s15184_s1 + $0x138] sm:$0xff] }
  0xdc   : > { %8985 = vmatprep.subr.msk.mxu0 %vm1325_vm2, %v11181_v5  ;;  %9113 = vmatprep.subr.msk.mxu1 %vm1746_vm3, %v11386_v37 }
  0xdd   : > { %8986 = vmatpush3.msk.msra.mxu0 %vm1325_vm2, %v11181_v5  ;;  %9052 = vmatprep.mubr.msk.f32.mxu1 %vm631_vm0, %v7438_v38  ;;  %v7581_v38 = vld [vmem:[%s15185_s2 + $0x1a8] sm:$0xff] }
  0xde   : > { %9114 = vmatpush3.msk.msra.mxu1 %vm1746_vm3, %v11386_v37  ;;  %8987 = vmatprep.subr.msk.mxu0 %vm1325_vm2, %v11186_v7  ;;  %v11509_v57 = vpop.permute.xlu0 %2153  ;;  %v11530_v61 = vpop.permute.xlu1 %2151 }
  0xdf   : > { %9053 = vmatmul.mubr.msk.f32.gmra.mxu1 %vm631_vm0, %v7439_v40  ;;  %9115 = vmatprep.subr.msk.mxu1 %vm1746_vm3, %v11401_v39  ;;  %v7473_v40 = vld [vmem:[%s15184_s1 + $0x148] sm:$0xff] }
  0xe0   : > { %8926 = vmatprep.mubr.msk.f32.mxu0 %vm631_vm0, %v7354_v41  ;;  %8988 = vmatpush3.msk.msra.mxu0 %vm1325_vm2, %v11186_v7  ;;  %v7400_v7 = vld [vmem:[%s15184_s1 + $0xe0] sm:$0xff]  ;;  %v7474_v41 = vld [vmem:[%s15184_s1 + $0x150] sm:$0xff] }
  0xe1   : > { %9116 = vmatpush3.msk.msra.mxu1 %vm1746_vm3, %v11401_v39  ;;  %8927 = vmatmul.mubr.msk.f32.gmra.mxu0 %vm631_vm0, %v7355_v42  ;;  %v7583_v42 = vld [vmem:[%s15185_s2 + $0x1b8] sm:$0xff] }
  0xe2   : > { %8989 = vmatprep.subr.msk.mxu0 %vm1325_vm2, %v11205_v9  ;;  %9117 = vmatprep.subr.msk.mxu1 %vm1746_vm3, %v11422_v43  ;;  %v11545_v63 = vpop.permute.xlu0 %2149  ;;  %v11566_v3 = vpop.permute.xlu1 %2147 }
  0xe3   : > { %8990 = vmatpush3.msk.msra.mxu0 %vm1325_vm2, %v11205_v9  ;;  %9055 = vmatprep.mubr.msk.f32.mxu1 %vm631_vm0, %v7440_v44  ;;  %v7475_v44 = vld [vmem:[%s15184_s1 + $0x158] sm:$0xff] }
  0xe4   : > { %9118 = vmatpush3.msk.msra.mxu1 %vm1746_vm3, %v11422_v43  ;;  %8991 = vmatprep.subr.msk.mxu0 %vm1325_vm2, %v11213_v11 }
  0xe5   : > { %9056 = vmatmul.mubr.msk.f32.gmra.mxu1 %vm631_vm0, %v7441_v46  ;;  %9119 = vmatprep.subr.msk.mxu1 %vm1746_vm3, %v11437_v45  ;;  %v7585_v46 = vld [vmem:[%s15185_s2 + $0x1c8] sm:$0xff] }
  0xe6   : > { %8929 = vmatprep.mubr.msk.f32.mxu0 %vm631_vm0, %v7356_v47  ;;  %8992 = vmatpush3.msk.msra.mxu0 %vm1325_vm2, %v11213_v11  ;;  %v11581_v5 = vpop.permute.xlu0 %2145  ;;  %v11602_v9 = vpop.permute.xlu1 %2143  ;;  %v7586_v47 = vld [vmem:[%s15185_s2 + $0x1d0] sm:$0xff] }
  0xe7   : > { %9120 = vmatpush3.msk.msra.mxu1 %vm1746_vm3, %v11437_v45  ;;  %8930 = vmatmul.mubr.msk.f32.gmra.mxu0 %vm631_vm0, %v7357_v48  ;;  %v7477_v48 = vld [vmem:[%s15184_s1 + $0x168] sm:$0xff] }
  0xe8   : > { %8993 = vmatprep.subr.msk.mxu0 %vm1325_vm2, %v11229_v13  ;;  %9121 = vmatprep.subr.msk.mxu1 %vm1746_vm3, %v11458_v49 }
  0xe9   : > { %8994 = vmatpush3.msk.msra.mxu0 %vm1325_vm2, %v11229_v13  ;;  %9058 = vmatprep.mubr.msk.f32.mxu1 %vm631_vm0, %v7442_v50  ;;  %v7402_v13 = vld [vmem:[%s15184_s1 + $0xf0] sm:$0xff]  ;;  %v7587_v50 = vld [vmem:[%s15185_s2 + $0x1d8] sm:$0xff] }
  0xea   : > { %9122 = vmatpush3.msk.msra.mxu1 %vm1746_vm3, %v11458_v49  ;;  %8995 = vmatprep.subr.msk.mxu0 %vm1325_vm2, %v11245_v15  ;;  %v11617_v11 = vpop.permute.xlu0 %2141 }
  0xeb   : > { %9059 = vmatmul.mubr.msk.f32.gmra.mxu1 %vm631_vm0, %v7443_v52  ;;  %9123 = vmatprep.subr.msk.mxu1 %vm1746_vm3, %v11473_v51  ;;  %v7540_v52 = vld [vmem:[%s15184_s1 + $0x180] sm:$0xff] }
  0xec   : > { %8932 = vmatprep.mubr.msk.f32.mxu0 %vm631_vm0, %v7358_v53  ;;  %8996 = vmatpush3.msk.msra.mxu0 %vm1325_vm2, %v11245_v15  ;;  %v11638_v15 = vpop.permute.xlu1 %2139  ;;  %v10686_v53 = vmov 0  }
  0xed   : > { %9124 = vmatpush3.msk.msra.mxu1 %vm1746_vm3, %v11473_v51  ;;  %8933 = vmatmul.mubr.msk.f32.gmra.mxu0 %vm631_vm0, %v7359_v54  ;;  %v2574_v54 = vld [vmem:[%s15186_s3 + $0x50] sm:$0xff] }
  0xee   : > { %8997 = vmatprep.subr.msk.mxu0 %vm1325_vm2, %v11261_v17  ;;  %9125 = vmatprep.subr.msk.mxu1 %vm1746_vm3, %v11494_v55 }
  0xef   : > { %8998 = vmatpush3.msk.msra.mxu0 %vm1325_vm2, %v11261_v17  ;;  %9126 = vmatpush3.msk.msra.mxu1 %vm1746_vm3, %v11494_v55  ;;  %v11653_v17 = vpop.permute.xlu0 %2137 }
  0xf0   : > { %9127 = vmatprep.mubr.msk.f32.mxu1 %vm631_vm0, %v7504_v56  ;;  %8999 = vmatprep.subr.msk.mxu0 %vm1325_vm2, %v11277_v19  ;;  %v2575_v56 = vld [vmem:[%s15186_s3 + $0x58] sm:$0xff] }
  0xf1   : > { %9128 = vmatmul.mubr.msk.f32.vlgmr.msra.gmra.mxu1 %vm631_vm0, %v7505_v58  ;;  %9187 = vmatprep.subr.msk.mxu1 %vm2167_vm4, %v11509_v57 }
  0xf2   : > { %9000 = vmatpush3.msk.msra.mxu0 %vm1325_vm2, %v11277_v19  ;;  %9001 = vmatprep.mubr.msk.f32.mxu0 %vm631_vm0, %v7396_v59  ;;  %v7404_v19 = vld [vmem:[%s15184_s1 + $0x100] sm:$0xff]  ;;  %v2573_v59 = vld [vmem:[%s15186_s3 + $0x48] sm:$0xff] }
  0xf3   : > { %9188 = vmatpush3.msk.msra.mxu1 %vm2167_vm4, %v11509_v57  ;;  %9002 = vmatmul.mubr.msk.f32.vlgmr.msra.gmra.mxu0 %vm631_vm0, %v7397_v60  ;;  %v11689_v23 = vpop.permute.xlu0 %2133  ;;  %v7543_v60 = vld [vmem:[%s15184_s1 + $0x198] sm:$0xff] }
  0xf4   : > { %9061 = vmatprep.subr.msk.mxu0 %vm1746_vm3, %v11292_v21  ;;  %9189 = vmatprep.subr.msk.mxu1 %vm2167_vm4, %v11530_v61 }
  0xf5   : > { %9062 = vmatpush3.msk.msra.mxu0 %vm1746_vm3, %v11292_v21  ;;  %9130 = vmatprep.mubr.msk.f32.mxu1 %vm631_vm0, %v7506_v62  ;;  %v11674_v21 = vpop.permute.xlu1 %2135  ;;  %v7544_v62 = vld [vmem:[%s15184_s1 + $0x1a0] sm:$0xff] }
  0xf6   : > { %9190 = vmatpush3.msk.msra.mxu1 %vm2167_vm4, %v11530_v61  ;;  %9063 = vmatprep.subr.msk.mxu0 %vm1746_vm3, %v11314_v25 }
  0xf7   : > { %9131 = vmatmul.mubr.msk.f32.gmra.mxu1 %vm631_vm0, %v7507_v0  ;;  %9191 = vmatprep.subr.msk.mxu1 %vm2167_vm4, %v11545_v63  ;;  %v2571_v0 = vld [vmem:[%s15186_s3 + $0x38] sm:$0xff] }
  0xf8   : > { %9004 = vmatprep.mubr.msk.f32.mxu0 %vm631_vm0, %v7398_v1  ;;  %9064 = vmatpush3.msk.msra.mxu0 %vm1746_vm3, %v11314_v25  ;;  %v7406_v25 = vld [vmem:[%s15184_s1 + $0x110] sm:$0xff]  ;;  %v7545_v1 = vld [vmem:[%s15184_s1 + $0x1a8] sm:$0xff] }
  0xf9   : > { %9192 = vmatpush3.msk.msra.mxu1 %vm2167_vm4, %v11545_v63  ;;  %9005 = vmatmul.mubr.msk.f32.gmra.mxu0 %vm631_vm0, %v7399_v2  ;;  %v2570_v2 = vld [vmem:[%s15186_s3 + $0x30] sm:$0xff] }
  0xfa   : > { %9065 = vmatprep.subr.msk.mxu0 %vm1746_vm3, %v11329_v27  ;;  %9193 = vmatprep.subr.msk.mxu1 %vm2167_vm4, %v11566_v3 }
  0xfb   : > { %9066 = vmatpush3.msk.msra.mxu0 %vm1746_vm3, %v11329_v27  ;;  %9133 = vmatprep.mubr.msk.f32.mxu1 %vm631_vm0, %v7508_v4  ;;  %v11710_v27 = vpop.permute.xlu1 %2131 }
  0xfc   : > { %9194 = vmatpush3.msk.msra.mxu1 %vm2167_vm4, %v11566_v3  ;;  %9067 = vmatprep.subr.msk.mxu0 %vm1746_vm3, %v11350_v31 }
  0xfd   : > { %9134 = vmatmul.mubr.msk.f32.gmra.mxu1 %vm631_vm0, %v7509_v6  ;;  %9195 = vmatprep.subr.msk.mxu1 %vm2167_vm4, %v11581_v5  ;;  %v7547_v6 = vld [vmem:[%s15184_s1 + $0x1b8] sm:$0xff] }
  0xfe   : > { %9007 = vmatprep.mubr.msk.f32.mxu0 %vm631_vm0, %v7400_v7  ;;  %9068 = vmatpush3.msk.msra.mxu0 %vm1746_vm3, %v11350_v31  ;;  %v7469_v31 = vld [vmem:[%s15184_s1 + $0x128] sm:$0xff]  ;;  %v2568_v7 = vld [vmem:[%s15186_s3 + $0x20] sm:$0xff] }
  0xff   : > { %9196 = vmatpush3.msk.msra.mxu1 %vm2167_vm4, %v11581_v5  ;;  %9008 = vmatmul.mubr.msk.f32.gmra.mxu0 %vm631_vm0, %v7401_v8  ;;  %v7548_v8 = vld [vmem:[%s15184_s1 + $0x1c0] sm:$0xff] }
 0x100   : > { %9069 = vmatprep.subr.msk.mxu0 %vm1746_vm3, %v11365_v33  ;;  %9197 = vmatprep.subr.msk.mxu1 %vm2167_vm4, %v11602_v9 }
 0x101   : > { %9070 = vmatpush3.msk.msra.mxu0 %vm1746_vm3, %v11365_v33  ;;  %9136 = vmatprep.mubr.msk.f32.mxu1 %vm631_vm0, %v7510_v10  ;;  %v7470_v33 = vld [vmem:[%s15184_s1 + $0x130] sm:$0xff]  ;;  %v2567_v10 = vld [vmem:[%s15186_s3 + $0x18] sm:$0xff] }
 0x102   : > { %9198 = vmatpush3.msk.msra.mxu1 %vm2167_vm4, %v11602_v9  ;;  %9071 = vmatprep.subr.msk.mxu0 %vm1746_vm3, %v11386_v37 }
 0x103   : > { %9137 = vmatmul.mubr.msk.f32.gmra.mxu1 %vm631_vm0, %v7511_v12  ;;  %9199 = vmatprep.subr.msk.mxu1 %vm2167_vm4, %v11617_v11  ;;  %v2566_v12 = vld [vmem:[%s15186_s3 + $0x10] sm:$0xff] }
 0x104   : > { %9010 = vmatprep.mubr.msk.f32.mxu0 %vm631_vm0, %v7402_v13  ;;  %9072 = vmatpush3.msk.msra.mxu0 %vm1746_vm3, %v11386_v37  ;;  %v7472_v37 = vld [vmem:[%s15184_s1 + $0x140] sm:$0xff]  ;;  %v7550_v13 = vld [vmem:[%s15184_s1 + $0x1d0] sm:$0xff] }
 0x105   : > { %9200 = vmatpush3.msk.msra.mxu1 %vm2167_vm4, %v11617_v11  ;;  %9011 = vmatmul.mubr.msk.f32.gmra.mxu0 %vm631_vm0, %v7403_v14  ;;  %v11888_v58 = vpop.f32.mrf.mxu1 }
 0x106   : > { %9073 = vmatprep.subr.msk.mxu0 %vm1746_vm3, %v11401_v39  ;;  %9201 = vmatprep.subr.msk.mxu1 %vm2167_vm4, %v11638_v15 }
 0x107   : > { %9074 = vmatpush3.msk.msra.mxu0 %vm1746_vm3, %v11401_v39  ;;  %9139 = vmatprep.mubr.msk.f32.mxu1 %vm631_vm0, %v7512_v16  ;;  %v7582_v39 = vld [vmem:[%s15185_s2 + $0x1b0] sm:$0xff]  ;;  %v7551_v16 = vld [vmem:[%s15184_s1 + $0x1d8] sm:$0xff] }
 0x108   : > { %9202 = vmatpush3.msk.msra.mxu1 %vm2167_vm4, %v11638_v15  ;;  %9075 = vmatprep.subr.msk.mxu0 %vm1746_vm3, %v11422_v43 }
 0x109   : > { %9140 = vmatmul.mubr.msk.f32.gmra.mxu1 %vm631_vm0, %v7513_v18  ;;  %9203 = vmatprep.subr.msk.mxu1 %vm2167_vm4, %v11653_v17 }
 0x10a   : > { %9013 = vmatprep.mubr.msk.f32.mxu0 %vm631_vm0, %v7404_v19  ;;  %9076 = vmatpush3.msk.msra.mxu0 %vm1746_vm3, %v11422_v43  ;;  %v7584_v43 = vld [vmem:[%s15185_s2 + $0x1c0] sm:$0xff] }
 0x10b   : > { %9204 = vmatpush3.msk.msra.mxu1 %vm2167_vm4, %v11653_v17  ;;  %9014 = vmatmul.mubr.msk.f32.gmra.mxu0 %vm631_vm0, %v7405_v20 }
 0x10c   : > { %9077 = vmatprep.subr.msk.mxu0 %vm1746_vm3, %v11437_v45  ;;  %9205 = vmatprep.subr.msk.mxu1 %vm2167_vm4, %v11674_v21 }
 0x10d   : > { %9078 = vmatpush3.msk.msra.mxu0 %vm1746_vm3, %v11437_v45  ;;  %9142 = vmatprep.mubr.msk.f32.mxu1 %vm631_vm0, %v7514_v22  ;;  %v7476_v45 = vld [vmem:[%s15184_s1 + $0x160] sm:$0xff] }
 0x10e   : > { %9206 = vmatpush3.msk.msra.mxu1 %vm2167_vm4, %v11674_v21  ;;  %9079 = vmatprep.subr.msk.mxu0 %vm1746_vm3, %v11458_v49 }
 0x10f   : > { %9143 = vmatmul.mubr.msk.f32.gmra.mxu1 %vm631_vm0, %v7515_v24  ;;  %9207 = vmatprep.subr.msk.mxu1 %vm2167_vm4, %v11689_v23 }
 0x110   : > { %9016 = vmatprep.mubr.msk.f32.mxu0 %vm631_vm0, %v7406_v25  ;;  %9080 = vmatpush3.msk.msra.mxu0 %vm1746_vm3, %v11458_v49  ;;  %v7478_v49 = vld [vmem:[%s15184_s1 + $0x170] sm:$0xff] }
 0x111   : > { %9208 = vmatpush3.msk.msra.mxu1 %vm2167_vm4, %v11689_v23  ;;  %9017 = vmatmul.mubr.msk.f32.gmra.mxu0 %vm631_vm0, %v7407_v26 }
 0x112   : > { %9081 = vmatprep.subr.msk.mxu0 %vm1746_vm3, %v11473_v51  ;;  %9209 = vmatprep.subr.msk.mxu1 %vm2167_vm4, %v11710_v27 }
 0x113   : > { %9082 = vmatpush3.msk.msra.mxu0 %vm1746_vm3, %v11473_v51  ;;  %9210 = vmatpush3.msk.msra.mxu1 %vm2167_vm4, %v11710_v27  ;;  %v7479_v51 = vld [vmem:[%s15184_s1 + $0x178] sm:$0xff] }
 0x114   : > { %9211 = vmatprep.mubr.msk.f32.mxu1 %vm631_vm0, %v7576_v28  ;;  %9083 = vmatprep.subr.msk.mxu0 %vm1746_vm3, %v11494_v55 }
 0x115   : > { %9212 = vmatmul.mubr.msk.f32.vlgmr.msra.gmra.mxu1 %vm631_vm0, %v7577_v29  ;;  %9084 = vmatpush3.msk.msra.mxu0 %vm1746_vm3, %v11494_v55  ;;  %v7541_v55 = vld [vmem:[%s15184_s1 + $0x188] sm:$0xff] }
 0x116   : > { %9085 = vmatprep.mubr.msk.f32.mxu0 %vm631_vm0, %v7468_v30  ;;  %9145 = vmatprep.subr.msk.mxu0 %vm2167_vm4, %v11509_v57 }
 0x117   : > { %9086 = vmatmul.mubr.msk.f32.vlgmr.msra.gmra.mxu0 %vm631_vm0, %v7469_v31  ;;  %9214 = vmatprep.mubr.msk.f32.mxu1 %vm631_vm0, %v7578_v32 }
 0x118   : > { %9146 = vmatpush3.msk.msra.mxu0 %vm2167_vm4, %v11509_v57  ;;  %9088 = vmatprep.mubr.msk.f32.mxu0 %vm631_vm0, %v7470_v33  ;;  %v7542_v57 = vld [vmem:[%s15184_s1 + $0x190] sm:$0xff] }
 0x119   : > { %9147 = vmatprep.subr.msk.mxu0 %vm2167_vm4, %v11530_v61  ;;  %9215 = vmatmul.mubr.msk.f32.gmra.mxu1 %vm631_vm0, %v7579_v34 }
 0x11a   : > { %9148 = vmatpush3.msk.msra.mxu0 %vm2167_vm4, %v11530_v61  ;;  %9217 = vmatprep.mubr.msk.f32.mxu1 %vm631_vm0, %v7580_v35  ;;  %v2572_v61 = vld [vmem:[%s15186_s3 + $0x40] sm:$0xff] }
 0x11b   : > { %9089 = vmatmul.mubr.msk.f32.gmra.mxu0 %vm631_vm0, %v7471_v36  ;;  %9149 = vmatprep.subr.msk.mxu0 %vm2167_vm4, %v11545_v63 }
 0x11c   : > { %9150 = vmatpush3.msk.msra.mxu0 %vm2167_vm4, %v11545_v63  ;;  %9091 = vmatprep.mubr.msk.f32.mxu0 %vm631_vm0, %v7472_v37  ;;  %v11906_v63 = vpop.f32.mrf.mxu1 }
 0x11d   : > { %9151 = vmatprep.subr.msk.mxu0 %vm2167_vm4, %v11566_v3  ;;  %9218 = vmatmul.mubr.msk.f32.gmra.mxu1 %vm631_vm0, %v7581_v38  ;;  %15213 = vst [vmem:[#allocation3_spill] sm:$0xff] %v11906_v63 }
 0x11e   : > { %9152 = vmatpush3.msk.msra.mxu0 %vm2167_vm4, %v11566_v3  ;;  %9220 = vmatprep.mubr.msk.f32.mxu1 %vm631_vm0, %v7582_v39  ;;  %v7546_v3 = vld [vmem:[%s15184_s1 + $0x1b0] sm:$0xff]  ;;  %v11922_v4 = vpop.f32.mrf.mxu1 }
 0x11f   : > { %9092 = vmatmul.mubr.msk.f32.gmra.mxu0 %vm631_vm0, %v7473_v40  ;;  %9153 = vmatprep.subr.msk.mxu0 %vm2167_vm4, %v11581_v5 }
 0x120   : > { %9154 = vmatpush3.msk.msra.mxu0 %vm2167_vm4, %v11581_v5  ;;  %9094 = vmatprep.mubr.msk.f32.mxu0 %vm631_vm0, %v7474_v41  ;;  %v2569_v5 = vld [vmem:[%s15186_s3 + $0x28] sm:$0xff] }
 0x121   : > { %9155 = vmatprep.subr.msk.mxu0 %vm2167_vm4, %v11602_v9  ;;  %9221 = vmatmul.mubr.msk.f32.gmra.mxu1 %vm631_vm0, %v7583_v42 }
 0x122   : > { %9156 = vmatpush3.msk.msra.mxu0 %vm2167_vm4, %v11602_v9  ;;  %9223 = vmatprep.mubr.msk.f32.mxu1 %vm631_vm0, %v7584_v43  ;;  %v11938_v9 = vpop.f32.mrf.mxu1 }
 0x123   : > { %9095 = vmatmul.mubr.msk.f32.gmra.mxu0 %vm631_vm0, %v7475_v44  ;;  %9157 = vmatprep.subr.msk.mxu0 %vm2167_vm4, %v11617_v11  ;;  %15214 = vst [vmem:[#allocation4_spill] sm:$0xff] %v11938_v9 }
 0x124   : > { %9158 = vmatpush3.msk.msra.mxu0 %vm2167_vm4, %v11617_v11  ;;  %9097 = vmatprep.mubr.msk.f32.mxu0 %vm631_vm0, %v7476_v45  ;;  %v7549_v11 = vld [vmem:[%s15184_s1 + $0x1c8] sm:$0xff]  ;;  %v11954_v14 = vpop.f32.mrf.mxu1 }
 0x125   : > { %9159 = vmatprep.subr.msk.mxu0 %vm2167_vm4, %v11638_v15  ;;  %9224 = vmatmul.mubr.msk.f32.gmra.mxu1 %vm631_vm0, %v7585_v46 }
 0x126   : > { %9160 = vmatpush3.msk.msra.mxu0 %vm2167_vm4, %v11638_v15  ;;  %9226 = vmatprep.mubr.msk.f32.mxu1 %vm631_vm0, %v7586_v47  ;;  %v2565_v15 = vld [vmem:[%s15186_s3 + $0x8] sm:$0xff]  ;;  %v11967_v18 = vpop.f32.mrf.mxu1 }
 0x127   : > { %9098 = vmatmul.mubr.msk.f32.gmra.mxu0 %vm631_vm0, %v7477_v48  ;;  %9161 = vmatprep.subr.msk.mxu0 %vm2167_vm4, %v11653_v17  ;;  %15215 = vst [vmem:[#allocation5_spill] sm:$0xff] %v11967_v18 }
 0x128   : > { %9162 = vmatpush3.msk.msra.mxu0 %vm2167_vm4, %v11653_v17  ;;  %9100 = vmatprep.mubr.msk.f32.mxu0 %vm631_vm0, %v7478_v49  ;;  %v2564_v17 = vld [vmem:[%s15186_s3] sm:$0xff]  ;;  %v11970_v19 = vpop.f32.mrf.mxu1 }
 0x129   : > { %9163 = vmatprep.subr.msk.mxu0 %vm2167_vm4, %v11674_v21  ;;  %9227 = vmatmul.mubr.msk.f32.gmra.mxu1 %vm631_vm0, %v7587_v50 }
 0x12a   : > { %9164 = vmatpush3.msk.msra.mxu0 %vm2167_vm4, %v11674_v21  ;;  %10169 = vset.pattern.permute.xlu1 %v10686_v53  ;;  %v11972_v20 = vpop.f32.mrf.mxu1 }
 0x12b   : > { %9101 = vmatmul.mubr.msk.f32.gmra.mxu0 %vm631_vm0, %v7479_v51  ;;  %9165 = vmatprep.subr.msk.mxu0 %vm2167_vm4, %v11689_v23 }
 0x12c   : > { %9166 = vmatpush3.msk.msra.mxu0 %vm2167_vm4, %v11689_v23  ;;  %9169 = vmatprep.mubr.msk.f32.mxu0 %vm631_vm0, %v7540_v52  ;;  %v11974_v21 = vpop.f32.mrf.mxu1 }
 0x12d   : > { %9167 = vmatprep.subr.msk.mxu0 %vm2167_vm4, %v11710_v27  ;;  %2628 = vperm.xlu1 %10169, %v2574_v54  }
 0x12e   : > { %9168 = vmatpush3.msk.msra.mxu0 %vm2167_vm4, %v11710_v27  ;;  %10168 = vset.pattern.permute.xlu0 %v10686_v53  ;;  %v11976_v22 = vpop.f32.mrf.mxu1 }
 0x12f   : > { %9170 = vmatmul.mubr.msk.f32.vlgmr.msra.gmra.mxu0 %vm631_vm0, %v7541_v55  ;;  %2633 = vperm.xlu0 %10168, %v2575_v56  }
 0x130   : > { %9172 = vmatprep.mubr.msk.f32.mxu0 %vm631_vm0, %v7542_v57  ;;  %v11978_v23 = vpop.f32.mrf.mxu1 }
 0x131   : > { %2623 = vperm.xlu1 %10169, %v2573_v59  }
 0x132   : > { %v11980_v24 = vpop.f32.mrf.mxu1 }
 0x133   : > { %9173 = vmatmul.mubr.msk.f32.gmra.mxu0 %vm631_vm0, %v7543_v60  ;;  %2618 = vperm.xlu0 %10168, %v2572_v61  }
 0x134   : > { %9175 = vmatprep.mubr.msk.f32.mxu0 %vm631_vm0, %v7544_v62  ;;  %v8961_v25 = vpop.f32.mrf.mxu1 }
 0x135   : > { %2613 = vperm.xlu1 %10169, %v2571_v0  }
 0x136   : > { %v11982_v26 = vpop.f32.mrf.mxu1 }
 0x137   : > { %9176 = vmatmul.mubr.msk.f32.gmra.mxu0 %vm631_vm0, %v7545_v1  ;;  %2608 = vperm.xlu0 %10168, %v2570_v2   ;;  %15216 = vst [vmem:[#allocation6_spill] sm:$0xff] %v11982_v26 }
 0x138   : > { %9178 = vmatprep.mubr.msk.f32.mxu0 %vm631_vm0, %v7546_v3  ;;  %v8964_v27 = vpop.f32.mrf.mxu1 }
 0x139   : > { %2603 = vperm.xlu1 %10169, %v2569_v5  }
 0x13a   : > { %v11984_v28 = vpop.f32.mrf.mxu1 }
 0x13b   : > { %9179 = vmatmul.mubr.msk.f32.gmra.mxu0 %vm631_vm0, %v7547_v6  ;;  %2598 = vperm.xlu0 %10168, %v2568_v7   ;;  %15217 = vst [vmem:[#allocation7_spill] sm:$0xff] %v11984_v28 }
 0x13c   : > { %9181 = vmatprep.mubr.msk.f32.mxu0 %vm631_vm0, %v7548_v8  ;;  %v8967_v29 = vpop.f32.mrf.mxu1 }
 0x13d   : > { %2593 = vperm.xlu1 %10169, %v2567_v10  }
 0x13e   : > { %v11986_v31 = vpop.f32.mrf.mxu1 }
 0x13f   : > { %9182 = vmatmul.mubr.msk.f32.gmra.mxu0 %vm631_vm0, %v7549_v11  ;;  %2588 = vperm.xlu0 %10168, %v2566_v12   ;;  %15218 = vst [vmem:[#allocation8_spill] sm:$0xff] %v11986_v31 }
 0x140   : > { %9184 = vmatprep.mubr.msk.f32.mxu0 %vm631_vm0, %v7550_v13  ;;  %v11990_v33 = vpop.f32.mrf.mxu1 }
 0x141   : > { %2583 = vperm.xlu1 %10169, %v2565_v15  }
 0x142   : > { %v11994_v36 = vpop.f32.mrf.mxu1 }
 0x143   : > { %9185 = vmatmul.mubr.msk.f32.gmra.mxu0 %vm631_vm0, %v7551_v16  ;;  %2578 = vperm.xlu0 %10168, %v2564_v17  }
 0x144   : > { %v11998_v39 = vpop.f32.mrf.mxu1 }
 0x146   : > { %v12002_v41 = vpop.f32.mrf.mxu1 }
 0x148   : > { %v12008_v44 = vpop.f32.mrf.mxu1 }
 0x14a   : > { %v12012_v46 = vpop.f32.mrf.mxu1 }
 0x171   : > { %v8835_v30 = vpop.f32.mrf.mxu0 }
 0x173   : > { %v11988_v32 = vpop.f32.mrf.mxu0 }
 0x174   : > { %15219 = vst [vmem:[#allocation9_spill] sm:$0xff] %v11988_v32 }
 0x176   : > { %v8838_v34 = vpop.f32.mrf.mxu0 }
 0x178   : > { %v11992_v35 = vpop.f32.mrf.mxu0 }
 0x179   : > { %15220 = vst [vmem:[#allocation10_spill] sm:$0xff] %v11992_v35 }
 0x17b   : > { %v8841_v37 = vpop.f32.mrf.mxu0 }
 0x17d   : > { %v11996_v38 = vpop.f32.mrf.mxu0 }
 0x17e   : > { %15221 = vst [vmem:[#allocation11_spill] sm:$0xff] %v11996_v38 }
 0x180   : > { %v12000_v40 = vpop.f32.mrf.mxu0 }
 0x182   : > { %v12004_v42 = vpop.f32.mrf.mxu0 }
 0x185   : > { %v12006_v43 = vpop.f32.mrf.mxu0 }
 0x187   : > { %v12010_v45 = vpop.f32.mrf.mxu0 }
 0x18a   : > { %v12014_v47 = vpop.f32.mrf.mxu0 }
 0x18c   : > { %v12016_v48 = vpop.f32.mrf.mxu0 }
 0x18d   : > { %v9045_v49 = vpop.f32.mrf.mxu1 }
 0x18f   : > { %v8919_v50 = vpop.f32.mrf.mxu0  ;;  %v12018_v51 = vpop.f32.mrf.mxu1 }
 0x190   : > { %15222 = vst [vmem:[#allocation12_spill] sm:$0xff] %v12018_v51  ;;  %v1236_v52 = vadd.f32 %v8961_v25, %v8919_v50 }
 0x191   : > { %v12020_v53 = vpop.f32.mrf.mxu0 }
 0x192   : > { %15223 = vst [vmem:[#allocation13_spill] sm:$0xff] %v12020_v53  ;;  %v12022_v54 = vadd.f32 %v9045_v49, %v1236_v52  ;;  %v901_v49 = vadd.f32 %v11888_v58, %v8835_v30  ;;  %v921_v53 = vadd.f32 %v11954_v14, %v8841_v37 }
 0x193   : > { %v9048_v55 = vpop.f32.mrf.mxu1 }
 0x195   : > { %v8922_v56 = vpop.f32.mrf.mxu0  ;;  %v12024_v57 = vpop.f32.mrf.mxu1 }
 0x196   : > { %15224 = vst [vmem:[#allocation14_spill] sm:$0xff] %v12024_v57  ;;  %v1246_v59 = vadd.f32 %v8964_v27, %v8922_v56 }
 0x197   : > { %v12026_v60 = vpop.f32.mrf.mxu0 }
 0x198   : > { %15225 = vst [vmem:[#allocation15_spill] sm:$0xff] %v12026_v60  ;;  %v12028_v61 = vadd.f32 %v9048_v55, %v1246_v59 }
 0x199   : > { %v9051_v62 = vpop.f32.mrf.mxu1 }
 0x19b   : > { %v8925_v0 = vpop.f32.mrf.mxu0  ;;  %v12030_v1 = vpop.f32.mrf.mxu1 }
 0x19c   : > { %15226 = vst [vmem:[#allocation16_spill] sm:$0xff] %v12030_v1  ;;  %v1256_v2 = vadd.f32 %v8967_v29, %v8925_v0 }
 0x19d   : > { %v12032_v3 = vpop.f32.mrf.mxu0 }
 0x19e   : > { %15227 = vst [vmem:[#allocation17_spill] sm:$0xff] %v12032_v3  ;;  %v12034_v5 = vadd.f32 %v9051_v62, %v1256_v2  ;;  %v911_v62 = vadd.f32 %v11922_v4, %v8838_v34 }
 0x19f   : > { %v12036_v6 = vpop.f32.mrf.mxu1 }
 0x1a1   : > { %v12038_v7 = vpop.f32.mrf.mxu0  ;;  %v12040_v8 = vpop.f32.mrf.mxu1 }
 0x1a2   : > { %15228 = vst [vmem:[#allocation18_spill] sm:$0xff] %v12040_v8 }
 0x1a3   : > { %v12042_v10 = vpop.f32.mrf.mxu0 }
 0x1a5   : > { %v12044_v11 = vpop.f32.mrf.mxu1 }
 0x1a7   : > { %v12046_v12 = vpop.f32.mrf.mxu0  ;;  %v12048_v13 = vpop.f32.mrf.mxu1 }
 0x1a9   : > { %v12050_v15 = vpop.f32.mrf.mxu0 }
 0x1ab   : > { %v12052_v16 = vpop.f32.mrf.mxu1 }
 0x1ad   : > { %v12054_v17 = vpop.f32.mrf.mxu0  ;;  %v12056_v25 = vpop.f32.mrf.mxu1 }
 0x1ae   : > { %15229 = vst [vmem:[#allocation19_spill] sm:$0xff] %v12056_v25 }
 0x1af   : > { %v12058_v27 = vpop.f32.mrf.mxu0 }
 0x1b1   : > { %v9129_v29 = vpop.f32.mrf.mxu1 }
 0x1b3   : > { %v9003_v50 = vpop.f32.mrf.mxu0  ;;  %v12061_v52 = vpop.f32.mrf.mxu1 }
 0x1b4   : > { %15230 = vst [vmem:[#allocation20_spill] sm:$0xff] %v12061_v52  ;;  %v1513_v55 = vadd.f32 %v9003_v50, %v901_v49 }
 0x1b5   : > { %v12063_v56 = vpop.f32.mrf.mxu0 }
 0x1b6   : > { %15231 = vst [vmem:[#allocation21_spill] sm:$0xff] %v12063_v56 }
 0x1b7   : > { %v9132_v59 = vpop.f32.mrf.mxu1 }
 0x1b8   : > { %v2122_v25 = vadd.f32 %v9132_v59, %v12028_v61  ;;  %v12145_v59 = vpop.permute.xlu1 %2628 }
 0x1b9   : > { %v9006_v0 = vpop.f32.mrf.mxu0  ;;  %v12066_v2 = vpop.f32.mrf.mxu1 }
 0x1ba   : > { %15232 = vst [vmem:[#allocation22_spill] sm:$0xff] %v12066_v2  ;;  %v1515_v51 = vadd.f32 %v9006_v0, %v911_v62 }
 0x1bb   : > { %v12068_v57 = vpop.f32.mrf.mxu0 }
 0x1bc   : > { %15233 = vst [vmem:[#allocation23_spill] sm:$0xff] %v12068_v57 }
 0x1bd   : > { %v9135_v26 = vpop.f32.mrf.mxu1 }
 0x1bf   : > { %v9009_v63 = vpop.f32.mrf.mxu0  ;;  %v12071_v58 = vpop.f32.mrf.mxu1 }
 0x1c0   : > { %15234 = vst [vmem:[#allocation24_spill] sm:$0xff] %v12071_v58  ;;  %v1517_v30 = vadd.f32 %v9009_v63, %v921_v53 }
 0x1c1   : > { %v12073_v52 = vpop.f32.mrf.mxu0 }
 0x1c2   : > { %15235 = vst [vmem:[#allocation25_spill] sm:$0xff] %v12073_v52 }
 0x1c3   : > { %v9138_v49 = vpop.f32.mrf.mxu1 }
 0x1c5   : > { %v9012_v50 = vpop.f32.mrf.mxu0  ;;  %v12075_v56 = vpop.f32.mrf.mxu1 }
 0x1c6   : > { %15236 = vst [vmem:[#allocation26_spill] sm:$0xff] %v12075_v56 }
 0x1c7   : > { %v12077_v4 = vpop.f32.mrf.mxu0 }
 0x1c8   : > { %15237 = vst [vmem:[#allocation27_spill] sm:$0xff] %v12077_v4 }
 0x1c9   : > { %v12079_v34 = vpop.f32.mrf.mxu1 }
 0x1cb   : > { %v12081_v62 = vpop.f32.mrf.mxu0  ;;  %v12083_v0 = vpop.f32.mrf.mxu1 }
 0x1cc   : > { %15238 = vst [vmem:[#allocation28_spill] sm:$0xff] %v12083_v0 }
 0x1cd   : > { %v12085_v2 = vpop.f32.mrf.mxu0 }
 0x1cf   : > { %v12087_v14 = vpop.f32.mrf.mxu1 }
 0x1d1   : > { %v12089_v37 = vpop.f32.mrf.mxu0  ;;  %v12091_v63 = vpop.f32.mrf.mxu1 }
 0x1d2   : > { %15239 = vst [vmem:[#allocation29_spill] sm:$0xff] %v12091_v63 }
 0x1d3   : > { %v12093_v53 = vpop.f32.mrf.mxu0 }
 0x1d4   : > { %15240 = vst [vmem:[#allocation30_spill] sm:$0xff] %v12093_v53 }
 0x1d5   : > { %v9213_v32 = vpop.f32.mrf.mxu1 }
 0x1d7   : > { %v9087_v58 = vpop.f32.mrf.mxu0  ;;  %v12097_v1 = vpop.f32.mrf.mxu1 }
 0x1d8   : > { %15242 = vst [vmem:[#allocation32_spill] sm:$0xff] %v12097_v1  ;;  %v1934_v0 = vadd.f32 %v9087_v58, %v1513_v55  ;;  %v931_v55 = vadd.f32 %v11970_v19, %v12000_v40  ;;  %v12153_v40 = vpop.permute.xlu0 %2633 }
 0x1d9   : > { %v12095_v57 = vpop.f32.mrf.mxu0  ;;  %v9216_v9 = vpop.f32.mrf.mxu1 }
 0x1da   : > { %15241 = vst [vmem:[#allocation31_spill] sm:$0xff] %v12095_v57 }
 0x1db   : > { %v9090_v28 = vpop.f32.mrf.mxu0  ;;  %v12103_v52 = vpop.f32.mrf.mxu1 }
 0x1dc   : > { %15245 = vst [vmem:[#allocation35_spill] sm:$0xff] %v12103_v52 }
 0x1dd   : > { %v12099_v60 = vpop.f32.mrf.mxu0  ;;  %v9219_v3 = vpop.f32.mrf.mxu1 }
 0x1de   : > { %15243 = vst [vmem:[#allocation33_spill] sm:$0xff] %v12099_v60  ;;  %v2120_v60 = vadd.f32 %v9129_v29, %v12022_v54  ;;  %v12129_v29 = vadd.f32 %v9216_v9, %v2122_v25  ;;  %v1276_v9 = vadd.f32 %v11998_v39, %v12046_v12  ;;  %v1286_v39 = vadd.f32 %v12008_v44, %v12054_v17 }
 0x1df   : > { %v9093_v35 = vpop.f32.mrf.mxu0  ;;  %v12109_v63 = vpop.f32.mrf.mxu1  ;;  %v951_v17 = vadd.f32 %v11978_v23, %v12014_v47 }
 0x1e0   : > { %15248 = vst [vmem:[#allocation38_spill] sm:$0xff] %v12109_v63  ;;  %v12116_v53 = vadd.f32 %v9213_v32, %v2120_v60  ;;  %v1707_v12 = vadd.f32 %v12044_v11, %v1276_v9 }
 0x1e1   : > { %v12101_v56 = vpop.f32.mrf.mxu0  ;;  %v9222_v4 = vpop.f32.mrf.mxu1  ;;  %v1523_v23 = vadd.f32 %v12089_v37, %v951_v17  ;;  %v15262_v17 = vld [vmem:[#allocation8_spill] sm:$0xff] }
 0x1e2   : > { %15244 = vst [vmem:[#allocation34_spill] sm:$0xff] %v12101_v56  ;;  %v2128_v11 = vadd.f32 %v12079_v34, %v1707_v12 }
 0x1e3   : > { %v9096_v8 = vpop.f32.mrf.mxu0 }
 0x1e5   : > { %v12105_v31 = vpop.f32.mrf.mxu0 }
 0x1e6   : > { %15246 = vst [vmem:[#allocation36_spill] sm:$0xff] %v12105_v31 }
 0x1e7   : > { %v9099_v18 = vpop.f32.mrf.mxu0 }
 0x1e9   : > { %v12107_v38 = vpop.f32.mrf.mxu0 }
 0x1ea   : > { %15247 = vst [vmem:[#allocation37_spill] sm:$0xff] %v12107_v38  ;;  %v1936_v38 = vadd.f32 %v9090_v28, %v1515_v51  ;;  %v2124_v28 = vadd.f32 %v9135_v26, %v12034_v5  ;;  %v1938_v51 = vadd.f32 %v9093_v35, %v1517_v30  ;;  %v941_v26 = vadd.f32 %v11974_v21, %v12006_v43 }
 0x1eb   : > { %v12111_v57 = vpop.f32.mrf.mxu0  ;;  %v936_v21 = vadd.f32 %v11976_v22, %v12010_v45  ;;  %v1271_v43 = vadd.f32 %v12002_v41, %v12050_v15  ;;  %v926_v22 = vadd.f32 %v11972_v20, %v12004_v42  ;;  %v946_v41 = vadd.f32 %v11980_v24, %v12016_v48  ;;  %v15251_v42 = vld [vmem:[#allocation19_spill] sm:$0xff]  ;;  %v2619_v24 = vpop.permute.xlu0 %2618 }
 0x1ec   : > { %15249 = vst [vmem:[#allocation39_spill] sm:$0xff] %v12111_v57  ;;  %v12127_v57 = vpop.f32.mrf.mxu1  ;;  %v12143_v25 = vadd.f32 %v9219_v3, %v2124_v28  ;;  %v1521_v30 = vadd.f32 %v12081_v62, %v941_v26  ;;  %v1709_v45 = vadd.f32 %v12052_v16, %v1286_v39  ;;  %v15252_v16 = vld [vmem:[#allocation30_spill] sm:$0xff] }
 0x1ed   : > { %v12113_v1 = vpop.f32.mrf.mxu0  ;;  %v1522_v28 = vadd.f32 %v15252_v16, %v946_v41 }
 0x1ee   : > { %15250 = vst [vmem:[#allocation40_spill] sm:$0xff] %v12113_v1  ;;  %v1266_v1 = vadd.f32 %v11990_v33, %v12038_v7  ;;  %v9225_v7 = vpop.f32.mrf.mxu1  ;;  %v2130_v20 = vadd.f32 %v12087_v14, %v1709_v45 }
 0x1ef   : > { %v9171_v56 = vpop.f32.mrf.mxu0  ;;  %v2549_v47 = vadd.f32 %v9225_v7, %v2128_v11  ;;  %v15255_v7 = vld [vmem:[#allocation27_spill] sm:$0xff] }
 0x1f0   : > { %v12118_v52 = vadd.f32 %v9171_v56, %v1934_v0  ;;  %v1705_v33 = vadd.f32 %v12036_v6, %v1266_v1  ;;  %v2521_v3 = vpop.f32.mrf.mxu1  ;;  %v1518_v9 = vadd.f32 %v15255_v7, %v926_v22  ;;  %v15264_v22 = vld [vmem:[#allocation36_spill] sm:$0xff]  ;;  %v15269_v7 = vld [vmem:[#allocation15_spill] sm:$0xff] }
 0x1f1   : > { %v12120_v31 = vpop.f32.mrf.mxu0 }
 0x1f2   : > { %v2553_v63 = vmax.f32 %v12118_v52, %v12116_v53  ;;  %v2126_v35 = vadd.f32 %v9138_v49, %v1705_v33  ;;  %v2624_v49 = vpop.permute.xlu1 %2623  ;;  %v1939_v45 = vadd.f32 %v15264_v22, %v1518_v9  ;;  %v15270_v9 = vld [vmem:[#allocation7_spill] sm:$0xff] }
 0x1f3   : > { %v9174_v54 = vpop.f32.mrf.mxu0 }
 0x1f4   : > { %v12131_v32 = vadd.f32 %v9174_v54, %v1936_v38  ;;  %v1519_v38 = vadd.f32 %v9012_v50, %v931_v55  ;;  %v12161_v50 = vadd.f32 %v9222_v4, %v2126_v35  ;;  %v1942_v4 = vadd.f32 %v9099_v18, %v1521_v30  ;;  %v15259_v30 = vld [vmem:[#allocation11_spill] sm:$0xff] }
 0x1f5   : > { %v12133_v60 = vpop.f32.mrf.mxu0  ;;  %v1261_v18 = vadd.f32 %v11994_v36, %v12042_v10  ;;  %v1706_v54 = vadd.f32 %v12048_v13, %v1271_v43  ;;  %v15257_v36 = vld [vmem:[#allocation29_spill] sm:$0xff] }
 0x1f6   : > { %v2555_v61 = vmax.f32 %v12131_v32, %v12129_v29  ;;  %v1940_v1 = vadd.f32 %v9096_v8, %v1519_v38  ;;  %v1281_v8 = vadd.f32 %v12012_v46, %v12058_v27  ;;  %v9228_v46 = vpop.f32.mrf.mxu1  ;;  %v1520_v27 = vadd.f32 %v12085_v2, %v936_v21  ;;  %v15254_v2 = vld [vmem:[#allocation39_spill] sm:$0xff]  ;;  %v15256_v38 = vld [vmem:[#allocation28_spill] sm:$0xff]  ;;  %v15260_v21 = vld [vmem:[#allocation5_spill] sm:$0xff] }
 0x1f7   : > { %v9177_v56 = vpop.f32.mrf.mxu0  ;;  %v2127_v26 = vadd.f32 %v15256_v38, %v1706_v54  ;;  %v2551_v14 = vadd.f32 %v9228_v46, %v2130_v20  ;;  %v916_v43 = vadd.f32 %v15260_v21, %v15259_v30  ;;  %v15265_v54 = vld [vmem:[#allocation25_spill] sm:$0xff]  ;;  %v15271_v38 = vld [vmem:[#allocation16_spill] sm:$0xff] }
 0x1f8   : > { %v12147_v58 = vadd.f32 %v9177_v56, %v1938_v51  ;;  %v1708_v55 = vadd.f32 %v15251_v42, %v1281_v8  ;;  %v15253_v51 = vld [vmem:[#allocation37_spill] sm:$0xff]  ;;  %v1944_v56 = vadd.f32 %v15254_v2, %v1523_v23  ;;  %v2531_v13 = vpop.f32.mrf.mxu1  ;;  %v15266_v42 = vld [vmem:[#allocation26_spill] sm:$0xff]  ;;  %v15268_v2 = vld [vmem:[#allocation4_spill] sm:$0xff] }
 0x1f9   : > { %v12149_v19 = vpop.f32.mrf.mxu0  ;;  %v1941_v33 = vadd.f32 %v15253_v51, %v1520_v27  ;;  %v15261_v8 = vld [vmem:[#allocation17_spill] sm:$0xff]  ;;  %v2548_v23 = vadd.f32 %v2521_v3, %v2127_v26  ;;  %v1516_v20 = vadd.f32 %v15265_v54, %v916_v43  ;;  %v1241_v3 = vadd.f32 %v15270_v9, %v15269_v7  ;;  %v15283_v54 = vld [vmem:[#allocation22_spill] sm:$0xff]  ;;  %v15287_v7 = vld [vmem:[#allocation20_spill] sm:$0xff] }
 0x1fa   : > { %v2557_v5 = vmax.f32 %v12147_v58, %v12143_v25  ;;  %v2129_v10 = vadd.f32 %v15257_v36, %v1708_v55  ;;  %v1251_v11 = vadd.f32 %v15262_v17, %v15261_v8  ;;  %v15272_v36 = vld [vmem:[#allocation34_spill] sm:$0xff]  ;;  %v15276_v8 = vld [vmem:[#allocation3_spill] sm:$0xff] }
 0x1fb   : > { %v9180_v6 = vpop.f32.mrf.mxu0  ;;  %v15278_v17 = vld [vmem:[#allocation6_spill] sm:$0xff] }
 0x1fc   : > { %v12163_v0 = vadd.f32 %v9180_v6, %v1940_v1  ;;  %v15258_v1 = vld [vmem:[#allocation40_spill] sm:$0xff]  ;;  %v1702_v26 = vadd.f32 %v15271_v38, %v1251_v11 }
 0x1fd   : > { %v2325_v44 = vpop.f32.mrf.mxu0  ;;  %v1943_v39 = vadd.f32 %v15258_v1, %v1522_v28 }
 0x1fe   : > { %v2559_v62 = vmax.f32 %v12163_v0, %v12161_v50  ;;  %v2360_v16 = vadd.f32 %v2325_v44, %v1939_v45  ;;  %v15280_v45 = vld [vmem:[#allocation33_spill] sm:$0xff]  ;;  %v15286_v0 = vld [vmem:[#allocation35_spill] sm:$0xff] }
 0x1ff   : > { %v9183_v15 = vpop.f32.mrf.mxu0 }
 0x200   : > { %v2363_v34 = vadd.f32 %v9183_v15, %v1942_v4  ;;  %v15263_v4 = vld [vmem:[#allocation18_spill] sm:$0xff]  ;;  %v2614_v15 = vpop.permute.xlu1 %2613 }
 0x201   : > { %v2335_v48 = vpop.f32.mrf.mxu0  ;;  %v1704_v41 = vadd.f32 %v15263_v4, %v1261_v18  ;;  %v15267_v18 = vld [vmem:[#allocation10_spill] sm:$0xff] }
 0x202   : > { %v2561_v37 = vmax.f32 %v2363_v34, %v2549_v47  ;;  %v2362_v6 = vadd.f32 %v2335_v48, %v1941_v33  ;;  %v2550_v47 = vadd.f32 %v2531_v13, %v2129_v10  ;;  %v2609_v48 = vpop.permute.xlu0 %2608  ;;  %v1937_v10 = vadd.f32 %v15272_v36, %v1516_v20  ;;  %v15279_v4 = vld [vmem:[#allocation14_spill] sm:$0xff] }
 0x203   : > { %v9186_v35 = vpop.f32.mrf.mxu0  ;;  %v2125_v55 = vadd.f32 %v15266_v42, %v1704_v41  ;;  %v1700_v41 = vadd.f32 %v15279_v4, %v1241_v3 }
 0x204   : > { %v2365_v12 = vadd.f32 %v9186_v35, %v1944_v56  ;;  %v2560_v28 = vmax.f32 %v2362_v6, %v2548_v23  ;;  %v906_v56 = vadd.f32 %v15268_v2, %v15267_v18  ;;  %v2358_v30 = vadd.f32 %v12149_v19, %v1937_v10  ;;  %v15288_v10 = vld [vmem:[#allocation32_spill] sm:$0xff] }
 0x205   : > { %v2345_v27 = vpop.f32.mrf.mxu0  ;;  %v2546_v13 = vadd.f32 %v12127_v57, %v2125_v55  ;;  %v2121_v20 = vadd.f32 %v15283_v54, %v1700_v41 }
 0x206   : > { %v2563_v34 = vmax.f32 %v2365_v12, %v2551_v14  ;;  %v2364_v46 = vadd.f32 %v2345_v27, %v1943_v39  ;;  %v12217_v14 = vadd.f32 %v2624_v49, %v2561_v37  ;;  %v15274_v39 = vld [vmem:[#allocation24_spill] sm:$0xff]  ;;  %v2604_v12 = vpop.permute.xlu1 %2603  ;;  %v12226_v43 = vadd.f32 %v2619_v24, %v2560_v28  ;;  %v15277_v37 = vld [vmem:[#allocation13_spill] sm:$0xff]  ;;  %v2599_v22 = vpop.permute.xlu0 %2598  ;;  %v15281_v27 = vld [vmem:[#allocation38_spill] sm:$0xff] }
 0x207   : > { %v2123_v6 = vadd.f32 %v15274_v39, %v1702_v26  ;;  %v2558_v21 = vmax.f32 %v2360_v16, %v2546_v13  ;;  %v1231_v11 = vadd.f32 %v15278_v17, %v15277_v37  ;;  %v12240_v24 = vadd.f32 %v2614_v15, %v2559_v62 }
 0x208   : > { %v2562_v51 = vmax.f32 %v2364_v46, %v2550_v47  ;;  %v12204_v33 = vadd.f32 %v12153_v40, %v2563_v34  ;;  %v15273_v40 = vld [vmem:[#allocation23_spill] sm:$0xff]  ;;  %v2657_v47 = vmax.f32 %v12217_v14, 0.0  ;;  %v15282_v34 = vld [vmem:[#allocation21_spill] sm:$0xff]  ;;  %v2656_v16 = vmax.f32 %v12226_v43, 0.0 }
 0x209   : > { %v1514_v1 = vadd.f32 %v15273_v40, %v906_v56  ;;  %v2544_v23 = vadd.f32 %v15281_v27, %v2123_v6  ;;  %v12247_v28 = vadd.f32 %v2609_v48, %v2558_v21  ;;  %v15285_v56 = vld [vmem:[#allocation31_spill] sm:$0xff]  ;;  %v2542_v62 = vadd.f32 %v15286_v0, %v2121_v20  ;;  %v2733_v0 = vld [vmem:[%s15187_s4 + $0x8] sm:$0xff] }
 0x20a   : > { %v2659_v35 = vmax.f32 %v12204_v33, 0.0  ;;  %v12215_v44 = vadd.f32 %v12145_v59, %v2562_v51  ;;  %v15275_v59 = vld [vmem:[#allocation9_spill] sm:$0xff]  ;;  %v15284_v51 = vld [vmem:[#allocation12_spill] sm:$0xff]  ;;  %v2594_v2 = vpop.permute.xlu1 %2593  ;;  %v2655_v15 = vmax.f32 %v12240_v24, 0.0  ;;  %v2589_v48 = vpop.permute.xlu0 %2588  ;;  %v7612_v27 = vld [vmem:[%s15187_s4 + $0x80] sm:$0xff] }
 0x20b   : > { %v896_v49 = vadd.f32 %v15276_v8, %v15275_v59  ;;  %v1935_v19 = vadd.f32 %v15280_v45, %v1514_v1  ;;  %v2556_v55 = vmax.f32 %v2358_v30, %v2544_v23  ;;  %v1698_v18 = vadd.f32 %v15284_v51, %v1231_v11  ;;  %v2732_v1 = vld [vmem:[%s15187_s4] sm:$0xff]  ;;  %9253 = vmatprep.mubr.msk.f32.mxu0 %vm631_vm0, %v7612_v27 }
 0x20c   : > { %2694 = vrot.lane.b32.xlu1 %v2659_v35, %s10682_s25  ;;  %v2658_v57 = vmax.f32 %v12215_v44, 0.0  ;;  %v2654_v26 = vmax.f32 %v12247_v28, 0.0  ;;  %v12271_v58 = vadd.f32 %v2594_v2, %v2555_v61  ;;  %9301 = vmatprep.mubr.msk.f32.mxu1 %vm631_vm0, %v2732_v1  ;;  %v2753_v1 = vld [vmem:[%s15188_s5 + $0x28] sm:$0xff] }
 0x20d   : > { %v1512_v46 = vadd.f32 %v15282_v34, %v896_v49  ;;  %v2356_v42 = vadd.f32 %v12133_v60, %v1935_v19  ;;  %v12257_v60 = vadd.f32 %v2604_v12, %v2557_v5  ;;  %v2119_v9 = vadd.f32 %v15287_v7, %v1698_v18  ;;  %v2737_v7 = vld [vmem:[%s15187_s4 + $0x28] sm:$0xff] }
 0x20e   : > { %2692 = vrot.lane.b32.xlu0 %v2658_v57, %s10682_s25  ;;  %v12263_v36 = vadd.f32 %v2599_v22, %v2556_v55  ;;  %v2584_v5 = vpop.permute.xlu1 %2583  ;;  %v2579_v40 = vpop.permute.xlu0 %2578  ;;  %v2651_v29 = vmax.f32 %v12271_v58, 0.0  ;;  %v2747_v58 = vld [vmem:[%s15187_s4 + $0x78] sm:$0xff] }
 0x20f   : > { %v1933_v50 = vadd.f32 %v15285_v56, %v1512_v46  ;;  %v2554_v38 = vmax.f32 %v2356_v42, %v2542_v62  ;;  %v2540_v13 = vadd.f32 %v15288_v10, %v2119_v9  ;;  %v2653_v25 = vmax.f32 %v12257_v60, 0.0  ;;  %v2734_v62 = vld [vmem:[%s15187_s4 + $0x10] sm:$0xff]  ;;  %v2736_v60 = vld [vmem:[%s15187_s4 + $0x20] sm:$0xff] }
 0x210   : > { %2690 = vrot.lane.b32.xlu1 %v2657_v47, %s10682_s25  ;;  %v2652_v44 = vmax.f32 %v12263_v36, 0.0  ;;  %v12283_v39 = vadd.f32 %v2584_v5, %v2553_v63  ;;  %v2738_v9 = vld [vmem:[%s15187_s4 + $0x30] sm:$0xff]  ;;  %v2743_v36 = vld [vmem:[%s15187_s4 + $0x58] sm:$0xff]  ;;  %v2744_v10 = vld [vmem:[%s15187_s4 + $0x60] sm:$0xff] }
 0x211   : > { %v2354_v3 = vadd.f32 %v12120_v31, %v1933_v50  ;;  %v12275_v14 = vadd.f32 %v2589_v48, %v2554_v38  ;;  %v2739_v48 = vld [vmem:[%s15187_s4 + $0x38] sm:$0xff]  ;;  %v2741_v38 = vld [vmem:[%s15187_s4 + $0x48] sm:$0xff]  ;;  %v2748_v5 = vld [vmem:[%s15188_s5] sm:$0xff] }
 0x212   : > { %2688 = vrot.lane.b32.xlu0 %v2656_v16, %s10682_s25  ;;  %v2649_v6 = vmax.f32 %v12283_v39, 0.0  ;;  %v2754_v39 = vld [vmem:[%s15188_s5 + $0x30] sm:$0xff] }
 0x213   : > { %v2552_v31 = vmax.f32 %v2354_v3, %v2540_v13  ;;  %v2650_v61 = vmax.f32 %v12275_v14, 0.0  ;;  %v2740_v3 = vld [vmem:[%s15187_s4 + $0x40] sm:$0xff]  ;;  %v2745_v13 = vld [vmem:[%s15187_s4 + $0x68] sm:$0xff]  ;;  %v2751_v14 = vld [vmem:[%s15188_s5 + $0x18] sm:$0xff] }
 0x214   : > { %2686 = vrot.lane.b32.xlu1 %v2655_v15, %s10682_s25 }
 0x215   : > { %v12288_v32 = vadd.f32 %v2579_v40, %v2552_v31  ;;  %v2749_v31 = vld [vmem:[%s15188_s5 + $0x8] sm:$0xff]  ;;  %v2752_v40 = vld [vmem:[%s15188_s5 + $0x20] sm:$0xff] }
 0x216   : > { %2684 = vrot.lane.b32.xlu0 %v2654_v26, %s10682_s25 }
 0x217   : > { %v2648_v52 = vmax.f32 %v12288_v32, 0.0  ;;  %v2756_v32 = vld [vmem:[%s15188_s5 + $0x40] sm:$0xff] }
 0x218   : > { %2682 = vrot.lane.b32.xlu1 %v2653_v25, %s10682_s25 }
 0x21a   : > { %2680 = vrot.lane.b32.xlu0 %v2652_v44, %s10682_s25 }
 0x21c   : > { %2678 = vrot.lane.b32.xlu1 %v2651_v29, %s10682_s25 }
 0x21e   : > { %2676 = vrot.lane.b32.xlu0 %v2650_v61, %s10682_s25 }
 0x220   : > { %2674 = vrot.lane.b32.xlu1 %v2649_v6, %s10682_s25 }
 0x222   : > { %2672 = vrot.lane.b32.xlu0 %v2648_v52, %s10682_s25  ;;  %s10687_s25 = smov 122  }
 0x27e   : > { %v2695_v63 = vpop.permute.xlu1 %2694 }
 0x27f   : > { %v2719_v53 = vsel %vm605_vm1, %v2695_v63, 0.0  ;;  %v2760_v63 = vld [vmem:[%s15188_s5 + $0x60] sm:$0xff] }
 0x280   : > { %v12304_v12 = vmax.f32 %v2659_v35, %v2719_v53  ;;  %v2693_v30 = vpop.permute.xlu0 %2692  ;;  %v2761_v53 = vld [vmem:[%s15188_s5 + $0x68] sm:$0xff] }
 0x281   : > { %v2718_v21 = vsel %vm605_vm1, %v2693_v30, 0.0  ;;  %v2763_v30 = vld [vmem:[%s15188_s5 + $0x78] sm:$0xff] }
 0x282   : > { %v12307_v43 = vmax.f32 %v2658_v57, %v2718_v21  ;;  %2798 = vrot.lane.b32.xlu1 %v12304_v12, %s10683_s19  ;;  %9277 = vmatprep.subr.mxu1 %v12304_v12  ;;  %v2691_v59 = vpop.permute.xlu1 %2690  ;;  %v7776_v21 = vld [vmem:[%s15188_s5 + $0x100] sm:$0xff] }
 0x283   : > { %v2717_v8 = vsel %vm605_vm1, %v2691_v59, 0.0  ;;  %9278 = vmatpush3.msra.mxu1 %v12304_v12  ;;  %v5149_v59 = vld [vmem:[%s15189_s6 + $0x8] sm:$0xff] }
 0x284   : > { %v12314_v49 = vmax.f32 %v2657_v47, %v2717_v8  ;;  %9279 = vmatprep.subr.mxu1 %v12307_v43  ;;  %v2689_v33 = vpop.permute.xlu0 %2688  ;;  %2796 = vrot.lane.b32.xlu0 %v12307_v43, %s10683_s19  ;;  %v5150_v8 = vld [vmem:[%s15189_s6 + $0x10] sm:$0xff] }
 0x285   : > { %v2716_v35 = vsel %vm605_vm1, %v2689_v33, 0.0  ;;  %9280 = vmatpush3.msra.mxu1 %v12307_v43  ;;  %v5152_v33 = vld [vmem:[%s15189_s6 + $0x20] sm:$0xff] }
 0x286   : > { %v12321_v57 = vmax.f32 %v2656_v16, %v2716_v35  ;;  %2794 = vrot.lane.b32.xlu1 %v12314_v49, %s10683_s19  ;;  %v2687_v37 = vpop.permute.xlu1 %2686  ;;  %9281 = vmatprep.subr.mxu1 %v12314_v49  ;;  %v5153_v35 = vld [vmem:[%s15189_s6 + $0x28] sm:$0xff] }
 0x287   : > { %v2715_v17 = vsel %vm605_vm1, %v2687_v37, 0.0  ;;  %9282 = vmatpush3.msra.mxu1 %v12314_v49  ;;  %v5155_v37 = vld [vmem:[%s15189_s6 + $0x38] sm:$0xff] }
 0x288   : > { %v12328_v11 = vmax.f32 %v2655_v15, %v2715_v17  ;;  %9283 = vmatprep.subr.mxu1 %v12321_v57  ;;  %v2685_v4 = vpop.permute.xlu0 %2684  ;;  %2792 = vrot.lane.b32.xlu0 %v12321_v57, %s10683_s19  ;;  %v2735_v15 = vld [vmem:[%s15187_s4 + $0x18] sm:$0xff]  ;;  %v5156_v17 = vld [vmem:[%s15189_s6 + $0x40] sm:$0xff] }
 0x289   : > { %v2714_v41 = vsel %vm605_vm1, %v2685_v4, 0.0  ;;  %9284 = vmatpush3.msra.mxu1 %v12321_v57  ;;  %v5158_v4 = vld [vmem:[%s15189_s6 + $0x50] sm:$0xff] }
 0x28a   : > { %v12335_v22 = vmax.f32 %v2654_v26, %v2714_v41  ;;  %2790 = vrot.lane.b32.xlu1 %v12328_v11, %s10683_s19  ;;  %v2683_v45 = vpop.permute.xlu1 %2682  ;;  %9285 = vmatprep.subr.mxu1 %v12328_v11  ;;  %v2742_v26 = vld [vmem:[%s15187_s4 + $0x50] sm:$0xff] }
 0x28b   : > { %v2713_v19 = vsel %vm605_vm1, %v2683_v45, 0.0  ;;  %9286 = vmatpush3.msra.mxu1 %v12328_v11 }
 0x28c   : > { %v12345_v23 = vmax.f32 %v2653_v25, %v2713_v19  ;;  %9287 = vmatprep.subr.mxu1 %v12335_v22  ;;  %v2681_v47 = vpop.permute.xlu0 %2680  ;;  %2788 = vrot.lane.b32.xlu0 %v12335_v22, %s10683_s19  ;;  %v2746_v25 = vld [vmem:[%s15187_s4 + $0x70] sm:$0xff]  ;;  %v5160_v19 = vld [vmem:[%s15189_s6 + $0x60] sm:$0xff] }
 0x28d   : > { %v2712_v24 = vsel %vm605_vm1, %v2681_v47, 0.0  ;;  %9288 = vmatpush3.msra.mxu1 %v12335_v22 }
 0x28e   : > { %v12353_v34 = vmax.f32 %v2652_v44, %v2712_v24  ;;  %2786 = vrot.lane.b32.xlu1 %v12345_v23, %s10683_s19  ;;  %v2679_v46 = vpop.permute.xlu1 %2678  ;;  %9289 = vmatprep.subr.mxu1 %v12345_v23  ;;  %v2750_v44 = vld [vmem:[%s15188_s5 + $0x10] sm:$0xff] }
 0x28f   : > { %v2711_v54 = vsel %vm605_vm1, %v2679_v46, 0.0  ;;  %9290 = vmatpush3.msra.mxu1 %v12345_v23  ;;  %v5162_v24 = vld [vmem:[%s15189_s6 + $0x70] sm:$0xff]  ;;  %v5163_v46 = vld [vmem:[%s15189_s6 + $0x78] sm:$0xff] }
 0x290   : > { %v12360_v20 = vmax.f32 %v2651_v29, %v2711_v54  ;;  %9291 = vmatprep.subr.mxu1 %v12353_v34  ;;  %v2677_v42 = vpop.permute.xlu0 %2676  ;;  %2784 = vrot.lane.b32.xlu0 %v12353_v34, %s10683_s19  ;;  %v2755_v29 = vld [vmem:[%s15188_s5 + $0x38] sm:$0xff] }
 0x291   : > { %v2710_v55 = vsel %vm605_vm1, %v2677_v42, 0.0  ;;  %9292 = vmatpush3.msra.mxu1 %v12353_v34 }
 0x292   : > { %v12367_v16 = vmax.f32 %v2650_v61, %v2710_v55  ;;  %2782 = vrot.lane.b32.xlu1 %v12360_v20, %s10683_s19  ;;  %v2675_v28 = vpop.permute.xlu1 %2674  ;;  %9293 = vmatprep.subr.mxu1 %v12360_v20  ;;  %v2757_v61 = vld [vmem:[%s15188_s5 + $0x48] sm:$0xff] }
 0x293   : > { %v2709_v51 = vsel %vm605_vm1, %v2675_v28, 0.0  ;;  %9294 = vmatpush3.msra.mxu1 %v12360_v20 }
 0x294   : > { %v12376_v18 = vmax.f32 %v2649_v6, %v2709_v51  ;;  %9295 = vmatprep.subr.mxu1 %v12367_v16  ;;  %2780 = vrot.lane.b32.xlu0 %v12367_v16, %s10683_s19  ;;  %v2673_v2 = vpop.permute.xlu0 %2672  ;;  %v2758_v6 = vld [vmem:[%s15188_s5 + $0x50] sm:$0xff] }
 0x295   : > { %v2708_v56 = vsel %vm605_vm1, %v2673_v2, 0.0  ;;  %9296 = vmatpush3.msra.mxu1 %v12367_v16 }
 0x296   : > { %v12385_v50 = vmax.f32 %v2648_v52, %v2708_v56  ;;  %2778 = vrot.lane.b32.xlu1 %v12376_v18, %s10683_s19  ;;  %9297 = vmatprep.subr.mxu1 %v12376_v18  ;;  %v2759_v52 = vld [vmem:[%s15188_s5 + $0x58] sm:$0xff]  ;;  %v7614_v56 = vld [vmem:[%s15187_s4 + $0x90] sm:$0xff] }
 0x297   : > { %9298 = vmatpush3.msra.mxu1 %v12376_v18 }
 0x298   : > { %2776 = vrot.lane.b32.xlu0 %v12385_v50, %s10683_s19  ;;  %9299 = vmatprep.subr.mxu1 %v12385_v50 }
 0x299   : > { %9300 = vmatpush3.msra.mxu1 %v12385_v50 }
 0x29a   : > { %3652 = vrot.lane.b32.xlu1 %v12304_v12, %s10685_s18  ;;  %9373 = vmatprep.subr.mxu1 %v12304_v12 }
 0x29b   : > { %9302 = vmatmul.mubr.msk.f32.vlgmr.msra.gmra.mxu1 %vm631_vm0, %v2733_v0  ;;  %v7615_v0 = vld [vmem:[%s15187_s4 + $0x98] sm:$0xff] }
 0x29c   : > { %9374 = vmatpush3.msra.mxu1 %v12304_v12  ;;  %3650 = vrot.lane.b32.xlu0 %v12307_v43, %s10685_s18 }
 0x29d   : > { %9375 = vmatprep.subr.mxu1 %v12307_v43  ;;  %9304 = vmatprep.mubr.msk.f32.mxu1 %vm631_vm0, %v2734_v62 }
 0x29e   : > { %9376 = vmatpush3.msra.mxu1 %v12307_v43  ;;  %3648 = vrot.lane.b32.xlu1 %v12314_v49, %s10685_s18 }
 0x29f   : > { %9377 = vmatprep.subr.mxu1 %v12314_v49  ;;  %9305 = vmatmul.mubr.msk.f32.gmra.mxu1 %vm631_vm0, %v2735_v15 }
 0x2a0   : > { %9378 = vmatpush3.msra.mxu1 %v12314_v49  ;;  %3646 = vrot.lane.b32.xlu0 %v12321_v57, %s10685_s18 }
 0x2a1   : > { %9379 = vmatprep.subr.mxu1 %v12321_v57  ;;  %9307 = vmatprep.mubr.msk.f32.mxu1 %vm631_vm0, %v2736_v60  ;;  %v7616_v60 = vld [vmem:[%s15187_s4 + $0xa0] sm:$0xff] }
 0x2a2   : > { %9380 = vmatpush3.msra.mxu1 %v12321_v57  ;;  %3644 = vrot.lane.b32.xlu1 %v12328_v11, %s10685_s18 }
 0x2a3   : > { %9381 = vmatprep.subr.mxu1 %v12328_v11  ;;  %9308 = vmatmul.mubr.msk.f32.gmra.mxu1 %vm631_vm0, %v2737_v7 }
 0x2a4   : > { %9382 = vmatpush3.msra.mxu1 %v12328_v11  ;;  %3642 = vrot.lane.b32.xlu0 %v12335_v22, %s10685_s18 }
 0x2a5   : > { %9383 = vmatprep.subr.mxu1 %v12335_v22  ;;  %9310 = vmatprep.mubr.msk.f32.mxu1 %vm631_vm0, %v2738_v9  ;;  %v7617_v9 = vld [vmem:[%s15187_s4 + $0xa8] sm:$0xff] }
 0x2a6   : > { %9384 = vmatpush3.msra.mxu1 %v12335_v22  ;;  %3640 = vrot.lane.b32.xlu1 %v12345_v23, %s10685_s18 }
 0x2a7   : > { %9385 = vmatprep.subr.mxu1 %v12345_v23  ;;  %9311 = vmatmul.mubr.msk.f32.gmra.mxu1 %vm631_vm0, %v2739_v48 }
 0x2a8   : > { %9386 = vmatpush3.msra.mxu1 %v12345_v23  ;;  %3638 = vrot.lane.b32.xlu0 %v12353_v34, %s10685_s18 }
 0x2a9   : > { %9387 = vmatprep.subr.mxu1 %v12353_v34  ;;  %9313 = vmatprep.mubr.msk.f32.mxu1 %vm631_vm0, %v2740_v3  ;;  %v7618_v3 = vld [vmem:[%s15187_s4 + $0xb0] sm:$0xff] }
 0x2aa   : > { %9388 = vmatpush3.msra.mxu1 %v12353_v34  ;;  %3636 = vrot.lane.b32.xlu1 %v12360_v20, %s10685_s18 }
 0x2ab   : > { %9389 = vmatprep.subr.mxu1 %v12360_v20  ;;  %9314 = vmatmul.mubr.msk.f32.gmra.mxu1 %vm631_vm0, %v2741_v38 }
 0x2ac   : > { %9390 = vmatpush3.msra.mxu1 %v12360_v20  ;;  %3634 = vrot.lane.b32.xlu0 %v12367_v16, %s10685_s18 }
 0x2ad   : > { %9391 = vmatprep.subr.mxu1 %v12367_v16  ;;  %9316 = vmatprep.mubr.msk.f32.mxu1 %vm631_vm0, %v2742_v26  ;;  %v7619_v26 = vld [vmem:[%s15187_s4 + $0xb8] sm:$0xff] }
 0x2ae   : > { %9392 = vmatpush3.msra.mxu1 %v12367_v16  ;;  %3632 = vrot.lane.b32.xlu1 %v12376_v18, %s10685_s18 }
 0x2af   : > { %9393 = vmatprep.subr.mxu1 %v12376_v18  ;;  %9317 = vmatmul.mubr.msk.f32.gmra.mxu1 %vm631_vm0, %v2743_v36 }
 0x2b0   : > { %9394 = vmatpush3.msra.mxu1 %v12376_v18  ;;  %3630 = vrot.lane.b32.xlu0 %v12385_v50, %s10685_s18 }
 0x2b1   : > { %9395 = vmatprep.subr.mxu1 %v12385_v50  ;;  %9319 = vmatprep.mubr.msk.f32.mxu1 %vm631_vm0, %v2744_v10 }
 0x2b2   : > { %9396 = vmatpush3.msra.mxu1 %v12385_v50  ;;  %4152 = vrot.lane.b32.xlu1 %v12304_v12, %s10687_s25 }
 0x2b3   : > { %9320 = vmatmul.mubr.msk.f32.gmra.mxu1 %vm631_vm0, %v2745_v13  ;;  %v7620_v13 = vld [vmem:[%s15187_s4 + $0xc0] sm:$0xff] }
 0x2b4   : > { %4150 = vrot.lane.b32.xlu0 %v12307_v43, %s10687_s25  ;;  %9322 = vmatprep.mubr.msk.f32.mxu1 %vm631_vm0, %v2746_v25  ;;  %v7621_v25 = vld [vmem:[%s15187_s4 + $0xc8] sm:$0xff] }
 0x2b6   : > { %4148 = vrot.lane.b32.xlu1 %v12314_v49, %s10687_s25 }
 0x2b7   : > { %9323 = vmatmul.mubr.msk.f32.gmra.mxu1 %vm631_vm0, %v2747_v58 }
 0x2b8   : > { %4146 = vrot.lane.b32.xlu0 %v12321_v57, %s10687_s25  ;;  %9397 = vmatprep.mubr.msk.f32.mxu1 %vm631_vm0, %v2748_v5 }
 0x2ba   : > { %4144 = vrot.lane.b32.xlu1 %v12328_v11, %s10687_s25 }
 0x2bb   : > { %9398 = vmatmul.mubr.msk.f32.vlgmr.msra.gmra.mxu1 %vm631_vm0, %v2749_v31  ;;  %v7622_v31 = vld [vmem:[%s15187_s4 + $0xd0] sm:$0xff] }
 0x2bc   : > { %4142 = vrot.lane.b32.xlu0 %v12335_v22, %s10687_s25  ;;  %9400 = vmatprep.mubr.msk.f32.mxu1 %vm631_vm0, %v2750_v44 }
 0x2be   : > { %4140 = vrot.lane.b32.xlu1 %v12345_v23, %s10687_s25 }
 0x2bf   : > { %9401 = vmatmul.mubr.msk.f32.gmra.mxu1 %vm631_vm0, %v2751_v14  ;;  %v7623_v14 = vld [vmem:[%s15187_s4 + $0xd8] sm:$0xff] }
 0x2c0   : > { %4138 = vrot.lane.b32.xlu0 %v12353_v34, %s10687_s25  ;;  %9403 = vmatprep.mubr.msk.f32.mxu1 %vm631_vm0, %v2752_v40 }
 0x2c2   : > { %4136 = vrot.lane.b32.xlu1 %v12360_v20, %s10687_s25 }
 0x2c3   : > { %9404 = vmatmul.mubr.msk.f32.gmra.mxu1 %vm631_vm0, %v2753_v1  ;;  %v7624_v1 = vld [vmem:[%s15187_s4 + $0xe0] sm:$0xff] }
 0x2c4   : > { %4134 = vrot.lane.b32.xlu0 %v12367_v16, %s10687_s25  ;;  %9406 = vmatprep.mubr.msk.f32.mxu1 %vm631_vm0, %v2754_v39  ;;  %v7625_v39 = vld [vmem:[%s15187_s4 + $0xe8] sm:$0xff] }
 0x2c6   : > { %4132 = vrot.lane.b32.xlu1 %v12376_v18, %s10687_s25 }
 0x2c7   : > { %9407 = vmatmul.mubr.msk.f32.gmra.mxu1 %vm631_vm0, %v2755_v29 }
 0x2c8   : > { %4130 = vrot.lane.b32.xlu0 %v12385_v50, %s10687_s25  ;;  %9409 = vmatprep.mubr.msk.f32.mxu1 %vm631_vm0, %v2756_v32  ;;  %v7777_v32 = vld [vmem:[%s15188_s5 + $0x108] sm:$0xff] }
 0x2ca   : > { %4653 = vrot.lane.b32.xlu1 %v12304_v12, %s10688_s16  ;;  %v2762_v12 = vld [vmem:[%s15188_s5 + $0x70] sm:$0xff] }
 0x2cb   : > { %9410 = vmatmul.mubr.msk.f32.gmra.mxu1 %vm631_vm0, %v2757_v61  ;;  %v7626_v61 = vld [vmem:[%s15187_s4 + $0xf0] sm:$0xff] }
 0x2cc   : > { %4651 = vrot.lane.b32.xlu0 %v12307_v43, %s10688_s16  ;;  %9412 = vmatprep.mubr.msk.f32.mxu1 %vm631_vm0, %v2758_v6  ;;  %v5148_v43 = vld [vmem:[%s15189_s6] sm:$0xff]  ;;  %v7778_v6 = vld [vmem:[%s15188_s5 + $0x110] sm:$0xff] }
 0x2ce   : > { %4649 = vrot.lane.b32.xlu1 %v12314_v49, %s10688_s16  ;;  %v5151_v49 = vld [vmem:[%s15189_s6 + $0x18] sm:$0xff] }
 0x2cf   : > { %9413 = vmatmul.mubr.msk.f32.gmra.mxu1 %vm631_vm0, %v2759_v52 }
 0x2d0   : > { %4647 = vrot.lane.b32.xlu0 %v12321_v57, %s10688_s16  ;;  %9415 = vmatprep.mubr.msk.f32.mxu1 %vm631_vm0, %v2760_v63  ;;  %v5154_v57 = vld [vmem:[%s15189_s6 + $0x30] sm:$0xff]  ;;  %v7627_v63 = vld [vmem:[%s15187_s4 + $0xf8] sm:$0xff] }
 0x2d2   : > { %4645 = vrot.lane.b32.xlu1 %v12328_v11, %s10688_s16  ;;  %v5157_v11 = vld [vmem:[%s15189_s6 + $0x48] sm:$0xff] }
 0x2d3   : > { %9416 = vmatmul.mubr.msk.f32.gmra.mxu1 %vm631_vm0, %v2761_v53  ;;  %v7779_v53 = vld [vmem:[%s15188_s5 + $0x118] sm:$0xff] }
 0x2d4   : > { %4643 = vrot.lane.b32.xlu0 %v12335_v22, %s10688_s16  ;;  %9418 = vmatprep.mubr.msk.f32.mxu1 %vm631_vm0, %v2762_v12  ;;  %v5159_v22 = vld [vmem:[%s15189_s6 + $0x58] sm:$0xff] }
 0x2d6   : > { %4641 = vrot.lane.b32.xlu1 %v12345_v23, %s10688_s16  ;;  %v5161_v23 = vld [vmem:[%s15189_s6 + $0x68] sm:$0xff] }
 0x2d7   : > { %9419 = vmatmul.mubr.msk.f32.gmra.mxu1 %vm631_vm0, %v2763_v30  ;;  %v7672_v30 = vld [vmem:[%s15188_s5 + $0x80] sm:$0xff] }
 0x2d8   : > { %4639 = vrot.lane.b32.xlu0 %v12353_v34, %s10688_s16  ;;  %9493 = vmatprep.mubr.msk.f32.mxu1 %vm631_vm0, %v7776_v21  ;;  %v7780_v21 = vld [vmem:[%s15188_s5 + $0x120] sm:$0xff] }
 0x2da   : > { %4637 = vrot.lane.b32.xlu1 %v12360_v20, %s10688_s16 }
 0x2dc   : > { %4635 = vrot.lane.b32.xlu0 %v12367_v16, %s10688_s16 }
 0x2de   : > { %4633 = vrot.lane.b32.xlu1 %v12376_v18, %s10688_s16  ;;  %v7613_v18 = vld [vmem:[%s15187_s4 + $0x88] sm:$0xff] }
 0x2e0   : > { %4631 = vrot.lane.b32.xlu0 %v12385_v50, %s10688_s16 }
 0x2e2   : > { %5166 = vperm.xlu1 %10169, %v5148_v43   ;;  %v7673_v43 = vld [vmem:[%s15188_s5 + $0x88] sm:$0xff] }
 0x2e4   : > { %5171 = vperm.xlu0 %10168, %v5149_v59   ;;  %v7781_v59 = vld [vmem:[%s15188_s5 + $0x128] sm:$0xff] }
 0x2e6   : > { %5176 = vperm.xlu1 %10169, %v5150_v8  }
 0x2e8   : > { %5181 = vperm.xlu0 %10168, %v5151_v49  }
 0x2ea   : > { %5186 = vperm.xlu1 %10169, %v5152_v33   ;;  %v7674_v33 = vld [vmem:[%s15188_s5 + $0x90] sm:$0xff] }
 0x2ec   : > { %5191 = vperm.xlu0 %10168, %v5153_v35   ;;  %v7782_v35 = vld [vmem:[%s15188_s5 + $0x130] sm:$0xff] }
 0x2ee   : > { %5196 = vperm.xlu1 %10169, %v5154_v57   ;;  %v7675_v57 = vld [vmem:[%s15188_s5 + $0x98] sm:$0xff] }
 0x2f0   : > { %5201 = vperm.xlu0 %10168, %v5155_v37   ;;  %v7783_v37 = vld [vmem:[%s15188_s5 + $0x138] sm:$0xff] }
 0x2f2   : > { %5206 = vperm.xlu1 %10169, %v5156_v17  }
 0x2f4   : > { %v2799_v41 = vpop.permute.xlu1 %2798  ;;  %5211 = vperm.xlu0 %10168, %v5157_v11  }
 0x2f5   : > { %9229 = vmatprep.subr.msk.mxu0 %vm1325_vm2, %v2799_v41 }
 0x2f6   : > { %5216 = vperm.xlu1 %10169, %v5158_v4   ;;  %9230 = vmatpush3.msk.msra.mxu0 %vm1325_vm2, %v2799_v41  ;;  %v2797_v45 = vpop.permute.xlu0 %2796  ;;  %v7676_v4 = vld [vmem:[%s15188_s5 + $0xa0] sm:$0xff] }
 0x2f7   : > { %9231 = vmatprep.subr.msk.mxu0 %vm1325_vm2, %v2797_v45 }
 0x2f8   : > { %v2795_v27 = vpop.permute.xlu1 %2794  ;;  %5221 = vperm.xlu0 %10168, %v5159_v22   ;;  %9232 = vmatpush3.msk.msra.mxu0 %vm1325_vm2, %v2797_v45  ;;  %v7677_v22 = vld [vmem:[%s15188_s5 + $0xa8] sm:$0xff] }
 0x2f9   : > { %9233 = vmatprep.subr.msk.mxu0 %vm1325_vm2, %v2795_v27 }
 0x2fa   : > { %5226 = vperm.xlu1 %10169, %v5160_v19   ;;  %9234 = vmatpush3.msk.msra.mxu0 %vm1325_vm2, %v2795_v27  ;;  %v2793_v47 = vpop.permute.xlu0 %2792 }
 0x2fb   : > { %9235 = vmatprep.subr.msk.mxu0 %vm1325_vm2, %v2793_v47 }
 0x2fc   : > { %v12671_v34 = vpop.permute.xlu1 %2790  ;;  %5231 = vperm.xlu0 %10168, %v5161_v23   ;;  %9236 = vmatpush3.msk.msra.mxu0 %vm1325_vm2, %v2793_v47  ;;  %v7678_v23 = vld [vmem:[%s15188_s5 + $0xb0] sm:$0xff] }
 0x2fd   : > { %9237 = vmatprep.subr.msk.mxu0 %vm1325_vm2, %v12671_v34 }
 0x2fe   : > { %5236 = vperm.xlu1 %10169, %v5162_v24   ;;  %9238 = vmatpush3.msk.msra.mxu0 %vm1325_vm2, %v12671_v34  ;;  %v12681_v54 = vpop.permute.xlu0 %2788  ;;  %v7679_v24 = vld [vmem:[%s15188_s5 + $0xb8] sm:$0xff] }
 0x2ff   : > { %9239 = vmatprep.subr.msk.mxu0 %vm1325_vm2, %v12681_v54 }
 0x300   : > { %v12685_v20 = vpop.permute.xlu1 %2786  ;;  %5241 = vperm.xlu0 %10168, %v5163_v46   ;;  %9240 = vmatpush3.msk.msra.mxu0 %vm1325_vm2, %v12681_v54 }
 0x301   : > { %9241 = vmatprep.subr.msk.mxu0 %vm1325_vm2, %v12685_v20 }
 0x302   : > { %9242 = vmatpush3.msk.msra.mxu0 %vm1325_vm2, %v12685_v20  ;;  %v12693_v42 = vpop.permute.xlu0 %2784 }
 0x303   : > { %9243 = vmatprep.subr.msk.mxu0 %vm1325_vm2, %v12693_v42 }
 0x304   : > { %v12697_v55 = vpop.permute.xlu1 %2782  ;;  %9244 = vmatpush3.msk.msra.mxu0 %vm1325_vm2, %v12693_v42 }
 0x305   : > { %9245 = vmatprep.subr.msk.mxu0 %vm1325_vm2, %v12697_v55 }
 0x306   : > { %9246 = vmatpush3.msk.msra.mxu0 %vm1325_vm2, %v12697_v55  ;;  %v12705_v16 = vpop.permute.xlu0 %2780 }
 0x307   : > { %9247 = vmatprep.subr.msk.mxu0 %vm1325_vm2, %v12705_v16 }
 0x308   : > { %v12709_v28 = vpop.permute.xlu1 %2778  ;;  %9248 = vmatpush3.msk.msra.mxu0 %vm1325_vm2, %v12705_v16 }
 0x309   : > { %9249 = vmatprep.subr.msk.mxu0 %vm1325_vm2, %v12709_v28 }
 0x30a   : > { %9250 = vmatpush3.msk.msra.mxu0 %vm1325_vm2, %v12709_v28  ;;  %v12717_v51 = vpop.permute.xlu0 %2776 }
 0x30b   : > { %9251 = vmatprep.subr.msk.mxu0 %vm1325_vm2, %v12717_v51 }
 0x30c   : > { %v12724_v2 = vpop.permute.xlu1 %3652  ;;  %9252 = vmatpush3.msk.msra.mxu0 %vm1325_vm2, %v12717_v51 }
 0x30d   : > { %9254 = vmatmul.mubr.msk.f32.vlgmr.msra.gmra.mxu0 %vm631_vm0, %v7613_v18  ;;  %9325 = vmatprep.subr.msk.mxu0 %vm1325_vm2, %v2799_v41  ;;  %v7790_v18 = vld [vmem:[%s15188_s5 + $0x170] sm:$0xff] }
 0x30e   : > { %9469 = vmatprep.subr.msk.mxu1 %vm2167_vm4, %v12724_v2  ;;  %9326 = vmatpush3.msk.msra.mxu0 %vm1325_vm2, %v2799_v41  ;;  %v12736_v50 = vpop.permute.xlu0 %3650  ;;  %v7784_v41 = vld [vmem:[%s15188_s5 + $0x140] sm:$0xff] }
 0x30f   : > { %9470 = vmatpush3.msk.msra.mxu1 %vm2167_vm4, %v12724_v2  ;;  %9327 = vmatprep.subr.msk.mxu0 %vm1325_vm2, %v2797_v45 }
 0x310   : > { %9471 = vmatprep.subr.msk.mxu1 %vm2167_vm4, %v12736_v50  ;;  %v12746_v62 = vpop.permute.xlu1 %3648  ;;  %9256 = vmatprep.mubr.msk.f32.mxu0 %vm631_vm0, %v7614_v56  ;;  %v7791_v56 = vld [vmem:[%s15188_s5 + $0x178] sm:$0xff] }
 0x311   : > { %9328 = vmatpush3.msk.msra.mxu0 %vm1325_vm2, %v2797_v45  ;;  %9472 = vmatpush3.msk.msra.mxu1 %vm2167_vm4, %v12736_v50  ;;  %v7785_v45 = vld [vmem:[%s15188_s5 + $0x148] sm:$0xff] }
 0x312   : > { %9257 = vmatmul.mubr.msk.f32.gmra.mxu0 %vm631_vm0, %v7615_v0  ;;  %9329 = vmatprep.subr.msk.mxu0 %vm1325_vm2, %v2795_v27  ;;  %v12754_v15 = vpop.permute.xlu0 %3646  ;;  %v7864_v0 = vld [vmem:[%s15188_s5 + $0x180] sm:$0xff] }
 0x313   : > { %9473 = vmatprep.subr.msk.mxu1 %vm2167_vm4, %v12746_v62  ;;  %9330 = vmatpush3.msk.msra.mxu0 %vm1325_vm2, %v2795_v27 }
 0x314   : > { %9474 = vmatpush3.msk.msra.mxu1 %vm2167_vm4, %v12746_v62  ;;  %9331 = vmatprep.subr.msk.mxu0 %vm1325_vm2, %v2793_v47  ;;  %v12765_v7 = vpop.permute.xlu1 %3644 }
 0x315   : > { %9475 = vmatprep.subr.msk.mxu1 %vm2167_vm4, %v12754_v15  ;;  %9259 = vmatprep.mubr.msk.f32.mxu0 %vm631_vm0, %v7616_v60  ;;  %v7865_v60 = vld [vmem:[%s15188_s5 + $0x188] sm:$0xff] }
 0x316   : > { %9332 = vmatpush3.msk.msra.mxu0 %vm1325_vm2, %v2793_v47  ;;  %9476 = vmatpush3.msk.msra.mxu1 %vm2167_vm4, %v12754_v15  ;;  %v12776_v48 = vpop.permute.xlu0 %3642  ;;  %v7786_v47 = vld [vmem:[%s15188_s5 + $0x150] sm:$0xff] }
 0x317   : > { %9260 = vmatmul.mubr.msk.f32.gmra.mxu0 %vm631_vm0, %v7617_v9  ;;  %9333 = vmatprep.subr.msk.mxu0 %vm1325_vm2, %v12671_v34  ;;  %v7866_v9 = vld [vmem:[%s15188_s5 + $0x190] sm:$0xff] }
 0x318   : > { %9477 = vmatprep.subr.msk.mxu1 %vm2167_vm4, %v12765_v7  ;;  %9334 = vmatpush3.msk.msra.mxu0 %vm1325_vm2, %v12671_v34  ;;  %v12788_v38 = vpop.permute.xlu1 %3640  ;;  %v7787_v34 = vld [vmem:[%s15188_s5 + $0x158] sm:$0xff] }
 0x319   : > { %9478 = vmatpush3.msk.msra.mxu1 %vm2167_vm4, %v12765_v7  ;;  %9335 = vmatprep.subr.msk.mxu0 %vm1325_vm2, %v12681_v54 }
 0x31a   : > { %9479 = vmatprep.subr.msk.mxu1 %vm2167_vm4, %v12776_v48  ;;  %9262 = vmatprep.mubr.msk.f32.mxu0 %vm631_vm0, %v7618_v3  ;;  %v12800_v36 = vpop.permute.xlu0 %3638  ;;  %v7687_v3 = vld [vmem:[%s15188_s5 + $0xf8] sm:$0xff] }
 0x31b   : > { %9336 = vmatpush3.msk.msra.mxu0 %vm1325_vm2, %v12681_v54  ;;  %9480 = vmatpush3.msk.msra.mxu1 %vm2167_vm4, %v12776_v48 }
 0x31c   : > { %9263 = vmatmul.mubr.msk.f32.gmra.mxu0 %vm631_vm0, %v7619_v26  ;;  %9337 = vmatprep.subr.msk.mxu0 %vm1325_vm2, %v12685_v20  ;;  %v12809_v10 = vpop.permute.xlu1 %3636  ;;  %v7732_v26 = vld [vmem:[%s15187_s4 + $0x100] sm:$0xff] }
 0x31d   : > { %9481 = vmatprep.subr.msk.mxu1 %vm2167_vm4, %v12788_v38  ;;  %9338 = vmatpush3.msk.msra.mxu0 %vm1325_vm2, %v12685_v20  ;;  %v7680_v20 = vld [vmem:[%s15188_s5 + $0xc0] sm:$0xff] }
 0x31e   : > { %9482 = vmatpush3.msk.msra.mxu1 %vm2167_vm4, %v12788_v38  ;;  %9339 = vmatprep.subr.msk.mxu0 %vm1325_vm2, %v12693_v42  ;;  %v12825_v58 = vpop.permute.xlu0 %3634 }
 0x31f   : > { %9483 = vmatprep.subr.msk.mxu1 %vm2167_vm4, %v12800_v36  ;;  %9265 = vmatprep.mubr.msk.f32.mxu0 %vm631_vm0, %v7620_v13  ;;  %v7733_v13 = vld [vmem:[%s15187_s4 + $0x108] sm:$0xff] }
 0x320   : > { %9340 = vmatpush3.msk.msra.mxu0 %vm1325_vm2, %v12693_v42  ;;  %9484 = vmatpush3.msk.msra.mxu1 %vm2167_vm4, %v12800_v36  ;;  %v12834_v5 = vpop.permute.xlu1 %3632  ;;  %v7788_v42 = vld [vmem:[%s15188_s5 + $0x160] sm:$0xff] }
 0x321   : > { %9266 = vmatmul.mubr.msk.f32.gmra.mxu0 %vm631_vm0, %v7621_v25  ;;  %9341 = vmatprep.subr.msk.mxu0 %vm1325_vm2, %v12697_v55 }
 0x322   : > { %9485 = vmatprep.subr.msk.mxu1 %vm2167_vm4, %v12809_v10  ;;  %9342 = vmatpush3.msk.msra.mxu0 %vm1325_vm2, %v12697_v55  ;;  %v12846_v44 = vpop.permute.xlu0 %3630  ;;  %v7681_v55 = vld [vmem:[%s15188_s5 + $0xc8] sm:$0xff] }
 0x323   : > { %9486 = vmatpush3.msk.msra.mxu1 %vm2167_vm4, %v12809_v10  ;;  %9343 = vmatprep.subr.msk.mxu0 %vm1325_vm2, %v12705_v16 }
 0x324   : > { %9487 = vmatprep.subr.msk.mxu1 %vm2167_vm4, %v12825_v58  ;;  %9268 = vmatprep.mubr.msk.f32.mxu0 %vm631_vm0, %v7622_v31  ;;  %v12865_v40 = vpop.permute.xlu1 %4152 }
 0x325   : > { %9344 = vmatpush3.msk.msra.mxu0 %vm1325_vm2, %v12705_v16  ;;  %9488 = vmatpush3.msk.msra.mxu1 %vm2167_vm4, %v12825_v58  ;;  %v7789_v16 = vld [vmem:[%s15188_s5 + $0x168] sm:$0xff] }
 0x326   : > { %9269 = vmatmul.mubr.msk.f32.gmra.mxu0 %vm631_vm0, %v7623_v14  ;;  %9345 = vmatprep.subr.msk.mxu0 %vm1325_vm2, %v12709_v28  ;;  %v12881_v29 = vpop.permute.xlu0 %4150  ;;  %v7735_v14 = vld [vmem:[%s15187_s4 + $0x118] sm:$0xff] }
 0x327   : > { %9489 = vmatprep.subr.msk.mxu1 %vm2167_vm4, %v12834_v5  ;;  %9346 = vmatpush3.msk.msra.mxu0 %vm1325_vm2, %v12709_v28 }
 0x328   : > { %9490 = vmatpush3.msk.msra.mxu1 %vm2167_vm4, %v12834_v5  ;;  %9347 = vmatprep.subr.msk.mxu0 %vm1325_vm2, %v12717_v51  ;;  %v12905_v52 = vpop.permute.xlu1 %4148 }
 0x329   : > { %9491 = vmatprep.subr.msk.mxu1 %vm2167_vm4, %v12846_v44  ;;  %9271 = vmatprep.mubr.msk.f32.mxu0 %vm631_vm0, %v7624_v1 }
 0x32a   : > { %9348 = vmatpush3.msk.msra.mxu0 %vm1325_vm2, %v12717_v51  ;;  %9492 = vmatpush3.msk.msra.mxu1 %vm2167_vm4, %v12846_v44  ;;  %v12919_v12 = vpop.permute.xlu0 %4146  ;;  %v7682_v51 = vld [vmem:[%s15188_s5 + $0xd0] sm:$0xff] }
 0x32b   : > { %9272 = vmatmul.mubr.msk.f32.gmra.mxu0 %vm631_vm0, %v7625_v39  ;;  %9421 = vmatprep.subr.msk.mxu0 %vm2167_vm4, %v12724_v2 }
 0x32c   : > { %9494 = vmatmul.mubr.msk.f32.vlgmr.msra.gmra.mxu1 %vm631_vm0, %v7777_v32  ;;  %9565 = vmatprep.subr.msk.mxu1 %vm4166_vm5, %v12865_v40  ;;  %v12944_v8 = vpop.permute.xlu1 %4144  ;;  %v7872_v32 = vld [vmem:[%s15188_s5 + $0x1c0] sm:$0xff] }
 0x32d   : > { %9566 = vmatpush3.msk.msra.mxu1 %vm4166_vm5, %v12865_v40  ;;  %9274 = vmatprep.mubr.msk.f32.mxu0 %vm631_vm0, %v7626_v61  ;;  %v7737_v61 = vld [vmem:[%s15187_s4 + $0x128] sm:$0xff] }
 0x32e   : > { %9567 = vmatprep.subr.msk.mxu1 %vm4166_vm5, %v12881_v29  ;;  %9496 = vmatprep.mubr.msk.f32.mxu1 %vm631_vm0, %v7778_v6  ;;  %v12953_v49 = vpop.permute.xlu0 %4142  ;;  %v7873_v6 = vld [vmem:[%s15188_s5 + $0x1c8] sm:$0xff] }
 0x32f   : > { %9568 = vmatpush3.msk.msra.mxu1 %vm4166_vm5, %v12881_v29  ;;  %9275 = vmatmul.mubr.msk.f32.gmra.mxu0 %vm631_vm0, %v7627_v63 }
 0x330   : > { %9497 = vmatmul.mubr.msk.f32.gmra.mxu1 %vm631_vm0, %v7779_v53  ;;  %9569 = vmatprep.subr.msk.mxu1 %vm4166_vm5, %v12905_v52  ;;  %v12978_v17 = vpop.permute.xlu1 %4140  ;;  %v7738_v53 = vld [vmem:[%s15187_s4 + $0x130] sm:$0xff] }
 0x331   : > { %9570 = vmatpush3.msk.msra.mxu1 %vm4166_vm5, %v12905_v52  ;;  %9349 = vmatprep.mubr.msk.f32.mxu0 %vm631_vm0, %v7672_v30  ;;  %v7739_v30 = vld [vmem:[%s15187_s4 + $0x138] sm:$0xff] }
 0x332   : > { %9571 = vmatprep.subr.msk.mxu1 %vm4166_vm5, %v12919_v12  ;;  %9499 = vmatprep.mubr.msk.f32.mxu1 %vm631_vm0, %v7780_v21  ;;  %v12989_v11 = vpop.permute.xlu0 %4138  ;;  %v7875_v21 = vld [vmem:[%s15188_s5 + $0x1d8] sm:$0xff] }
 0x333   : > { %9572 = vmatpush3.msk.msra.mxu1 %vm4166_vm5, %v12919_v12  ;;  %9350 = vmatmul.mubr.msk.f32.vlgmr.msra.gmra.mxu0 %vm631_vm0, %v7673_v43 }
 0x334   : > { %9422 = vmatpush3.msk.msra.mxu0 %vm2167_vm4, %v12724_v2  ;;  %9500 = vmatmul.mubr.msk.f32.gmra.mxu1 %vm631_vm0, %v7781_v59  ;;  %v13014_v19 = vpop.permute.xlu1 %4136  ;;  %v7683_v2 = vld [vmem:[%s15188_s5 + $0xd8] sm:$0xff] }
 0x335   : > { %9573 = vmatprep.subr.msk.mxu1 %vm4166_vm5, %v12944_v8  ;;  %9423 = vmatprep.subr.msk.mxu0 %vm2167_vm4, %v12736_v50 }
 0x336   : > { %9574 = vmatpush3.msk.msra.mxu1 %vm4166_vm5, %v12944_v8  ;;  %9424 = vmatpush3.msk.msra.mxu0 %vm2167_vm4, %v12736_v50  ;;  %v13025_v27 = vpop.permute.xlu0 %4134  ;;  %v7684_v50 = vld [vmem:[%s15188_s5 + $0xe0] sm:$0xff] }
 0x337   : > { %9575 = vmatprep.subr.msk.mxu1 %vm4166_vm5, %v12953_v49  ;;  %9352 = vmatprep.mubr.msk.f32.mxu0 %vm631_vm0, %v7674_v33 }
 0x338   : > { %9425 = vmatprep.subr.msk.mxu0 %vm2167_vm4, %v12746_v62  ;;  %9502 = vmatprep.mubr.msk.f32.mxu1 %vm631_vm0, %v7782_v35  ;;  %v13050_v46 = vpop.permute.xlu1 %4132  ;;  %v7876_v35 = vld [vmem:[%s15188_s5 + $0x1e0] sm:$0xff] }
 0x339   : > { %9576 = vmatpush3.msk.msra.mxu1 %vm4166_vm5, %v12953_v49  ;;  %9353 = vmatmul.mubr.msk.f32.gmra.mxu0 %vm631_vm0, %v7675_v57  ;;  %v7741_v57 = vld [vmem:[%s15187_s4 + $0x148] sm:$0xff] }
 0x33a   : > { %9426 = vmatpush3.msk.msra.mxu0 %vm2167_vm4, %v12746_v62  ;;  %9503 = vmatmul.mubr.msk.f32.gmra.mxu1 %vm631_vm0, %v7783_v37  ;;  %v13061_v54 = vpop.permute.xlu0 %4130  ;;  %v7685_v62 = vld [vmem:[%s15188_s5 + $0xe8] sm:$0xff] }
 0x33b   : > { %9577 = vmatprep.subr.msk.mxu1 %vm4166_vm5, %v12978_v17  ;;  %9427 = vmatprep.subr.msk.mxu0 %vm2167_vm4, %v12754_v15  ;;  %v7877_v37 = vld [vmem:[%s15188_s5 + $0x1e8] sm:$0xff] }
 0x33c   : > { %9578 = vmatpush3.msk.msra.mxu1 %vm4166_vm5, %v12978_v17  ;;  %9428 = vmatpush3.msk.msra.mxu0 %vm2167_vm4, %v12754_v15  ;;  %v13086_v28 = vpop.permute.xlu1 %4653 }
 0x33d   : > { %9579 = vmatprep.subr.msk.mxu1 %vm4166_vm5, %v12989_v11  ;;  %9355 = vmatprep.mubr.msk.f32.mxu0 %vm631_vm0, %v7676_v4 }
 0x33e   : > { %9429 = vmatprep.subr.msk.mxu0 %vm2167_vm4, %v12765_v7  ;;  %9505 = vmatprep.mubr.msk.f32.mxu1 %vm631_vm0, %v7784_v41  ;;  %v13133_v15 = vpop.permute.xlu0 %4651  ;;  %v7743_v41 = vld [vmem:[%s15187_s4 + $0x158] sm:$0xff] }
 0x33f   : > { %9580 = vmatpush3.msk.msra.mxu1 %vm4166_vm5, %v12989_v11  ;;  %9356 = vmatmul.mubr.msk.f32.gmra.mxu0 %vm631_vm0, %v7677_v22  ;;  %v7879_v22 = vld [vmem:[%s15188_s5 + $0x1f8] sm:$0xff] }
 0x340   : > { %9430 = vmatpush3.msk.msra.mxu0 %vm2167_vm4, %v12765_v7  ;;  %9506 = vmatmul.mubr.msk.f32.gmra.mxu1 %vm631_vm0, %v7785_v45  ;;  %v7686_v7 = vld [vmem:[%s15188_s5 + $0xf0] sm:$0xff]  ;;  %v7744_v45 = vld [vmem:[%s15187_s4 + $0x160] sm:$0xff] }
 0x341   : > { %9581 = vmatprep.subr.msk.mxu1 %vm4166_vm5, %v13014_v19  ;;  %9431 = vmatprep.subr.msk.mxu0 %vm2167_vm4, %v12776_v48 }
 0x342   : > { %9582 = vmatpush3.msk.msra.mxu1 %vm4166_vm5, %v13014_v19  ;;  %9432 = vmatpush3.msk.msra.mxu0 %vm2167_vm4, %v12776_v48  ;;  %v13152_v48 = vpop.permute.xlu1 %4649 }
 0x343   : > { %9583 = vmatprep.subr.msk.mxu1 %vm4166_vm5, %v13025_v27  ;;  %9358 = vmatprep.mubr.msk.f32.mxu0 %vm631_vm0, %v7678_v23 }
 0x344   : > { %9433 = vmatprep.subr.msk.mxu0 %vm2167_vm4, %v12788_v38  ;;  %9508 = vmatprep.mubr.msk.f32.mxu1 %vm631_vm0, %v7786_v47  ;;  %v7953_v47 = vld [vmem:[%s15188_s5 + $0x208] sm:$0xff] }
 0x345   : > { %9584 = vmatpush3.msk.msra.mxu1 %vm4166_vm5, %v13025_v27  ;;  %9359 = vmatmul.mubr.msk.f32.gmra.mxu0 %vm631_vm0, %v7679_v24  ;;  %v7746_v24 = vld [vmem:[%s15187_s4 + $0x170] sm:$0xff] }
 0x346   : > { %9434 = vmatpush3.msk.msra.mxu0 %vm2167_vm4, %v12788_v38  ;;  %9509 = vmatmul.mubr.msk.f32.gmra.mxu1 %vm631_vm0, %v7787_v34  ;;  %v7867_v38 = vld [vmem:[%s15188_s5 + $0x198] sm:$0xff]  ;;  %v13187_v25 = vpop.permute.xlu1 %4645  ;;  %v7954_v34 = vld [vmem:[%s15188_s5 + $0x210] sm:$0xff] }
 0x347   : > { %9585 = vmatprep.subr.msk.mxu1 %vm4166_vm5, %v13050_v46  ;;  %9435 = vmatprep.subr.msk.mxu0 %vm2167_vm4, %v12800_v36 }
 0x348   : > { %9586 = vmatpush3.msk.msra.mxu1 %vm4166_vm5, %v13050_v46  ;;  %9436 = vmatpush3.msk.msra.mxu0 %vm2167_vm4, %v12800_v36  ;;  %v13170_v36 = vpop.permute.xlu0 %4647 }
 0x349   : > { %9587 = vmatprep.subr.msk.mxu1 %vm4166_vm5, %v13061_v54  ;;  %9361 = vmatprep.mubr.msk.f32.mxu0 %vm631_vm0, %v7680_v20  ;;  %v7955_v20 = vld [vmem:[%s15188_s5 + $0x218] sm:$0xff] }
 0x34a   : > { %9437 = vmatprep.subr.msk.mxu0 %vm2167_vm4, %v12809_v10  ;;  %9511 = vmatprep.mubr.msk.f32.mxu1 %vm631_vm0, %v7788_v42  ;;  %v13226_v1 = vpop.permute.xlu1 %4641  ;;  %v7820_v42 = vld [vmem:[%s15187_s4 + $0x180] sm:$0xff] }
 0x34b   : > { %9588 = vmatpush3.msk.msra.mxu1 %vm4166_vm5, %v13061_v54  ;;  %9362 = vmatmul.mubr.msk.f32.gmra.mxu0 %vm631_vm0, %v7681_v55  ;;  %v7956_v55 = vld [vmem:[%s15188_s5 + $0x220] sm:$0xff] }
 0x34c   : > { %9438 = vmatpush3.msk.msra.mxu0 %vm2167_vm4, %v12809_v10  ;;  %9512 = vmatmul.mubr.msk.f32.gmra.mxu1 %vm631_vm0, %v7789_v16  ;;  %v7868_v10 = vld [vmem:[%s15188_s5 + $0x1a0] sm:$0xff]  ;;  %v13205_v31 = vpop.permute.xlu0 %4643 }
 0x34d   : > { %9661 = vmatprep.subr.msk.mxu1 %vm4667_vm6, %v13086_v28  ;;  %9439 = vmatprep.subr.msk.mxu0 %vm2167_vm4, %v12825_v58 }
 0x34e   : > { %9440 = vmatpush3.msk.msra.mxu0 %vm2167_vm4, %v12825_v58  ;;  %9364 = vmatprep.mubr.msk.f32.mxu0 %vm631_vm0, %v7682_v51  ;;  %v7869_v58 = vld [vmem:[%s15188_s5 + $0x1a8] sm:$0xff] }
 0x34f   : > { %9441 = vmatprep.subr.msk.mxu0 %vm2167_vm4, %v12834_v5  ;;  %9514 = vmatprep.mubr.msk.f32.mxu1 %vm631_vm0, %v7790_v18  ;;  %v7821_v51 = vld [vmem:[%s15187_s4 + $0x188] sm:$0xff] }
 0x350   : > { %9365 = vmatmul.mubr.msk.f32.gmra.mxu0 %vm631_vm0, %v7683_v2  ;;  %9515 = vmatmul.mubr.msk.f32.gmra.mxu1 %vm631_vm0, %v7791_v56  ;;  %v13237_v39 = vpop.permute.xlu0 %4639  ;;  %v7957_v18 = vld [vmem:[%s15188_s5 + $0x228] sm:$0xff]  ;;  %v7822_v2 = vld [vmem:[%s15187_s4 + $0x190] sm:$0xff] }
 0x351   : > { %9442 = vmatpush3.msk.msra.mxu0 %vm2167_vm4, %v12834_v5  ;;  %9367 = vmatprep.mubr.msk.f32.mxu0 %vm631_vm0, %v7684_v50  ;;  %v7734_v5 = vld [vmem:[%s15187_s4 + $0x110] sm:$0xff] }
 0x352   : > { %9443 = vmatprep.subr.msk.mxu0 %vm2167_vm4, %v12846_v44  ;;  %9589 = vmatprep.mubr.msk.f32.mxu1 %vm631_vm0, %v7864_v0  ;;  %v7958_v56 = vld [vmem:[%s15188_s5 + $0x230] sm:$0xff]  ;;  %v7823_v0 = vld [vmem:[%s15187_s4 + $0x198] sm:$0xff] }
 0x353   : > { %9444 = vmatpush3.msk.msra.mxu0 %vm2167_vm4, %v12846_v44  ;;  %v7870_v44 = vld [vmem:[%s15188_s5 + $0x1b0] sm:$0xff] }
 0x354   : > { %9517 = vmatprep.subr.msk.mxu0 %vm4166_vm5, %v12865_v40  ;;  %9368 = vmatmul.mubr.msk.f32.gmra.mxu0 %vm631_vm0, %v7685_v62  ;;  %v13273_v63 = vpop.permute.xlu0 %4635  ;;  %v7959_v62 = vld [vmem:[%s15188_s5 + $0x238] sm:$0xff] }
 0x355   : > { %9590 = vmatmul.mubr.msk.f32.vlgmr.msra.gmra.mxu1 %vm631_vm0, %v7865_v60  ;;  %9370 = vmatprep.mubr.msk.f32.mxu0 %vm631_vm0, %v7686_v7  ;;  %v7960_v60 = vld [vmem:[%s15188_s5 + $0x240] sm:$0xff] }
 0x356   : > { %9662 = vmatpush3.msk.msra.mxu1 %vm4667_vm6, %v13086_v28  ;;  %9592 = vmatprep.mubr.msk.f32.mxu1 %vm631_vm0, %v7866_v9  ;;  %v7961_v9 = vld [vmem:[%s15188_s5 + $0x248] sm:$0xff] }
 0x357   : > { %9663 = vmatprep.subr.msk.mxu1 %vm4667_vm6, %v13133_v15 }
 0x358   : > { %9664 = vmatpush3.msk.msra.mxu1 %vm4667_vm6, %v13133_v15  ;;  %9371 = vmatmul.mubr.msk.f32.gmra.mxu0 %vm631_vm0, %v7687_v3  ;;  %v7962_v3 = vld [vmem:[%s15188_s5 + $0x250] sm:$0xff] }
 0x359   : > { %9665 = vmatprep.subr.msk.mxu1 %vm4667_vm6, %v13152_v48  ;;  %9593 = vmatmul.mubr.msk.f32.gmra.mxu1 %vm631_vm0, %v7867_v38 }
 0x35a   : > { %9666 = vmatpush3.msk.msra.mxu1 %vm4667_vm6, %v13152_v48  ;;  %9445 = vmatprep.mubr.msk.f32.mxu0 %vm631_vm0, %v7732_v26  ;;  %v7827_v26 = vld [vmem:[%s15187_s4 + $0x1b8] sm:$0xff] }
 0x35b   : > { %9667 = vmatprep.subr.msk.mxu1 %vm4667_vm6, %v13170_v36  ;;  %9595 = vmatprep.mubr.msk.f32.mxu1 %vm631_vm0, %v7868_v10  ;;  %v13299_v43 = vpop.f32.mrf.mxu1  ;;  %v7828_v10 = vld [vmem:[%s15187_s4 + $0x1c0] sm:$0xff] }
 0x35c   : > { %9668 = vmatpush3.msk.msra.mxu1 %vm4667_vm6, %v13170_v36  ;;  %9446 = vmatmul.mubr.msk.f32.vlgmr.msra.gmra.mxu0 %vm631_vm0, %v7733_v13  ;;  %v7964_v13 = vld [vmem:[%s15188_s5 + $0x260] sm:$0xff] }
 0x35d   : > { %9669 = vmatprep.subr.msk.mxu1 %vm4667_vm6, %v13187_v25  ;;  %9518 = vmatpush3.msk.msra.mxu0 %vm4166_vm5, %v12865_v40  ;;  %v7871_v40 = vld [vmem:[%s15188_s5 + $0x1b8] sm:$0xff]  ;;  %v13320_v33 = vpop.f32.mrf.mxu1 }
 0x35e   : > { %9596 = vmatmul.mubr.msk.f32.gmra.mxu1 %vm631_vm0, %v7869_v58  ;;  %9519 = vmatprep.subr.msk.mxu0 %vm4166_vm5, %v12881_v29  ;;  %v7829_v58 = vld [vmem:[%s15187_s4 + $0x1c8] sm:$0xff] }
 0x35f   : > { %9670 = vmatpush3.msk.msra.mxu1 %vm4667_vm6, %v13187_v25  ;;  %9520 = vmatpush3.msk.msra.mxu0 %vm4166_vm5, %v12881_v29  ;;  %v7736_v29 = vld [vmem:[%s15187_s4 + $0x120] sm:$0xff]  ;;  %v13350_v4 = vpop.f32.mrf.mxu1 }
 0x360   : > { %9671 = vmatprep.subr.msk.mxu1 %vm4667_vm6, %v13205_v31  ;;  %9448 = vmatprep.mubr.msk.f32.mxu0 %vm631_vm0, %v7734_v5  ;;  %v7965_v5 = vld [vmem:[%s15188_s5 + $0x268] sm:$0xff] }
 0x361   : > { %9672 = vmatpush3.msk.msra.mxu1 %vm4667_vm6, %v13205_v31  ;;  %9521 = vmatprep.subr.msk.mxu0 %vm4166_vm5, %v12905_v52  ;;  %v13376_v23 = vpop.f32.mrf.mxu1 }
 0x362   : > { %9598 = vmatprep.mubr.msk.f32.mxu1 %vm631_vm0, %v7870_v44  ;;  %9673 = vmatprep.subr.msk.mxu1 %vm4667_vm6, %v13226_v1  ;;  %v7966_v44 = vld [vmem:[%s15188_s5 + $0x270] sm:$0xff] }
 0x363   : > { %9449 = vmatmul.mubr.msk.f32.gmra.mxu0 %vm631_vm0, %v7735_v14  ;;  %9599 = vmatmul.mubr.msk.f32.gmra.mxu1 %vm631_vm0, %v7871_v40  ;;  %v7831_v40 = vld [vmem:[%s15187_s4 + $0x1d8] sm:$0xff] }
 0x364   : > { %9522 = vmatpush3.msk.msra.mxu0 %vm4166_vm5, %v12905_v52  ;;  %9674 = vmatpush3.msk.msra.mxu1 %vm4667_vm6, %v13226_v1  ;;  %v13263_v52 = vpop.permute.xlu1 %4637 }
 0x365   : > { %9523 = vmatprep.subr.msk.mxu0 %vm4166_vm5, %v12919_v12  ;;  %9675 = vmatprep.subr.msk.mxu1 %vm4667_vm6, %v13237_v39 }
 0x366   : > { %9524 = vmatpush3.msk.msra.mxu0 %vm4166_vm5, %v12919_v12  ;;  %9676 = vmatpush3.msk.msra.mxu1 %vm4667_vm6, %v13237_v39  ;;  %v7874_v12 = vld [vmem:[%s15188_s5 + $0x1d0] sm:$0xff] }
 0x367   : > { %9451 = vmatprep.mubr.msk.f32.mxu0 %vm631_vm0, %v7736_v29  ;;  %9525 = vmatprep.subr.msk.mxu0 %vm4166_vm5, %v12944_v8 }
 0x368   : > { %9601 = vmatprep.mubr.msk.f32.mxu1 %vm631_vm0, %v7872_v32  ;;  %9677 = vmatprep.subr.msk.mxu1 %vm4667_vm6, %v13263_v52  ;;  %v13301_v59 = vpop.permute.xlu1 %4633  ;;  %v7833_v32 = vld [vmem:[%s15187_s4 + $0x1e8] sm:$0xff] }
 0x369   : > { %9452 = vmatmul.mubr.msk.f32.gmra.mxu0 %vm631_vm0, %v7737_v61  ;;  %9602 = vmatmul.mubr.msk.f32.gmra.mxu1 %vm631_vm0, %v7873_v6  ;;  %v7834_v61 = vld [vmem:[%s15187_s4 + $0x1f0] sm:$0xff] }
 0x36a   : > { %9526 = vmatpush3.msk.msra.mxu0 %vm4166_vm5, %v12944_v8  ;;  %9678 = vmatpush3.msk.msra.mxu1 %vm4667_vm6, %v13263_v52  ;;  %v13311_v8 = vpop.permute.xlu0 %4631 }
 0x36b   : > { %9527 = vmatprep.subr.msk.mxu0 %vm4166_vm5, %v12953_v49  ;;  %9679 = vmatprep.subr.msk.mxu1 %vm4667_vm6, %v13273_v63 }
 0x36c   : > { %9528 = vmatpush3.msk.msra.mxu0 %vm4166_vm5, %v12953_v49  ;;  %9680 = vmatpush3.msk.msra.mxu1 %vm4667_vm6, %v13273_v63  ;;  %v7740_v49 = vld [vmem:[%s15187_s4 + $0x140] sm:$0xff] }
 0x36d   : > { %9454 = vmatprep.mubr.msk.f32.mxu0 %vm631_vm0, %v7738_v53  ;;  %9529 = vmatprep.subr.msk.mxu0 %vm4166_vm5, %v12978_v17 }
 0x36e   : > { %9604 = vmatprep.mubr.msk.f32.mxu1 %vm631_vm0, %v7874_v12  ;;  %9681 = vmatprep.subr.msk.mxu1 %vm4667_vm6, %v13301_v59  ;;  %v7909_v12 = vld [vmem:[%s15187_s4 + $0x208] sm:$0xff] }
 0x36f   : > { %9455 = vmatmul.mubr.msk.f32.gmra.mxu0 %vm631_vm0, %v7739_v30  ;;  %9605 = vmatmul.mubr.msk.f32.gmra.mxu1 %vm631_vm0, %v7875_v21  ;;  %v7910_v30 = vld [vmem:[%s15187_s4 + $0x210] sm:$0xff] }
 0x370   : > { %9530 = vmatpush3.msk.msra.mxu0 %vm4166_vm5, %v12978_v17  ;;  %9682 = vmatpush3.msk.msra.mxu1 %vm4667_vm6, %v13301_v59  ;;  %v7742_v17 = vld [vmem:[%s15187_s4 + $0x150] sm:$0xff] }
 0x371   : > { %9531 = vmatprep.subr.msk.mxu0 %vm4166_vm5, %v12989_v11  ;;  %9683 = vmatprep.subr.msk.mxu1 %vm4667_vm6, %v13311_v8 }
 0x372   : > { %9532 = vmatpush3.msk.msra.mxu0 %vm4166_vm5, %v12989_v11  ;;  %9684 = vmatpush3.msk.msra.mxu1 %vm4667_vm6, %v13311_v8  ;;  %v7878_v11 = vld [vmem:[%s15188_s5 + $0x1f0] sm:$0xff] }
 0x373   : > { %9457 = vmatprep.mubr.msk.f32.mxu0 %vm631_vm0, %v7740_v49  ;;  %9533 = vmatprep.subr.msk.mxu0 %vm4166_vm5, %v13014_v19 }
 0x374   : > { %9607 = vmatprep.mubr.msk.f32.mxu1 %vm631_vm0, %v7876_v35  ;;  %9458 = vmatmul.mubr.msk.f32.gmra.mxu0 %vm631_vm0, %v7741_v57  ;;  %v7913_v35 = vld [vmem:[%s15187_s4 + $0x228] sm:$0xff]  ;;  %v7914_v57 = vld [vmem:[%s15187_s4 + $0x230] sm:$0xff] }
 0x375   : > { %9534 = vmatpush3.msk.msra.mxu0 %vm4166_vm5, %v13014_v19  ;;  %9608 = vmatmul.mubr.msk.f32.gmra.mxu1 %vm631_vm0, %v7877_v37  ;;  %v7952_v19 = vld [vmem:[%s15188_s5 + $0x200] sm:$0xff] }
 0x376   : > { %9535 = vmatprep.subr.msk.mxu0 %vm4166_vm5, %v13025_v27  ;;  %9460 = vmatprep.mubr.msk.f32.mxu0 %vm631_vm0, %v7742_v17  ;;  %v7915_v17 = vld [vmem:[%s15187_s4 + $0x238] sm:$0xff] }
 0x377   : > { %9536 = vmatpush3.msk.msra.mxu0 %vm4166_vm5, %v13025_v27  ;;  %9610 = vmatprep.mubr.msk.f32.mxu1 %vm631_vm0, %v7878_v11  ;;  %v7745_v27 = vld [vmem:[%s15187_s4 + $0x168] sm:$0xff]  ;;  %v7916_v11 = vld [vmem:[%s15187_s4 + $0x240] sm:$0xff] }
 0x378   : > { %9537 = vmatprep.subr.msk.mxu0 %vm4166_vm5, %v13050_v46  ;;  %9461 = vmatmul.mubr.msk.f32.gmra.mxu0 %vm631_vm0, %v7743_v41 }
 0x379   : > { %9538 = vmatpush3.msk.msra.mxu0 %vm4166_vm5, %v13050_v46  ;;  %9611 = vmatmul.mubr.msk.f32.gmra.mxu1 %vm631_vm0, %v7879_v22  ;;  %v13402_v46 = vpop.f32.mrf.mxu1  ;;  %v7917_v22 = vld [vmem:[%s15187_s4 + $0x248] sm:$0xff] }
 0x37a   : > { %9539 = vmatprep.subr.msk.mxu0 %vm4166_vm5, %v13061_v54  ;;  %9463 = vmatprep.mubr.msk.f32.mxu0 %vm631_vm0, %v7744_v45  ;;  %v7918_v45 = vld [vmem:[%s15187_s4 + $0x250] sm:$0xff] }
 0x37b   : > { %9540 = vmatpush3.msk.msra.mxu0 %vm4166_vm5, %v13061_v54  ;;  %9685 = vmatprep.mubr.msk.f32.mxu1 %vm631_vm0, %v7952_v19  ;;  %v7747_v54 = vld [vmem:[%s15187_s4 + $0x178] sm:$0xff]  ;;  %v13420_v16 = vpop.f32.mrf.mxu1 }
 0x37c   : > { %9613 = vmatprep.subr.msk.mxu0 %vm4667_vm6, %v13086_v28  ;;  %9464 = vmatmul.mubr.msk.f32.gmra.mxu0 %vm631_vm0, %v7745_v27  ;;  %v7919_v27 = vld [vmem:[%s15187_s4 + $0x258] sm:$0xff] }
 0x37d   : > { %9686 = vmatmul.mubr.msk.f32.vlgmr.msra.gmra.mxu1 %vm631_vm0, %v7953_v47  ;;  %9466 = vmatprep.mubr.msk.f32.mxu0 %vm631_vm0, %v7746_v24  ;;  %v13438_v50 = vpop.f32.mrf.mxu1  ;;  %v7920_v47 = vld [vmem:[%s15187_s4 + $0x260] sm:$0xff] }
 0x37e   : > { %9688 = vmatprep.mubr.msk.f32.mxu1 %vm631_vm0, %v7954_v34  ;;  %v7921_v34 = vld [vmem:[%s15187_s4 + $0x268] sm:$0xff] }
 0x37f   : > { %v13464_v7 = vpop.f32.mrf.mxu1 }
 0x380   : > { %9467 = vmatmul.mubr.msk.f32.gmra.mxu0 %vm631_vm0, %v7747_v54  ;;  %v7922_v54 = vld [vmem:[%s15187_s4 + $0x270] sm:$0xff] }
 0x381   : > { %9689 = vmatmul.mubr.msk.f32.gmra.mxu1 %vm631_vm0, %v7955_v20  ;;  %9541 = vmatprep.mubr.msk.f32.mxu0 %vm631_vm0, %v7820_v42  ;;  %v13490_v38 = vpop.f32.mrf.mxu1  ;;  %v7923_v42 = vld [vmem:[%s15187_s4 + $0x278] sm:$0xff] }
 0x382   : > { %9691 = vmatprep.mubr.msk.f32.mxu1 %vm631_vm0, %v7956_v55 }
 0x384   : > { %9542 = vmatmul.mubr.msk.f32.vlgmr.msra.gmra.mxu0 %vm631_vm0, %v7821_v51 }
 0x385   : > { %9614 = vmatpush3.msk.msra.mxu0 %vm4667_vm6, %v13086_v28  ;;  %9692 = vmatmul.mubr.msk.f32.gmra.mxu1 %vm631_vm0, %v7957_v18  ;;  %v7824_v28 = vld [vmem:[%s15187_s4 + $0x1a0] sm:$0xff] }
 0x386   : > { %9615 = vmatprep.subr.msk.mxu0 %vm4667_vm6, %v13133_v15  ;;  %9544 = vmatprep.mubr.msk.f32.mxu0 %vm631_vm0, %v7822_v2 }
 0x387   : > { %9616 = vmatpush3.msk.msra.mxu0 %vm4667_vm6, %v13133_v15  ;;  %9694 = vmatprep.mubr.msk.f32.mxu1 %vm631_vm0, %v7958_v56  ;;  %v7825_v15 = vld [vmem:[%s15187_s4 + $0x1a8] sm:$0xff] }
 0x388   : > { %9617 = vmatprep.subr.msk.mxu0 %vm4667_vm6, %v13152_v48  ;;  %9545 = vmatmul.mubr.msk.f32.gmra.mxu0 %vm631_vm0, %v7823_v0 }
 0x389   : > { %9618 = vmatpush3.msk.msra.mxu0 %vm4667_vm6, %v13152_v48  ;;  %9695 = vmatmul.mubr.msk.f32.gmra.mxu1 %vm631_vm0, %v7959_v62  ;;  %v7826_v48 = vld [vmem:[%s15187_s4 + $0x1b0] sm:$0xff] }
 0x38a   : > { %9619 = vmatprep.subr.msk.mxu0 %vm4667_vm6, %v13170_v36  ;;  %9547 = vmatprep.mubr.msk.f32.mxu0 %vm631_vm0, %v7824_v28 }
 0x38b   : > { %9620 = vmatpush3.msk.msra.mxu0 %vm4667_vm6, %v13170_v36  ;;  %9697 = vmatprep.mubr.msk.f32.mxu1 %vm631_vm0, %v7960_v60  ;;  %v7963_v36 = vld [vmem:[%s15188_s5 + $0x258] sm:$0xff] }
 0x38c   : > { %9621 = vmatprep.subr.msk.mxu0 %vm4667_vm6, %v13187_v25  ;;  %9548 = vmatmul.mubr.msk.f32.gmra.mxu0 %vm631_vm0, %v7825_v15 }
 0x38d   : > { %9622 = vmatpush3.msk.msra.mxu0 %vm4667_vm6, %v13187_v25  ;;  %9698 = vmatmul.mubr.msk.f32.gmra.mxu1 %vm631_vm0, %v7961_v9  ;;  %v13516_v25 = vpop.f32.mrf.mxu1 }
 0x38e   : > { %9623 = vmatprep.subr.msk.mxu0 %vm4667_vm6, %v13205_v31  ;;  %9550 = vmatprep.mubr.msk.f32.mxu0 %vm631_vm0, %v7826_v48 }
 0x38f   : > { %9624 = vmatpush3.msk.msra.mxu0 %vm4667_vm6, %v13205_v31  ;;  %9700 = vmatprep.mubr.msk.f32.mxu1 %vm631_vm0, %v7962_v3  ;;  %v7830_v31 = vld [vmem:[%s15187_s4 + $0x1d0] sm:$0xff]  ;;  %v13542_v14 = vpop.f32.mrf.mxu1 }
 0x390   : > { %9625 = vmatprep.subr.msk.mxu0 %vm4667_vm6, %v13226_v1  ;;  %9551 = vmatmul.mubr.msk.f32.gmra.mxu0 %vm631_vm0, %v7827_v26 }
 0x391   : > { %9626 = vmatpush3.msk.msra.mxu0 %vm4667_vm6, %v13226_v1  ;;  %9701 = vmatmul.mubr.msk.f32.gmra.mxu1 %vm631_vm0, %v7963_v36  ;;  %v7967_v1 = vld [vmem:[%s15188_s5 + $0x278] sm:$0xff]  ;;  %v13565_v29 = vpop.f32.mrf.mxu1 }
 0x392   : > { %9627 = vmatprep.subr.msk.mxu0 %vm4667_vm6, %v13237_v39  ;;  %9553 = vmatprep.mubr.msk.f32.mxu0 %vm631_vm0, %v7828_v10 }
 0x393   : > { %9628 = vmatpush3.msk.msra.mxu0 %vm4667_vm6, %v13237_v39  ;;  %9703 = vmatprep.mubr.msk.f32.mxu1 %vm631_vm0, %v7964_v13  ;;  %v7832_v39 = vld [vmem:[%s15187_s4 + $0x1e0] sm:$0xff]  ;;  %v13582_v6 = vpop.f32.mrf.mxu1 }
 0x394   : > { %9629 = vmatprep.subr.msk.mxu0 %vm4667_vm6, %v13263_v52  ;;  %9554 = vmatmul.mubr.msk.f32.gmra.mxu0 %vm631_vm0, %v7829_v58 }
 0x395   : > { %9630 = vmatpush3.msk.msra.mxu0 %vm4667_vm6, %v13263_v52  ;;  %9704 = vmatmul.mubr.msk.f32.gmra.mxu1 %vm631_vm0, %v7965_v5  ;;  %v7835_v52 = vld [vmem:[%s15187_s4 + $0x1f8] sm:$0xff]  ;;  %v13592_v53 = vpop.f32.mrf.mxu1 }
 0x396   : > { %9631 = vmatprep.subr.msk.mxu0 %vm4667_vm6, %v13273_v63  ;;  %9556 = vmatprep.mubr.msk.f32.mxu0 %vm631_vm0, %v7830_v31 }
 0x397   : > { %9632 = vmatpush3.msk.msra.mxu0 %vm4667_vm6, %v13273_v63  ;;  %9706 = vmatprep.mubr.msk.f32.mxu1 %vm631_vm0, %v7966_v44  ;;  %v7908_v63 = vld [vmem:[%s15187_s4 + $0x200] sm:$0xff]  ;;  %v13602_v21 = vpop.f32.mrf.mxu1 }
 0x398   : > { %9633 = vmatprep.subr.msk.mxu0 %vm4667_vm6, %v13301_v59  ;;  %9557 = vmatmul.mubr.msk.f32.gmra.mxu0 %vm631_vm0, %v7831_v40 }
 0x399   : > { %9634 = vmatpush3.msk.msra.mxu0 %vm4667_vm6, %v13301_v59  ;;  %9707 = vmatmul.mubr.msk.f32.gmra.mxu1 %vm631_vm0, %v7967_v1  ;;  %v7911_v59 = vld [vmem:[%s15187_s4 + $0x218] sm:$0xff]  ;;  %v13612_v49 = vpop.f32.mrf.mxu1 }
 0x39a   : > { %9635 = vmatprep.subr.msk.mxu0 %vm4667_vm6, %v13311_v8  ;;  %9559 = vmatprep.mubr.msk.f32.mxu0 %vm631_vm0, %v7832_v39 }
 0x39b   : > { %9636 = vmatpush3.msk.msra.mxu0 %vm4667_vm6, %v13311_v8  ;;  %v7912_v8 = vld [vmem:[%s15187_s4 + $0x220] sm:$0xff]  ;;  %v13622_v37 = vpop.f32.mrf.mxu1 }
 0x39c   : > { %9560 = vmatmul.mubr.msk.f32.gmra.mxu0 %vm631_vm0, %v7833_v32 }
 0x39d   : > { %9562 = vmatprep.mubr.msk.f32.mxu0 %vm631_vm0, %v7834_v61  ;;  %v13632_v41 = vpop.f32.mrf.mxu1 }
 0x39f   : > { %v13642_v19 = vpop.f32.mrf.mxu1 }
 0x3a0   : > { %9563 = vmatmul.mubr.msk.f32.gmra.mxu0 %vm631_vm0, %v7835_v52 }
 0x3a1   : > { %9637 = vmatprep.mubr.msk.f32.mxu0 %vm631_vm0, %v7908_v63  ;;  %v13652_v24 = vpop.f32.mrf.mxu1 }
 0x3a3   : > { %v13662_v20 = vpop.f32.mrf.mxu1 }
 0x3a4   : > { %9638 = vmatmul.mubr.msk.f32.vlgmr.msra.gmra.mxu0 %vm631_vm0, %v7909_v12 }
 0x3a5   : > { %9640 = vmatprep.mubr.msk.f32.mxu0 %vm631_vm0, %v7910_v30  ;;  %v13669_v55 = vpop.f32.mrf.mxu1 }
 0x3a7   : > { %v13671_v51 = vpop.f32.mrf.mxu1 }
 0x3a8   : > { %9641 = vmatmul.mubr.msk.f32.gmra.mxu0 %vm631_vm0, %v7911_v59 }
 0x3a9   : > { %9643 = vmatprep.mubr.msk.f32.mxu0 %vm631_vm0, %v7912_v8  ;;  %v13673_v18 = vpop.f32.mrf.mxu1 }
 0x3ab   : > { %v13675_v2 = vpop.f32.mrf.mxu1 }
 0x3ac   : > { %9644 = vmatmul.mubr.msk.f32.gmra.mxu0 %vm631_vm0, %v7913_v35 }
 0x3ad   : > { %9646 = vmatprep.mubr.msk.f32.mxu0 %vm631_vm0, %v7914_v57  ;;  %v13681_v62 = vpop.f32.mrf.mxu1 }
 0x3af   : > { %v13687_v15 = vpop.f32.mrf.mxu1 }
 0x3b0   : > { %9647 = vmatmul.mubr.msk.f32.gmra.mxu0 %vm631_vm0, %v7915_v17  ;;  %15289 = vst [vmem:[#allocation19_spill] sm:$0xff] %v13687_v15 }
 0x3b1   : > { %9649 = vmatprep.mubr.msk.f32.mxu0 %vm631_vm0, %v7916_v11  ;;  %v13691_v48 = vpop.f32.mrf.mxu1 }
 0x3b2   : > { %15290 = vst [vmem:[#allocation30_spill] sm:$0xff] %v13691_v48 }
 0x3b3   : > { %v13697_v36 = vpop.f32.mrf.mxu1 }
 0x3b4   : > { %9650 = vmatmul.mubr.msk.f32.gmra.mxu0 %vm631_vm0, %v7917_v22  ;;  %15291 = vst [vmem:[#allocation37_spill] sm:$0xff] %v13697_v36 }
 0x3b5   : > { %9652 = vmatprep.mubr.msk.f32.mxu0 %vm631_vm0, %v7918_v45  ;;  %v13701_v13 = vpop.f32.mrf.mxu1 }
 0x3b6   : > { %15292 = vst [vmem:[#allocation39_spill] sm:$0xff] %v13701_v13 }
 0x3b7   : > { %v13707_v31 = vpop.f32.mrf.mxu1 }
 0x3b8   : > { %9653 = vmatmul.mubr.msk.f32.gmra.mxu0 %vm631_vm0, %v7919_v27  ;;  %15293 = vst [vmem:[#allocation27_spill] sm:$0xff] %v13707_v31 }
 0x3b9   : > { %9655 = vmatprep.mubr.msk.f32.mxu0 %vm631_vm0, %v7920_v47  ;;  %v3621_v1 = vpop.f32.mrf.mxu1 }
 0x3bc   : > { %9656 = vmatmul.mubr.msk.f32.gmra.mxu0 %vm631_vm0, %v7921_v34 }
 0x3bd   : > { %9658 = vmatprep.mubr.msk.f32.mxu0 %vm631_vm0, %v7922_v54 }
 0x3c0   : > { %9659 = vmatmul.mubr.msk.f32.gmra.mxu0 %vm631_vm0, %v7923_v42 }
 0x3cd   : > { %v13677_v56 = vpop.f32.mrf.mxu0 }
 0x3cf   : > { %v13679_v0 = vpop.f32.mrf.mxu0 }
 0x3d2   : > { %v13683_v28 = vpop.f32.mrf.mxu0 }
 0x3d4   : > { %v13685_v60 = vpop.f32.mrf.mxu0 }
 0x3d7   : > { %v13689_v9 = vpop.f32.mrf.mxu0 }
 0x3d9   : > { %v13693_v3 = vpop.f32.mrf.mxu0 }
 0x3dc   : > { %v13695_v26 = vpop.f32.mrf.mxu0 }
 0x3de   : > { %v13699_v10 = vpop.f32.mrf.mxu0 }
 0x3e1   : > { %v13703_v58 = vpop.f32.mrf.mxu0 }
 0x3e3   : > { %v13705_v5 = vpop.f32.mrf.mxu0 }
 0x3e6   : > { %v13709_v44 = vpop.f32.mrf.mxu0 }
 0x3e8   : > { %v13711_v40 = vpop.f32.mrf.mxu0 }
 0x3eb   : > { %v13713_v39 = vpop.f32.mrf.mxu0 }
 0x3ec   : > { %v13715_v32 = vpop.f32.mrf.mxu1 }
 0x3ed   : > { %15294 = vst [vmem:[#allocation28_spill] sm:$0xff] %v13715_v32  ;;  %v13717_v61 = vpop.f32.mrf.mxu0 }
 0x3ee   : > { %v13719_v52 = vpop.f32.mrf.mxu1 }
 0x3ef   : > { %15295 = vst [vmem:[#allocation29_spill] sm:$0xff] %v13719_v52  ;;  %v13721_v63 = vpop.f32.mrf.mxu0 }
 0x3f0   : > { %v13723_v12 = vpop.f32.mrf.mxu1 }
 0x3f1   : > { %15296 = vst [vmem:[#allocation40_spill] sm:$0xff] %v13723_v12  ;;  %v13725_v30 = vpop.f32.mrf.mxu0 }
 0x3f2   : > { %v13727_v59 = vpop.f32.mrf.mxu1 }
 0x3f3   : > { %15297 = vst [vmem:[#allocation11_spill] sm:$0xff] %v13727_v59  ;;  %v13729_v8 = vpop.f32.mrf.mxu0 }
 0x3f4   : > { %v13731_v35 = vpop.f32.mrf.mxu1 }
 0x3f5   : > { %15298 = vst [vmem:[#allocation5_spill] sm:$0xff] %v13731_v35  ;;  %v13733_v57 = vpop.f32.mrf.mxu0 }
 0x3f6   : > { %v13735_v17 = vpop.f32.mrf.mxu1 }
 0x3f7   : > { %15299 = vst [vmem:[#allocation17_spill] sm:$0xff] %v13735_v17 }
 0x3f9   : > { %v13737_v11 = vpop.f32.mrf.mxu0 }
 0x3fa   : > { %v13739_v22 = vpop.f32.mrf.mxu1 }
 0x3fb   : > { %15300 = vst [vmem:[#allocation8_spill] sm:$0xff] %v13739_v22  ;;  %v13741_v45 = vpop.f32.mrf.mxu0 }
 0x3fc   : > { %v13743_v27 = vpop.f32.mrf.mxu1 }
 0x3fd   : > { %15301 = vst [vmem:[#allocation18_spill] sm:$0xff] %v13743_v27 }
 0x3ff   : > { %v13745_v47 = vpop.f32.mrf.mxu0 }
 0x400   : > { %v13747_v34 = vpop.f32.mrf.mxu1 }
 0x401   : > { %15302 = vst [vmem:[#allocation36_spill] sm:$0xff] %v13747_v34  ;;  %v13749_v54 = vpop.f32.mrf.mxu0 }
 0x402   : > { %v13751_v42 = vpop.f32.mrf.mxu1 }
 0x403   : > { %15303 = vst [vmem:[#allocation25_spill] sm:$0xff] %v13751_v42 }
 0x405   : > { %v13753_v35 = vpop.f32.mrf.mxu0 }
 0x406   : > { %v13755_v59 = vpop.f32.mrf.mxu1 }
 0x407   : > { %15304 = vst [vmem:[#allocation26_spill] sm:$0xff] %v13755_v59  ;;  %v13757_v17 = vpop.f32.mrf.mxu0 }
 0x408   : > { %v13759_v31 = vpop.f32.mrf.mxu1 }
 0x409   : > { %15305 = vst [vmem:[#allocation10_spill] sm:$0xff] %v13759_v31 }
 0x40b   : > { %v13761_v22 = vpop.f32.mrf.mxu0 }
 0x40c   : > { %v13763_v13 = vpop.f32.mrf.mxu1 }
 0x40d   : > { %15306 = vst [vmem:[#allocation4_spill] sm:$0xff] %v13763_v13  ;;  %v13765_v27 = vpop.f32.mrf.mxu0 }
 0x40e   : > { %v13767_v12 = vpop.f32.mrf.mxu1 }
 0x40f   : > { %15307 = vst [vmem:[#allocation15_spill] sm:$0xff] %v13767_v12 }
 0x410   : > { %v13769_v34 = vpop.f32.mrf.mxu0  ;;  %v13771_v52 = vpop.f32.mrf.mxu1 }
 0x411   : > { %15308 = vst [vmem:[#allocation7_spill] sm:$0xff] %v13769_v34  ;;  %15309 = vst [vmem:[#allocation16_spill] sm:$0xff] %v13771_v52 }
 0x412   : > { %v13773_v42 = vpop.f32.mrf.mxu0  ;;  %v13775_v32 = vpop.f32.mrf.mxu1 }
 0x413   : > { %15310 = vst [vmem:[#allocation34_spill] sm:$0xff] %v13773_v42  ;;  %15311 = vst [vmem:[#allocation23_spill] sm:$0xff] %v13775_v32 }
 0x414   : > { %v13777_v59 = vpop.f32.mrf.mxu0 }
 0x415   : > { %15312 = vst [vmem:[#allocation24_spill] sm:$0xff] %v13777_v59  ;;  %v13779_v36 = vpop.f32.mrf.mxu1 }
 0x416   : > { %15313 = vst [vmem:[#allocation9_spill] sm:$0xff] %v13779_v36  ;;  %v13781_v31 = vpop.f32.mrf.mxu0 }
 0x417   : > { %15314 = vst [vmem:[#allocation3_spill] sm:$0xff] %v13781_v31  ;;  %v13783_v48 = vpop.f32.mrf.mxu1 }
 0x418   : > { %15315 = vst [vmem:[#allocation13_spill] sm:$0xff] %v13783_v48  ;;  %v13785_v13 = vpop.f32.mrf.mxu0 }
 0x419   : > { %15316 = vst [vmem:[#allocation6_spill] sm:$0xff] %v13785_v13  ;;  %v13787_v15 = vpop.f32.mrf.mxu1 }
 0x41a   : > { %15317 = vst [vmem:[#allocation14_spill] sm:$0xff] %v13787_v15  ;;  %v3428_v12 = vpop.f32.mrf.mxu0 }
 0x41b   : > { %v13789_v34 = vadd.f32 %v3621_v1, %v3428_v12  ;;  %v13791_v52 = vpop.f32.mrf.mxu1 }
 0x41c   : > { %15319 = vst [vmem:[#allocation38_spill] sm:$0xff] %v13791_v52  ;;  %v13793_v42 = vpop.f32.mrf.mxu0 }
 0x41d   : > { %15318 = vst [vmem:[#allocation33_spill] sm:$0xff] %v13789_v34 }
 0x41e   : > { %v13795_v32 = vpop.f32.mrf.mxu1  ;;  %v13797_v59 = vpop.f32.mrf.mxu0 }
 0x41f   : > { %15320 = vst [vmem:[#allocation21_spill] sm:$0xff] %v13795_v32  ;;  %15321 = vst [vmem:[#allocation22_spill] sm:$0xff] %v13797_v59 }
 0x420   : > { %v13799_v36 = vpop.f32.mrf.mxu1 }
 0x421   : > { %15322 = vst [vmem:[#allocation12_spill] sm:$0xff] %v13799_v36 }
 0x423   : > { %v13801_v31 = vpop.f32.mrf.mxu0  ;;  %v13803_v48 = vpop.f32.mrf.mxu1 }
 0x424   : > { %15323 = vst [vmem:[#allocation31_spill] sm:$0xff] %v13801_v31  ;;  %15324 = vst [vmem:[#allocation35_spill] sm:$0xff] %v13803_v48 }
 0x425   : > { %v13805_v13 = vpop.f32.mrf.mxu0  ;;  %v13807_v15 = vpop.f32.mrf.mxu1 }
 0x426   : > { %15325 = vst [vmem:[#allocation20_spill] sm:$0xff] %v13805_v13  ;;  %15326 = vst [vmem:[#allocation32_spill] sm:$0xff] %v13807_v15 }
 0x429   : > { %v13809_v1 = vpop.f32.mrf.mxu0  ;;  %v13811_v12 = vpop.f32.mrf.mxu1 }
 0x42a   : > { %15327 = vst [vmem:[#allocation41_spill] sm:$0xff] %v13809_v1  ;;  %15328 = vst [vmem:[#allocation42_spill] sm:$0xff] %v13811_v12 }
 0x42b   : > { %v13813_v34 = vpop.f32.mrf.mxu0  ;;  %v13815_v52 = vpop.f32.mrf.mxu1 }
 0x42c   : > { %15329 = vst [vmem:[#allocation43_spill] sm:$0xff] %v13813_v34  ;;  %15330 = vst [vmem:[#allocation44_spill] sm:$0xff] %v13815_v52 }
 0x42f   : > { %v13817_v32 = vpop.f32.mrf.mxu0  ;;  %v13819_v59 = vpop.f32.mrf.mxu1 }
 0x430   : > { %15331 = vst [vmem:[#allocation45_spill] sm:$0xff] %v13817_v32  ;;  %15332 = vst [vmem:[#allocation46_spill] sm:$0xff] %v13819_v59 }
 0x431   : > { %v13821_v36 = vpop.f32.mrf.mxu0  ;;  %v13823_v31 = vpop.f32.mrf.mxu1 }
 0x432   : > { %15333 = vst [vmem:[#allocation47_spill] sm:$0xff] %v13821_v36  ;;  %15334 = vst [vmem:[#allocation48_spill] sm:$0xff] %v13823_v31 }
 0x434   : > { %v13825_v48 = vpop.f32.mrf.mxu0 }
 0x435   : > { %15335 = vst [vmem:[#allocation49_spill] sm:$0xff] %v13825_v48  ;;  %v13827_v13 = vpop.f32.mrf.mxu1 }
 0x436   : > { %15336 = vst [vmem:[#allocation50_spill] sm:$0xff] %v13827_v13  ;;  %v13829_v15 = vpop.f32.mrf.mxu0 }
 0x437   : > { %15337 = vst [vmem:[#allocation51_spill] sm:$0xff] %v13829_v15  ;;  %v13831_v1 = vpop.f32.mrf.mxu1 }
 0x438   : > { %15338 = vst [vmem:[#allocation52_spill] sm:$0xff] %v13831_v1  ;;  %v13833_v12 = vpop.f32.mrf.mxu0 }
 0x439   : > { %15339 = vst [vmem:[#allocation53_spill] sm:$0xff] %v13833_v12  ;;  %v13837_v52 = vpop.f32.mrf.mxu1 }
 0x43a   : > { %v13835_v34 = vpop.f32.mrf.mxu0  ;;  %15341 = vst [vmem:[#allocation55_spill] sm:$0xff] %v13837_v52 }
 0x43b   : > { %15340 = vst [vmem:[#allocation54_spill] sm:$0xff] %v13835_v34  ;;  %v13843_v36 = vpop.f32.mrf.mxu1 }
 0x43c   : > { %v13839_v32 = vpop.f32.mrf.mxu0  ;;  %15344 = vst [vmem:[#allocation58_spill] sm:$0xff] %v13843_v36 }
 0x43d   : > { %15342 = vst [vmem:[#allocation56_spill] sm:$0xff] %v13839_v32  ;;  %v13849_v13 = vpop.f32.mrf.mxu1 }
 0x43e   : > { %v13841_v59 = vpop.f32.mrf.mxu0  ;;  %15347 = vst [vmem:[#allocation61_spill] sm:$0xff] %v13849_v13 }
 0x43f   : > { %15343 = vst [vmem:[#allocation57_spill] sm:$0xff] %v13841_v59  ;;  %v13855_v12 = vpop.f32.mrf.mxu1 }
 0x440   : > { %v13845_v31 = vpop.f32.mrf.mxu0  ;;  %15350 = vst [vmem:[#allocation64_spill] sm:$0xff] %v13855_v12 }
 0x441   : > { %15345 = vst [vmem:[#allocation59_spill] sm:$0xff] %v13845_v31  ;;  %v13861_v32 = vpop.f32.mrf.mxu1 }
 0x442   : > { %v13847_v48 = vpop.f32.mrf.mxu0 }
 0x443   : > { %15346 = vst [vmem:[#allocation60_spill] sm:$0xff] %v13847_v48  ;;  %v13867_v31 = vpop.f32.mrf.mxu1 }
 0x444   : > { %v13851_v15 = vpop.f32.mrf.mxu0 }
 0x445   : > { %15348 = vst [vmem:[#allocation62_spill] sm:$0xff] %v13851_v15  ;;  %v13873_v15 = vpop.f32.mrf.mxu1 }
 0x446   : > { %v13853_v1 = vpop.f32.mrf.mxu0  ;;  %15356 = vst [vmem:[#allocation70_spill] sm:$0xff] %v13873_v15 }
 0x447   : > { %15349 = vst [vmem:[#allocation63_spill] sm:$0xff] %v13853_v1 }
 0x448   : > { %v13857_v34 = vpop.f32.mrf.mxu0 }
 0x44a   : > { %v13859_v52 = vpop.f32.mrf.mxu0 }
 0x44b   : > { %15351 = vst [vmem:[#allocation65_spill] sm:$0xff] %v13859_v52  ;;  %v3154_v52 = vadd.f32 %v13299_v43, %v13677_v56  ;;  %v13899_v43 = vadd.f32 %v13402_v46, %v13689_v9  ;;  %v13915_v56 = vadd.f32 %v13490_v38, %v13703_v58  ;;  %v13919_v46 = vadd.f32 %v13516_v25, %v13705_v5  ;;  %v15363_v5 = vld [vmem:[#allocation30_spill] sm:$0xff] }
 0x44c   : > { %v13863_v59 = vpop.f32.mrf.mxu0  ;;  %v13935_v38 = vadd.f32 %v13582_v6, %v13713_v39  ;;  %v3557_v25 = vadd.f32 %v13622_v37, %v13729_v8  ;;  %v3562_v6 = vadd.f32 %v13652_v24, %v13741_v45  ;;  %v3577_v37 = vadd.f32 %v13662_v20, %v13745_v47  ;;  %v15366_v39 = vld [vmem:[#allocation37_spill] sm:$0xff]  ;;  %v15369_v8 = vld [vmem:[#allocation40_spill] sm:$0xff] }
 0x44d   : > { %15352 = vst [vmem:[#allocation66_spill] sm:$0xff] %v13863_v59  ;;  %v3149_v59 = vadd.f32 %v13320_v33, %v13679_v0  ;;  %v13903_v33 = vadd.f32 %v13420_v16, %v13693_v3  ;;  %v13923_v16 = vadd.f32 %v13542_v14, %v13709_v44  ;;  %v3567_v14 = vadd.f32 %v13642_v19, %v13737_v11  ;;  %v15372_v11 = vld [vmem:[#allocation6_spill] sm:$0xff] }
 0x44e   : > { %v13865_v36 = vpop.f32.mrf.mxu0  ;;  %v13961_v19 = vadd.f32 %v13612_v49, %v13725_v30  ;;  %v3582_v24 = vadd.f32 %v13673_v18, %v13757_v17  ;;  %v3597_v20 = vadd.f32 %v13675_v2, %v13761_v22  ;;  %v3592_v3 = vadd.f32 %v13681_v62, %v13765_v27  ;;  %v15362_v49 = vld [vmem:[#allocation34_spill] sm:$0xff]  ;;  %v15367_v18 = vld [vmem:[#allocation28_spill] sm:$0xff]  ;;  %v15368_v30 = vld [vmem:[#allocation29_spill] sm:$0xff] }
 0x44f   : > { %15353 = vst [vmem:[#allocation67_spill] sm:$0xff] %v13865_v36  ;;  %v13885_v36 = vadd.f32 %v13350_v4, %v13683_v28  ;;  %v13907_v4 = vadd.f32 %v13438_v50, %v13695_v26  ;;  %v13927_v50 = vadd.f32 %v13565_v29, %v13711_v40  ;;  %v3552_v28 = vadd.f32 %v13632_v41, %v13733_v57  ;;  %v15360_v26 = vld [vmem:[#allocation7_spill] sm:$0xff] }
 0x450   : > { %v13869_v48 = vpop.f32.mrf.mxu0  ;;  %v13945_v29 = vadd.f32 %v13592_v53, %v13717_v61  ;;  %15359 = vst [vmem:[#allocation73_spill] sm:$0xff] %v13961_v19  ;;  %v3572_v53 = vadd.f32 %v13669_v55, %v13749_v54  ;;  %v3602_v44 = vadd.f32 %v15363_v5, %v15362_v49  ;;  %v15370_v62 = vld [vmem:[#allocation3_spill] sm:$0xff]  ;;  %v15375_v54 = vld [vmem:[#allocation5_spill] sm:$0xff] }
 0x451   : > { %15354 = vst [vmem:[#allocation68_spill] sm:$0xff] %v13869_v48  ;;  %v13889_v48 = vadd.f32 %v13376_v23, %v13685_v60  ;;  %v13911_v23 = vadd.f32 %v13464_v7, %v13699_v10  ;;  %v13931_v7 = vpop.permute.xlu1 %5166  ;;  %v13949_v60 = vadd.f32 %v13602_v21, %v13721_v63  ;;  %v3587_v21 = vadd.f32 %v13671_v51, %v13753_v35  ;;  %v15361_v10 = vld [vmem:[#allocation19_spill] sm:$0xff]  ;;  %v15365_v51 = vld [vmem:[#allocation24_spill] sm:$0xff] }
 0x452   : > { %v13871_v13 = vpop.f32.mrf.mxu0  ;;  %v3607_v58 = vadd.f32 %v15361_v10, %v15360_v26  ;;  %v3617_v61 = vadd.f32 %v15366_v39, %v15365_v51  ;;  %v4115_v63 = vadd.f32 %v15367_v18, %v3557_v25  ;;  %v4114_v2 = vadd.f32 %v15368_v30, %v3552_v28  ;;  %v15371_v57 = vld [vmem:[#allocation39_spill] sm:$0xff]  ;;  %v15377_v28 = vld [vmem:[#allocation17_spill] sm:$0xff]  ;;  %v15378_v51 = vld [vmem:[#allocation8_spill] sm:$0xff] }
 0x453   : > { %15355 = vst [vmem:[#allocation69_spill] sm:$0xff] %v13871_v13  ;;  %v13891_v13 = vpop.f32.mrf.mxu1  ;;  %15358 = vst [vmem:[#allocation72_spill] sm:$0xff] %v13949_v60  ;;  %v4117_v35 = vadd.f32 %v15369_v8, %v3567_v14  ;;  %v3612_v17 = vadd.f32 %v15371_v57, %v15370_v62  ;;  %v15373_v22 = vld [vmem:[#allocation27_spill] sm:$0xff]  ;;  %v4119_v26 = vadd.f32 %v15375_v54, %v3577_v37  ;;  %v15379_v18 = vld [vmem:[#allocation18_spill] sm:$0xff] }
 0x454   : > { %v13875_v1 = vpop.f32.mrf.mxu0  ;;  %v3627_v45 = vadd.f32 %v15373_v22, %v15372_v11  ;;  %v15374_v27 = vld [vmem:[#allocation11_spill] sm:$0xff]  ;;  %v3889_v25 = vadd.f32 %v13793_v42, %v3154_v52  ;;  %v4118_v14 = vadd.f32 %v15377_v28, %v3572_v53  ;;  %v4121_v39 = vadd.f32 %v15378_v51, %v3587_v21  ;;  %v15380_v8 = vld [vmem:[#allocation36_spill] sm:$0xff]  ;;  %v15381_v57 = vld [vmem:[#allocation25_spill] sm:$0xff] }
 0x455   : > { %15357 = vst [vmem:[#allocation71_spill] sm:$0xff] %v13875_v1  ;;  %v13895_v1 = vpop.permute.xlu0 %5171  ;;  %v13955_v9 = vpop.f32.mrf.mxu1  ;;  %v4116_v47 = vadd.f32 %v15374_v27, %v3562_v6  ;;  %v4120_v30 = vadd.f32 %v15379_v18, %v3582_v24  ;;  %v4123_v62 = vadd.f32 %v15380_v8, %v3597_v20  ;;  %v4122_v6 = vadd.f32 %v15381_v57, %v3592_v3  ;;  %v15382_v11 = vld [vmem:[#allocation26_spill] sm:$0xff]  ;;  %v15387_v42 = vld [vmem:[#allocation4_spill] sm:$0xff]  ;;  %v15389_v24 = vld [vmem:[#allocation13_spill] sm:$0xff] }
 0x456   : > { %v13877_v12 = vpop.f32.mrf.mxu0  ;;  %v13996_v5 = vpop.permute.xlu1 %5176  ;;  %v4125_v37 = vadd.f32 %v15382_v11, %v3607_v58  ;;  %v15383_v22 = vld [vmem:[#allocation10_spill] sm:$0xff]  ;;  %v14011_v53 = vadd.f32 %v15387_v42, %v3617_v61  ;;  %v4615_v51 = vadd.f32 %v15389_v24, %v4114_v2  ;;  %v15391_v3 = vld [vmem:[#allocation15_spill] sm:$0xff]  ;;  %v15392_v58 = vld [vmem:[#allocation16_spill] sm:$0xff] }
 0x457   : > { %v13992_v10 = vpop.f32.mrf.mxu1  ;;  %v4124_v27 = vadd.f32 %v15383_v22, %v3602_v44  ;;  %v15388_v21 = vld [vmem:[#allocation62_spill] sm:$0xff]  ;;  %v14017_v8 = vadd.f32 %v15391_v3, %v3612_v17  ;;  %v14020_v44 = vadd.f32 %v15392_v58, %v3627_v45  ;;  %v15394_v61 = vld [vmem:[#allocation61_spill] sm:$0xff]  ;;  %v15395_v11 = vld [vmem:[#allocation63_spill] sm:$0xff] }
 0x458   : > { %v13893_v15 = vpop.f32.mrf.mxu0  ;;  %v4390_v28 = vadd.f32 %v15388_v21, %v3889_v25  ;;  %v15390_v20 = vld [vmem:[#allocation14_spill] sm:$0xff]  ;;  %v15397_v17 = vld [vmem:[#allocation21_spill] sm:$0xff]  ;;  %v15398_v45 = vld [vmem:[#allocation20_spill] sm:$0xff] }
 0x459   : > { %v13979_v55 = vpop.permute.xlu0 %5181  ;;  %v4618_v18 = vadd.f32 %v15390_v20, %v4117_v35  ;;  %v14022_v57 = vpop.f32.mrf.mxu1  ;;  %v15396_v35 = vld [vmem:[#allocation38_spill] sm:$0xff]  ;;  %v4620_v21 = vadd.f32 %v15397_v17, %v4119_v26  ;;  %v3890_v24 = vadd.f32 %v15398_v45, %v13889_v48  ;;  %v15399_v20 = vld [vmem:[#allocation33_spill] sm:$0xff]  ;;  %v15400_v3 = vld [vmem:[#allocation23_spill] sm:$0xff] }
 0x45a   : > { %v13929_v0 = vpop.f32.mrf.mxu0  ;;  %v4617_v42 = vadd.f32 %v15396_v35, %v4116_v47  ;;  %v14036_v58 = vadd.f32 %v15400_v3, %v15399_v20  ;;  %v14038_v60 = vpop.permute.xlu1 %5186  ;;  %v15405_v20 = vld [vmem:[#allocation65_spill] sm:$0xff] }
 0x45b   : > { %v5119_v35 = vadd.f32 %v13861_v32, %v4618_v18  ;;  %v14047_v17 = vpop.f32.mrf.mxu1  ;;  %v4391_v3 = vadd.f32 %v15405_v20, %v3890_v24  ;;  %v15413_v20 = vld [vmem:[#allocation46_spill] sm:$0xff] }
 0x45c   : > { %v13957_v41 = vpop.f32.mrf.mxu0 }
 0x45e   : > { %v13977_v40 = vpop.f32.mrf.mxu0 }
 0x45f   : > { %15364 = vst [vmem:[#allocation7_spill] sm:$0xff] %v13977_v40  ;;  %v15386_v40 = vld [vmem:[#allocation22_spill] sm:$0xff] }
 0x460   : > { %v13994_v49 = vpop.f32.mrf.mxu0  ;;  %v3888_v52 = vadd.f32 %v15386_v40, %v3149_v59  ;;  %v15393_v59 = vld [vmem:[#allocation31_spill] sm:$0xff] }
 0x461   : > { %15376 = vst [vmem:[#allocation19_spill] sm:$0xff] %v13994_v49  ;;  %v15385_v49 = vld [vmem:[#allocation9_spill] sm:$0xff]  ;;  %v3891_v40 = vadd.f32 %v15393_v59, %v13885_v36  ;;  %v15401_v36 = vld [vmem:[#allocation64_spill] sm:$0xff] }
 0x462   : > { %v14006_v54 = vpop.f32.mrf.mxu0  ;;  %v4616_v19 = vadd.f32 %v15385_v49, %v4115_v63  ;;  %v14024_v49 = vpop.permute.xlu0 %5191  ;;  %v4389_v2 = vadd.f32 %v15395_v11, %v3888_v52  ;;  %v5116_v59 = vadd.f32 %v15401_v36, %v4615_v51  ;;  %v15404_v11 = vld [vmem:[#allocation41_spill] sm:$0xff]  ;;  %v15409_v36 = vld [vmem:[#allocation66_spill] sm:$0xff] }
 0x463   : > { %15384 = vst [vmem:[#allocation34_spill] sm:$0xff] %v14006_v54  ;;  %v3893_v48 = vadd.f32 %v15404_v11, %v13899_v43  ;;  %v5118_v43 = vadd.f32 %v13867_v31, %v4617_v42  ;;  %v9702_v11 = vpop.f32.mrf.mxu1  ;;  %v5197_v42 = vpop.permute.xlu1 %5196 }
 0x464   : > { %v9639_v63 = vpop.f32.mrf.mxu0  ;;  %v5117_v25 = vadd.f32 %v15394_v61, %v4616_v19  ;;  %v4392_v19 = vadd.f32 %v13857_v34, %v3891_v40  ;;  %v15403_v61 = vld [vmem:[#allocation35_spill] sm:$0xff] }
 0x465   : > { %v4891_v22 = vadd.f32 %v9639_v63, %v4390_v28  ;;  %v15402_v63 = vld [vmem:[#allocation12_spill] sm:$0xff]  ;;  %v4622_v26 = vadd.f32 %v15403_v61, %v4121_v39  ;;  %v15408_v39 = vld [vmem:[#allocation43_spill] sm:$0xff] }
 0x466   : > { %v4811_v54 = vpop.f32.mrf.mxu0  ;;  %v4619_v47 = vadd.f32 %v15402_v63, %v4118_v14  ;;  %v15407_v14 = vld [vmem:[#allocation42_spill] sm:$0xff]  ;;  %v5202_v18 = vpop.permute.xlu0 %5201  ;;  %v4394_v63 = vadd.f32 %v15409_v36, %v3893_v48  ;;  %v15418_v36 = vld [vmem:[#allocation49_spill] sm:$0xff] }
 0x467   : > { %v5133_v52 = vmax.f32 %v4891_v22, %v5117_v25  ;;  %v4890_v28 = vadd.f32 %v4811_v54, %v4389_v2  ;;  %v15406_v54 = vld [vmem:[#allocation32_spill] sm:$0xff]  ;;  %v4624_v2 = vadd.f32 %v15407_v14, %v4123_v62  ;;  %v3892_v22 = vadd.f32 %v15408_v39, %v13903_v33  ;;  %v15412_v62 = vld [vmem:[#allocation70_spill] sm:$0xff] }
 0x468   : > { %v9642_v45 = vpop.f32.mrf.mxu0  ;;  %v4621_v25 = vadd.f32 %v15406_v54, %v4120_v30  ;;  %v15411_v30 = vld [vmem:[#allocation45_spill] sm:$0xff]  ;;  %v5121_v61 = vadd.f32 %v15412_v62, %v4620_v21  ;;  %v15416_v21 = vld [vmem:[#allocation67_spill] sm:$0xff]  ;;  %v15417_v39 = vld [vmem:[#allocation68_spill] sm:$0xff] }
 0x469   : > { %v14051_v51 = vadd.f32 %v13895_v1, %v5133_v52  ;;  %v5132_v34 = vmax.f32 %v4890_v28, %v5116_v59  ;;  %v4893_v40 = vadd.f32 %v9642_v45, %v4392_v19  ;;  %v15410_v59 = vld [vmem:[#allocation44_spill] sm:$0xff]  ;;  %v3895_v28 = vadd.f32 %v15411_v30, %v13907_v4  ;;  %v15419_v30 = vld [vmem:[#allocation69_spill] sm:$0xff] }
 0x46a   : > { %v4821_v32 = vpop.f32.mrf.mxu0  ;;  %v4623_v19 = vadd.f32 %v15410_v59, %v4122_v6  ;;  %v15414_v6 = vld [vmem:[#allocation47_spill] sm:$0xff]  ;;  %v15415_v4 = vld [vmem:[#allocation48_spill] sm:$0xff]  ;;  %v4393_v54 = vadd.f32 %v15416_v21, %v3892_v22  ;;  %v5087_v22 = vpop.f32.mrf.mxu1  ;;  %v15422_v21 = vld [vmem:[#allocation50_spill] sm:$0xff] }
 0x46b   : > { %v14060_v24 = vadd.f32 %v13931_v7, %v5132_v34  ;;  %v5135_v1 = vmax.f32 %v4893_v40, %v5119_v35  ;;  %v4892_v52 = vadd.f32 %v4821_v32, %v4391_v3  ;;  %v5261_v33 = vmax.f32 %v14051_v51, 0.0  ;;  %v5212_v59 = vpop.permute.xlu0 %5211 }
 0x46c   : > { %v9645_v31 = vpop.f32.mrf.mxu0  ;;  %v4626_v3 = vadd.f32 %v15413_v20, %v4125_v37  ;;  %v3894_v34 = vadd.f32 %v15414_v6, %v13911_v23  ;;  %v14075_v40 = vadd.f32 %v15415_v4, %v4124_v27  ;;  %v4396_v32 = vadd.f32 %v15417_v39, %v3895_v28 }
 0x46d   : > { %v5260_v45 = vmax.f32 %v14060_v24, 0.0  ;;  %v14069_v48 = vadd.f32 %v13979_v55, %v5135_v1  ;;  %v5134_v7 = vmax.f32 %v4892_v52, %v5118_v43  ;;  %v4895_v35 = vadd.f32 %v9645_v31, %v4394_v63 }
 0x46e   : > { %v4831_v14 = vpop.f32.mrf.mxu0  ;;  %v3897_v23 = vadd.f32 %v15418_v36, %v13915_v56  ;;  %v5120_v27 = vadd.f32 %v13891_v13, %v4619_v47  ;;  %v5123_v63 = vadd.f32 %v13955_v9, %v4622_v26  ;;  %v4395_v28 = vadd.f32 %v15419_v30, %v3894_v34 }
 0x46f   : > { %v10170_v55 = vpack.i.bf16 %v5261_v33, %v5260_v45  ;;  %v14084_v43 = vadd.f32 %v13996_v5, %v5134_v7  ;;  %v5137_v37 = vmax.f32 %v4895_v35, %v5121_v61  ;;  %v4894_v1 = vadd.f32 %v4831_v14, %v4393_v54  ;;  %v15420_v61 = vld [vmem:[#allocation51_spill] sm:$0xff]  ;;  %v5207_v7 = vpop.permute.xlu1 %5206  ;;  %v9705_v54 = vpop.f32.mrf.mxu1 }
 0x470   : > { %v9648_v52 = vpop.f32.mrf.mxu0  ;;  %v5263_v62 = vmax.f32 %v14069_v48, 0.0  ;;  %v3896_v56 = vadd.f32 %v15420_v61, %v13919_v46  ;;  %v5122_v13 = vadd.f32 %v13992_v10, %v4621_v25  ;;  %v15421_v35 = vld [vmem:[#allocation71_spill] sm:$0xff]  ;;  %v4628_v46 = vadd.f32 %v15422_v21, %v14011_v53  ;;  %v15423_v10 = vld [vmem:[#allocation53_spill] sm:$0xff]  ;;  %v15424_v53 = vld [vmem:[#allocation54_spill] sm:$0xff] }
 0x471   : > { %v5262_v31 = vmax.f32 %v14084_v43, 0.0  ;;  %v4897_v5 = vadd.f32 %v9648_v52, %v4396_v32  ;;  %10171 = vrot.lane.b32.xlu1 %v10170_v55, %s10683_s19  ;;  %v14098_v9 = vadd.f32 %v14024_v49, %v5137_v37  ;;  %v5136_v47 = vmax.f32 %v4894_v1, %v5120_v27  ;;  %v5222_v27 = vpop.permute.xlu0 %5221  ;;  %v15425_v52 = vld [vmem:[#allocation56_spill] sm:$0xff] }
 0x472   : > { %v4841_v26 = vpop.f32.mrf.mxu0  ;;  %v4398_v20 = vadd.f32 %v15421_v35, %v3897_v23  ;;  %v3899_v25 = vadd.f32 %v15423_v10, %v13923_v16  ;;  %v5125_v49 = vadd.f32 %v14022_v57, %v4624_v2  ;;  %v4397_v32 = vadd.f32 %v13877_v12, %v3896_v56  ;;  %v15429_v21 = vld [vmem:[#allocation72_spill] sm:$0xff] }
 0x473   : > { %v10175_v6 = vpack.i.bf16 %v5263_v62, %v5262_v31  ;;  %v5139_v34 = vmax.f32 %v4897_v5, %v5123_v63  ;;  %v4896_v4 = vadd.f32 %v4841_v26, %v4395_v28  ;;  %v14111_v14 = vadd.f32 %v14038_v60, %v5136_v47  ;;  %v5097_v5 = vpop.f32.mrf.mxu1  ;;  %v5217_v61 = vpop.permute.xlu1 %5216  ;;  %v15426_v47 = vld [vmem:[#allocation52_spill] sm:$0xff]  ;;  %v15428_v26 = vld [vmem:[#allocation57_spill] sm:$0xff] }
 0x474   : > { %v9651_v39 = vpop.f32.mrf.mxu0  ;;  %v3898_v23 = vadd.f32 %v15424_v53, %v13927_v50  ;;  %v5124_v16 = vadd.f32 %v14047_v17, %v4623_v19  ;;  %v5265_v57 = vmax.f32 %v14098_v9, 0.0  ;;  %v4400_v63 = vadd.f32 %v13893_v15, %v3899_v25 }
 0x475   : > { %v14114_v55 = vadd.f32 %v5202_v18, %v5139_v34  ;;  %v5138_v37 = vmax.f32 %v4896_v4, %v5122_v13  ;;  %v4899_v36 = vadd.f32 %v9651_v39, %v4398_v20  ;;  %10176 = vrot.lane.b32.xlu0 %v10175_v6, %s10683_s19  ;;  %v5264_v2 = vmax.f32 %v14111_v14, 0.0 }
 0x476   : > { %v4851_v60 = vpop.f32.mrf.mxu0  ;;  %v3901_v30 = vadd.f32 %v15425_v52, %v13935_v38  ;;  %v5127_v28 = vadd.f32 %v9702_v11, %v4626_v3  ;;  %v4627_v38 = vadd.f32 %v15426_v47, %v14017_v8  ;;  %v15427_v11 = vld [vmem:[#allocation55_spill] sm:$0xff]  ;;  %v3900_v35 = vadd.f32 %v15428_v26, %v13945_v29  ;;  %v15436_v47 = vld [vmem:[#allocation34_spill] sm:$0xff] }
 0x477   : > { %v14123_v12 = vadd.f32 %v5197_v42, %v5138_v37  ;;  %v5141_v18 = vmax.f32 %v4899_v36, %v5125_v49  ;;  %v4898_v1 = vadd.f32 %v4851_v60, %v4397_v32  ;;  %v10180_v50 = vpack.i.bf16 %v5265_v57, %v5264_v2  ;;  %v15431_v32 = vld [vmem:[#allocation7_spill] sm:$0xff] }
 0x478   : > { %v5267_v17 = vmax.f32 %v14114_v55, 0.0  ;;  %v9654_v19 = vpop.f32.mrf.mxu0  ;;  %v4630_v3 = vadd.f32 %v15427_v11, %v14020_v44  ;;  %v4399_v20 = vadd.f32 %v13929_v0, %v3898_v23  ;;  %v4402_v34 = vadd.f32 %v13957_v41, %v3901_v30  ;;  %v15430_v44 = vld [vmem:[#allocation59_spill] sm:$0xff]  ;;  %v9708_v0 = vpop.f32.mrf.mxu1  ;;  %v15432_v23 = vld [vmem:[#allocation73_spill] sm:$0xff] }
 0x479   : > { %v5266_v15 = vmax.f32 %v14123_v12, 0.0  ;;  %v14133_v42 = vadd.f32 %v5212_v59, %v5141_v18  ;;  %v5140_v56 = vmax.f32 %v4898_v1, %v5124_v16  ;;  %v4901_v13 = vadd.f32 %v9654_v19, %v4400_v63  ;;  %10181 = vrot.lane.b32.xlu1 %v10180_v50, %s10683_s19  ;;  %v15433_v16 = vld [vmem:[#allocation60_spill] sm:$0xff]  ;;  %v15435_v50 = vld [vmem:[#allocation58_spill] sm:$0xff] }
 0x47a   : > { %v4861_v6 = vpop.f32.mrf.mxu0  ;;  %v3903_v10 = vadd.f32 %v15430_v44, %v15429_v21  ;;  %v5126_v29 = vadd.f32 %v5087_v22, %v14075_v40  ;;  %v5129_v25 = vadd.f32 %v9705_v54, %v4628_v46  ;;  %v4401_v37 = vadd.f32 %v15431_v32, %v3900_v35  ;;  %v5227_v46 = vpop.permute.xlu1 %5226  ;;  %v15434_v54 = vld [vmem:[#allocation19_spill] sm:$0xff] }
 0x47b   : > { %v10185_v59 = vpack.i.bf16 %v5267_v17, %v5266_v15  ;;  %v14148_v4 = vadd.f32 %v5207_v7, %v5140_v56  ;;  %v5143_v8 = vmax.f32 %v4901_v13, %v5127_v28  ;;  %v4900_v49 = vadd.f32 %v4861_v6, %v4399_v20  ;;  %v5232_v7 = vpop.permute.xlu0 %5231  ;;  %v5107_v13 = vpop.f32.mrf.mxu1 }
 0x47c   : > { %v9657_v39 = vpop.f32.mrf.mxu0  ;;  %v5269_v41 = vmax.f32 %v14133_v42, 0.0  ;;  %v3902_v60 = vadd.f32 %v15433_v16, %v15432_v23  ;;  %v5128_v63 = vadd.f32 %v5097_v5, %v4627_v38  ;;  %v4404_v1 = vadd.f32 %v15434_v54, %v3903_v10 }
 0x47d   : > { %v5268_v36 = vmax.f32 %v14148_v4, 0.0  ;;  %v4903_v53 = vadd.f32 %v9657_v39, %v4402_v34  ;;  %10186 = vrot.lane.b32.xlu0 %v10185_v59, %s10683_s19  ;;  %v14159_v18 = vadd.f32 %v5222_v27, %v5143_v8  ;;  %v5142_v40 = vmax.f32 %v4900_v49, %v5126_v29 }
 0x47e   : > { %v4871_v22 = vpop.f32.mrf.mxu0  ;;  %v4629_v19 = vadd.f32 %v15435_v50, %v14036_v58  ;;  %v5131_v56 = vadd.f32 %v9708_v0, %v4630_v3  ;;  %v4403_v38 = vadd.f32 %v15436_v47, %v3902_v60  ;;  %v5237_v0 = vpop.permute.xlu1 %5236 }
 0x47f   : > { %v10190_v52 = vpack.i.bf16 %v5269_v41, %v5268_v36  ;;  %v5145_v30 = vmax.f32 %v4903_v53, %v5129_v25  ;;  %v4902_v28 = vadd.f32 %v4871_v22, %v4401_v37  ;;  %v14168_v5 = vadd.f32 %v5217_v61, %v5142_v40  ;;  %v5242_v8 = vpop.permute.xlu0 %5241 }
 0x480   : > { %v9660_v27 = vpop.f32.mrf.mxu0  ;;  %v5271_v20 = vmax.f32 %v14159_v18, 0.0  ;;  %v5130_v59 = vadd.f32 %v5107_v13, %v4629_v19 }
 0x481   : > { %v14171_v11 = vadd.f32 %v5232_v7, %v5145_v30  ;;  %v5144_v26 = vmax.f32 %v4902_v28, %v5128_v63  ;;  %v4905_v35 = vadd.f32 %v9660_v27, %v4404_v1  ;;  %10191 = vrot.lane.b32.xlu1 %v10190_v52, %s10683_s19  ;;  %v5270_v6 = vmax.f32 %v14168_v5, 0.0 }
 0x482   : > { %v4881_v34 = vpop.f32.mrf.mxu0 }
 0x483   : > { %v14176_v58 = vadd.f32 %v5227_v46, %v5144_v26  ;;  %v5147_v3 = vmax.f32 %v4905_v35, %v5131_v56  ;;  %v4904_v61 = vadd.f32 %v4881_v34, %v4403_v38  ;;  %v10195_v21 = vpack.i.bf16 %v5271_v20, %v5270_v6 }
 0x484   : > { %v5273_v44 = vmax.f32 %v14171_v11, 0.0 }
 0x485   : > { %v5272_v10 = vmax.f32 %v14176_v58, 0.0  ;;  %v14184_v29 = vadd.f32 %v5242_v8, %v5147_v3  ;;  %v5146_v25 = vmax.f32 %v4904_v61, %v5130_v59  ;;  %10196 = vrot.lane.b32.xlu0 %v10195_v21, %s10683_s19 }
 0x487   : > { %v10200_v49 = vpack.i.bf16 %v5273_v44, %v5272_v10  ;;  %v14191_v39 = vadd.f32 %v5237_v0, %v5146_v25  ;;  %v5275_v32 = vmax.f32 %v14184_v29, 0.0  ;;  %v5387_v29 = vld [vmem:[%s15190_s7 + $0x78] sm:$0xff] }
 0x488   : > { %9765 = vmatprep.subr.mxu1 %v5387_v29 }
 0x489   : > { %v5274_v37 = vmax.f32 %v14191_v39, 0.0  ;;  %10201 = vrot.lane.b32.xlu1 %v10200_v49, %s10683_s19  ;;  %9766 = vmatpush3.msra.mxu1 %v5387_v29  ;;  %v8010_v39 = vld [vmem:[%s15190_s7 + $0xf0] sm:$0xff] }
 0x48b   : > { %v10205_v53 = vpack.i.bf16 %v5275_v32, %v5274_v37 }
 0x48d   : > { %10206 = vrot.lane.b32.xlu0 %v10205_v53, %s10683_s19  ;;  %s10689_s19 = smov 112  }
 0x4e3   : > { %v10172_v7 = vpop.permute.xlu1 %10171 }
 0x4e4   : > { %v10174_v23 = vunpack.i.h.bf16 %v10172_v7  ;;  %v10173_v16 = vunpack.i.l.bf16 %v10172_v7 }
 0x4e6   : > { %v5341_v60 = vsel %vm1325_vm2, %v10174_v23, 0.0  ;;  %v5340_v63 = vsel %vm1325_vm2, %v10173_v16, 0.0 }
 0x4e7   : > { %v14205_v40 = vmax.f32 %v5261_v33, %v5341_v60  ;;  %v14209_v22 = vmax.f32 %v5260_v45, %v5340_v63  ;;  %v10177_v46 = vpop.permute.xlu0 %10176 }
 0x4e8   : > { %v10179_v54 = vunpack.i.h.bf16 %v10177_v46  ;;  %v10178_v1 = vunpack.i.l.bf16 %v10177_v46  ;;  %v5385_v46 = vld [vmem:[%s15190_s7 + $0x68] sm:$0xff] }
 0x4e9   : > { %v10210_v52 = vpack.i.bf16 %v14205_v40, %v14209_v22 }
 0x4ea   : > { %v5343_v30 = vsel %vm1325_vm2, %v10179_v54, 0.0  ;;  %v5342_v28 = vsel %vm1325_vm2, %v10178_v1, 0.0  ;;  %v8008_v54 = vld [vmem:[%s15190_s7 + $0xe0] sm:$0xff] }
 0x4eb   : > { %v14217_v50 = vmax.f32 %v5263_v62, %v5343_v30  ;;  %v14221_v51 = vmax.f32 %v5262_v31, %v5342_v28  ;;  %10211 = vrot.lane.b32.xlu1 %v10210_v52, %s10685_s18  ;;  %10226 = vrot.lane.b32.xlu0 %v10210_v52, %s10689_s19  ;;  %v10182_v24 = vpop.permute.xlu1 %10181  ;;  %v5384_v1 = vld [vmem:[%s15190_s7 + $0x60] sm:$0xff]  ;;  %v5383_v30 = vld [vmem:[%s15190_s7 + $0x58] sm:$0xff] }
 0x4ec   : > { %v10184_v45 = vunpack.i.h.bf16 %v10182_v24  ;;  %v10183_v19 = vunpack.i.l.bf16 %v10182_v24  ;;  %v8006_v28 = vld [vmem:[%s15190_s7 + $0xd0] sm:$0xff] }
 0x4ed   : > { %v10230_v33 = vpack.i.bf16 %v14217_v50, %v14221_v51  ;;  %v5382_v24 = vld [vmem:[%s15190_s7 + $0x50] sm:$0xff] }
 0x4ee   : > { %v5345_v43 = vsel %vm1325_vm2, %v10184_v45, 0.0  ;;  %v5344_v62 = vsel %vm1325_vm2, %v10183_v19, 0.0  ;;  %v5381_v45 = vld [vmem:[%s15190_s7 + $0x48] sm:$0xff]  ;;  %v8004_v19 = vld [vmem:[%s15190_s7 + $0xc0] sm:$0xff] }
 0x4ef   : > { %10216 = vrot.lane.b32.xlu1 %v10210_v52, %s10688_s16  ;;  %v10187_v48 = vpop.permute.xlu0 %10186  ;;  %10231 = vrot.lane.b32.xlu0 %v10230_v33, %s10685_s18  ;;  %v14235_v13 = vmax.f32 %v5265_v57, %v5345_v43  ;;  %v14239_v27 = vmax.f32 %v5264_v2, %v5344_v62  ;;  %v8003_v43 = vld [vmem:[%s15190_s7 + $0xb8] sm:$0xff] }
 0x4f0   : > { %v10189_v31 = vunpack.i.h.bf16 %v10187_v48  ;;  %v10188_v56 = vunpack.i.l.bf16 %v10187_v48  ;;  %v5380_v48 = vld [vmem:[%s15190_s7 + $0x40] sm:$0xff]  ;;  %v5379_v62 = vld [vmem:[%s15190_s7 + $0x38] sm:$0xff] }
 0x4f1   : > { %v10250_v14 = vpack.i.bf16 %v14235_v13, %v14239_v27 }
 0x4f2   : > { %v5347_v47 = vsel %vm1325_vm2, %v10189_v31, 0.0  ;;  %v5346_v38 = vsel %vm1325_vm2, %v10188_v56, 0.0  ;;  %v8002_v31 = vld [vmem:[%s15190_s7 + $0xb0] sm:$0xff] }
 0x4f3   : > { %10221 = vrot.lane.b32.xlu1 %v10210_v52, %s10690_s24  ;;  %10236 = vrot.lane.b32.xlu0 %v10230_v33, %s10688_s16  ;;  %v14247_v26 = vmax.f32 %v5267_v17, %v5347_v47  ;;  %v14251_v9 = vmax.f32 %v5266_v15, %v5346_v38  ;;  %v10192_v57 = vpop.permute.xlu1 %10191  ;;  %v8007_v52 = vld [vmem:[%s15190_s7 + $0xd8] sm:$0xff]  ;;  %v5378_v56 = vld [vmem:[%s15190_s7 + $0x30] sm:$0xff] }
 0x4f4   : > { %v10194_v35 = vunpack.i.h.bf16 %v10192_v57  ;;  %v10193_v34 = vunpack.i.l.bf16 %v10192_v57  ;;  %v8001_v47 = vld [vmem:[%s15190_s7 + $0xa8] sm:$0xff]  ;;  %v5376_v57 = vld [vmem:[%s15190_s7 + $0x20] sm:$0xff] }
 0x4f5   : > { %v10270_v2 = vpack.i.bf16 %v14247_v26, %v14251_v9  ;;  %v5377_v38 = vld [vmem:[%s15190_s7 + $0x28] sm:$0xff] }
 0x4f6   : > { %v5349_v12 = vsel %vm1325_vm2, %v10194_v35, 0.0  ;;  %v5348_v17 = vsel %vm1325_vm2, %v10193_v34, 0.0  ;;  %v5375_v35 = vld [vmem:[%s15190_s7 + $0x18] sm:$0xff] }
 0x4f7   : > { %10241 = vrot.lane.b32.xlu1 %v10230_v33, %s10690_s24  ;;  %10246 = vrot.lane.b32.xlu0 %v10230_v33, %s10689_s19  ;;  %v10197_v55 = vpop.permute.xlu0 %10196  ;;  %v14267_v3 = vmax.f32 %v5269_v41, %v5349_v12  ;;  %v14271_v61 = vmax.f32 %v5268_v36, %v5348_v17  ;;  %v8005_v33 = vld [vmem:[%s15190_s7 + $0xc8] sm:$0xff] }
 0x4f8   : > { %v10199_v15 = vunpack.i.h.bf16 %v10197_v55  ;;  %v10198_v59 = vunpack.i.l.bf16 %v10197_v55 }
 0x4f9   : > { %v10290_v4 = vpack.i.bf16 %v14267_v3, %v14271_v61 }
 0x4fa   : > { %v5351_v8 = vsel %vm1325_vm2, %v10199_v15, 0.0  ;;  %v5350_v21 = vsel %vm1325_vm2, %v10198_v59, 0.0  ;;  %v7998_v59 = vld [vmem:[%s15190_s7 + $0x90] sm:$0xff] }
 0x4fb   : > { %10251 = vrot.lane.b32.xlu1 %v10250_v14, %s10685_s18  ;;  %10266 = vrot.lane.b32.xlu0 %v10250_v14, %s10689_s19  ;;  %v14279_v25 = vmax.f32 %v5271_v20, %v5351_v8  ;;  %v14283_v42 = vmax.f32 %v5270_v6, %v5350_v21  ;;  %v10202_v41 = vpop.permute.xlu1 %10201  ;;  %v5374_v8 = vld [vmem:[%s15190_s7 + $0x10] sm:$0xff] }
 0x4fc   : > { %v10204_v0 = vunpack.i.h.bf16 %v10202_v41  ;;  %v10203_v49 = vunpack.i.l.bf16 %v10202_v41 }
 0x4fd   : > { %v10310_v36 = vpack.i.bf16 %v14279_v25, %v14283_v42 }
 0x4fe   : > { %v5353_v5 = vsel %vm1325_vm2, %v10204_v0, 0.0  ;;  %v5352_v20 = vsel %vm1325_vm2, %v10203_v49, 0.0  ;;  %v5373_v0 = vld [vmem:[%s15190_s7 + $0x8] sm:$0xff] }
 0x4ff   : > { %10256 = vrot.lane.b32.xlu1 %v10250_v14, %s10688_s16  ;;  %10271 = vrot.lane.b32.xlu0 %v10270_v2, %s10685_s18  ;;  %v10207_v18 = vpop.permute.xlu0 %10206  ;;  %v14299_v7 = vmax.f32 %v5273_v44, %v5353_v5  ;;  %v14303_v23 = vmax.f32 %v5272_v10, %v5352_v20  ;;  %v8011_v10 = vld [vmem:[%s15190_s7 + $0xf8] sm:$0xff]  ;;  %v7996_v5 = vld [vmem:[%s15190_s7 + $0x80] sm:$0xff] }
 0x500   : > { %v10209_v6 = vunpack.i.h.bf16 %v10207_v18  ;;  %v10208_v53 = vunpack.i.l.bf16 %v10207_v18  ;;  %9709 = vmatprep.subr.mxu0 %v8011_v10  ;;  %v5372_v20 = vld [vmem:[%s15190_s7] sm:$0xff] }
 0x501   : > { %v10330_v58 = vpack.i.bf16 %v14299_v7, %v14303_v23  ;;  %9710 = vmatpush3.msra.mxu0 %v8011_v10 }
 0x502   : > { %v5355_v16 = vsel %vm1325_vm2, %v10209_v6, 0.0  ;;  %v5354_v60 = vsel %vm1325_vm2, %v10208_v53, 0.0  ;;  %9711 = vmatprep.subr.mxu0 %v8010_v39 }
 0x503   : > { %10261 = vrot.lane.b32.xlu1 %v10250_v14, %s10690_s24  ;;  %10276 = vrot.lane.b32.xlu0 %v10270_v2, %s10688_s16  ;;  %v14311_v63 = vmax.f32 %v5275_v32, %v5355_v16  ;;  %v14315_v11 = vmax.f32 %v5274_v37, %v5354_v60  ;;  %v5386_v32 = vld [vmem:[%s15190_s7 + $0x70] sm:$0xff]  ;;  %v8009_v37 = vld [vmem:[%s15190_s7 + $0xe8] sm:$0xff] }
 0x504   : > { %9767 = vmatprep.subr.mxu1 %v5386_v32  ;;  %9712 = vmatpush3.msra.mxu0 %v8010_v39  ;;  %v8000_v14 = vld [vmem:[%s15190_s7 + $0xa0] sm:$0xff] }
 0x505   : > { %v10350_v44 = vpack.i.bf16 %v14311_v63, %v14315_v11  ;;  %9768 = vmatpush3.msra.mxu1 %v5386_v32  ;;  %9713 = vmatprep.subr.mxu0 %v8009_v37 }
 0x506   : > { %9769 = vmatprep.subr.mxu1 %v5385_v46  ;;  %9714 = vmatpush3.msra.mxu0 %v8009_v37 }
 0x507   : > { %10281 = vrot.lane.b32.xlu1 %v10270_v2, %s10690_s24  ;;  %10286 = vrot.lane.b32.xlu0 %v10270_v2, %s10689_s19  ;;  %v7999_v2 = vld [vmem:[%s15190_s7 + $0x98] sm:$0xff] }
 0x508   : > { %9770 = vmatpush3.msra.mxu1 %v5385_v46  ;;  %9715 = vmatprep.subr.mxu0 %v8008_v54 }
 0x509   : > { %9771 = vmatprep.subr.mxu1 %v5384_v1  ;;  %9716 = vmatpush3.msra.mxu0 %v8008_v54 }
 0x50a   : > { %9772 = vmatpush3.msra.mxu1 %v5384_v1  ;;  %9717 = vmatprep.subr.mxu0 %v8007_v52 }
 0x50b   : > { %10291 = vrot.lane.b32.xlu1 %v10290_v4, %s10685_s18  ;;  %10306 = vrot.lane.b32.xlu0 %v10290_v4, %s10689_s19 }
 0x50c   : > { %9773 = vmatprep.subr.mxu1 %v5383_v30  ;;  %9718 = vmatpush3.msra.mxu0 %v8007_v52 }
 0x50d   : > { %9774 = vmatpush3.msra.mxu1 %v5383_v30  ;;  %9719 = vmatprep.subr.mxu0 %v8006_v28 }
 0x50e   : > { %9775 = vmatprep.subr.mxu1 %v5382_v24  ;;  %9720 = vmatpush3.msra.mxu0 %v8006_v28 }
 0x50f   : > { %10296 = vrot.lane.b32.xlu1 %v10290_v4, %s10688_s16  ;;  %10311 = vrot.lane.b32.xlu0 %v10310_v36, %s10685_s18 }
 0x510   : > { %9776 = vmatpush3.msra.mxu1 %v5382_v24  ;;  %9721 = vmatprep.subr.mxu0 %v8005_v33 }
 0x511   : > { %9777 = vmatprep.subr.mxu1 %v5381_v45  ;;  %9722 = vmatpush3.msra.mxu0 %v8005_v33 }
 0x512   : > { %9778 = vmatpush3.msra.mxu1 %v5381_v45  ;;  %9723 = vmatprep.subr.mxu0 %v8004_v19 }
 0x513   : > { %10301 = vrot.lane.b32.xlu1 %v10290_v4, %s10690_s24  ;;  %10316 = vrot.lane.b32.xlu0 %v10310_v36, %s10688_s16 }
 0x514   : > { %9779 = vmatprep.subr.mxu1 %v5380_v48  ;;  %9724 = vmatpush3.msra.mxu0 %v8004_v19 }
 0x515   : > { %9780 = vmatpush3.msra.mxu1 %v5380_v48  ;;  %9725 = vmatprep.subr.mxu0 %v8003_v43 }
 0x516   : > { %9781 = vmatprep.subr.mxu1 %v5379_v62  ;;  %9726 = vmatpush3.msra.mxu0 %v8003_v43 }
 0x517   : > { %10321 = vrot.lane.b32.xlu1 %v10310_v36, %s10690_s24  ;;  %10326 = vrot.lane.b32.xlu0 %v10310_v36, %s10689_s19  ;;  %v7997_v36 = vld [vmem:[%s15190_s7 + $0x88] sm:$0xff] }
 0x518   : > { %9782 = vmatpush3.msra.mxu1 %v5379_v62  ;;  %9727 = vmatprep.subr.mxu0 %v8002_v31 }
 0x519   : > { %9783 = vmatprep.subr.mxu1 %v5378_v56  ;;  %9728 = vmatpush3.msra.mxu0 %v8002_v31 }
 0x51a   : > { %9784 = vmatpush3.msra.mxu1 %v5378_v56  ;;  %9729 = vmatprep.subr.mxu0 %v8001_v47 }
 0x51b   : > { %10331 = vrot.lane.b32.xlu1 %v10330_v58, %s10685_s18  ;;  %10346 = vrot.lane.b32.xlu0 %v10330_v58, %s10689_s19 }
 0x51c   : > { %9785 = vmatprep.subr.mxu1 %v5377_v38  ;;  %9730 = vmatpush3.msra.mxu0 %v8001_v47 }
 0x51d   : > { %9786 = vmatpush3.msra.mxu1 %v5377_v38  ;;  %9731 = vmatprep.subr.mxu0 %v8000_v14 }
 0x51e   : > { %9787 = vmatprep.subr.mxu1 %v5376_v57  ;;  %9732 = vmatpush3.msra.mxu0 %v8000_v14 }
 0x51f   : > { %10336 = vrot.lane.b32.xlu1 %v10330_v58, %s10688_s16  ;;  %10351 = vrot.lane.b32.xlu0 %v10350_v44, %s10685_s18 }
 0x520   : > { %9788 = vmatpush3.msra.mxu1 %v5376_v57  ;;  %9733 = vmatprep.subr.mxu0 %v7999_v2 }
 0x521   : > { %9789 = vmatprep.subr.mxu1 %v5375_v35  ;;  %9734 = vmatpush3.msra.mxu0 %v7999_v2 }
 0x522   : > { %9790 = vmatpush3.msra.mxu1 %v5375_v35  ;;  %9735 = vmatprep.subr.mxu0 %v7998_v59 }
 0x523   : > { %10341 = vrot.lane.b32.xlu1 %v10330_v58, %s10690_s24  ;;  %10356 = vrot.lane.b32.xlu0 %v10350_v44, %s10688_s16 }
 0x524   : > { %9791 = vmatprep.subr.mxu1 %v5374_v8  ;;  %9736 = vmatpush3.msra.mxu0 %v7998_v59 }
 0x525   : > { %9792 = vmatpush3.msra.mxu1 %v5374_v8  ;;  %9737 = vmatprep.subr.mxu0 %v7997_v36 }
 0x526   : > { %9793 = vmatprep.subr.mxu1 %v5373_v0  ;;  %9738 = vmatpush3.msra.mxu0 %v7997_v36 }
 0x527   : > { %10361 = vrot.lane.b32.xlu0 %v10350_v44, %s10690_s24  ;;  %9794 = vmatpush3.msra.mxu1 %v5373_v0 }
 0x528   : > { %9739 = vmatprep.subr.mxu0 %v7996_v5  ;;  %9795 = vmatprep.subr.mxu1 %v5372_v20 }
 0x529   : > { %9740 = vmatpush3.msra.mxu0 %v7996_v5  ;;  %9796 = vmatpush3.msra.mxu1 %v5372_v20 }
 0x52b   : > { %10366 = vrot.lane.b32.xlu0 %v10350_v44, %s10689_s19  ;;  %s7299_s19 = sshll.u32 %s15474_s23, 3 }
 0x52c   : > { %s15139_s25 = scalar_lea.vmem %s15196_s13, %s7299_s19 }
 0x55d   : > { %v10212_v34 = vpop.permute.xlu1 %10211  ;;  %v14407_v55 = vpop.permute.xlu0 %10226 }
 0x55e   : > { %v10214_v12 = vunpack.i.h.bf16 %v10212_v34  ;;  %v10213_v17 = vunpack.i.l.bf16 %v10212_v34 }
 0x560   : > { %v5452_v15 = vsel %vm2167_vm4, %v10213_v17, 0.0  ;;  %v5453_v49 = vsel %vm2167_vm4, %v10214_v12, 0.0 }
 0x561   : > { %v10370_v21 = vpack.i.bf16 %v14209_v22, %v5452_v15  ;;  %v10217_v4 = vpop.permute.xlu1 %10216  ;;  %v10232_v41 = vpop.permute.xlu0 %10231  ;;  %v10372_v6 = vpack.i.bf16 %v14205_v40, %v5453_v49 }
 0x562   : > { %v10233_v18 = vunpack.i.l.bf16 %v10232_v41  ;;  %v10218_v22 = vunpack.i.l.bf16 %v10217_v4  ;;  %v10234_v60 = vunpack.i.h.bf16 %v10232_v41  ;;  %v10219_v29 = vunpack.i.h.bf16 %v10217_v4 }
 0x563   : > { %10371 = vxpose.xlu1.b32.start [1/16] %v10370_v21, 128 }
 0x564   : > { %v5454_v58 = vsel %vm2167_vm4, %v10233_v18, 0.0  ;;  %v5887_v39 = vsel %vm4667_vm6, %v10218_v22, 0.0  ;;  %v5455_v1 = vsel %vm2167_vm4, %v10234_v60, 0.0  ;;  %v5888_v28 = vsel %vm4667_vm6, %v10219_v29, 0.0 }
 0x565   : > { %v10222_v53 = vpop.permute.xlu1 %10221  ;;  %v10237_v16 = vpop.permute.xlu0 %10236  ;;  %v10374_v40 = vpack.i.bf16 %v14221_v51, %v5454_v58  ;;  %v10376_v33 = vpack.i.bf16 %v14217_v50, %v5455_v1 }
 0x566   : > { %v10224_v44 = vunpack.i.h.bf16 %v10222_v53  ;;  %v10223_v10 = vunpack.i.l.bf16 %v10222_v53  ;;  %v10238_v24 = vunpack.i.l.bf16 %v10237_v16  ;;  %v10239_v56 = vunpack.i.h.bf16 %v10237_v16 }
 0x567   : > { %10373 = vxpose.xlu1.b32.cont [2/16] %v10372_v6, 128 }
 0x568   : > { %v6162_v32 = vsel %vm6161_vm7, %v10223_v10, 0.0  ;;  %v6163_v52 = vsel %vm6161_vm7, %v10224_v44, 0.0  ;;  %v5889_v47 = vsel %vm4667_vm6, %v10238_v24, 0.0  ;;  %v5890_v17 = vsel %vm4667_vm6, %v10239_v56, 0.0 }
 0x569   : > { %v10482_v37 = vpack.i.bf16 %v6162_v32, %v5887_v39  ;;  %v10242_v46 = vpop.permute.xlu1 %10241  ;;  %v14435_v54 = vpop.permute.xlu0 %10246  ;;  %v10484_v45 = vpack.i.bf16 %v6163_v52, %v5888_v28  ;;  %v14474_v28 = vld [vmem:[%s15190_s7 + $0x1f8] sm:$0xff] }
 0x56a   : > { %v10243_v30 = vunpack.i.l.bf16 %v10242_v46  ;;  %v10244_v51 = vunpack.i.h.bf16 %v10242_v46  ;;  %9877 = vmatprep.subr.mxu1 %v14474_v28 }
 0x56b   : > { %10483 = vxpose.xlu0.b32.start [1/16] %v10482_v37, 128  ;;  %10375 = vxpose.xlu1.b32.cont [3/16] %v10374_v40, 128 }
 0x56c   : > { %v6164_v43 = vsel %vm6161_vm7, %v10243_v30, 0.0  ;;  %v6165_v35 = vsel %vm6161_vm7, %v10244_v51, 0.0 }
 0x56d   : > { %v10252_v19 = vpop.permute.xlu1 %10251  ;;  %v14441_v48 = vpop.permute.xlu0 %10266  ;;  %v10486_v14 = vpack.i.bf16 %v6164_v43, %v5889_v47  ;;  %v10488_v59 = vpack.i.bf16 %v6165_v35, %v5890_v17 }
 0x56e   : > { %v10254_v62 = vunpack.i.h.bf16 %v10252_v19  ;;  %v10253_v31 = vunpack.i.l.bf16 %v10252_v19 }
 0x56f   : > { %10485 = vxpose.xlu0.b32.cont [2/16] %v10484_v45, 128  ;;  %10377 = vxpose.xlu1.b32.cont [4/16] %v10376_v33, 128 }
 0x570   : > { %v5456_v38 = vsel %vm2167_vm4, %v10253_v31, 0.0  ;;  %v5457_v34 = vsel %vm2167_vm4, %v10254_v62, 0.0 }
 0x571   : > { %v10378_v57 = vpack.i.bf16 %v14239_v27, %v5456_v38  ;;  %v10257_v50 = vpop.permute.xlu1 %10256  ;;  %v10272_v2 = vpop.permute.xlu0 %10271  ;;  %v10380_v8 = vpack.i.bf16 %v14235_v13, %v5457_v34 }
 0x572   : > { %v10273_v12 = vunpack.i.l.bf16 %v10272_v2  ;;  %v10258_v15 = vunpack.i.l.bf16 %v10257_v50  ;;  %v10274_v41 = vunpack.i.h.bf16 %v10272_v2  ;;  %v10259_v49 = vunpack.i.h.bf16 %v10257_v50 }
 0x573   : > { %10487 = vxpose.xlu0.b32.cont [3/16] %v10486_v14, 128  ;;  %10379 = vxpose.xlu1.b32.cont [5/16] %v10378_v57, 128 }
 0x574   : > { %v5458_v27 = vsel %vm2167_vm4, %v10273_v12, 0.0  ;;  %v5891_v18 = vsel %vm4667_vm6, %v10258_v15, 0.0  ;;  %v5459_v13 = vsel %vm2167_vm4, %v10274_v41, 0.0  ;;  %v5892_v58 = vsel %vm4667_vm6, %v10259_v49, 0.0 }
 0x575   : > { %v10262_v21 = vpop.permute.xlu1 %10261  ;;  %v10277_v4 = vpop.permute.xlu0 %10276  ;;  %v10382_v5 = vpack.i.bf16 %v14251_v9, %v5458_v27  ;;  %v10384_v10 = vpack.i.bf16 %v14247_v26, %v5459_v13  ;;  %v14469_v26 = vld [vmem:[%s15190_s7 + $0x178] sm:$0xff] }
 0x576   : > { %v10264_v36 = vunpack.i.h.bf16 %v10262_v21  ;;  %v10263_v0 = vunpack.i.l.bf16 %v10262_v21  ;;  %v10278_v44 = vunpack.i.l.bf16 %v10277_v4  ;;  %v10279_v1 = vunpack.i.h.bf16 %v10277_v4  ;;  %9821 = vmatprep.subr.mxu0 %v14469_v26 }
 0x577   : > { %10489 = vxpose.xlu0.b32.cont [4/16] %v10488_v59, 128  ;;  %10381 = vxpose.xlu1.b32.cont [6/16] %v10380_v8, 128 }
 0x578   : > { %v6166_v22 = vsel %vm6161_vm7, %v10263_v0, 0.0  ;;  %v6167_v16 = vsel %vm6161_vm7, %v10264_v36, 0.0  ;;  %v5893_v52 = vsel %vm4667_vm6, %v10278_v44, 0.0  ;;  %v5894_v31 = vsel %vm4667_vm6, %v10279_v1, 0.0 }
 0x579   : > { %v10490_v20 = vpack.i.bf16 %v6166_v22, %v5891_v18  ;;  %v10282_v6 = vpop.permute.xlu1 %10281  ;;  %v14455_v53 = vpop.permute.xlu0 %10286  ;;  %v10492_v29 = vpack.i.bf16 %v6167_v16, %v5892_v58 }
 0x57a   : > { %v10283_v60 = vunpack.i.l.bf16 %v10282_v6  ;;  %v10284_v9 = vunpack.i.h.bf16 %v10282_v6 }
 0x57b   : > { %10491 = vxpose.xlu0.b32.cont [5/16] %v10490_v20, 128  ;;  %10383 = vxpose.xlu1.b32.cont [7/16] %v10382_v5, 128 }
 0x57c   : > { %v6168_v40 = vsel %vm6161_vm7, %v10283_v60, 0.0  ;;  %v6169_v51 = vsel %vm6161_vm7, %v10284_v9, 0.0 }
 0x57d   : > { %v10292_v39 = vpop.permute.xlu1 %10291  ;;  %v14461_v32 = vpop.permute.xlu0 %10306  ;;  %v10494_v24 = vpack.i.bf16 %v6168_v40, %v5893_v52  ;;  %v10496_v47 = vpack.i.bf16 %v6169_v51, %v5894_v31 }
 0x57e   : > { %v10294_v37 = vunpack.i.h.bf16 %v10292_v39  ;;  %v10293_v46 = vunpack.i.l.bf16 %v10292_v39 }
 0x57f   : > { %10493 = vxpose.xlu0.b32.cont [6/16] %v10492_v29, 128  ;;  %10385 = vxpose.xlu1.b32.cont [8/16] %v10384_v10, 128 }
 0x580   : > { %v5460_v30 = vsel %vm2167_vm4, %v10293_v46, 0.0  ;;  %v5461_v43 = vsel %vm2167_vm4, %v10294_v37, 0.0 }
 0x581   : > { %v10386_v33 = vpack.i.bf16 %v14271_v61, %v5460_v30  ;;  %v10297_v45 = vpop.permute.xlu1 %10296  ;;  %v10312_v19 = vpop.permute.xlu0 %10311  ;;  %v10388_v38 = vpack.i.bf16 %v14267_v3, %v5461_v43 }
 0x582   : > { %v10313_v62 = vunpack.i.l.bf16 %v10312_v19  ;;  %v10298_v56 = vunpack.i.l.bf16 %v10297_v45  ;;  %v10314_v57 = vunpack.i.h.bf16 %v10312_v19  ;;  %v10299_v34 = vunpack.i.h.bf16 %v10297_v45 }
 0x583   : > { %10495 = vxpose.xlu0.b32.cont [7/16] %v10494_v24, 128  ;;  %10387 = vxpose.xlu1.b32.cont [9/16] %v10386_v33, 128 }
 0x584   : > { %v5462_v50 = vsel %vm2167_vm4, %v10313_v62, 0.0  ;;  %v5895_v12 = vsel %vm4667_vm6, %v10298_v56, 0.0  ;;  %v5463_v3 = vsel %vm2167_vm4, %v10314_v57, 0.0  ;;  %v5896_v27 = vsel %vm4667_vm6, %v10299_v34, 0.0 }
 0x585   : > { %v10302_v61 = vpop.permute.xlu1 %10301  ;;  %v10317_v14 = vpop.permute.xlu0 %10316  ;;  %v10390_v15 = vpack.i.bf16 %v14283_v42, %v5462_v50  ;;  %v10392_v0 = vpack.i.bf16 %v14279_v25, %v5463_v3 }
 0x586   : > { %v10304_v2 = vunpack.i.h.bf16 %v10302_v61  ;;  %v10303_v35 = vunpack.i.l.bf16 %v10302_v61  ;;  %v10318_v36 = vunpack.i.l.bf16 %v10317_v14  ;;  %v10319_v13 = vunpack.i.h.bf16 %v10317_v14 }
 0x587   : > { %10497 = vxpose.xlu0.b32.cont [8/16] %v10496_v47, 128  ;;  %10389 = vxpose.xlu1.b32.cont [10/16] %v10388_v38, 128 }
 0x588   : > { %v6170_v17 = vsel %vm6161_vm7, %v10303_v35, 0.0  ;;  %v6171_v4 = vsel %vm6161_vm7, %v10304_v2, 0.0  ;;  %v5897_v16 = vsel %vm4667_vm6, %v10318_v36, 0.0  ;;  %v5898_v40 = vsel %vm4667_vm6, %v10319_v13, 0.0 }
 0x589   : > { %v10498_v59 = vpack.i.bf16 %v6170_v17, %v5895_v12  ;;  %v10322_v8 = vpop.permute.xlu1 %10321  ;;  %v14487_v21 = vpop.permute.xlu0 %10326  ;;  %v10500_v49 = vpack.i.bf16 %v6171_v4, %v5896_v27  ;;  %v10228_v2 = vunpack.i.l.bf16 %v14407_v55  ;;  %v10248_v4 = vunpack.i.l.bf16 %v14435_v54 }
 0x58a   : > { %v10323_v41 = vunpack.i.l.bf16 %v10322_v8  ;;  %v10324_v42 = vunpack.i.h.bf16 %v10322_v8  ;;  %v10249_v27 = vunpack.i.h.bf16 %v14435_v54  ;;  %v10289_v54 = vunpack.i.h.bf16 %v14455_v53 }
 0x58b   : > { %10499 = vxpose.xlu0.b32.cont [9/16] %v10498_v59, 128  ;;  %10391 = vxpose.xlu1.b32.cont [11/16] %v10390_v15, 128  ;;  %v10229_v15 = vunpack.i.h.bf16 %v14407_v55  ;;  %v6437_v8 = vsel %vm6436_vm8, %v10228_v2, 0.0  ;;  %v6439_v36 = vsel %vm6436_vm8, %v10248_v4, 0.0  ;;  %v10268_v55 = vunpack.i.l.bf16 %v14441_v48  ;;  %v8020_v4 = vld [vmem:[%s15190_s7 + $0x140] sm:$0xff] }
 0x58c   : > { %v6172_v5 = vsel %vm6161_vm7, %v10323_v41, 0.0  ;;  %v6173_v29 = vsel %vm6161_vm7, %v10324_v42, 0.0  ;;  %v10288_v42 = vunpack.i.l.bf16 %v14455_v53  ;;  %v6444_v13 = vsel %vm6436_vm8, %v10289_v54, 0.0 }
 0x58d   : > { %v10332_v18 = vpop.permute.xlu1 %10331  ;;  %v14493_v22 = vpop.permute.xlu0 %10346  ;;  %v10502_v58 = vpack.i.bf16 %v6172_v5, %v5897_v16  ;;  %v10504_v46 = vpack.i.bf16 %v6173_v29, %v5898_v40  ;;  %v6438_v41 = vsel %vm6436_vm8, %v10229_v15, 0.0  ;;  %v10329_v53 = vunpack.i.h.bf16 %v14487_v21  ;;  %v8037_v15 = vld [vmem:[%s15190_s7 + $0x1c8] sm:$0xff] }
 0x58e   : > { %v10334_v20 = vunpack.i.h.bf16 %v10332_v18  ;;  %v10333_v6 = vunpack.i.l.bf16 %v10332_v18  ;;  %v6441_v18 = vsel %vm6436_vm8, %v10268_v55, 0.0 }
 0x58f   : > { %10501 = vxpose.xlu0.b32.cont [10/16] %v10500_v49, 128  ;;  %10393 = vxpose.xlu1.b32.cont [12/16] %v10392_v0, 128  ;;  %v6440_v0 = vsel %vm6436_vm8, %v10249_v27, 0.0  ;;  %v10269_v49 = vunpack.i.h.bf16 %v14441_v48  ;;  %v10309_v48 = vunpack.i.h.bf16 %v14461_v32 }
 0x590   : > { %v5464_v60 = vsel %vm2167_vm4, %v10333_v6, 0.0  ;;  %v5465_v39 = vsel %vm2167_vm4, %v10334_v20, 0.0  ;;  %v6443_v20 = vsel %vm6436_vm8, %v10288_v42, 0.0  ;;  %v10308_v6 = vunpack.i.l.bf16 %v14461_v32  ;;  %v8018_v42 = vld [vmem:[%s15190_s7 + $0x130] sm:$0xff] }
 0x591   : > { %v10394_v44 = vpack.i.bf16 %v14303_v23, %v5464_v60  ;;  %v10337_v25 = vpop.permute.xlu1 %10336  ;;  %v10352_v10 = vpop.permute.xlu0 %10351  ;;  %v10396_v1 = vpack.i.bf16 %v14299_v7, %v5465_v39  ;;  %v6442_v5 = vsel %vm6436_vm8, %v10269_v49, 0.0  ;;  %v10328_v60 = vunpack.i.l.bf16 %v14487_v21  ;;  %v8019_v49 = vld [vmem:[%s15190_s7 + $0x138] sm:$0xff] }
 0x592   : > { %v10353_v9 = vunpack.i.l.bf16 %v10352_v10  ;;  %v10338_v37 = vunpack.i.l.bf16 %v10337_v25  ;;  %v10354_v24 = vunpack.i.h.bf16 %v10352_v10  ;;  %v10339_v19 = vunpack.i.h.bf16 %v10337_v25 }
 0x593   : > { %10503 = vxpose.xlu0.b32.cont [11/16] %v10502_v58, 128  ;;  %10395 = vxpose.xlu1.b32.cont [13/16] %v10394_v44, 128  ;;  %v6445_v16 = vsel %vm6436_vm8, %v10308_v6, 0.0  ;;  %v6446_v58 = vsel %vm6436_vm8, %v10309_v48, 0.0  ;;  %v6447_v44 = vsel %vm6436_vm8, %v10328_v60, 0.0  ;;  %v10348_v25 = vunpack.i.l.bf16 %v14493_v22  ;;  %v8017_v48 = vld [vmem:[%s15190_s7 + $0x128] sm:$0xff] }
 0x594   : > { %v5466_v23 = vsel %vm2167_vm4, %v10353_v9, 0.0  ;;  %v5899_v51 = vsel %vm4667_vm6, %v10338_v37, 0.0  ;;  %v5467_v7 = vsel %vm2167_vm4, %v10354_v24, 0.0  ;;  %v5900_v61 = vsel %vm4667_vm6, %v10339_v19, 0.0 }
 0x595   : > { %v10342_v52 = vpop.permute.xlu1 %10341  ;;  %v10357_v30 = vpop.permute.xlu0 %10356  ;;  %v10398_v62 = vpack.i.bf16 %v14315_v11, %v5466_v23  ;;  %v10400_v57 = vpack.i.bf16 %v14311_v63, %v5467_v7  ;;  %v6448_v10 = vsel %vm6436_vm8, %v10329_v53, 0.0  ;;  %v10349_v32 = vunpack.i.h.bf16 %v14493_v22 }
 0x596   : > { %v10344_v33 = vunpack.i.h.bf16 %v10342_v52  ;;  %v10343_v45 = vunpack.i.l.bf16 %v10342_v52  ;;  %v10358_v14 = vunpack.i.l.bf16 %v10357_v30  ;;  %v10359_v34 = vunpack.i.h.bf16 %v10357_v30 }
 0x597   : > { %10505 = vxpose.xlu0.b32.cont [12/16] %v10504_v46, 128  ;;  %10397 = vxpose.xlu1.b32.cont [14/16] %v10396_v1, 128  ;;  %v6449_v29 = vsel %vm6436_vm8, %v10348_v25, 0.0  ;;  %v6450_v40 = vsel %vm6436_vm8, %v10349_v32, 0.0  ;;  %v8016_v25 = vld [vmem:[%s15190_s7 + $0x120] sm:$0xff]  ;;  %v8015_v32 = vld [vmem:[%s15190_s7 + $0x118] sm:$0xff] }
 0x598   : > { %v6174_v43 = vsel %vm6161_vm7, %v10343_v45, 0.0  ;;  %v6175_v47 = vsel %vm6161_vm7, %v10344_v33, 0.0  ;;  %v5901_v12 = vsel %vm4667_vm6, %v10358_v14, 0.0  ;;  %v5902_v63 = vsel %vm4667_vm6, %v10359_v34, 0.0  ;;  %v8026_v33 = vld [vmem:[%s15190_s7 + $0x170] sm:$0xff]  ;;  %v8023_v14 = vld [vmem:[%s15190_s7 + $0x158] sm:$0xff] }
 0x599   : > { %v10506_v31 = vpack.i.bf16 %v6174_v43, %v5899_v51  ;;  %v10362_v56 = vpop.permute.xlu0 %10361  ;;  %v10508_v50 = vpack.i.bf16 %v6175_v47, %v5900_v61  ;;  %v8042_v45 = vld [vmem:[%s15190_s7 + $0x1f0] sm:$0xff] }
 0x59a   : > { %v10363_v38 = vunpack.i.l.bf16 %v10362_v56  ;;  %v10364_v35 = vunpack.i.h.bf16 %v10362_v56  ;;  %v8041_v56 = vld [vmem:[%s15190_s7 + $0x1e8] sm:$0xff]  ;;  %v8022_v34 = vld [vmem:[%s15190_s7 + $0x150] sm:$0xff] }
 0x59b   : > { %10507 = vxpose.xlu0.b32.cont [13/16] %v10506_v31, 128  ;;  %10399 = vxpose.xlu1.b32.cont [15/16] %v10398_v62, 128  ;;  %v8025_v31 = vld [vmem:[%s15190_s7 + $0x168] sm:$0xff] }
 0x59c   : > { %v6176_v11 = vsel %vm6161_vm7, %v10363_v38, 0.0  ;;  %v6177_v59 = vsel %vm6161_vm7, %v10364_v35, 0.0 }
 0x59d   : > { %v10510_v17 = vpack.i.bf16 %v6176_v11, %v5901_v12  ;;  %v10512_v3 = vpack.i.bf16 %v6177_v59, %v5902_v63  ;;  %v10367_v39 = vpop.permute.xlu0 %10366  ;;  %v8038_v12 = vld [vmem:[%s15190_s7 + $0x1d0] sm:$0xff] }
 0x59e   : > { %v10368_v9 = vunpack.i.l.bf16 %v10367_v39  ;;  %v10369_v37 = vunpack.i.h.bf16 %v10367_v39 }
 0x59f   : > { %10509 = vxpose.xlu0.b32.cont [14/16] %v10508_v50, 128  ;;  %10401 = vxpose.xlu1.b32.end [16/16] %v10400_v57, 128  ;;  %v8039_v57 = vld [vmem:[%s15190_s7 + $0x1d8] sm:$0xff] }
 0x5a0   : > { %v6451_v21 = vsel %vm6436_vm8, %v10368_v9, 0.0  ;;  %v6452_v46 = vsel %vm6436_vm8, %v10369_v37, 0.0 }
 0x5a3   : > { %10511 = vxpose.xlu0.b32.cont [15/16] %v10510_v17, 128  ;;  %6470 = vxpose.xlu1.b32.start [1/16] %v6437_v8, 128  ;;  %v8021_v17 = vld [vmem:[%s15190_s7 + $0x148] sm:$0xff] }
 0x5a7   : > { %10513 = vxpose.xlu0.b32.end [16/16] %v10512_v3, 128  ;;  %6471 = vxpose.xlu1.b32.cont [2/16] %v6438_v41, 128  ;;  %v8036_v41 = vld [vmem:[%s15190_s7 + $0x1c0] sm:$0xff] }
 0x5ab   : > { %6472 = vxpose.xlu1.b32.cont [3/16] %v6439_v36, 128 }
 0x5af   : > { %6473 = vxpose.xlu1.b32.cont [4/16] %v6440_v0, 128 }
 0x5b3   : > { %6474 = vxpose.xlu1.b32.cont [5/16] %v6441_v18, 128  ;;  %v8035_v18 = vld [vmem:[%s15190_s7 + $0x1b8] sm:$0xff] }
 0x5b7   : > { %6475 = vxpose.xlu1.b32.cont [6/16] %v6442_v5, 128  ;;  %v8034_v5 = vld [vmem:[%s15190_s7 + $0x1b0] sm:$0xff] }
 0x5bb   : > { %6476 = vxpose.xlu1.b32.cont [7/16] %v6443_v20, 128 }
 0x5bf   : > { %6477 = vxpose.xlu1.b32.cont [8/16] %v6444_v13, 128 }
 0x5c3   : > { %6478 = vxpose.xlu1.b32.cont [9/16] %v6445_v16, 128  ;;  %v8033_v16 = vld [vmem:[%s15190_s7 + $0x1a8] sm:$0xff] }
 0x5c7   : > { %6479 = vxpose.xlu1.b32.cont [10/16] %v6446_v58, 128 }
 0x5cb   : > { %6480 = vxpose.xlu1.b32.cont [11/16] %v6447_v44, 128 }
 0x5cf   : > { %6481 = vxpose.xlu1.b32.cont [12/16] %v6448_v10, 128  ;;  %v8032_v10 = vld [vmem:[%s15190_s7 + $0x1a0] sm:$0xff] }
 0x5d3   : > { %6482 = vxpose.xlu1.b32.cont [13/16] %v6449_v29, 128  ;;  %v8031_v29 = vld [vmem:[%s15190_s7 + $0x198] sm:$0xff] }
 0x5d7   : > { %6483 = vxpose.xlu1.b32.cont [14/16] %v6450_v40, 128 }
 0x5db   : > { %6484 = vxpose.xlu1.b32.cont [15/16] %v6451_v21, 128  ;;  %v8014_v21 = vld [vmem:[%s15190_s7 + $0x110] sm:$0xff] }
 0x5df   : > { %6485 = vxpose.xlu1.b32.end [16/16] %v6452_v46, 128  ;;  %v10402_v1 = vpop.trf.xlu1  ;;  %v8030_v46 = vld [vmem:[%s15190_s7 + $0x190] sm:$0xff] }
 0x5e0   : > { %v10403_v52 = vunpack.i.l.bf16 %v10402_v1  ;;  %v10406_v30 = vunpack.i.h.bf16 %v10402_v1 }
 0x5e2   : > { %9741 = vmatprep.mubr.f32.mxu0 %v10403_v52  ;;  %9797 = vmatprep.mubr.f32.mxu1 %v10406_v30 }
 0x5e3   : > { %v10407_v22 = vpop.trf.xlu1 }
 0x5e4   : > { %v10411_v24 = vunpack.i.h.bf16 %v10407_v22  ;;  %v10408_v23 = vunpack.i.l.bf16 %v10407_v22 }
 0x5e6   : > { %9742 = vmatmul.mubr.f32.vlgmr.msra.gmra.mxu0 %v10408_v23  ;;  %9798 = vmatmul.mubr.f32.vlgmr.msra.gmra.mxu1 %v10411_v24  ;;  %v8013_v24 = vld [vmem:[%s15190_s7 + $0x108] sm:$0xff] }
 0x5e7   : > { %v10412_v19 = vpop.trf.xlu1  ;;  %v14551_v51 = vpop.trf.xlu0  ;;  %9822 = vmatpush3.msra.mxu0 %v14469_v26  ;;  %9878 = vmatpush3.msra.mxu1 %v14474_v28  ;;  %v8024_v26 = vld [vmem:[%s15190_s7 + $0x160] sm:$0xff]  ;;  %v8029_v23 = vld [vmem:[%s15190_s7 + $0x188] sm:$0xff] }
 0x5e8   : > { %v10413_v43 = vunpack.i.l.bf16 %v10412_v19  ;;  %v10416_v62 = vunpack.i.h.bf16 %v10412_v19  ;;  %9823 = vmatprep.subr.mxu0 %v8026_v33  ;;  %9879 = vmatprep.subr.mxu1 %v8042_v45  ;;  %v8040_v28 = vld [vmem:[%s15190_s7 + $0x1e0] sm:$0xff] }
 0x5e9   : > { %9824 = vmatpush3.msra.mxu0 %v8026_v33  ;;  %9880 = vmatpush3.msra.mxu1 %v8042_v45  ;;  %v8012_v33 = vld [vmem:[%s15190_s7 + $0x100] sm:$0xff] }
 0x5ea   : > { %9744 = vmatprep.mubr.f32.mxu0 %v10413_v43  ;;  %9800 = vmatprep.mubr.f32.mxu1 %v10416_v62  ;;  %v8028_v45 = vld [vmem:[%s15190_s7 + $0x180] sm:$0xff] }
 0x5eb   : > { %v10417_v7 = vpop.trf.xlu1  ;;  %v14567_v47 = vpop.trf.xlu0  ;;  %9825 = vmatprep.subr.mxu0 %v8025_v31  ;;  %9881 = vmatprep.subr.mxu1 %v8041_v56 }
 0x5ec   : > { %v10421_v38 = vunpack.i.h.bf16 %v10417_v7  ;;  %v10418_v61 = vunpack.i.l.bf16 %v10417_v7  ;;  %9826 = vmatpush3.msra.mxu0 %v8025_v31  ;;  %9882 = vmatpush3.msra.mxu1 %v8041_v56  ;;  %v8059_v56 = vld [vmem:[%s15190_s7 + $0x278] sm:$0xff] }
 0x5ed   : > { %9827 = vmatprep.subr.mxu0 %v8024_v26  ;;  %9883 = vmatprep.subr.mxu1 %v8040_v28 }
 0x5ee   : > { %9745 = vmatmul.mubr.f32.gmra.mxu0 %v10418_v61  ;;  %9801 = vmatmul.mubr.f32.gmra.mxu1 %v10421_v38 }
 0x5ef   : > { %v10422_v50 = vpop.trf.xlu1  ;;  %v14575_v2 = vpop.trf.xlu0  ;;  %9828 = vmatpush3.msra.mxu0 %v8024_v26  ;;  %9884 = vmatpush3.msra.mxu1 %v8040_v28 }
 0x5f0   : > { %v10423_v35 = vunpack.i.l.bf16 %v10422_v50  ;;  %v10426_v11 = vunpack.i.h.bf16 %v10422_v50  ;;  %9829 = vmatprep.subr.mxu0 %v8023_v14  ;;  %9885 = vmatprep.subr.mxu1 %v8039_v57 }
 0x5f1   : > { %9830 = vmatpush3.msra.mxu0 %v8023_v14  ;;  %9886 = vmatpush3.msra.mxu1 %v8039_v57 }
 0x5f2   : > { %9747 = vmatprep.mubr.f32.mxu0 %v10423_v35  ;;  %9803 = vmatprep.mubr.f32.mxu1 %v10426_v11 }
 0x5f3   : > { %v10427_v59 = vpop.trf.xlu1  ;;  %v14589_v8 = vpop.trf.xlu0  ;;  %9831 = vmatprep.subr.mxu0 %v8022_v34  ;;  %9887 = vmatprep.subr.mxu1 %v8038_v12 }
 0x5f4   : > { %v10431_v63 = vunpack.i.h.bf16 %v10427_v59  ;;  %v10428_v3 = vunpack.i.l.bf16 %v10427_v59  ;;  %9832 = vmatpush3.msra.mxu0 %v8022_v34  ;;  %9888 = vmatpush3.msra.mxu1 %v8038_v12 }
 0x5f5   : > { %9833 = vmatprep.subr.mxu0 %v8021_v17  ;;  %9889 = vmatprep.subr.mxu1 %v8037_v15 }
 0x5f6   : > { %9748 = vmatmul.mubr.f32.gmra.mxu0 %v10428_v3  ;;  %9804 = vmatmul.mubr.f32.gmra.mxu1 %v10431_v63  ;;  %v10515_v3 = vunpack.i.l.bf16 %v14551_v51 }
 0x5f7   : > { %v10432_v27 = vpop.trf.xlu1  ;;  %v14597_v36 = vpop.trf.xlu0  ;;  %9834 = vmatpush3.msra.mxu0 %v8021_v17  ;;  %9890 = vmatpush3.msra.mxu1 %v8037_v15 }
 0x5f8   : > { %v10433_v55 = vunpack.i.l.bf16 %v10432_v27  ;;  %v10436_v0 = vunpack.i.h.bf16 %v10432_v27  ;;  %9835 = vmatprep.subr.mxu0 %v8020_v4  ;;  %9891 = vmatprep.subr.mxu1 %v8036_v41 }
 0x5f9   : > { %9836 = vmatpush3.msra.mxu0 %v8020_v4  ;;  %9892 = vmatpush3.msra.mxu1 %v8036_v41  ;;  %v10518_v4 = vunpack.i.h.bf16 %v14551_v51  ;;  %v8058_v51 = vld [vmem:[%s15190_s7 + $0x270] sm:$0xff] }
 0x5fa   : > { %9750 = vmatprep.mubr.f32.mxu0 %v10433_v55  ;;  %9806 = vmatprep.mubr.f32.mxu1 %v10436_v0  ;;  %v10523_v55 = vunpack.i.h.bf16 %v14567_v47  ;;  %v10520_v0 = vunpack.i.l.bf16 %v14567_v47  ;;  %v8057_v47 = vld [vmem:[%s15190_s7 + $0x268] sm:$0xff] }
 0x5fb   : > { %v10437_v54 = vpop.trf.xlu1  ;;  %9837 = vmatprep.subr.mxu0 %v8019_v49  ;;  %9893 = vmatprep.subr.mxu1 %v8035_v18  ;;  %v14611_v20 = vpop.trf.xlu0 }
 0x5fc   : > { %v10441_v6 = vunpack.i.h.bf16 %v10437_v54  ;;  %v10438_v13 = vunpack.i.l.bf16 %v10437_v54  ;;  %9838 = vmatpush3.msra.mxu0 %v8019_v49  ;;  %9894 = vmatpush3.msra.mxu1 %v8035_v18  ;;  %v10525_v49 = vunpack.i.l.bf16 %v14575_v2  ;;  %v10528_v18 = vunpack.i.h.bf16 %v14575_v2 }
 0x5fd   : > { %9839 = vmatprep.subr.mxu0 %v8018_v42  ;;  %9895 = vmatprep.subr.mxu1 %v8034_v5  ;;  %v10533_v54 = vunpack.i.h.bf16 %v14589_v8  ;;  %v10530_v2 = vunpack.i.l.bf16 %v14589_v8  ;;  %v8055_v8 = vld [vmem:[%s15190_s7 + $0x258] sm:$0xff] }
 0x5fe   : > { %9751 = vmatmul.mubr.f32.gmra.mxu0 %v10438_v13  ;;  %9807 = vmatmul.mubr.f32.gmra.mxu1 %v10441_v6  ;;  %v10535_v6 = vunpack.i.l.bf16 %v14597_v36  ;;  %v10538_v13 = vunpack.i.h.bf16 %v14597_v36  ;;  %v10540_v36 = vunpack.i.l.bf16 %v14611_v20 }
 0x5ff   : > { %v10442_v60 = vpop.trf.xlu1  ;;  %9840 = vmatpush3.msra.mxu0 %v8018_v42  ;;  %9896 = vmatpush3.msra.mxu1 %v8034_v5  ;;  %v14619_v58 = vpop.trf.xlu0 }
 0x600   : > { %v10443_v53 = vunpack.i.l.bf16 %v10442_v60  ;;  %v10446_v44 = vunpack.i.h.bf16 %v10442_v60  ;;  %9841 = vmatprep.subr.mxu0 %v8017_v48  ;;  %9897 = vmatprep.subr.mxu1 %v8033_v16  ;;  %v10543_v60 = vunpack.i.h.bf16 %v14611_v20  ;;  %v8053_v20 = vld [vmem:[%s15190_s7 + $0x248] sm:$0xff] }
 0x601   : > { %9842 = vmatpush3.msra.mxu0 %v8017_v48  ;;  %9898 = vmatpush3.msra.mxu1 %v8033_v16  ;;  %v8056_v48 = vld [vmem:[%s15190_s7 + $0x260] sm:$0xff] }
 0x602   : > { %9753 = vmatprep.mubr.f32.mxu0 %v10443_v53  ;;  %9809 = vmatprep.mubr.f32.mxu1 %v10446_v44  ;;  %v10548_v53 = vunpack.i.h.bf16 %v14619_v58  ;;  %v10545_v44 = vunpack.i.l.bf16 %v14619_v58 }
 0x603   : > { %v10447_v39 = vpop.trf.xlu1  ;;  %9843 = vmatprep.subr.mxu0 %v8016_v25  ;;  %9899 = vmatprep.subr.mxu1 %v8032_v10  ;;  %v14633_v9 = vpop.trf.xlu0 }
 0x604   : > { %v10451_v40 = vunpack.i.h.bf16 %v10447_v39  ;;  %v10448_v37 = vunpack.i.l.bf16 %v10447_v39  ;;  %9844 = vmatpush3.msra.mxu0 %v8016_v25  ;;  %9900 = vmatpush3.msra.mxu1 %v8032_v10  ;;  %v8054_v25 = vld [vmem:[%s15190_s7 + $0x250] sm:$0xff]  ;;  %v10550_v58 = vunpack.i.l.bf16 %v14633_v9 }
 0x605   : > { %9845 = vmatprep.subr.mxu0 %v8015_v32  ;;  %9901 = vmatprep.subr.mxu1 %v8031_v29 }
 0x606   : > { %9754 = vmatmul.mubr.f32.gmra.mxu0 %v10448_v37  ;;  %9810 = vmatmul.mubr.f32.gmra.mxu1 %v10451_v40  ;;  %v8052_v40 = vld [vmem:[%s15190_s7 + $0x240] sm:$0xff] }
 0x607   : > { %v10452_v1 = vpop.trf.xlu1  ;;  %9846 = vmatpush3.msra.mxu0 %v8015_v32  ;;  %9902 = vmatpush3.msra.mxu1 %v8031_v29  ;;  %v14641_v52 = vpop.trf.xlu0  ;;  %v10553_v32 = vunpack.i.h.bf16 %v14633_v9  ;;  %v8051_v9 = vld [vmem:[%s15190_s7 + $0x238] sm:$0xff] }
 0x608   : > { %v10453_v30 = vunpack.i.l.bf16 %v10452_v1  ;;  %v10456_v22 = vunpack.i.h.bf16 %v10452_v1  ;;  %9847 = vmatprep.subr.mxu0 %v8014_v21  ;;  %9903 = vmatprep.subr.mxu1 %v8030_v46  ;;  %v10558_v29 = vunpack.i.h.bf16 %v14641_v52  ;;  %v10555_v39 = vunpack.i.l.bf16 %v14641_v52 }
 0x609   : > { %9848 = vmatpush3.msra.mxu0 %v8014_v21  ;;  %9904 = vmatpush3.msra.mxu1 %v8030_v46 }
 0x60a   : > { %9756 = vmatprep.mubr.f32.mxu0 %v10453_v30  ;;  %9812 = vmatprep.mubr.f32.mxu1 %v10456_v22  ;;  %v8050_v30 = vld [vmem:[%s15190_s7 + $0x230] sm:$0xff] }
 0x60b   : > { %v10457_v19 = vpop.trf.xlu1  ;;  %9849 = vmatprep.subr.mxu0 %v8013_v24  ;;  %9905 = vmatprep.subr.mxu1 %v8029_v23  ;;  %v14655_v43 = vpop.trf.xlu0 }
 0x60c   : > { %v10461_v62 = vunpack.i.h.bf16 %v10457_v19  ;;  %v10458_v31 = vunpack.i.l.bf16 %v10457_v19  ;;  %9850 = vmatpush3.msra.mxu0 %v8013_v24  ;;  %9906 = vmatpush3.msra.mxu1 %v8029_v23  ;;  %v10563_v21 = vunpack.i.h.bf16 %v14655_v43  ;;  %v10560_v1 = vunpack.i.l.bf16 %v14655_v43  ;;  %v8049_v23 = vld [vmem:[%s15190_s7 + $0x228] sm:$0xff]  ;;  %v8048_v43 = vld [vmem:[%s15190_s7 + $0x220] sm:$0xff] }
 0x60d   : > { %9851 = vmatprep.subr.mxu0 %v8012_v33  ;;  %9907 = vmatprep.subr.mxu1 %v8028_v45 }
 0x60e   : > { %9757 = vmatmul.mubr.f32.gmra.mxu0 %v10458_v31  ;;  %9813 = vmatmul.mubr.f32.gmra.mxu1 %v10461_v62 }
 0x60f   : > { %v10462_v26 = vpop.trf.xlu1  ;;  %9852 = vmatpush3.msra.mxu0 %v8012_v33  ;;  %9908 = vmatpush3.msra.mxu1 %v8028_v45  ;;  %v14660_v28 = vpop.trf.xlu0 }
 0x610   : > { %v10463_v7 = vunpack.i.l.bf16 %v10462_v26  ;;  %v10466_v38 = vunpack.i.h.bf16 %v10462_v26  ;;  %9933 = vmatprep.subr.mxu0 %v8059_v56  ;;  %v10568_v46 = vunpack.i.h.bf16 %v14660_v28  ;;  %v10565_v52 = vunpack.i.l.bf16 %v14660_v28  ;;  %v8047_v26 = vld [vmem:[%s15190_s7 + $0x218] sm:$0xff] }
 0x612   : > { %9759 = vmatprep.mubr.f32.mxu0 %v10463_v7  ;;  %9815 = vmatprep.mubr.f32.mxu1 %v10466_v38 }
 0x613   : > { %v10467_v61 = vpop.trf.xlu1  ;;  %v14662_v14 = vpop.trf.xlu0 }
 0x614   : > { %v10471_v57 = vunpack.i.h.bf16 %v10467_v61  ;;  %v10468_v50 = vunpack.i.l.bf16 %v10467_v61  ;;  %v10573_v24 = vunpack.i.h.bf16 %v14662_v14  ;;  %v10570_v45 = vunpack.i.l.bf16 %v14662_v14  ;;  %v8046_v61 = vld [vmem:[%s15190_s7 + $0x210] sm:$0xff] }
 0x616   : > { %9760 = vmatmul.mubr.f32.gmra.mxu0 %v10468_v50  ;;  %9816 = vmatmul.mubr.f32.gmra.mxu1 %v10471_v57  ;;  %v8045_v50 = vld [vmem:[%s15190_s7 + $0x208] sm:$0xff] }
 0x617   : > { %v10472_v35 = vpop.trf.xlu1  ;;  %v14664_v11 = vpop.trf.xlu0 }
 0x618   : > { %v10473_v34 = vunpack.i.l.bf16 %v10472_v35  ;;  %v10476_v12 = vunpack.i.h.bf16 %v10472_v35  ;;  %v10578_v33 = vunpack.i.h.bf16 %v14664_v11  ;;  %v10575_v19 = vunpack.i.l.bf16 %v14664_v11  ;;  %v8044_v35 = vld [vmem:[%s15190_s7 + $0x200] sm:$0xff] }
 0x61a   : > { %9762 = vmatprep.mubr.f32.mxu0 %v10473_v34  ;;  %9818 = vmatprep.mubr.f32.mxu1 %v10476_v12 }
 0x61b   : > { %v10477_v17 = vpop.trf.xlu1  ;;  %v14666_v15 = vpop.trf.xlu0 }
 0x61c   : > { %v10481_v59 = vunpack.i.h.bf16 %v10477_v17  ;;  %v10478_v63 = vunpack.i.l.bf16 %v10477_v17  ;;  %v10580_v7 = vunpack.i.l.bf16 %v14666_v15 }
 0x61e   : > { %9763 = vmatmul.mubr.f32.gmra.mxu0 %v10478_v63  ;;  %9819 = vmatmul.mubr.f32.gmra.mxu1 %v10481_v59 }
 0x61f   : > { %9853 = vmatprep.mubr.f32.mxu0 %v10515_v3  ;;  %9909 = vmatprep.mubr.f32.mxu1 %v10518_v4  ;;  %v14670_v41 = vpop.trf.xlu1  ;;  %v14672_v27 = vpop.trf.xlu0  ;;  %v6717_v4 = vld [vmem:[%s15192_s9 + $0x78] sm:$0xff] }
 0x620   : > { %v10588_v31 = vunpack.i.h.bf16 %v14672_v27  ;;  %v10585_v28 = vunpack.i.l.bf16 %v14672_v27  ;;  %9989 = vmatprep.subr.mxu1 %v6717_v4  ;;  %v6715_v27 = vld [vmem:[%s15192_s9 + $0x68] sm:$0xff] }
 0x622   : > { %9854 = vmatmul.mubr.f32.vlgmr.msra.gmra.mxu0 %v10520_v0  ;;  %9910 = vmatmul.mubr.f32.vlgmr.msra.gmra.mxu1 %v10523_v55  ;;  %v6714_v55 = vld [vmem:[%s15192_s9 + $0x60] sm:$0xff]  ;;  %v6713_v0 = vld [vmem:[%s15192_s9 + $0x58] sm:$0xff] }
 0x623   : > { %9856 = vmatprep.mubr.f32.mxu0 %v10525_v49  ;;  %9912 = vmatprep.mubr.f32.mxu1 %v10528_v18  ;;  %v14681_v42 = vpop.trf.xlu1  ;;  %v14683_v5 = vpop.trf.xlu0  ;;  %v6712_v49 = vld [vmem:[%s15192_s9 + $0x50] sm:$0xff]  ;;  %v6711_v18 = vld [vmem:[%s15192_s9 + $0x48] sm:$0xff] }
 0x624   : > { %9934 = vmatpush3.msra.mxu0 %v8059_v56  ;;  %v10583_v56 = vunpack.i.h.bf16 %v14666_v15  ;;  %v10593_v38 = vunpack.i.h.bf16 %v14683_v5  ;;  %v10590_v57 = vunpack.i.l.bf16 %v14683_v5  ;;  %9990 = vmatpush3.msra.mxu1 %v6717_v4  ;;  %v6708_v5 = vld [vmem:[%s15192_s9 + $0x30] sm:$0xff] }
 0x625   : > { %9935 = vmatprep.subr.mxu0 %v8058_v51 }
 0x626   : > { %9936 = vmatpush3.msra.mxu0 %v8058_v51  ;;  %9913 = vmatmul.mubr.f32.gmra.mxu1 %v10533_v54  ;;  %v6710_v51 = vld [vmem:[%s15192_s9 + $0x40] sm:$0xff]  ;;  %v6707_v54 = vld [vmem:[%s15192_s9 + $0x28] sm:$0xff] }
 0x627   : > { %9857 = vmatmul.mubr.f32.gmra.mxu0 %v10530_v2  ;;  %9937 = vmatprep.subr.mxu0 %v8057_v47  ;;  %v14695_v16 = vpop.trf.xlu1  ;;  %v6705_v2 = vld [vmem:[%s15192_s9 + $0x18] sm:$0xff] }
 0x628   : > { %9859 = vmatprep.mubr.f32.mxu0 %v10535_v6  ;;  %9915 = vmatprep.mubr.f32.mxu1 %v10538_v13  ;;  %v6704_v6 = vld [vmem:[%s15192_s9 + $0x10] sm:$0xff]  ;;  %v6703_v13 = vld [vmem:[%s15192_s9 + $0x8] sm:$0xff] }
 0x629   : > { %9938 = vmatpush3.msra.mxu0 %v8057_v47  ;;  %v6706_v47 = vld [vmem:[%s15192_s9 + $0x20] sm:$0xff] }
 0x62a   : > { %9939 = vmatprep.subr.mxu0 %v8056_v48  ;;  %9916 = vmatmul.mubr.f32.gmra.mxu1 %v10543_v60  ;;  %v14820_v60 = vld [vmem:[%s15194_s11 + $0x70] sm:$0xff] }
 0x62b   : > { %9940 = vmatpush3.msra.mxu0 %v8056_v48  ;;  %9918 = vmatprep.mubr.f32.mxu1 %v10548_v53  ;;  %v14707_v10 = vpop.trf.xlu1  ;;  %v6702_v48 = vld [vmem:[%s15192_s9] sm:$0xff] }
 0x62c   : > { %9860 = vmatmul.mubr.f32.gmra.mxu0 %v10540_v36  ;;  %9941 = vmatprep.subr.mxu0 %v8055_v8  ;;  %v14835_v53 = vld [vmem:[%s15194_s11 + $0x60] sm:$0xff]  ;;  %v14842_v36 = vld [vmem:[%s15194_s11 + $0x58] sm:$0xff] }
 0x62d   : > { %9862 = vmatprep.mubr.f32.mxu0 %v10545_v44  ;;  %9942 = vmatpush3.msra.mxu0 %v8055_v8  ;;  %v14828_v8 = vld [vmem:[%s15194_s11 + $0x68] sm:$0xff]  ;;  %15437 = vst [vmem:[#allocation30_spill] sm:$0xff] %v14842_v36  ;;  %v14849_v44 = vld [vmem:[%s15194_s11 + $0x50] sm:$0xff] }
 0x62e   : > { %9943 = vmatprep.subr.mxu0 %v8054_v25  ;;  %9919 = vmatmul.mubr.f32.gmra.mxu1 %v10553_v32  ;;  %15438 = vst [vmem:[#allocation24_spill] sm:$0xff] %v14849_v44  ;;  %v14860_v32 = vld [vmem:[%s15194_s11 + $0x48] sm:$0xff] }
 0x62f   : > { %9944 = vmatpush3.msra.mxu0 %v8054_v25  ;;  %9921 = vmatprep.mubr.f32.mxu1 %v10558_v29  ;;  %v14719_v37 = vpop.trf.xlu1  ;;  %15439 = vst [vmem:[#allocation37_spill] sm:$0xff] %v14860_v32 }
 0x630   : > { %9863 = vmatmul.mubr.f32.gmra.mxu0 %v10550_v58  ;;  %9945 = vmatprep.subr.mxu0 %v8053_v20 }
 0x631   : > { %9865 = vmatprep.mubr.f32.mxu0 %v10555_v39  ;;  %9946 = vmatpush3.msra.mxu0 %v8053_v20  ;;  %v14867_v20 = vld [vmem:[%s15194_s11 + $0x40] sm:$0xff]  ;;  %v14878_v39 = vld [vmem:[%s15194_s11 + $0x38] sm:$0xff] }
 0x632   : > { %9947 = vmatprep.subr.mxu0 %v8052_v40  ;;  %9922 = vmatmul.mubr.f32.gmra.mxu1 %v10563_v21  ;;  %15440 = vst [vmem:[#allocation28_spill] sm:$0xff] %v14867_v20  ;;  %15441 = vst [vmem:[#allocation29_spill] sm:$0xff] %v14878_v39  ;;  %v14889_v21 = vld [vmem:[%s15194_s11 + $0x30] sm:$0xff] }
 0x633   : > { %9948 = vmatpush3.msra.mxu0 %v8052_v40  ;;  %9924 = vmatprep.mubr.f32.mxu1 %v10568_v46  ;;  %v6491_v22 = vpop.trf.xlu1  ;;  %15442 = vst [vmem:[#allocation40_spill] sm:$0xff] %v14889_v21 }
 0x634   : > { %9866 = vmatmul.mubr.f32.gmra.mxu0 %v10560_v1  ;;  %9949 = vmatprep.subr.mxu0 %v8051_v9 }
 0x635   : > { %9868 = vmatprep.mubr.f32.mxu0 %v10565_v52  ;;  %9950 = vmatpush3.msra.mxu0 %v8051_v9  ;;  %v14896_v9 = vld [vmem:[%s15194_s11 + $0x28] sm:$0xff]  ;;  %v14903_v52 = vld [vmem:[%s15194_s11 + $0x20] sm:$0xff] }
 0x636   : > { %9951 = vmatprep.subr.mxu0 %v8050_v30  ;;  %9925 = vmatmul.mubr.f32.gmra.mxu1 %v10573_v24  ;;  %15443 = vst [vmem:[#allocation3_spill] sm:$0xff] %v14896_v9  ;;  %15444 = vst [vmem:[#allocation39_spill] sm:$0xff] %v14903_v52 }
 0x637   : > { %9952 = vmatpush3.msra.mxu0 %v8050_v30  ;;  %9927 = vmatprep.mubr.f32.mxu1 %v10578_v33  ;;  %v6492_v62 = vpop.trf.xlu1 }
 0x638   : > { %9869 = vmatmul.mubr.f32.gmra.mxu0 %v10570_v45  ;;  %9953 = vmatprep.subr.mxu0 %v8049_v23 }
 0x639   : > { %9871 = vmatprep.mubr.f32.mxu0 %v10575_v19  ;;  %9954 = vmatpush3.msra.mxu0 %v8049_v23 }
 0x63a   : > { %9955 = vmatprep.subr.mxu0 %v8048_v43  ;;  %9928 = vmatmul.mubr.f32.gmra.mxu1 %v10583_v56 }
 0x63b   : > { %9956 = vmatpush3.msra.mxu0 %v8048_v43  ;;  %9930 = vmatprep.mubr.f32.mxu1 %v10588_v31  ;;  %v6493_v14 = vpop.trf.xlu1 }
 0x63c   : > { %9872 = vmatmul.mubr.f32.gmra.mxu0 %v10580_v7  ;;  %9957 = vmatprep.subr.mxu0 %v8047_v26 }
 0x63d   : > { %9874 = vmatprep.mubr.f32.mxu0 %v10585_v28  ;;  %9958 = vmatpush3.msra.mxu0 %v8047_v26 }
 0x63e   : > { %9959 = vmatprep.subr.mxu0 %v8046_v61  ;;  %9931 = vmatmul.mubr.f32.gmra.mxu1 %v10593_v38 }
 0x63f   : > { %9960 = vmatpush3.msra.mxu0 %v8046_v61  ;;  %v6494_v11 = vpop.trf.xlu1 }
 0x640   : > { %9875 = vmatmul.mubr.f32.gmra.mxu0 %v10590_v57  ;;  %9961 = vmatprep.subr.mxu0 %v8045_v50 }
 0x641   : > { %9962 = vmatpush3.msra.mxu0 %v8045_v50  ;;  %9965 = vmatprep.mubr.f32.mxu0 %v14670_v41  ;;  %v6716_v41 = vld [vmem:[%s15192_s9 + $0x70] sm:$0xff] }
 0x642   : > { %9963 = vmatprep.subr.mxu0 %v8044_v35  ;;  %9991 = vmatprep.subr.mxu1 %v6716_v41 }
 0x643   : > { %9964 = vmatpush3.msra.mxu0 %v8044_v35  ;;  %v6495_v34 = vpop.trf.xlu1  ;;  %9992 = vmatpush3.msra.mxu1 %v6716_v41 }
 0x644   : > { %9966 = vmatmul.mubr.f32.vlgmr.msra.gmra.mxu0 %v14681_v42  ;;  %9993 = vmatprep.subr.mxu1 %v6715_v27  ;;  %v6709_v42 = vld [vmem:[%s15192_s9 + $0x38] sm:$0xff] }
 0x645   : > { %9968 = vmatprep.mubr.f32.mxu0 %v14695_v16  ;;  %9994 = vmatpush3.msra.mxu1 %v6715_v27  ;;  %v14815_v16 = vld [vmem:[%s15194_s11 + $0x78] sm:$0xff] }
 0x646   : > { %9995 = vmatprep.subr.mxu1 %v6714_v55  ;;  %10045 = vmatprep.subr.mxu0 %v14815_v16 }
 0x647   : > { %v6496_v12 = vpop.trf.xlu1  ;;  %9996 = vmatpush3.msra.mxu1 %v6714_v55  ;;  %10046 = vmatpush3.msra.mxu0 %v14815_v16 }
 0x648   : > { %9969 = vmatmul.mubr.f32.gmra.mxu0 %v14707_v10  ;;  %9997 = vmatprep.subr.mxu1 %v6713_v0 }
 0x649   : > { %9971 = vmatprep.mubr.f32.mxu0 %v14719_v37  ;;  %9998 = vmatpush3.msra.mxu1 %v6713_v0 }
 0x64a   : > { %9999 = vmatprep.subr.mxu1 %v6712_v49  ;;  %10047 = vmatprep.subr.mxu0 %v14820_v60 }
 0x64b   : > { %v6497_v17 = vpop.trf.xlu1  ;;  %10000 = vmatpush3.msra.mxu1 %v6712_v49  ;;  %10048 = vmatpush3.msra.mxu0 %v14820_v60 }
 0x64c   : > { %9972 = vmatmul.mubr.f32.gmra.mxu0 %v6491_v22  ;;  %10001 = vmatprep.subr.mxu1 %v6711_v18 }
 0x64d   : > { %9974 = vmatprep.mubr.f32.mxu0 %v6492_v62  ;;  %10002 = vmatpush3.msra.mxu1 %v6711_v18 }
 0x64e   : > { %10003 = vmatprep.subr.mxu1 %v6710_v51  ;;  %10049 = vmatprep.subr.mxu0 %v14828_v8 }
 0x64f   : > { %v6498_v15 = vpop.trf.xlu1  ;;  %10004 = vmatpush3.msra.mxu1 %v6710_v51  ;;  %10050 = vmatpush3.msra.mxu0 %v14828_v8 }
 0x650   : > { %9975 = vmatmul.mubr.f32.gmra.mxu0 %v6493_v14  ;;  %10005 = vmatprep.subr.mxu1 %v6709_v42 }
 0x651   : > { %9977 = vmatprep.mubr.f32.mxu0 %v6494_v11  ;;  %10006 = vmatpush3.msra.mxu1 %v6709_v42 }
 0x652   : > { %10007 = vmatprep.subr.mxu1 %v6708_v5  ;;  %10051 = vmatprep.subr.mxu0 %v14835_v53 }
 0x653   : > { %v6499_v59 = vpop.trf.xlu1  ;;  %10008 = vmatpush3.msra.mxu1 %v6708_v5  ;;  %10052 = vmatpush3.msra.mxu0 %v14835_v53 }
 0x654   : > { %9978 = vmatmul.mubr.f32.gmra.mxu0 %v6495_v34  ;;  %10009 = vmatprep.subr.mxu1 %v6707_v54 }
 0x655   : > { %9980 = vmatprep.mubr.f32.mxu0 %v6496_v12  ;;  %10010 = vmatpush3.msra.mxu1 %v6707_v54 }
 0x656   : > { %10011 = vmatprep.subr.mxu1 %v6706_v47  ;;  %10053 = vmatprep.subr.mxu0 %v14842_v36 }
 0x657   : > { %v6500_v63 = vpop.trf.xlu1  ;;  %10012 = vmatpush3.msra.mxu1 %v6706_v47  ;;  %10054 = vmatpush3.msra.mxu0 %v14842_v36 }
 0x658   : > { %9981 = vmatmul.mubr.f32.gmra.mxu0 %v6497_v17  ;;  %10013 = vmatprep.subr.mxu1 %v6705_v2 }
 0x659   : > { %9983 = vmatprep.mubr.f32.mxu0 %v6498_v15  ;;  %10014 = vmatpush3.msra.mxu1 %v6705_v2 }
 0x65a   : > { %10015 = vmatprep.subr.mxu1 %v6704_v6  ;;  %10055 = vmatprep.subr.mxu0 %v14849_v44 }
 0x65b   : > { %v6501_v3 = vpop.trf.xlu1  ;;  %10016 = vmatpush3.msra.mxu1 %v6704_v6  ;;  %10056 = vmatpush3.msra.mxu0 %v14849_v44 }
 0x65c   : > { %9984 = vmatmul.mubr.f32.gmra.mxu0 %v6499_v59  ;;  %10017 = vmatprep.subr.mxu1 %v6703_v13 }
 0x65d   : > { %9986 = vmatprep.mubr.f32.mxu0 %v6500_v63  ;;  %10018 = vmatpush3.msra.mxu1 %v6703_v13 }
 0x65e   : > { %10019 = vmatprep.subr.mxu1 %v6702_v48  ;;  %10057 = vmatprep.subr.mxu0 %v14860_v32 }
 0x65f   : > { %10020 = vmatpush3.msra.mxu1 %v6702_v48  ;;  %10058 = vmatpush3.msra.mxu0 %v14860_v32 }
 0x660   : > { %9987 = vmatmul.mubr.f32.gmra.mxu0 %v6501_v3  ;;  %10101 = vmatprep.subr.mxu1 %v14815_v16 }
 0x661   : > { %10059 = vmatprep.subr.mxu0 %v14867_v20 }
 0x662   : > { %10060 = vmatpush3.msra.mxu0 %v14867_v20 }
 0x663   : > { %10061 = vmatprep.subr.mxu0 %v14878_v39 }
 0x664   : > { %10062 = vmatpush3.msra.mxu0 %v14878_v39 }
 0x665   : > { %10063 = vmatprep.subr.mxu0 %v14889_v21 }
 0x666   : > { %10064 = vmatpush3.msra.mxu0 %v14889_v21 }
 0x667   : > { %10065 = vmatprep.subr.mxu0 %v14896_v9 }
 0x668   : > { %10066 = vmatpush3.msra.mxu0 %v14896_v9 }
 0x669   : > { %10067 = vmatprep.subr.mxu0 %v14903_v52 }
 0x66a   : > { %10068 = vmatpush3.msra.mxu0 %v14903_v52 }
 0x6a6   : > { %v14852_v25 = vpop.f32.mrf.mxu0  ;;  %v14854_v10 = vpop.f32.mrf.mxu1 }
 0x6a7   : > { %v5766_v52 = vadd.f32 %v14854_v10, %v14852_v25 }
 0x6a8   : > { %v14870_v29 = vpop.f32.mrf.mxu0  ;;  %v14872_v58 = vpop.f32.mrf.mxu1 }
 0x6a9   : > { %v5761_v21 = vadd.f32 %v14872_v58, %v14870_v29  ;;  %v14972_v29 = vld [vmem:[%s15191_s8] ss:$0 sm:$0xff] }
 0x6ae   : > { %v14881_v40 = vpop.f32.mrf.mxu0  ;;  %v14883_v37 = vpop.f32.mrf.mxu1 }
 0x6b0   : > { %v5593_v46 = vpop.f32.mrf.mxu0  ;;  %v5770_v1 = vpop.f32.mrf.mxu1 }
 0x6b6   : > { %v9749_v30 = vpop.f32.mrf.mxu0  ;;  %v9805_v22 = vpop.f32.mrf.mxu1 }
 0x6b7   : > { %v5786_v10 = vadd.f32 %v9805_v22, %v9749_v30 }
 0x6b8   : > { %v5603_v24 = vpop.f32.mrf.mxu0  ;;  %v5780_v23 = vpop.f32.mrf.mxu1 }
 0x6be   : > { %v14909_v33 = vpop.f32.mrf.mxu0  ;;  %v14911_v45 = vpop.f32.mrf.mxu1 }
 0x6c0   : > { %v14913_v19 = vpop.f32.mrf.mxu0  ;;  %v14915_v43 = vpop.f32.mrf.mxu1 }
 0x6c6   : > { %v14917_v62 = vpop.f32.mrf.mxu0  ;;  %v14919_v31 = vpop.f32.mrf.mxu1 }
 0x6c8   : > { %v14921_v56 = vpop.f32.mrf.mxu0  ;;  %v14923_v26 = vpop.f32.mrf.mxu1 }
 0x6ce   : > { %v14925_v28 = vpop.f32.mrf.mxu0  ;;  %v14927_v7 = vpop.f32.mrf.mxu1 }
 0x6d0   : > { %v14929_v38 = vpop.f32.mrf.mxu0  ;;  %v14931_v61 = vpop.f32.mrf.mxu1 }
 0x6d6   : > { %v14933_v14 = vpop.f32.mrf.mxu0  ;;  %v14935_v57 = vpop.f32.mrf.mxu1 }
 0x6d8   : > { %v14937_v50 = vpop.f32.mrf.mxu0  ;;  %v14939_v35 = vpop.f32.mrf.mxu1 }
 0x6d9   : > { %15445 = vst [vmem:[#allocation6_spill] sm:$0xff] %v14937_v50  ;;  %15446 = vst [vmem:[#allocation27_spill] sm:$0xff] %v14939_v35 }
 0x6de   : > { %v14941_v11 = vpop.f32.mrf.mxu0  ;;  %v14943_v34 = vpop.f32.mrf.mxu1 }
 0x6df   : > { %15447 = vst [vmem:[#allocation11_spill] sm:$0xff] %v14941_v11  ;;  %15448 = vst [vmem:[#allocation5_spill] sm:$0xff] %v14943_v34  ;;  %v5771_v34 = vadd.f32 %v5770_v1, %v5593_v46 }
 0x6e0   : > { %v14945_v12 = vpop.f32.mrf.mxu0  ;;  %v14947_v17 = vpop.f32.mrf.mxu1 }
 0x6e1   : > { %15449 = vst [vmem:[#allocation17_spill] sm:$0xff] %v14945_v12  ;;  %15450 = vst [vmem:[#allocation8_spill] sm:$0xff] %v14947_v17  ;;  %v5776_v17 = vadd.f32 %v14883_v37, %v14881_v40 }
 0x6e2   : > { %v9855_v15 = vpop.f32.mrf.mxu0  ;;  %v9911_v59 = vpop.f32.mrf.mxu1 }
 0x6e3   : > { %v6098_v39 = vadd.f32 %v9855_v15, %v5766_v52  ;;  %v5781_v52 = vadd.f32 %v5780_v23, %v5603_v24 }
 0x6e4   : > { %v6018_v63 = vpop.f32.mrf.mxu0  ;;  %v6293_v4 = vpop.f32.mrf.mxu1 }
 0x6e5   : > { %v6097_v12 = vadd.f32 %v6018_v63, %v5761_v21  ;;  %v6373_v11 = vadd.f32 %v9911_v59, %v6098_v39  ;;  %v5796_v39 = vadd.f32 %v14911_v45, %v14909_v33  ;;  %v5806_v33 = vadd.f32 %v14919_v31, %v14917_v62 }
 0x6e6   : > { %v9914_v27 = vpop.f32.mrf.mxu1  ;;  %v5816_v31 = vadd.f32 %v14927_v7, %v14925_v28 }
 0x6e7   : > { %v9858_v3 = vpop.f32.mrf.mxu0 }
 0x6e8   : > { %v6303_v49 = vpop.f32.mrf.mxu1 }
 0x6e9   : > { %v6028_v41 = vpop.f32.mrf.mxu0 }
 0x6ea   : > { %v9917_v42 = vpop.f32.mrf.mxu1  ;;  %v6099_v35 = vadd.f32 %v6028_v41, %v5771_v34 }
 0x6ec   : > { %v9861_v55 = vpop.f32.mrf.mxu0  ;;  %v6313_v47 = vpop.f32.mrf.mxu1  ;;  %v6374_v22 = vadd.f32 %v6303_v49, %v6099_v35 }
 0x6ed   : > { %v6102_v37 = vadd.f32 %v9861_v55, %v5786_v10 }
 0x6ee   : > { %v6038_v0 = vpop.f32.mrf.mxu0  ;;  %v9920_v13 = vpop.f32.mrf.mxu1 }
 0x6ef   : > { %v6101_v34 = vadd.f32 %v6038_v0, %v5781_v52  ;;  %v6377_v24 = vadd.f32 %v9917_v42, %v6102_v37 }
 0x6f0   : > { %v9864_v18 = vpop.f32.mrf.mxu0  ;;  %v6323_v20 = vpop.f32.mrf.mxu1 }
 0x6f1   : > { %v6104_v23 = vadd.f32 %v9864_v18, %v5796_v39 }
 0x6f2   : > { %v6048_v51 = vpop.f32.mrf.mxu0  ;;  %v9923_v36 = vpop.f32.mrf.mxu1 }
 0x6f3   : > { %v6379_v55 = vadd.f32 %v9920_v13, %v6104_v23  ;;  %v15460_v23 = vld [vmem:[#allocation24_spill] sm:$0xff] }
 0x6f4   : > { %v9867_v5 = vpop.f32.mrf.mxu0  ;;  %v6333_v46 = vpop.f32.mrf.mxu1 }
 0x6f5   : > { %v6106_v0 = vadd.f32 %v9867_v5, %v5806_v33 }
 0x6f6   : > { %v14949_v54 = vpop.f32.mrf.mxu0  ;;  %v9926_v45 = vpop.f32.mrf.mxu1 }
 0x6f7   : > { %v6381_v7 = vadd.f32 %v9923_v36, %v6106_v0 }
 0x6f8   : > { %v14951_v2 = vpop.f32.mrf.mxu0 }
 0x6fa   : > { %v14953_v6 = vpop.f32.mrf.mxu0 }
 0x6fc   : > { %v14955_v48 = vpop.f32.mrf.mxu0 }
 0x6fd   : > { %15451 = vst [vmem:[#allocation18_spill] sm:$0xff] %v14955_v48  ;;  %v6100_v48 = vadd.f32 %v9858_v3, %v5776_v17  ;;  %v5791_v17 = vadd.f32 %v14915_v43, %v14913_v19  ;;  %v6376_v3 = vadd.f32 %v6313_v47, %v6101_v34  ;;  %v5801_v19 = vadd.f32 %v14923_v26, %v14921_v56 }
 0x6fe   : > { %v14959_v9 = vpop.f32.mrf.mxu0 }
 0x6ff   : > { %15452 = vst [vmem:[#allocation36_spill] sm:$0xff] %v14959_v9  ;;  %v6372_v9 = vadd.f32 %v6293_v4, %v6097_v12  ;;  %v6375_v40 = vadd.f32 %v9914_v27, %v6100_v48  ;;  %v6103_v4 = vadd.f32 %v6048_v51, %v5791_v17  ;;  %v6105_v18 = vadd.f32 %v14949_v54, %v5801_v19  ;;  %v6343_v51 = vpop.f32.mrf.mxu1 }
 0x700   : > { %v14963_v32 = vpop.f32.mrf.mxu0  ;;  %v6108_v54 = vadd.f32 %v14951_v2, %v5816_v31  ;;  %v15464_v31 = vld [vmem:[#allocation28_spill] sm:$0xff] }
 0x701   : > { %v6378_v56 = vadd.f32 %v6323_v20, %v6103_v4  ;;  %v5826_v20 = vadd.f32 %v14935_v57, %v14933_v14  ;;  %v6380_v10 = vadd.f32 %v6333_v46, %v6105_v18  ;;  %v15455_v57 = vld [vmem:[#allocation30_spill] sm:$0xff] }
 0x702   : > { %v14967_v44 = vpop.f32.mrf.mxu0 }
 0x704   : > { %v9967_v25 = vpop.f32.mrf.mxu0  ;;  %v15456_v39 = vld [vmem:[#allocation18_spill] sm:$0xff] }
 0x705   : > { %v6648_v50 = vadd.f32 %v9967_v25, %v6373_v11  ;;  %v6110_v46 = vadd.f32 %v15456_v39, %v5826_v20 }
 0x706   : > { %v6568_v58 = vpop.f32.mrf.mxu0 }
 0x707   : > { %v6647_v21 = vadd.f32 %v6568_v58, %v6372_v9  ;;  %v6671_v1 = vadd.f32 %v14972_v29, %v6648_v50  ;;  %v9929_v58 = vpop.f32.mrf.mxu1 }
 0x708   : > { %v9970_v30 = vpop.f32.mrf.mxu0  ;;  %v6385_v4 = vadd.f32 %v9929_v58, %v6110_v46 }
 0x709   : > { %v6670_v11 = vadd.f32 %v14972_v29, %v6647_v21  ;;  %v6650_v12 = vadd.f32 %v9970_v30, %v6375_v40  ;;  %v6687_v63 = vmax.f32 %v6671_v1, 0.0  ;;  %v15454_v40 = vld [vmem:[#allocation27_spill] sm:$0xff]  ;;  %v6383_v21 = vadd.f32 %v9926_v45, %v6108_v54  ;;  %v15461_v45 = vld [vmem:[#allocation17_spill] sm:$0xff] }
 0x70a   : > { %v6578_v15 = vpop.f32.mrf.mxu0 }
 0x70b   : > { %v6686_v59 = vmax.f32 %v6670_v11, 0.0  ;;  %v6649_v9 = vadd.f32 %v6578_v15, %v6374_v22  ;;  %v6673_v50 = vadd.f32 %v14972_v29, %v6650_v12  ;;  %v15458_v22 = vld [vmem:[#allocation5_spill] sm:$0xff]  ;;  %v15459_v11 = vld [vmem:[#allocation36_spill] sm:$0xff] }
 0x70c   : > { %v9973_v35 = vpop.f32.mrf.mxu0 }
 0x70d   : > { %v6672_v41 = vadd.f32 %v14972_v29, %v6649_v9  ;;  %v6652_v27 = vadd.f32 %v9973_v35, %v6377_v24  ;;  %10021 = vmatprep.mubr.f32.mxu1 %v6686_v59  ;;  %v6689_v42 = vmax.f32 %v6673_v50, 0.0 }
 0x70e   : > { %v6588_v43 = vpop.f32.mrf.mxu0  ;;  %10022 = vmatmul.mubr.f32.vlgmr.msra.gmra.mxu1 %v6687_v63  ;;  %v15462_v63 = vld [vmem:[#allocation8_spill] sm:$0xff] }
 0x70f   : > { %v6688_v49 = vmax.f32 %v6672_v41, 0.0  ;;  %v6651_v62 = vadd.f32 %v6588_v43, %v6376_v3  ;;  %10117 = vmatpush3.msra.mxu1 %v14815_v16  ;;  %v6675_v47 = vadd.f32 %v14972_v29, %v6652_v27  ;;  %v5811_v16 = vadd.f32 %v14931_v61, %v14929_v38  ;;  %v15463_v3 = vld [vmem:[#allocation37_spill] sm:$0xff] }
 0x710   : > { %v9976_v48 = vpop.f32.mrf.mxu0  ;;  %10102 = vmatprep.subr.mxu1 %v14820_v60  ;;  %v5831_v50 = vadd.f32 %v15462_v63, %v15461_v45 }
 0x711   : > { %v6674_v26 = vadd.f32 %v14972_v29, %v6651_v62  ;;  %v6654_v5 = vadd.f32 %v9976_v48, %v6379_v55  ;;  %10024 = vmatprep.mubr.f32.mxu1 %v6688_v49  ;;  %10118 = vmatpush3.msra.mxu1 %v14820_v60  ;;  %v6691_v60 = vmax.f32 %v6675_v47, 0.0  ;;  %v6107_v61 = vadd.f32 %v14953_v6, %v5811_v16  ;;  %v15457_v6 = vld [vmem:[#allocation11_spill] sm:$0xff]  ;;  %v15465_v47 = vld [vmem:[#allocation29_spill] sm:$0xff] }
 0x712   : > { %v6598_v28 = vpop.f32.mrf.mxu0  ;;  %10025 = vmatmul.mubr.f32.gmra.mxu1 %v6689_v42  ;;  %10103 = vmatprep.subr.mxu1 %v14828_v8  ;;  %v5836_v34 = vadd.f32 %v15458_v22, %v15457_v6  ;;  %v6111_v18 = vadd.f32 %v14967_v44, %v5831_v50 }
 0x713   : > { %v6690_v13 = vmax.f32 %v6674_v26, 0.0  ;;  %v6653_v25 = vadd.f32 %v6598_v28, %v6378_v56  ;;  %10119 = vmatpush3.msra.mxu1 %v14828_v8  ;;  %v6677_v52 = vadd.f32 %v14972_v29, %v6654_v5  ;;  %v15453_v8 = vld [vmem:[#allocation6_spill] sm:$0xff]  ;;  %v6382_v59 = vadd.f32 %v6343_v51, %v6107_v61  ;;  %v15468_v61 = vld [vmem:[#allocation39_spill] sm:$0xff] }
 0x714   : > { %v9979_v38 = vpop.f32.mrf.mxu0  ;;  %10104 = vmatprep.subr.mxu1 %v14835_v53  ;;  %v5821_v37 = vadd.f32 %v15454_v40, %v15453_v8  ;;  %v6112_v41 = vadd.f32 %v14963_v32, %v5836_v34  ;;  %v6889_v40 = vld [vmem:[%s15194_s11 + $0x18] sm:$0xff] }
 0x715   : > { %v6676_v36 = vadd.f32 %v14972_v29, %v6653_v25  ;;  %v6656_v2 = vadd.f32 %v9979_v38, %v6381_v7  ;;  %10027 = vmatprep.mubr.f32.mxu1 %v6690_v13  ;;  %10120 = vmatpush3.msra.mxu1 %v14835_v53  ;;  %v6353_v53 = vpop.f32.mrf.mxu1  ;;  %v6693_v17 = vmax.f32 %v6677_v52, 0.0  ;;  %v15466_v7 = vld [vmem:[#allocation40_spill] sm:$0xff] }
 0x716   : > { %v6608_v14 = vpop.f32.mrf.mxu0  ;;  %10028 = vmatmul.mubr.f32.gmra.mxu1 %v6691_v60  ;;  %10105 = vmatprep.subr.mxu1 %v15455_v57  ;;  %v6109_v12 = vadd.f32 %v15459_v11, %v5821_v37  ;;  %v6888_v37 = vld [vmem:[%s15194_s11 + $0x10] sm:$0xff] }
 0x717   : > { %v6692_v1 = vmax.f32 %v6676_v36, 0.0  ;;  %v6655_v30 = vadd.f32 %v6608_v14, %v6380_v10  ;;  %10121 = vmatpush3.msra.mxu1 %v15455_v57  ;;  %v6679_v15 = vadd.f32 %v14972_v29, %v6656_v2  ;;  %v9932_v55 = vpop.f32.mrf.mxu1  ;;  %v15467_v10 = vld [vmem:[#allocation3_spill] sm:$0xff]  ;;  %10069 = vmatprep.subr.mxu0 %v6889_v40 }
 0x718   : > { %v9982_v24 = vpop.f32.mrf.mxu0  ;;  %10106 = vmatprep.subr.mxu1 %v15460_v23  ;;  %v6384_v43 = vadd.f32 %v6353_v53, %v6109_v12  ;;  %v6387_v48 = vadd.f32 %v9932_v55, %v6112_v41  ;;  %10070 = vmatpush3.msra.mxu0 %v6889_v40  ;;  %v6886_v14 = vld [vmem:[%s15194_s11] sm:$0xff] }
 0x719   : > { %v6678_v9 = vadd.f32 %v14972_v29, %v6655_v30  ;;  %v6658_v33 = vadd.f32 %v9982_v24, %v6383_v21  ;;  %10030 = vmatprep.mubr.f32.mxu1 %v6692_v1  ;;  %10122 = vmatpush3.msra.mxu1 %v15460_v23  ;;  %v6695_v0 = vmax.f32 %v6679_v15, 0.0  ;;  %v6363_v5 = vpop.f32.mrf.mxu1  ;;  %v8061_v57 = vld [vmem:[%s15193_s10] ss:$0 sm:$0xff] }
 0x71a   : > { %v6618_v35 = vpop.f32.mrf.mxu0  ;;  %10031 = vmatmul.mubr.f32.gmra.mxu1 %v6693_v17  ;;  %10107 = vmatprep.subr.mxu1 %v15463_v3  ;;  %v6386_v54 = vadd.f32 %v6363_v5, %v6111_v18 }
 0x71b   : > { %v6694_v27 = vmax.f32 %v6678_v9, 0.0  ;;  %v6657_v19 = vadd.f32 %v6618_v35, %v6382_v59  ;;  %10123 = vmatpush3.msra.mxu1 %v15463_v3  ;;  %v6681_v49 = vadd.f32 %v14972_v29, %v6658_v33  ;;  %10071 = vmatprep.subr.mxu0 %v6888_v37 }
 0x71c   : > { %v9985_v62 = vpop.f32.mrf.mxu0  ;;  %10108 = vmatprep.subr.mxu1 %v15464_v31  ;;  %10072 = vmatpush3.msra.mxu0 %v6888_v37 }
 0x71d   : > { %v6680_v51 = vadd.f32 %v14972_v29, %v6657_v19  ;;  %v6660_v42 = vadd.f32 %v9985_v62, %v6385_v4  ;;  %10033 = vmatprep.mubr.f32.mxu1 %v6694_v27  ;;  %10124 = vmatpush3.msra.mxu1 %v15464_v31  ;;  %v6697_v16 = vmax.f32 %v6681_v49, 0.0 }
 0x71e   : > { %v6628_v32 = vpop.f32.mrf.mxu0  ;;  %10034 = vmatmul.mubr.f32.gmra.mxu1 %v6695_v0  ;;  %10109 = vmatprep.subr.mxu1 %v15465_v47 }
 0x71f   : > { %v6696_v56 = vmax.f32 %v6680_v51, 0.0  ;;  %v6659_v26 = vadd.f32 %v6628_v32, %v6384_v43  ;;  %10125 = vmatpush3.msra.mxu1 %v15465_v47  ;;  %v6683_v28 = vadd.f32 %v14972_v29, %v6660_v42 }
 0x720   : > { %v9988_v44 = vpop.f32.mrf.mxu0  ;;  %10110 = vmatprep.subr.mxu1 %v15466_v7 }
 0x721   : > { %v6682_v13 = vadd.f32 %v14972_v29, %v6659_v26  ;;  %v6662_v25 = vadd.f32 %v9988_v44, %v6387_v48  ;;  %10036 = vmatprep.mubr.f32.mxu1 %v6696_v56  ;;  %10126 = vmatpush3.msra.mxu1 %v15466_v7  ;;  %v6699_v52 = vmax.f32 %v6683_v28, 0.0 }
 0x722   : > { %v6638_v20 = vpop.f32.mrf.mxu0  ;;  %10037 = vmatmul.mubr.f32.gmra.mxu1 %v6697_v16  ;;  %10111 = vmatprep.subr.mxu1 %v15467_v10 }
 0x723   : > { %v6698_v58 = vmax.f32 %v6682_v13, 0.0  ;;  %v6661_v60 = vadd.f32 %v6638_v20, %v6386_v54  ;;  %10127 = vmatpush3.msra.mxu1 %v15467_v10  ;;  %v6685_v38 = vadd.f32 %v14972_v29, %v6662_v25  ;;  %v8062_v25 = vld [vmem:[%s15195_s12] ss:$0 sm:$0xff] }
 0x724   : > { %10112 = vmatprep.subr.mxu1 %v15468_v61 }
 0x725   : > { %v6684_v36 = vadd.f32 %v14972_v29, %v6661_v60  ;;  %10039 = vmatprep.mubr.f32.mxu1 %v6698_v58  ;;  %10128 = vmatpush3.msra.mxu1 %v15468_v61  ;;  %v6701_v8 = vmax.f32 %v6685_v38, 0.0  ;;  %v6887_v29 = vld [vmem:[%s15194_s11 + $0x8] sm:$0xff] }
 0x726   : > { %10040 = vmatmul.mubr.f32.gmra.mxu1 %v6699_v52  ;;  %10113 = vmatprep.subr.mxu1 %v6889_v40 }
 0x727   : > { %v6700_v2 = vmax.f32 %v6684_v36, 0.0  ;;  %10129 = vmatpush3.msra.mxu1 %v6889_v40  ;;  %10073 = vmatprep.subr.mxu0 %v6887_v29 }
 0x728   : > { %10114 = vmatprep.subr.mxu1 %v6888_v37  ;;  %10074 = vmatpush3.msra.mxu0 %v6887_v29 }
 0x729   : > { %10042 = vmatprep.mubr.f32.mxu1 %v6700_v2  ;;  %10130 = vmatpush3.msra.mxu1 %v6888_v37 }
 0x72a   : > { %10043 = vmatmul.mubr.f32.gmra.mxu1 %v6701_v8  ;;  %10115 = vmatprep.subr.mxu1 %v6887_v29 }
 0x72b   : > { %10131 = vmatpush3.msra.mxu1 %v6887_v29  ;;  %10075 = vmatprep.subr.mxu0 %v6886_v14 }
 0x72c   : > { %10116 = vmatprep.subr.mxu1 %v6886_v14  ;;  %10076 = vmatpush3.msra.mxu0 %v6886_v14 }
 0x72d   : > { %10132 = vmatpush3.msra.mxu1 %v6886_v14 }
 0x7ce   : > { %v10023_v21 = vpop.f32.mrf.mxu1 }
 0x7cf   : > { %v6797_v39 = vadd.f32 %v10023_v21, %v8061_v57 }
 0x7d0   : > { %v6791_v46 = vpop.f32.mrf.mxu1 }
 0x7d1   : > { %v6792_v1 = vadd.f32 %v8061_v57, %v6791_v46  ;;  %v6871_v22 = vmax.f32 %v6797_v39, 0.0 }
 0x7d2   : > { %v10026_v30 = vpop.f32.mrf.mxu1 }
 0x7d3   : > { %v6870_v6 = vmax.f32 %v6792_v1, 0.0  ;;  %v6807_v34 = vadd.f32 %v10026_v30, %v8061_v57 }
 0x7d4   : > { %v6801_v11 = vpop.f32.mrf.mxu1 }
 0x7d5   : > { %v6802_v12 = vadd.f32 %v8061_v57, %v6801_v11  ;;  %10077 = vmatprep.mubr.f32.mxu0 %v6870_v6  ;;  %v6873_v15 = vmax.f32 %v6807_v34, 0.0 }
 0x7d6   : > { %v10029_v53 = vpop.f32.mrf.mxu1  ;;  %10078 = vmatmul.mubr.f32.vlgmr.msra.gmra.mxu0 %v6871_v22 }
 0x7d7   : > { %v6872_v17 = vmax.f32 %v6802_v12, 0.0  ;;  %v6817_v24 = vadd.f32 %v10029_v53, %v8061_v57 }
 0x7d8   : > { %v6811_v23 = vpop.f32.mrf.mxu1 }
 0x7d9   : > { %v6812_v59 = vadd.f32 %v8061_v57, %v6811_v23  ;;  %10080 = vmatprep.mubr.f32.mxu0 %v6872_v17  ;;  %v6875_v45 = vmax.f32 %v6817_v24, 0.0 }
 0x7da   : > { %v10032_v9 = vpop.f32.mrf.mxu1  ;;  %10081 = vmatmul.mubr.f32.gmra.mxu0 %v6873_v15 }
 0x7db   : > { %v6874_v33 = vmax.f32 %v6812_v59, 0.0  ;;  %v6827_v63 = vadd.f32 %v10032_v9, %v8061_v57 }
 0x7dc   : > { %v6821_v50 = vpop.f32.mrf.mxu1 }
 0x7dd   : > { %v6822_v35 = vadd.f32 %v8061_v57, %v6821_v50  ;;  %10083 = vmatprep.mubr.f32.mxu0 %v6874_v33  ;;  %v6877_v41 = vmax.f32 %v6827_v63, 0.0 }
 0x7de   : > { %v10035_v3 = vpop.f32.mrf.mxu1  ;;  %10084 = vmatmul.mubr.f32.gmra.mxu0 %v6875_v45 }
 0x7df   : > { %v6876_v4 = vmax.f32 %v6822_v35, 0.0  ;;  %v6837_v27 = vadd.f32 %v10035_v3, %v8061_v57 }
 0x7e0   : > { %v6831_v19 = vpop.f32.mrf.mxu1 }
 0x7e1   : > { %v6832_v43 = vadd.f32 %v8061_v57, %v6831_v19  ;;  %10086 = vmatprep.mubr.f32.mxu0 %v6876_v4  ;;  %v6879_v49 = vmax.f32 %v6837_v27, 0.0 }
 0x7e2   : > { %v10038_v55 = vpop.f32.mrf.mxu1  ;;  %10087 = vmatmul.mubr.f32.gmra.mxu0 %v6877_v41 }
 0x7e3   : > { %v6878_v0 = vmax.f32 %v6832_v43, 0.0  ;;  %v6847_v62 = vadd.f32 %v10038_v55, %v8061_v57 }
 0x7e4   : > { %v6841_v31 = vpop.f32.mrf.mxu1 }
 0x7e5   : > { %v6842_v18 = vadd.f32 %v8061_v57, %v6841_v31  ;;  %10089 = vmatprep.mubr.f32.mxu1 %v6878_v0  ;;  %v6881_v32 = vmax.f32 %v6847_v62, 0.0 }
 0x7e6   : > { %v10041_v51 = vpop.f32.mrf.mxu1  ;;  %10090 = vmatmul.mubr.f32.vlgmr.msra.gmra.mxu1 %v6879_v49 }
 0x7e7   : > { %v6880_v42 = vmax.f32 %v6842_v18, 0.0  ;;  %v6857_v47 = vadd.f32 %v10041_v51, %v8061_v57 }
 0x7e8   : > { %v6851_v48 = vpop.f32.mrf.mxu1 }
 0x7e9   : > { %v6852_v56 = vadd.f32 %v8061_v57, %v6851_v48  ;;  %10092 = vmatprep.mubr.f32.mxu1 %v6880_v42  ;;  %v6883_v16 = vmax.f32 %v6857_v47, 0.0 }
 0x7ea   : > { %v10044_v26 = vpop.f32.mrf.mxu1  ;;  %10093 = vmatmul.mubr.f32.gmra.mxu1 %v6881_v32 }
 0x7eb   : > { %v6882_v5 = vmax.f32 %v6852_v56, 0.0  ;;  %v6867_v28 = vadd.f32 %v10044_v26, %v8061_v57 }
 0x7ec   : > { %v6861_v44 = vpop.f32.mrf.mxu1 }
 0x7ed   : > { %v6862_v7 = vadd.f32 %v8061_v57, %v6861_v44  ;;  %10095 = vmatprep.mubr.f32.mxu1 %v6882_v5  ;;  %v6885_v13 = vmax.f32 %v6867_v28, 0.0 }
 0x7ee   : > { %10096 = vmatmul.mubr.f32.gmra.mxu1 %v6883_v16 }
 0x7ef   : > { %v6884_v54 = vmax.f32 %v6862_v7, 0.0 }
 0x7f1   : > { %10098 = vmatprep.mubr.f32.mxu1 %v6884_v54 }
 0x7f2   : > { %10099 = vmatmul.mubr.f32.gmra.mxu1 %v6885_v13 }
 0x896   : > { %v10079_v20 = vpop.f32.mrf.mxu0 }
 0x897   : > { %v6981_v10 = vadd.f32 %v10079_v20, %v8062_v25 }
 0x898   : > { %v6975_v58 = vpop.f32.mrf.mxu0 }
 0x899   : > { %7056 = vmax.xlane.f32.xlu0 %v6981_v10  ;;  %v6976_v52 = vadd.f32 %v8062_v25, %v6975_v58 }
 0x89a   : > { %v10082_v60 = vpop.f32.mrf.mxu0 }
 0x89b   : > { %v6991_v36 = vadd.f32 %v10082_v60, %v8062_v25 }
 0x89c   : > { %v6985_v38 = vpop.f32.mrf.mxu0 }
 0x89d   : > { %7054 = vmax.xlane.f32.xlu0 %v6976_v52  ;;  %v6986_v40 = vadd.f32 %v8062_v25, %v6985_v38 }
 0x89e   : > { %v10085_v61 = vpop.f32.mrf.mxu0 }
 0x89f   : > { %v7001_v14 = vadd.f32 %v10085_v61, %v8062_v25 }
 0x8a0   : > { %v6995_v2 = vpop.f32.mrf.mxu0 }
 0x8a1   : > { %7060 = vmax.xlane.f32.xlu0 %v6991_v36  ;;  %v6996_v57 = vadd.f32 %v8062_v25, %v6995_v2 }
 0x8a2   : > { %v10088_v8 = vpop.f32.mrf.mxu0 }
 0x8a3   : > { %v7011_v39 = vadd.f32 %v10088_v8, %v8062_v25 }
 0x8a4   : > { %v7005_v37 = vpop.f32.mrf.mxu0 }
 0x8a5   : > { %v7006_v29 = vadd.f32 %v8062_v25, %v7005_v37  ;;  %7058 = vmax.xlane.f32.xlu0 %v6986_v40 }
 0x8a6   : > { %v10091_v21 = vpop.f32.mrf.mxu1 }
 0x8a7   : > { %7066 = vmax.xlane.f32.xlu1 %v7006_v29  ;;  %v7021_v1 = vadd.f32 %v10091_v21, %v8062_v25 }
 0x8a8   : > { %v7015_v46 = vpop.f32.mrf.mxu1 }
 0x8a9   : > { %7064 = vmax.xlane.f32.xlu0 %v7001_v14  ;;  %v15058_v6 = vadd.f32 %v8062_v25, %v7015_v46 }
 0x8aa   : > { %v10094_v30 = vpop.f32.mrf.mxu1 }
 0x8ab   : > { %v15061_v34 = vadd.f32 %v10094_v30, %v8062_v25 }
 0x8ac   : > { %v7025_v22 = vpop.f32.mrf.mxu1 }
 0x8ad   : > { %7062 = vmax.xlane.f32.xlu0 %v6996_v57  ;;  %v15064_v12 = vadd.f32 %v8062_v25, %v7025_v22 }
 0x8ae   : > { %v10097_v11 = vpop.f32.mrf.mxu1 }
 0x8af   : > { %v15067_v17 = vadd.f32 %v10097_v11, %v8062_v25 }
 0x8b0   : > { %v7035_v53 = vpop.f32.mrf.mxu1 }
 0x8b1   : > { %7068 = vmax.xlane.f32.xlu0 %v7011_v39  ;;  %v15070_v24 = vadd.f32 %v8062_v25, %v7035_v53 }
 0x8b2   : > { %v10100_v15 = vpop.f32.mrf.mxu1 }
 0x8b3   : > { %v15076_v9 = vadd.f32 %v10100_v15, %v8062_v25 }
 0x8b4   : > { %v7045_v23 = vpop.f32.mrf.mxu1 }
 0x8b5   : > { %7072 = vmax.xlane.f32.xlu0 %v7021_v1  ;;  %v15073_v59 = vadd.f32 %v8062_v25, %v7045_v23 }
 0x8b9   : > { %7070 = vmax.xlane.f32.xlu0 %v15058_v6 }
 0x8bd   : > { %7076 = vmax.xlane.f32.xlu0 %v15061_v34 }
 0x8c1   : > { %7074 = vmax.xlane.f32.xlu0 %v15064_v12 }
 0x8c5   : > { %7080 = vmax.xlane.f32.xlu0 %v15067_v17 }
 0x8c9   : > { %7078 = vmax.xlane.f32.xlu0 %v15070_v24 }
 0x8cd   : > { %7082 = vmax.xlane.f32.xlu0 %v15073_v59 }
 0x8d1   : > { %7084 = vmax.xlane.f32.xlu0 %v15076_v9 }
 0x922   : > { %v7057_v33 = vpop.xlane.xlu0 %7056 }
 0x923   : > { %v15079_v45 = vsub.f32 %v6981_v10, %v7057_v33 }
 0x925   : > { %v7104_v63 = vmul.f32 1.442695, %v15079_v45 }
 0x926   : > { %v7055_v50 = vpop.xlane.xlu0 %7054 }
 0x927   : > { %10594 = vpow2.f32 %v7104_v63  ;;  %v15082_v35 = vsub.f32 %v6976_v52, %v7055_v50 }
 0x929   : > { %v7102_v3 = vmul.f32 1.442695, %v15082_v35 }
 0x92a   : > { %v7061_v4 = vpop.xlane.xlu0 %7060 }
 0x92b   : > { %10596 = vpow2.f32 %v7102_v3  ;;  %v15085_v41 = vsub.f32 %v6991_v36, %v7061_v4 }
 0x92d   : > { %v7108_v27 = vmul.f32 1.442695, %v15085_v41 }
 0x92e   : > { %v7059_v19 = vpop.xlane.xlu0 %7058 }
 0x92f   : > { %10598 = vpow2.f32 %v7108_v27  ;;  %v15088_v43 = vsub.f32 %v6986_v40, %v7059_v19 }
 0x930   : > { %v7067_v49 = vpop.xlane.xlu1 %7066 }
 0x931   : > { %v7106_v55 = vmul.f32 1.442695, %v15088_v43  ;;  %v15094_v51 = vsub.f32 %v7006_v29, %v7067_v49 }
 0x932   : > { %v7065_v0 = vpop.xlane.xlu0 %7064 }
 0x933   : > { %10600 = vpow2.f32 %v7106_v55  ;;  %v15091_v62 = vsub.f32 %v7001_v14, %v7065_v0  ;;  %v7114_v56 = vmul.f32 1.442695, %v15094_v51 }
 0x934   : > { %v10595_v31 = vpop.eup %10594 }
 0x935   : > { %v7112_v18 = vmul.f32 1.442695, %v15091_v62  ;;  %7136 = vadd.xlane.f32.xlu1 %v10595_v31 }
 0x936   : > { %v7063_v42 = vpop.xlane.xlu0 %7062 }
 0x937   : > { %10602 = vpow2.f32 %v7112_v18  ;;  %v15096_v32 = vsub.f32 %v6996_v57, %v7063_v42 }
 0x938   : > { %v10597_v47 = vpop.eup %10596 }
 0x939   : > { %v7110_v48 = vmul.f32 1.442695, %v15096_v32  ;;  %7134 = vadd.xlane.f32.xlu0 %v10597_v47 }
 0x93a   : > { %v7069_v26 = vpop.xlane.xlu0 %7068 }
 0x93b   : > { %10604 = vpow2.f32 %v7110_v48  ;;  %v15100_v5 = vsub.f32 %v7011_v39, %v7069_v26 }
 0x93c   : > { %v10599_v16 = vpop.eup %10598  ;;  %10606 = vpow2.f32 %v7114_v56 }
 0x93d   : > { %v7116_v28 = vmul.f32 1.442695, %v15100_v5  ;;  %7140 = vadd.xlane.f32.xlu1 %v10599_v16 }
 0x93e   : > { %v7073_v44 = vpop.xlane.xlu0 %7072 }
 0x93f   : > { %10608 = vpow2.f32 %v7116_v28  ;;  %v15103_v7 = vsub.f32 %v7021_v1, %v7073_v44 }
 0x940   : > { %v10601_v54 = vpop.eup %10600 }
 0x941   : > { %v7120_v13 = vmul.f32 1.442695, %v15103_v7  ;;  %7138 = vadd.xlane.f32.xlu0 %v10601_v54 }
 0x942   : > { %v7071_v25 = vpop.xlane.xlu0 %7070 }
 0x943   : > { %10610 = vpow2.f32 %v7120_v13  ;;  %v15107_v20 = vsub.f32 %v15058_v6, %v7071_v25 }
 0x944   : > { %v10603_v10 = vpop.eup %10602 }
 0x945   : > { %v7118_v58 = vmul.f32 1.442695, %v15107_v20  ;;  %7144 = vadd.xlane.f32.xlu1 %v10603_v10 }
 0x946   : > { %v7077_v60 = vpop.xlane.xlu0 %7076 }
 0x947   : > { %10612 = vpow2.f32 %v7118_v58  ;;  %v15111_v52 = vsub.f32 %v15061_v34, %v7077_v60 }
 0x948   : > { %v10605_v38 = vpop.eup %10604 }
 0x949   : > { %v7124_v61 = vmul.f32 1.442695, %v15111_v52  ;;  %7142 = vadd.xlane.f32.xlu0 %v10605_v38  ;;  %v10607_v2 = vpop.eup %10606 }
 0x94a   : > { %v7075_v36 = vpop.xlane.xlu0 %7074 }
 0x94b   : > { %10614 = vpow2.f32 %v7124_v61  ;;  %v15115_v8 = vsub.f32 %v15064_v12, %v7075_v36 }
 0x94c   : > { %v10609_v40 = vpop.eup %10608 }
 0x94d   : > { %v7122_v37 = vmul.f32 1.442695, %v15115_v8  ;;  %7148 = vadd.xlane.f32.xlu1 %v10609_v40  ;;  %7146 = vadd.xlane.f32.xlu0 %v10607_v2 }
 0x94e   : > { %v7081_v29 = vpop.xlane.xlu0 %7080 }
 0x94f   : > { %10616 = vpow2.f32 %v7122_v37  ;;  %v15119_v14 = vsub.f32 %v15067_v17, %v7081_v29 }
 0x950   : > { %v10611_v57 = vpop.eup %10610 }
 0x951   : > { %v7128_v21 = vmul.f32 1.442695, %v15119_v14  ;;  %7152 = vadd.xlane.f32.xlu1 %v10611_v57 }
 0x952   : > { %v7079_v39 = vpop.xlane.xlu0 %7078 }
 0x953   : > { %10618 = vpow2.f32 %v7128_v21  ;;  %v15123_v46 = vsub.f32 %v15070_v24, %v7079_v39 }
 0x954   : > { %v10613_v1 = vpop.eup %10612 }
 0x955   : > { %v7126_v30 = vmul.f32 1.442695, %v15123_v46  ;;  %7150 = vadd.xlane.f32.xlu0 %v10613_v1 }
 0x956   : > { %v7083_v6 = vpop.xlane.xlu0 %7082 }
 0x957   : > { %10620 = vpow2.f32 %v7126_v30  ;;  %v15127_v22 = vsub.f32 %v15073_v59, %v7083_v6 }
 0x958   : > { %v10615_v34 = vpop.eup %10614 }
 0x959   : > { %v7130_v11 = vmul.f32 1.442695, %v15127_v22  ;;  %7156 = vadd.xlane.f32.xlu1 %v10615_v34 }
 0x95a   : > { %v7085_v12 = vpop.xlane.xlu0 %7084 }
 0x95b   : > { %10622 = vpow2.f32 %v7130_v11  ;;  %v15131_v53 = vsub.f32 %v15076_v9, %v7085_v12 }
 0x95c   : > { %v10617_v17 = vpop.eup %10616 }
 0x95d   : > { %v7132_v15 = vmul.f32 1.442695, %v15131_v53  ;;  %7154 = vadd.xlane.f32.xlu0 %v10617_v17 }
 0x95f   : > { %10624 = vpow2.f32 %v7132_v15 }
 0x960   : > { %v10619_v24 = vpop.eup %10618 }
 0x961   : > { %7160 = vadd.xlane.f32.xlu1 %v10619_v24 }
 0x964   : > { %v10621_v23 = vpop.eup %10620 }
 0x965   : > { %7158 = vadd.xlane.f32.xlu0 %v10621_v23 }
 0x968   : > { %v10623_v59 = vpop.eup %10622 }
 0x969   : > { %7162 = vadd.xlane.f32.xlu0 %v10623_v59 }
 0x96c   : > { %v10625_v33 = vpop.eup %10624 }
 0x96d   : > { %7164 = vadd.xlane.f32.xlu1 %v10625_v33 }
 0x9be   : > { %v7137_v63 = vpop.xlane.xlu1 %7136 }
 0x9bf   : > { %10626 = vlog2.f32 %v7137_v63 }
 0x9c2   : > { %v7135_v50 = vpop.xlane.xlu0 %7134 }
 0x9c3   : > { %10628 = vlog2.f32 %v7135_v50 }
 0x9c6   : > { %v7141_v9 = vpop.xlane.xlu1 %7140 }
 0x9c7   : > { %10630 = vlog2.f32 %v7141_v9 }
 0x9ca   : > { %v7139_v3 = vpop.xlane.xlu0 %7138 }
 0x9cb   : > { %10632 = vlog2.f32 %v7139_v3 }
 0x9cc   : > { %v10627_v4 = vpop.eup %10626 }
 0x9cd   : > { %v7169_v27 = vmul.f32 0.6931472, %v10627_v4 }
 0x9ce   : > { %v7145_v19 = vpop.xlane.xlu1 %7144 }
 0x9cf   : > { %v7199_v55 = vsub.f32 %v15079_v45, %v7169_v27  ;;  %10634 = vlog2.f32 %v7145_v19 }
 0x9d0   : > { %v10629_v0 = vpop.eup %10628 }
 0x9d1   : > { %7215 = vst [vmem:[%s15139_s25 + $0x8] sm:$0xff] %v7199_v55  ;;  %v7167_v49 = vmul.f32 0.6931472, %v10629_v0 }
 0x9d2   : > { %v7143_v31 = vpop.xlane.xlu0 %7142 }
 0x9d3   : > { %v7198_v18 = vsub.f32 %v15082_v35, %v7167_v49  ;;  %10636 = vlog2.f32 %v7143_v31 }
 0x9d4   : > { %v10631_v42 = vpop.eup %10630 }
 0x9d5   : > { %7214 = vst [vmem:[%s15139_s25] sm:$0xff] %v7198_v18  ;;  %v7173_v47 = vmul.f32 0.6931472, %v10631_v42 }
 0x9d6   : > { %v7149_v48 = vpop.xlane.xlu1 %7148  ;;  %v7147_v56 = vpop.xlane.xlu0 %7146 }
 0x9d7   : > { %v7201_v26 = vsub.f32 %v15085_v41, %v7173_v47  ;;  %10638 = vlog2.f32 %v7149_v48 }
 0x9d8   : > { %v10633_v45 = vpop.eup %10632  ;;  %10640 = vlog2.f32 %v7147_v56 }
 0x9d9   : > { %7217 = vst [vmem:[%s15139_s25 + $0x18] sm:$0xff] %v7201_v26  ;;  %v7171_v16 = vmul.f32 0.6931472, %v10633_v45 }
 0x9da   : > { %v7153_v28 = vpop.xlane.xlu1 %7152 }
 0x9db   : > { %v7200_v44 = vsub.f32 %v15088_v43, %v7171_v16  ;;  %10642 = vlog2.f32 %v7153_v28 }
 0x9dc   : > { %v10635_v35 = vpop.eup %10634 }
 0x9dd   : > { %7216 = vst [vmem:[%s15139_s25 + $0x10] sm:$0xff] %v7200_v44  ;;  %v7177_v54 = vmul.f32 0.6931472, %v10635_v35 }
 0x9de   : > { %v7151_v13 = vpop.xlane.xlu0 %7150 }
 0x9df   : > { %v7203_v25 = vsub.f32 %v15091_v62, %v7177_v54  ;;  %10644 = vlog2.f32 %v7151_v13 }
 0x9e0   : > { %v10637_v10 = vpop.eup %10636 }
 0x9e1   : > { %7219 = vst [vmem:[%s15139_s25 + $0x28] sm:$0xff] %v7203_v25  ;;  %v7175_v41 = vmul.f32 0.6931472, %v10637_v10 }
 0x9e2   : > { %v7157_v58 = vpop.xlane.xlu1 %7156 }
 0x9e3   : > { %v7202_v60 = vsub.f32 %v15096_v32, %v7175_v41  ;;  %10646 = vlog2.f32 %v7157_v58 }
 0x9e4   : > { %v10639_v38 = vpop.eup %10638 }
 0x9e5   : > { %v10641_v43 = vpop.eup %10640  ;;  %7218 = vst [vmem:[%s15139_s25 + $0x20] sm:$0xff] %v7202_v60  ;;  %v7181_v61 = vmul.f32 0.6931472, %v10639_v38 }
 0x9e6   : > { %v7179_v36 = vmul.f32 0.6931472, %v10641_v43  ;;  %v7155_v2 = vpop.xlane.xlu0 %7154 }
 0x9e7   : > { %v7205_v40 = vsub.f32 %v15100_v5, %v7181_v61  ;;  %10648 = vlog2.f32 %v7155_v2 }
 0x9e8   : > { %v10643_v62 = vpop.eup %10642  ;;  %v7204_v37 = vsub.f32 %v15094_v51, %v7179_v36 }
 0x9e9   : > { %7221 = vst [vmem:[%s15139_s25 + $0x38] sm:$0xff] %v7205_v40  ;;  %v7185_v29 = vmul.f32 0.6931472, %v10643_v62 }
 0x9ea   : > { %7220 = vst [vmem:[%s15139_s25 + $0x30] sm:$0xff] %v7204_v37  ;;  %v7161_v57 = vpop.xlane.xlu1 %7160 }
 0x9eb   : > { %v7207_v32 = vsub.f32 %v15103_v7, %v7185_v29  ;;  %10650 = vlog2.f32 %v7161_v57 }
 0x9ec   : > { %v10645_v21 = vpop.eup %10644 }
 0x9ed   : > { %7223 = vst [vmem:[%s15139_s25 + $0x48] sm:$0xff] %v7207_v32  ;;  %v7183_v39 = vmul.f32 0.6931472, %v10645_v21 }
 0x9ee   : > { %v7159_v1 = vpop.xlane.xlu0 %7158 }
 0x9ef   : > { %v7206_v5 = vsub.f32 %v15107_v20, %v7183_v39  ;;  %10652 = vlog2.f32 %v7159_v1 }
 0x9f0   : > { %v10647_v30 = vpop.eup %10646 }
 0x9f1   : > { %7222 = vst [vmem:[%s15139_s25 + $0x40] sm:$0xff] %v7206_v5  ;;  %v7189_v51 = vmul.f32 0.6931472, %v10647_v30 }
 0x9f2   : > { %v7163_v6 = vpop.xlane.xlu0 %7162 }
 0x9f3   : > { %v7209_v34 = vsub.f32 %v15111_v52, %v7189_v51  ;;  %10654 = vlog2.f32 %v7163_v6 }
 0x9f4   : > { %v10649_v11 = vpop.eup %10648 }
 0x9f5   : > { %7225 = vst [vmem:[%s15139_s25 + $0x58] sm:$0xff] %v7209_v34  ;;  %v7187_v7 = vmul.f32 0.6931472, %v10649_v11 }
 0x9f6   : > { %v7165_v12 = vpop.xlane.xlu1 %7164 }
 0x9f7   : > { %v7208_v17 = vsub.f32 %v15115_v8, %v7187_v7  ;;  %10656 = vlog2.f32 %v7165_v12 }
 0x9f8   : > { %v10651_v15 = vpop.eup %10650 }
 0x9f9   : > { %7224 = vst [vmem:[%s15139_s25 + $0x50] sm:$0xff] %v7208_v17  ;;  %v7193_v20 = vmul.f32 0.6931472, %v10651_v15 }
 0x9fb   : > { %v7211_v24 = vsub.f32 %v15119_v14, %v7193_v20 }
 0x9fc   : > { %v10653_v23 = vpop.eup %10652 }
 0x9fd   : > { %7227 = vst [vmem:[%s15139_s25 + $0x68] sm:$0xff] %v7211_v24  ;;  %v7191_v59 = vmul.f32 0.6931472, %v10653_v23 }
 0x9ff   : > { %v7210_v52 = vsub.f32 %v15123_v46, %v7191_v59 }
 0xa00   : > { %v10655_v33 = vpop.eup %10654 }
 0xa01   : > { %7226 = vst [vmem:[%s15139_s25 + $0x60] sm:$0xff] %v7210_v52  ;;  %v7195_v63 = vmul.f32 0.6931472, %v10655_v33 }
 0xa03   : > { %v7212_v50 = vsub.f32 %v15127_v22, %v7195_v63 }
 0xa04   : > { %v10657_v9 = vpop.eup %10656 }
 0xa05   : > { %7228 = vst [vmem:[%s15139_s25 + $0x70] sm:$0xff] %v7212_v50  ;;  %v7197_v8 = vmul.f32 0.6931472, %v10657_v9 }
 0xa07   : > { %v7213_v3 = vsub.f32 %v15131_v53, %v7197_v8 }
 0xa09   : > { %7229 = vst [vmem:[%s15139_s25 + $0x78] sm:$0xff] %v7213_v3 }
 0xa0a PF: > { %p20_p9 = scmp.ge.s32.totalorder %s10778_s29, 4   ;;  %s15470_s25 = smov %s10676_s26 }
 0xa0b   : > { %s15471_s26 = smov %s10787_s15  ;;  %s15472_s27 = smov %s10778_s29 }
 0xa0c   :  { %22 = sbr.rel (!%p20_p9) target bundleno = 2 (0x2), region = 165 }

</bundles_post_ra>
